<compile_context>
chip_gen: v7x
topology: tpu7x:2x2x1
jax: 0.10.0
libtpu: 0.0.40
codegen_flags: <defaults>
</compile_context>

<pallas_src>
import functools

import jax
import jax.numpy as jnp
from jax import lax
from jax.experimental import pallas as pl
from jax.experimental.pallas import tpu as pltpu


# ----------------------------------------------------------------------------
# In-kernel helpers (static shapes, pure jnp).
# ----------------------------------------------------------------------------
def _reflect_pad3(A):
    """PyTorch-style 'reflect' (no edge repeat) pad of 3 on the first two axes
    of a (h, w, C) array.  Requires h >= 4 and w >= 4."""
    h, w = A.shape[0], A.shape[1]
    top = jnp.concatenate([A[3:4], A[2:3], A[1:2]], axis=0)
    bot = jnp.concatenate([A[h - 2:h - 1], A[h - 3:h - 2], A[h - 4:h - 3]], axis=0)
    Ah = jnp.concatenate([top, A, bot], axis=0)                      # (h+6, w, C)
    left = jnp.concatenate([Ah[:, 3:4], Ah[:, 2:3], Ah[:, 1:2]], axis=1)
    right = jnp.concatenate(
        [Ah[:, w - 2:w - 1], Ah[:, w - 3:w - 2], Ah[:, w - 4:w - 3]], axis=1)
    return jnp.concatenate([left, Ah, right], axis=1)                # (h+6, w+6, C)


def _dw_conv3x3_d2(P, w, hout, wout):
    """Depthwise 3x3 dilation-2 cross-correlation on a pre-padded (hp, wp, C)
    buffer.  w: (9, C) per-channel taps (BN scale already folded in)."""
    C = P.shape[-1]
    acc = jnp.zeros((hout, wout, C), jnp.float32)
    for dx in range(3):
        Pdx = P[:, 2 * dx:2 * dx + wout, :]        # one sublane-offset slice per dx
        for dy in range(3):
            acc = acc + Pdx[2 * dy:2 * dy + hout] * w[3 * dy + dx]
    return acc


# ----------------------------------------------------------------------------
# Pallas kernel: full ASFusion forward for ONE batch element.
# ----------------------------------------------------------------------------
def asfusion_kernel(
    x_ref,                                   # (H, W, C)
    w1_ref, b1_ref,                          # shallow conv1: (9, C), (1, C)  (BN folded)
    w2_ref, b2_ref,                          # shallow conv2: (9, C), (1, C)  (BN folded)
    w1cat_ref,                               # fused MLP layer 1: (C, 4C) = [Wt1 | Wa1]
    w2blk_ref,                               # fused MLP layer 2: (4C, 2C) block-diag(Wt2, Wa2)
    o_ref,                                   # (H, W, C)
    *, H, W, C,
):
    X = x_ref[...].astype(jnp.float32)                               # (H, W, C)

    # ---- shallow[0]: depthwise 3x3, dilation 2, reflect pad 3, BN, ReLU ----
    P1 = _reflect_pad3(X)                                            # (H+6, W+6, C)
    y1 = _dw_conv3x3_d2(P1, w1_ref[...], H + 2, W + 2)
    y1 = jnp.maximum(y1 + b1_ref[...].reshape(1, 1, C), 0.0)         # (H+2, W+2, C)

    # ---- shallow[1] ---------------------------------------------------------
    P2 = _reflect_pad3(y1)                                           # (H+8, W+8, C)
    y2 = _dw_conv3x3_d2(P2, w2_ref[...], H + 4, W + 4)
    mid = jnp.maximum(y2 + b2_ref[...].reshape(1, 1, C), 0.0)        # (H+4, W+4, C)

    # ---- shared global average pool ----------------------------------------
    v = jnp.mean(mid, axis=(0, 1), keepdims=True).reshape(1, C)      # (1, C)

    # ---- fused MLP_T / MLP_A (shared-LHS matmul fusion) ---------------------
    h1 = jnp.maximum(
        jnp.dot(v, w1cat_ref[...], preferred_element_type=jnp.float32), 0.0)   # (1, 4C)
    ta = jnp.maximum(
        jnp.dot(h1, w2blk_ref[...], preferred_element_type=jnp.float32), 0.0)  # (1, 2C)
    t = ta[:, :C].reshape(1, 1, C)
    a = ta[:, C:].reshape(1, 1, C)

    # ---- x * t + a * (1 - t) ------------------------------------------------
    o_ref[...] = (X * t + a * (1.0 - t)).astype(o_ref.dtype)


# ----------------------------------------------------------------------------
# Wrapper: grid over batch, weights resident.
# ----------------------------------------------------------------------------
def asfusion_forward(x, params):
    B, H, W, C = x.shape
    assert H >= 4 and W >= 4, "reflect pad of 3 requires spatial dims >= 4"

    kernel = functools.partial(asfusion_kernel, H=H, W=W, C=C)

    def full_spec(p):
        return pl.BlockSpec(p.shape, lambda b, _nd=p.ndim: (0,) * _nd)

    in_specs = [
        pl.BlockSpec((None, H, W, C), lambda b: (b, 0, 0, 0)),       # x (one batch elem)
        full_spec(params["w1"]), full_spec(params["b1"]),
        full_spec(params["w2"]), full_spec(params["b2"]),
        full_spec(params["w1cat"]), full_spec(params["w2blk"]),
    ]
    out_spec = pl.BlockSpec((None, H, W, C), lambda b: (b, 0, 0, 0))

    return pl.pallas_call(
        kernel,
        out_shape=jax.ShapeDtypeStruct((B, H, W, C), x.dtype),
        grid_spec=pltpu.PrefetchScalarGridSpec(
            num_scalar_prefetch=0,
            grid=(B,),
            in_specs=in_specs,
            out_specs=out_spec,
        ),
        compiler_params=pltpu.CompilerParams(
            dimension_semantics=("parallel",)),                      # megacore on v7x
    )(
        x,
        params["w1"], params["b1"], params["w2"], params["b2"],
        params["w1cat"], params["w2blk"],
    )


# ----------------------------------------------------------------------------
# Deterministic parameter construction (BN folded, eval mode) + fused matrices.
# ----------------------------------------------------------------------------
def init_params(key, C):
    ks = [jax.random.fold_in(key, i) for i in range(8)]

    def n(k, shape, s=0.1):
        return jax.random.normal(k, shape, jnp.float32) * s

    eps = 1e-5
    bn_scale = 1.0 / jnp.sqrt(jnp.float32(1.0) + eps)   # gamma=1, beta=0, mean=0, var=1

    # shallow depthwise convs: per-channel 3x3 taps + bias (Conv2d default bias=True)
    w1_raw = n(ks[0], (3, 3, C), 0.2)
    b1_raw = n(ks[1], (C,), 0.1)
    w2_raw = n(ks[2], (3, 3, C), 0.2)
    b2_raw = n(ks[3], (C,), 0.1)

    # fold BN (eval mode) into conv weight/bias
    w1 = (w1_raw * bn_scale).reshape(9, C)
    b1 = (b1_raw * bn_scale).reshape(1, C)
    w2 = (w2_raw * bn_scale).reshape(9, C)
    b2 = (b2_raw * bn_scale).reshape(1, C)

    # MLP_T / MLP_A 1x1 convs (no bias), stored as (in, out) for v @ W
    wt1 = n(ks[4], (C, 2 * C))
    wt2 = n(ks[5], (2 * C, C))
    wa1 = n(ks[6], (C, 2 * C))
    wa2 = n(ks[7], (2 * C, C))

    # fused shared-LHS matrices
    w1cat = jnp.concatenate([wt1, wa1], axis=1)                      # (C, 4C)
    w2blk = jnp.zeros((4 * C, 2 * C), jnp.float32)
    w2blk = w2blk.at[:2 * C, :C].set(wt2)
    w2blk = w2blk.at[2 * C:, C:].set(wa2)

    return dict(w1=w1, b1=b1, w2=w2, b2=b2, w1cat=w1cat, w2blk=w2blk,
                w1_raw=w1_raw, b1_raw=b1_raw, w2_raw=w2_raw, b2_raw=b2_raw,
                wt1=wt1, wt2=wt2, wa1=wa1, wa2=wa2)


# ----------------------------------------------------------------------------
# Pure-JAX reference (independent code path: jnp.pad + lax.conv) for checking.
# ----------------------------------------------------------------------------
def asfusion_reference(x, params):
    B, H, W, C = x.shape
    eps = 1e-5
    s = 1.0 / jnp.sqrt(1.0 + eps)

    def dw_block(z, w_raw, b_raw):
        zp = jnp.pad(z, ((0, 0), (3, 3), (3, 3), (0, 0)), mode="reflect")
        rhs = w_raw.reshape(3, 3, 1, C)                              # HWIO, depthwise
        y = lax.conv_general_dilated(
            zp, rhs, window_strides=(1, 1), padding="VALID",
            rhs_dilation=(2, 2),
            dimension_numbers=("NHWC", "HWIO", "NHWC"),
            feature_group_count=C)
        return jnp.maximum((y + b_raw) * s, 0.0)                     # conv+bias then BN(eval)

    mid = dw_block(dw_block(x, params["w1_raw"], params["b1_raw"]),
                   params["w2_raw"], params["b2_raw"])               # (B, H+4, W+4, C)

    v = jnp.mean(mid, axis=(1, 2))                                   # (B, C)
    t = jnp.maximum(jnp.maximum(v @ params["wt1"], 0.0) @ params["wt2"], 0.0)
    a = jnp.maximum(jnp.maximum(v @ params["wa1"], 0.0) @ params["wa2"], 0.0)
    t = t[:, None, None, :]
    a = a[:, None, None, :]
    return x * t + a * (1.0 - t)


if __name__ == "__main__":
    key = jax.random.PRNGKey(0)
    B, H, W, C = 2, 16, 16, 32

    kx, kp = jax.random.split(key)
    x = jax.random.normal(kx, (B, H, W, C), jnp.float32)
    params = init_params(kp, C)

    out = asfusion_forward(x, params)
    out = jax.block_until_ready(out)

    assert out.shape == (B, H, W, C), out.shape
    assert bool(jnp.all(jnp.isfinite(out)))

    ref = asfusion_reference(x, params)
    max_err = float(jnp.max(jnp.abs(out - ref)))
    assert max_err < 1e-2, f"max abs err vs reference: {max_err}"

    print("KERNEL_OK")
</pallas_src>

<mosaic_0001>
module attributes {stable_mosaic.version = 11 : i64} {
  func.func @asfusion_kernel(%arg0: i32, %arg1: memref<1x16x16x32xf32, #tpu.memory_space<vmem>>, %arg2: memref<9x32xf32, #tpu.memory_space<vmem>>, %arg3: memref<1x32xf32, #tpu.memory_space<vmem>>, %arg4: memref<9x32xf32, #tpu.memory_space<vmem>>, %arg5: memref<1x32xf32, #tpu.memory_space<vmem>>, %arg6: memref<32x128xf32, #tpu.memory_space<vmem>>, %arg7: memref<128x64xf32, #tpu.memory_space<vmem>>, %arg8: memref<1x16x16x32xf32, #tpu.memory_space<vmem>>) attributes {dimension_semantics = [#tpu.dimension_semantics<parallel>], iteration_bounds = array<i64: 2>, scalar_prefetch = 0 : i64, scratch_operands = 0 : i64, tpu.core_type = #tpu.core_type<tc>, window_params = [{transform_indices = @transform_0, window_bounds = array<i64: 1, 16, 16, 32>}, {pipeline_mode = #tpu.pipeline_mode<synchronous>, transform_indices = @transform_1, window_bounds = array<i64: 9, 32>}, {pipeline_mode = #tpu.pipeline_mode<synchronous>, transform_indices = @transform_2, window_bounds = array<i64: 1, 32>}, {pipeline_mode = #tpu.pipeline_mode<synchronous>, transform_indices = @transform_3, window_bounds = array<i64: 9, 32>}, {pipeline_mode = #tpu.pipeline_mode<synchronous>, transform_indices = @transform_4, window_bounds = array<i64: 1, 32>}, {pipeline_mode = #tpu.pipeline_mode<synchronous>, transform_indices = @transform_5, window_bounds = array<i64: 32, 128>}, {pipeline_mode = #tpu.pipeline_mode<synchronous>, transform_indices = @transform_6, window_bounds = array<i64: 128, 64>}, {transform_indices = @transform_7, window_bounds = array<i64: 1, 16, 16, 32>}]} {
    %c0 = arith.constant 0 : index
    %c0_0 = arith.constant 0 : index
    %c0_1 = arith.constant 0 : index
    %c0_2 = arith.constant 0 : index
    %0 = vector.load %arg1[%c0, %c0_0, %c0_1, %c0_2] : memref<1x16x16x32xf32, #tpu.memory_space<vmem>>, vector<1x16x16x32xf32>
    %1 = vector.shape_cast %0 : vector<1x16x16x32xf32> to vector<16x16x32xf32>
    %2 = vector.extract_strided_slice %1 {offsets = [3, 0, 0], sizes = [1, 16, 32], strides = [1, 1, 1]} : vector<16x16x32xf32> to vector<1x16x32xf32>
    %3 = vector.extract_strided_slice %1 {offsets = [2, 0, 0], sizes = [1, 16, 32], strides = [1, 1, 1]} : vector<16x16x32xf32> to vector<1x16x32xf32>
    %4 = vector.extract_strided_slice %1 {offsets = [1, 0, 0], sizes = [1, 16, 32], strides = [1, 1, 1]} : vector<16x16x32xf32> to vector<1x16x32xf32>
    %5 = tpu.concatenate %2, %3, %4 in 0 : vector<1x16x32xf32>, vector<1x16x32xf32>, vector<1x16x32xf32> -> vector<3x16x32xf32>
    %6 = vector.extract_strided_slice %1 {offsets = [14, 0, 0], sizes = [1, 16, 32], strides = [1, 1, 1]} : vector<16x16x32xf32> to vector<1x16x32xf32>
    %7 = vector.extract_strided_slice %1 {offsets = [13, 0, 0], sizes = [1, 16, 32], strides = [1, 1, 1]} : vector<16x16x32xf32> to vector<1x16x32xf32>
    %8 = vector.extract_strided_slice %1 {offsets = [12, 0, 0], sizes = [1, 16, 32], strides = [1, 1, 1]} : vector<16x16x32xf32> to vector<1x16x32xf32>
    %9 = tpu.concatenate %6, %7, %8 in 0 : vector<1x16x32xf32>, vector<1x16x32xf32>, vector<1x16x32xf32> -> vector<3x16x32xf32>
    %10 = tpu.concatenate %5, %1, %9 in 0 : vector<3x16x32xf32>, vector<16x16x32xf32>, vector<3x16x32xf32> -> vector<22x16x32xf32>
    %11 = vector.extract_strided_slice %10 {offsets = [0, 3, 0], sizes = [22, 1, 32], strides = [1, 1, 1]} : vector<22x16x32xf32> to vector<22x1x32xf32>
    %12 = vector.extract_strided_slice %10 {offsets = [0, 2, 0], sizes = [22, 1, 32], strides = [1, 1, 1]} : vector<22x16x32xf32> to vector<22x1x32xf32>
    %13 = vector.extract_strided_slice %10 {offsets = [0, 1, 0], sizes = [22, 1, 32], strides = [1, 1, 1]} : vector<22x16x32xf32> to vector<22x1x32xf32>
    %14 = tpu.concatenate %11, %12, %13 in 1 : vector<22x1x32xf32>, vector<22x1x32xf32>, vector<22x1x32xf32> -> vector<22x3x32xf32>
    %15 = vector.extract_strided_slice %10 {offsets = [0, 14, 0], sizes = [22, 1, 32], strides = [1, 1, 1]} : vector<22x16x32xf32> to vector<22x1x32xf32>
    %16 = vector.extract_strided_slice %10 {offsets = [0, 13, 0], sizes = [22, 1, 32], strides = [1, 1, 1]} : vector<22x16x32xf32> to vector<22x1x32xf32>
    %17 = vector.extract_strided_slice %10 {offsets = [0, 12, 0], sizes = [22, 1, 32], strides = [1, 1, 1]} : vector<22x16x32xf32> to vector<22x1x32xf32>
    %18 = tpu.concatenate %15, %16, %17 in 1 : vector<22x1x32xf32>, vector<22x1x32xf32>, vector<22x1x32xf32> -> vector<22x3x32xf32>
    %19 = tpu.concatenate %14, %10, %18 in 1 : vector<22x3x32xf32>, vector<22x16x32xf32>, vector<22x3x32xf32> -> vector<22x22x32xf32>
    %c0_3 = arith.constant 0 : index
    %c0_4 = arith.constant 0 : index
    %20 = vector.load %arg2[%c0_3, %c0_4] : memref<9x32xf32, #tpu.memory_space<vmem>>, vector<9x32xf32>
    %cst = arith.constant 0.000000e+00 : f32
    %21 = vector.broadcast %cst : f32 to vector<18x18x32xf32>
    %22 = vector.extract_strided_slice %19 {offsets = [0, 0, 0], sizes = [22, 18, 32], strides = [1, 1, 1]} : vector<22x22x32xf32> to vector<22x18x32xf32>
    %23 = vector.extract_strided_slice %22 {offsets = [0, 0, 0], sizes = [18, 18, 32], strides = [1, 1, 1]} : vector<22x18x32xf32> to vector<18x18x32xf32>
    %24 = vector.extract_strided_slice %20 {offsets = [0, 0], sizes = [1, 32], strides = [1, 1]} : vector<9x32xf32> to vector<1x32xf32>
    %25 = vector.shape_cast %24 : vector<1x32xf32> to vector<32xf32>
    %26 = vector.shape_cast %25 : vector<32xf32> to vector<1x1x32xf32>
    %27 = vector.broadcast %26 : vector<1x1x32xf32> to vector<18x18x32xf32>
    %28 = arith.mulf %23, %27 : vector<18x18x32xf32>
    %29 = arith.addf %21, %28 : vector<18x18x32xf32>
    %30 = vector.extract_strided_slice %22 {offsets = [2, 0, 0], sizes = [18, 18, 32], strides = [1, 1, 1]} : vector<22x18x32xf32> to vector<18x18x32xf32>
    %31 = vector.extract_strided_slice %20 {offsets = [3, 0], sizes = [1, 32], strides = [1, 1]} : vector<9x32xf32> to vector<1x32xf32>
    %32 = vector.shape_cast %31 : vector<1x32xf32> to vector<32xf32>
    %33 = vector.shape_cast %32 : vector<32xf32> to vector<1x1x32xf32>
    %34 = vector.broadcast %33 : vector<1x1x32xf32> to vector<18x18x32xf32>
    %35 = arith.mulf %30, %34 : vector<18x18x32xf32>
    %36 = arith.addf %29, %35 : vector<18x18x32xf32>
    %37 = vector.extract_strided_slice %22 {offsets = [4, 0, 0], sizes = [18, 18, 32], strides = [1, 1, 1]} : vector<22x18x32xf32> to vector<18x18x32xf32>
    %38 = vector.extract_strided_slice %20 {offsets = [6, 0], sizes = [1, 32], strides = [1, 1]} : vector<9x32xf32> to vector<1x32xf32>
    %39 = vector.shape_cast %38 : vector<1x32xf32> to vector<32xf32>
    %40 = vector.shape_cast %39 : vector<32xf32> to vector<1x1x32xf32>
    %41 = vector.broadcast %40 : vector<1x1x32xf32> to vector<18x18x32xf32>
    %42 = arith.mulf %37, %41 : vector<18x18x32xf32>
    %43 = arith.addf %36, %42 : vector<18x18x32xf32>
    %44 = vector.extract_strided_slice %19 {offsets = [0, 2, 0], sizes = [22, 18, 32], strides = [1, 1, 1]} : vector<22x22x32xf32> to vector<22x18x32xf32>
    %45 = vector.extract_strided_slice %44 {offsets = [0, 0, 0], sizes = [18, 18, 32], strides = [1, 1, 1]} : vector<22x18x32xf32> to vector<18x18x32xf32>
    %46 = vector.extract_strided_slice %20 {offsets = [1, 0], sizes = [1, 32], strides = [1, 1]} : vector<9x32xf32> to vector<1x32xf32>
    %47 = vector.shape_cast %46 : vector<1x32xf32> to vector<32xf32>
    %48 = vector.shape_cast %47 : vector<32xf32> to vector<1x1x32xf32>
    %49 = vector.broadcast %48 : vector<1x1x32xf32> to vector<18x18x32xf32>
    %50 = arith.mulf %45, %49 : vector<18x18x32xf32>
    %51 = arith.addf %43, %50 : vector<18x18x32xf32>
    %52 = vector.extract_strided_slice %44 {offsets = [2, 0, 0], sizes = [18, 18, 32], strides = [1, 1, 1]} : vector<22x18x32xf32> to vector<18x18x32xf32>
    %53 = vector.extract_strided_slice %20 {offsets = [4, 0], sizes = [1, 32], strides = [1, 1]} : vector<9x32xf32> to vector<1x32xf32>
    %54 = vector.shape_cast %53 : vector<1x32xf32> to vector<32xf32>
    %55 = vector.shape_cast %54 : vector<32xf32> to vector<1x1x32xf32>
    %56 = vector.broadcast %55 : vector<1x1x32xf32> to vector<18x18x32xf32>
    %57 = arith.mulf %52, %56 : vector<18x18x32xf32>
    %58 = arith.addf %51, %57 : vector<18x18x32xf32>
    %59 = vector.extract_strided_slice %44 {offsets = [4, 0, 0], sizes = [18, 18, 32], strides = [1, 1, 1]} : vector<22x18x32xf32> to vector<18x18x32xf32>
    %60 = vector.extract_strided_slice %20 {offsets = [7, 0], sizes = [1, 32], strides = [1, 1]} : vector<9x32xf32> to vector<1x32xf32>
    %61 = vector.shape_cast %60 : vector<1x32xf32> to vector<32xf32>
    %62 = vector.shape_cast %61 : vector<32xf32> to vector<1x1x32xf32>
    %63 = vector.broadcast %62 : vector<1x1x32xf32> to vector<18x18x32xf32>
    %64 = arith.mulf %59, %63 : vector<18x18x32xf32>
    %65 = arith.addf %58, %64 : vector<18x18x32xf32>
    %66 = vector.extract_strided_slice %19 {offsets = [0, 4, 0], sizes = [22, 18, 32], strides = [1, 1, 1]} : vector<22x22x32xf32> to vector<22x18x32xf32>
    %67 = vector.extract_strided_slice %66 {offsets = [0, 0, 0], sizes = [18, 18, 32], strides = [1, 1, 1]} : vector<22x18x32xf32> to vector<18x18x32xf32>
    %68 = vector.extract_strided_slice %20 {offsets = [2, 0], sizes = [1, 32], strides = [1, 1]} : vector<9x32xf32> to vector<1x32xf32>
    %69 = vector.shape_cast %68 : vector<1x32xf32> to vector<32xf32>
    %70 = vector.shape_cast %69 : vector<32xf32> to vector<1x1x32xf32>
    %71 = vector.broadcast %70 : vector<1x1x32xf32> to vector<18x18x32xf32>
    %72 = arith.mulf %67, %71 : vector<18x18x32xf32>
    %73 = arith.addf %65, %72 : vector<18x18x32xf32>
    %74 = vector.extract_strided_slice %66 {offsets = [2, 0, 0], sizes = [18, 18, 32], strides = [1, 1, 1]} : vector<22x18x32xf32> to vector<18x18x32xf32>
    %75 = vector.extract_strided_slice %20 {offsets = [5, 0], sizes = [1, 32], strides = [1, 1]} : vector<9x32xf32> to vector<1x32xf32>
    %76 = vector.shape_cast %75 : vector<1x32xf32> to vector<32xf32>
    %77 = vector.shape_cast %76 : vector<32xf32> to vector<1x1x32xf32>
    %78 = vector.broadcast %77 : vector<1x1x32xf32> to vector<18x18x32xf32>
    %79 = arith.mulf %74, %78 : vector<18x18x32xf32>
    %80 = arith.addf %73, %79 : vector<18x18x32xf32>
    %81 = vector.extract_strided_slice %66 {offsets = [4, 0, 0], sizes = [18, 18, 32], strides = [1, 1, 1]} : vector<22x18x32xf32> to vector<18x18x32xf32>
    %82 = vector.extract_strided_slice %20 {offsets = [8, 0], sizes = [1, 32], strides = [1, 1]} : vector<9x32xf32> to vector<1x32xf32>
    %83 = vector.shape_cast %82 : vector<1x32xf32> to vector<32xf32>
    %84 = vector.shape_cast %83 : vector<32xf32> to vector<1x1x32xf32>
    %85 = vector.broadcast %84 : vector<1x1x32xf32> to vector<18x18x32xf32>
    %86 = arith.mulf %81, %85 : vector<18x18x32xf32>
    %87 = arith.addf %80, %86 : vector<18x18x32xf32>
    %c0_5 = arith.constant 0 : index
    %c0_6 = arith.constant 0 : index
    %88 = vector.load %arg3[%c0_5, %c0_6] : memref<1x32xf32, #tpu.memory_space<vmem>>, vector<1x32xf32>
    %89 = vector.shape_cast %88 : vector<1x32xf32> to vector<1x1x32xf32>
    %90 = vector.broadcast %89 : vector<1x1x32xf32> to vector<18x18x32xf32>
    %91 = arith.addf %87, %90 : vector<18x18x32xf32>
    %cst_7 = arith.constant 0.000000e+00 : f32
    %92 = vector.broadcast %cst_7 : f32 to vector<18x18x32xf32>
    %93 = arith.maximumf %91, %92 : vector<18x18x32xf32>
    %94 = vector.extract_strided_slice %93 {offsets = [3, 0, 0], sizes = [1, 18, 32], strides = [1, 1, 1]} : vector<18x18x32xf32> to vector<1x18x32xf32>
    %95 = vector.extract_strided_slice %93 {offsets = [2, 0, 0], sizes = [1, 18, 32], strides = [1, 1, 1]} : vector<18x18x32xf32> to vector<1x18x32xf32>
    %96 = vector.extract_strided_slice %93 {offsets = [1, 0, 0], sizes = [1, 18, 32], strides = [1, 1, 1]} : vector<18x18x32xf32> to vector<1x18x32xf32>
    %97 = tpu.concatenate %94, %95, %96 in 0 : vector<1x18x32xf32>, vector<1x18x32xf32>, vector<1x18x32xf32> -> vector<3x18x32xf32>
    %98 = vector.extract_strided_slice %93 {offsets = [16, 0, 0], sizes = [1, 18, 32], strides = [1, 1, 1]} : vector<18x18x32xf32> to vector<1x18x32xf32>
    %99 = vector.extract_strided_slice %93 {offsets = [15, 0, 0], sizes = [1, 18, 32], strides = [1, 1, 1]} : vector<18x18x32xf32> to vector<1x18x32xf32>
    %100 = vector.extract_strided_slice %93 {offsets = [14, 0, 0], sizes = [1, 18, 32], strides = [1, 1, 1]} : vector<18x18x32xf32> to vector<1x18x32xf32>
    %101 = tpu.concatenate %98, %99, %100 in 0 : vector<1x18x32xf32>, vector<1x18x32xf32>, vector<1x18x32xf32> -> vector<3x18x32xf32>
    %102 = tpu.concatenate %97, %93, %101 in 0 : vector<3x18x32xf32>, vector<18x18x32xf32>, vector<3x18x32xf32> -> vector<24x18x32xf32>
    %103 = vector.extract_strided_slice %102 {offsets = [0, 3, 0], sizes = [24, 1, 32], strides = [1, 1, 1]} : vector<24x18x32xf32> to vector<24x1x32xf32>
    %104 = vector.extract_strided_slice %102 {offsets = [0, 2, 0], sizes = [24, 1, 32], strides = [1, 1, 1]} : vector<24x18x32xf32> to vector<24x1x32xf32>
    %105 = vector.extract_strided_slice %102 {offsets = [0, 1, 0], sizes = [24, 1, 32], strides = [1, 1, 1]} : vector<24x18x32xf32> to vector<24x1x32xf32>
    %106 = tpu.concatenate %103, %104, %105 in 1 : vector<24x1x32xf32>, vector<24x1x32xf32>, vector<24x1x32xf32> -> vector<24x3x32xf32>
    %107 = vector.extract_strided_slice %102 {offsets = [0, 16, 0], sizes = [24, 1, 32], strides = [1, 1, 1]} : vector<24x18x32xf32> to vector<24x1x32xf32>
    %108 = vector.extract_strided_slice %102 {offsets = [0, 15, 0], sizes = [24, 1, 32], strides = [1, 1, 1]} : vector<24x18x32xf32> to vector<24x1x32xf32>
    %109 = vector.extract_strided_slice %102 {offsets = [0, 14, 0], sizes = [24, 1, 32], strides = [1, 1, 1]} : vector<24x18x32xf32> to vector<24x1x32xf32>
    %110 = tpu.concatenate %107, %108, %109 in 1 : vector<24x1x32xf32>, vector<24x1x32xf32>, vector<24x1x32xf32> -> vector<24x3x32xf32>
    %111 = tpu.concatenate %106, %102, %110 in 1 : vector<24x3x32xf32>, vector<24x18x32xf32>, vector<24x3x32xf32> -> vector<24x24x32xf32>
    %c0_8 = arith.constant 0 : index
    %c0_9 = arith.constant 0 : index
    %112 = vector.load %arg4[%c0_8, %c0_9] : memref<9x32xf32, #tpu.memory_space<vmem>>, vector<9x32xf32>
    %cst_10 = arith.constant 0.000000e+00 : f32
    %113 = vector.broadcast %cst_10 : f32 to vector<20x20x32xf32>
    %114 = vector.extract_strided_slice %111 {offsets = [0, 0, 0], sizes = [24, 20, 32], strides = [1, 1, 1]} : vector<24x24x32xf32> to vector<24x20x32xf32>
    %115 = vector.extract_strided_slice %114 {offsets = [0, 0, 0], sizes = [20, 20, 32], strides = [1, 1, 1]} : vector<24x20x32xf32> to vector<20x20x32xf32>
    %116 = vector.extract_strided_slice %112 {offsets = [0, 0], sizes = [1, 32], strides = [1, 1]} : vector<9x32xf32> to vector<1x32xf32>
    %117 = vector.shape_cast %116 : vector<1x32xf32> to vector<32xf32>
    %118 = vector.shape_cast %117 : vector<32xf32> to vector<1x1x32xf32>
    %119 = vector.broadcast %118 : vector<1x1x32xf32> to vector<20x20x32xf32>
    %120 = arith.mulf %115, %119 : vector<20x20x32xf32>
    %121 = arith.addf %113, %120 : vector<20x20x32xf32>
    %122 = vector.extract_strided_slice %114 {offsets = [2, 0, 0], sizes = [20, 20, 32], strides = [1, 1, 1]} : vector<24x20x32xf32> to vector<20x20x32xf32>
    %123 = vector.extract_strided_slice %112 {offsets = [3, 0], sizes = [1, 32], strides = [1, 1]} : vector<9x32xf32> to vector<1x32xf32>
    %124 = vector.shape_cast %123 : vector<1x32xf32> to vector<32xf32>
    %125 = vector.shape_cast %124 : vector<32xf32> to vector<1x1x32xf32>
    %126 = vector.broadcast %125 : vector<1x1x32xf32> to vector<20x20x32xf32>
    %127 = arith.mulf %122, %126 : vector<20x20x32xf32>
    %128 = arith.addf %121, %127 : vector<20x20x32xf32>
    %129 = vector.extract_strided_slice %114 {offsets = [4, 0, 0], sizes = [20, 20, 32], strides = [1, 1, 1]} : vector<24x20x32xf32> to vector<20x20x32xf32>
    %130 = vector.extract_strided_slice %112 {offsets = [6, 0], sizes = [1, 32], strides = [1, 1]} : vector<9x32xf32> to vector<1x32xf32>
    %131 = vector.shape_cast %130 : vector<1x32xf32> to vector<32xf32>
    %132 = vector.shape_cast %131 : vector<32xf32> to vector<1x1x32xf32>
    %133 = vector.broadcast %132 : vector<1x1x32xf32> to vector<20x20x32xf32>
    %134 = arith.mulf %129, %133 : vector<20x20x32xf32>
    %135 = arith.addf %128, %134 : vector<20x20x32xf32>
    %136 = vector.extract_strided_slice %111 {offsets = [0, 2, 0], sizes = [24, 20, 32], strides = [1, 1, 1]} : vector<24x24x32xf32> to vector<24x20x32xf32>
    %137 = vector.extract_strided_slice %136 {offsets = [0, 0, 0], sizes = [20, 20, 32], strides = [1, 1, 1]} : vector<24x20x32xf32> to vector<20x20x32xf32>
    %138 = vector.extract_strided_slice %112 {offsets = [1, 0], sizes = [1, 32], strides = [1, 1]} : vector<9x32xf32> to vector<1x32xf32>
    %139 = vector.shape_cast %138 : vector<1x32xf32> to vector<32xf32>
    %140 = vector.shape_cast %139 : vector<32xf32> to vector<1x1x32xf32>
    %141 = vector.broadcast %140 : vector<1x1x32xf32> to vector<20x20x32xf32>
    %142 = arith.mulf %137, %141 : vector<20x20x32xf32>
    %143 = arith.addf %135, %142 : vector<20x20x32xf32>
    %144 = vector.extract_strided_slice %136 {offsets = [2, 0, 0], sizes = [20, 20, 32], strides = [1, 1, 1]} : vector<24x20x32xf32> to vector<20x20x32xf32>
    %145 = vector.extract_strided_slice %112 {offsets = [4, 0], sizes = [1, 32], strides = [1, 1]} : vector<9x32xf32> to vector<1x32xf32>
    %146 = vector.shape_cast %145 : vector<1x32xf32> to vector<32xf32>
    %147 = vector.shape_cast %146 : vector<32xf32> to vector<1x1x32xf32>
    %148 = vector.broadcast %147 : vector<1x1x32xf32> to vector<20x20x32xf32>
    %149 = arith.mulf %144, %148 : vector<20x20x32xf32>
    %150 = arith.addf %143, %149 : vector<20x20x32xf32>
    %151 = vector.extract_strided_slice %136 {offsets = [4, 0, 0], sizes = [20, 20, 32], strides = [1, 1, 1]} : vector<24x20x32xf32> to vector<20x20x32xf32>
    %152 = vector.extract_strided_slice %112 {offsets = [7, 0], sizes = [1, 32], strides = [1, 1]} : vector<9x32xf32> to vector<1x32xf32>
    %153 = vector.shape_cast %152 : vector<1x32xf32> to vector<32xf32>
    %154 = vector.shape_cast %153 : vector<32xf32> to vector<1x1x32xf32>
    %155 = vector.broadcast %154 : vector<1x1x32xf32> to vector<20x20x32xf32>
    %156 = arith.mulf %151, %155 : vector<20x20x32xf32>
    %157 = arith.addf %150, %156 : vector<20x20x32xf32>
    %158 = vector.extract_strided_slice %111 {offsets = [0, 4, 0], sizes = [24, 20, 32], strides = [1, 1, 1]} : vector<24x24x32xf32> to vector<24x20x32xf32>
    %159 = vector.extract_strided_slice %158 {offsets = [0, 0, 0], sizes = [20, 20, 32], strides = [1, 1, 1]} : vector<24x20x32xf32> to vector<20x20x32xf32>
    %160 = vector.extract_strided_slice %112 {offsets = [2, 0], sizes = [1, 32], strides = [1, 1]} : vector<9x32xf32> to vector<1x32xf32>
    %161 = vector.shape_cast %160 : vector<1x32xf32> to vector<32xf32>
    %162 = vector.shape_cast %161 : vector<32xf32> to vector<1x1x32xf32>
    %163 = vector.broadcast %162 : vector<1x1x32xf32> to vector<20x20x32xf32>
    %164 = arith.mulf %159, %163 : vector<20x20x32xf32>
    %165 = arith.addf %157, %164 : vector<20x20x32xf32>
    %166 = vector.extract_strided_slice %158 {offsets = [2, 0, 0], sizes = [20, 20, 32], strides = [1, 1, 1]} : vector<24x20x32xf32> to vector<20x20x32xf32>
    %167 = vector.extract_strided_slice %112 {offsets = [5, 0], sizes = [1, 32], strides = [1, 1]} : vector<9x32xf32> to vector<1x32xf32>
    %168 = vector.shape_cast %167 : vector<1x32xf32> to vector<32xf32>
    %169 = vector.shape_cast %168 : vector<32xf32> to vector<1x1x32xf32>
    %170 = vector.broadcast %169 : vector<1x1x32xf32> to vector<20x20x32xf32>
    %171 = arith.mulf %166, %170 : vector<20x20x32xf32>
    %172 = arith.addf %165, %171 : vector<20x20x32xf32>
    %173 = vector.extract_strided_slice %158 {offsets = [4, 0, 0], sizes = [20, 20, 32], strides = [1, 1, 1]} : vector<24x20x32xf32> to vector<20x20x32xf32>
    %174 = vector.extract_strided_slice %112 {offsets = [8, 0], sizes = [1, 32], strides = [1, 1]} : vector<9x32xf32> to vector<1x32xf32>
    %175 = vector.shape_cast %174 : vector<1x32xf32> to vector<32xf32>
    %176 = vector.shape_cast %175 : vector<32xf32> to vector<1x1x32xf32>
    %177 = vector.broadcast %176 : vector<1x1x32xf32> to vector<20x20x32xf32>
    %178 = arith.mulf %173, %177 : vector<20x20x32xf32>
    %179 = arith.addf %172, %178 : vector<20x20x32xf32>
    %c0_11 = arith.constant 0 : index
    %c0_12 = arith.constant 0 : index
    %180 = vector.load %arg5[%c0_11, %c0_12] : memref<1x32xf32, #tpu.memory_space<vmem>>, vector<1x32xf32>
    %181 = vector.shape_cast %180 : vector<1x32xf32> to vector<1x1x32xf32>
    %182 = vector.broadcast %181 : vector<1x1x32xf32> to vector<20x20x32xf32>
    %183 = arith.addf %179, %182 : vector<20x20x32xf32>
    %cst_13 = arith.constant 0.000000e+00 : f32
    %184 = vector.broadcast %cst_13 : f32 to vector<20x20x32xf32>
    %185 = arith.maximumf %183, %184 : vector<20x20x32xf32>
    %cst_14 = arith.constant dense<0.000000e+00> : vector<32xf32>
    %186 = vector.multi_reduction <add>, %185, %cst_14 [0, 1] : vector<20x20x32xf32> to vector<32xf32>
    %187 = vector.shape_cast %186 : vector<32xf32> to vector<1x1x32xf32>
    %cst_15 = arith.constant 4.000000e+02 : f32
    %188 = vector.broadcast %cst_15 : f32 to vector<1x1x32xf32>
    %189 = arith.divf %187, %188 : vector<1x1x32xf32>
    %190 = vector.shape_cast %189 : vector<1x1x32xf32> to vector<1x32xf32>
    %c0_16 = arith.constant 0 : index
    %c0_17 = arith.constant 0 : index
    %191 = vector.load %arg6[%c0_16, %c0_17] : memref<32x128xf32, #tpu.memory_space<vmem>>, vector<32x128xf32>
    %cst_18 = arith.constant dense<0.000000e+00> : vector<1x128xf32>
    %192 = tpu.matmul %190, %191, %cst_18 {dimension_numbers = #tpu.dot_dimension_numbers<[1], [0], [0], [1], [0, 0, 1, 1], [], []>} : vector<1x32xf32>, vector<32x128xf32>, vector<1x128xf32> -> vector<1x128xf32>
    %cst_19 = arith.constant 0.000000e+00 : f32
    %193 = vector.broadcast %cst_19 : f32 to vector<1x128xf32>
    %194 = arith.maximumf %192, %193 : vector<1x128xf32>
    %c0_20 = arith.constant 0 : index
    %c0_21 = arith.constant 0 : index
    %195 = vector.load %arg7[%c0_20, %c0_21] : memref<128x64xf32, #tpu.memory_space<vmem>>, vector<128x64xf32>
    %cst_22 = arith.constant dense<0.000000e+00> : vector<1x64xf32>
    %196 = tpu.matmul %194, %195, %cst_22 {dimension_numbers = #tpu.dot_dimension_numbers<[1], [0], [0], [1], [0, 0, 1, 1], [], []>} : vector<1x128xf32>, vector<128x64xf32>, vector<1x64xf32> -> vector<1x64xf32>
    %cst_23 = arith.constant 0.000000e+00 : f32
    %197 = vector.broadcast %cst_23 : f32 to vector<1x64xf32>
    %198 = arith.maximumf %196, %197 : vector<1x64xf32>
    %199 = vector.extract_strided_slice %198 {offsets = [0, 0], sizes = [1, 32], strides = [1, 1]} : vector<1x64xf32> to vector<1x32xf32>
    %200 = vector.shape_cast %199 : vector<1x32xf32> to vector<1x1x32xf32>
    %201 = vector.extract_strided_slice %198 {offsets = [0, 32], sizes = [1, 32], strides = [1, 1]} : vector<1x64xf32> to vector<1x32xf32>
    %202 = vector.shape_cast %201 : vector<1x32xf32> to vector<1x1x32xf32>
    %203 = vector.broadcast %200 : vector<1x1x32xf32> to vector<16x16x32xf32>
    %204 = arith.mulf %1, %203 : vector<16x16x32xf32>
    %cst_24 = arith.constant 1.000000e+00 : f32
    %205 = vector.broadcast %cst_24 : f32 to vector<1x1x32xf32>
    %206 = arith.subf %205, %200 : vector<1x1x32xf32>
    %207 = arith.mulf %202, %206 : vector<1x1x32xf32>
    %208 = vector.broadcast %207 : vector<1x1x32xf32> to vector<16x16x32xf32>
    %209 = arith.addf %204, %208 : vector<16x16x32xf32>
    %c0_25 = arith.constant 0 : index
    %c0_26 = arith.constant 0 : index
    %c0_27 = arith.constant 0 : index
    %c0_28 = arith.constant 0 : index
    %210 = vector.load %arg8[%c0_25, %c0_26, %c0_27, %c0_28] : memref<1x16x16x32xf32, #tpu.memory_space<vmem>>, vector<1x16x16x32xf32>
    %211 = vector.shape_cast %210 : vector<1x16x16x32xf32> to vector<16x16x32xf32>
    %212 = vector.shape_cast %209 : vector<16x16x32xf32> to vector<1x16x16x32xf32>
    tpu.vector_store %arg8[%c0_25, %c0_26, %c0_27, %c0_28], %212 {strides = array<i32>} : memref<1x16x16x32xf32, #tpu.memory_space<vmem>>, vector<1x16x16x32xf32>,
    return
  }
  func.func @transform_0(%arg0: i32) -> (i32, i32, i32, i32) {
    %c0_i32 = arith.constant 0 : i32
    %c0_i32_0 = arith.constant 0 : i32
    %c0_i32_1 = arith.constant 0 : i32
    %c0_i32_2 = arith.constant 0 : i32
    return %arg0, %c0_i32, %c0_i32_0, %c0_i32_1 : i32, i32, i32, i32
  }
  func.func @transform_1(%arg0: i32) -> (i32, i32) {
    %c0_i32 = arith.constant 0 : i32
    %c0_i32_0 = arith.constant 0 : i32
    %c0_i32_1 = arith.constant 0 : i32
    return %c0_i32, %c0_i32_0 : i32, i32
  }
  func.func @transform_2(%arg0: i32) -> (i32, i32) {
    %c0_i32 = arith.constant 0 : i32
    %c0_i32_0 = arith.constant 0 : i32
    %c0_i32_1 = arith.constant 0 : i32
    return %c0_i32, %c0_i32_0 : i32, i32
  }
  func.func @transform_3(%arg0: i32) -> (i32, i32) {
    %c0_i32 = arith.constant 0 : i32
    %c0_i32_0 = arith.constant 0 : i32
    %c0_i32_1 = arith.constant 0 : i32
    return %c0_i32, %c0_i32_0 : i32, i32
  }
  func.func @transform_4(%arg0: i32) -> (i32, i32) {
    %c0_i32 = arith.constant 0 : i32
    %c0_i32_0 = arith.constant 0 : i32
    %c0_i32_1 = arith.constant 0 : i32
    return %c0_i32, %c0_i32_0 : i32, i32
  }
  func.func @transform_5(%arg0: i32) -> (i32, i32) {
    %c0_i32 = arith.constant 0 : i32
    %c0_i32_0 = arith.constant 0 : i32
    %c0_i32_1 = arith.constant 0 : i32
    return %c0_i32, %c0_i32_0 : i32, i32
  }
  func.func @transform_6(%arg0: i32) -> (i32, i32) {
    %c0_i32 = arith.constant 0 : i32
    %c0_i32_0 = arith.constant 0 : i32
    %c0_i32_1 = arith.constant 0 : i32
    return %c0_i32, %c0_i32_0 : i32, i32
  }
  func.func @transform_7(%arg0: i32) -> (i32, i32, i32, i32) {
    %c0_i32 = arith.constant 0 : i32
    %c0_i32_0 = arith.constant 0 : i32
    %c0_i32_1 = arith.constant 0 : i32
    %c0_i32_2 = arith.constant 0 : i32
    return %arg0, %c0_i32, %c0_i32_0, %c0_i32_1 : i32, i32, i32, i32
  }
}

</mosaic_0001>

<bundles_post_ra>
// kernel: tpu_custom_call.1
= control target key start
LH: loop header
LB: loop body
LE: loop exit
PB: predicated region body
PF: predicated region fallthrough
CT: control target
= control target key end

     0   :  { %12 = vsyncpa [#allocation3], 0  ;;  %s15680_s0 = inlined_call_operand.hbm [shape: f32[2,16,16,32], index: 0, kind: input, shape index: {}]   ;;  %s15681_s1 = inlined_call_operand.vmem [shape: f32[9,32], index: 1, kind: input, shape index: {}]   ;;  %s15682_s2 = inlined_call_operand.vmem [shape: f32[1,32], index: 2, kind: input, shape index: {}]   ;;  %s15683_s3 = inlined_call_operand.vmem [shape: f32[9,32], index: 3, kind: input, shape index: {}]   ;;  %s15684_s4 = inlined_call_operand.vmem [shape: f32[1,32], index: 4, kind: input, shape index: {}]   ;;  %s15685_s5 = inlined_call_operand.vmem [shape: f32[32,128], index: 5, kind: input, shape index: {}]   ;;  %s15686_s6 = inlined_call_operand.vmem [shape: f32[128,64], index: 6, kind: input, shape index: {}]   ;;  %s15687_s7 = inlined_call_operand.hbm [shape: f32[2,16,16,32], index: 7, kind: output, shape index: {}]  }
   0x1   :  { %14 = vsyncpa [#allocation3 + $0x1], 0 }
   0x2   :  { %15 = vsyncpa [#allocation4], 0 }
   0x3   :  { %17 = vsyncpa [#allocation4 + $0x1], 0  ;;  %s6557_s24 = smov 0   ;;  %s6559_s25 = smov 0  }
   0x4   :  { %s6561_s26 = smov 0   ;;  %s6563_s27 = smov 0  }
   0x5 LB: > { %s6578_s28 = sadd.s32 4294967295, %s6504_s27   ;;  %s6198_s29 = sadd.s32 4294967294, %s6504_s27   ;;  %s6504_s27 = sphi %s6563_s27, %s19070_s27   ;;  %s6500_s26 = sphi %s6561_s26, %s19069_s26   ;;  %s6496_s25 = sphi %s6559_s25, %s19068_s25   ;;  %s6492_s24 = sphi %s6557_s24, %s19067_s24  }
   0x6   : > { %s6582_s30 = sadd.s32 1, %s6504_s27   ;;  %s30_s8 = sadd.s32 1, %s6500_s26 }
   0x7   : > { %s27_s9 = ssub.s32 %s6504_s27, %s6582_s30  ;;  %p37_p0 = scmp.ne.s32.totalorder %s6500_s26, %s6496_s25 }
   0x8   : > { %p28_p1 = scmp.eq.s32.totalorder %s27_s9, 0  ;;  %p38_p2 = scmp.eq.s32.totalorder %s6504_s27, 0 }
   0x9   : > { %p43_p3 = scmp.ne.s32.totalorder %s6496_s25, %s6492_s24  ;;  %p44_p4 = scmp.eq.s32.totalorder %s6578_s28, 0 }
   0xa   : > { %s6594_s10 = scalar_select %p28_p1, %s6500_s26, %s30_s8  }
   0xb   : > { %p6596_p5 = por %p38_p2, %p37_p0  ;;  %p6600_p6 = por %p44_p4, %p43_p3 }
   0xc   : > { %p193_p7 = scmp.eq.s32.totalorder %s6578_s28, 1  ;;  %p199_p8 = scmp.eq.s32.totalorder %s6198_s29, 1 }
   0xd   : > { %p6329_p10 = scmp.lt.s32.totalorder %s6504_s27, 2  ;;  %s237_s15 = sand.u32 1, %s6500_s26  }
   0xe   : > { %p6607_p11 = por %p193_p7, %p37_p0  ;;  %p6611_p12 = por %p199_p8, %p43_p3 }
   0xf   : > { %s6217_s16 = sshll.u32 %s6504_s27, 12  ;;  %s6201_s17 = sshll.u32 %s237_s15, 8 }
  0x10   : > { %s16171_s13 = scalar_select %p6607_p11, 1, 0 }
  0x11   : > { %s16172_s14 = scalar_select %p6611_p12, 1, 0 }
  0x12   : > { %s6620_s20 = scalar_lea.hbm %s15680_s0, %s6217_s16  ;;  %s241_s21 = scalar_lea.vmem [#allocation2], %s6201_s17 }
  0x13   : > { %s248_s22 = sshll.u32 %s241_s21, 4  ;;  %p6624_p13 = pnand %p6329_p10, %p6596_p5  ;;  %s6628_s22 = int_to_ptr.vmem [resolvable:$true] %s248_s22 }
  0x14   : > { %s6630_s29 = scalar_lea.sflag [#allocation3], %s237_s15  ;;  %s6408_s8 = scalar_lea.hbm %s6620_s20, 4096 }
  0x15   : > { %p6409_p0 = scmp.ne.s32.totalorder %s6620_s20, %s6408_s8  ;;  %p6410_p1 = pneg %p6624_p13 }
  0x16   : > { %s6413_s16 = scalar_lea.hbm %s15680_s0, 8192  ;;  %p6414_p4 = scmp.lt.u32.totalorder %s6620_s20, %s15680_s0 }
  0x17   : > { %p6411_p2 = pnand %p6410_p1, %p6409_p0  ;;  %p6415_p5 = scmp.lt.u32.totalorder %s6413_s16, %s6408_s8 }
  0x18   : > { %p6417_p8 = scmp.lt.u32.totalorder %s6408_s8, %s6620_s20 }
  0x19   : > { %p6412_p3 = pneg %p6411_p2  ;;  %p6416_p7 = por %p6415_p5, %p6414_p4 }
  0x1b   : > { %p6418_p10 = por %p6417_p8, %p6416_p7 }
  0x1d   : > { %p6419_p9 = pnand %p6418_p10, %p6412_p3 }
  0x1f   : > { %6422 = shalt.err (!%p6419_p9)
}
  0x20   : > { %s6423_s15 = scalar_lea.vmem %s6628_s22, 4096  ;;  %s6506_s19 = smov [#allocation2]  }
  0x21   : > { %p6424_p0 = scmp.ne.s32.totalorder %s6628_s22, %s6423_s15  ;;  %s6428_s21 = sshll.u32 %s6506_s19, 4  ;;  %s6429_s21 = int_to_ptr.vmem [resolvable:$false] %s6428_s21 }
  0x22   : > { %s6430_s9 = scalar_lea.vmem %s6429_s21, 8192  ;;  %p6431_p11 = scmp.lt.s32.totalorder %s6628_s22, %s6429_s21 }
  0x23   : > { %p6426_p2 = pnand %p6424_p0, %p6410_p1  ;;  %p6432_p4 = scmp.lt.s32.totalorder %s6430_s9, %s6423_s15 }
  0x25   : > { %p6427_p12 = pneg %p6426_p2  ;;  %p6433_p5 = por %p6432_p4, %p6431_p11 }
  0x27   : > { %p6434_p7 = pnand %p6433_p5, %p6427_p12 }
  0x29   : > { %6437 = shalt.err (!%p6434_p7)
}
  0x2a   : > { %s6507_s8 = smov 128   ;;  %s6508_s11 = smov 8  }
  0x2b   : > { %6324 = dma.hbm_to_vmem [thread:$0]  (!%p6624_p13), %s6620_s20, 4096, %s6628_s22, %s6630_s29, %s6507_s8, %s6507_s8, %s6508_s11  }
  0x2c   : > { %p6204_p9 = scmp.ge.s32.totalorder %s6504_s27, 1  ;;  %p256_p1 = scmp.lt.s32.totalorder %s6504_s27, 3 }
  0x2e   : > { %p257_p3 = pnand %p6204_p9, %p256_p1 }
  0x30   : > { %260 = sbr.rel (%p257_p3) target bundleno = 1937 (0x791), region = 48 }
  0x37   : > { %s6661_s16 = sand.u32 1, %s6496_s25  }
  0x38   : > { %s6205_s17 = sshll.u32 %s6661_s16, 8  ;;  %s263_s18 = scalar_lea.sflag [#allocation3], %s6661_s16 }
  0x39   : > { %s6667_s15 = scalar_lea.vmem [#allocation2], %s6205_s17 }
  0x3a   : > { %6483 = dma.done.wait (%p6600_p6), %s263_s18, 4096  }
  0x3b   : > { %6485 = vsyncadd (%p6600_p6), %s263_s18, 4294963200  ;;  %v798_v0 = vlaneseq  ;;  %v6674_v1 = vld [vmem:[%s6667_s15 + $0x10] sm:$0xff]  ;;  %v6677_v2 = vld [vmem:[%s6667_s15 + $0x20] sm:$0xff]  ;;  %vm441_vm0 = vcmask 1040384   ;;  %vm458_vm1 = vcmask 1041408   ;;  %vm619_vm2 = vcmask 1042432  }
  0x3c   : > { %v6682_v4 = vld [vmem:[%s6667_s15 + $0x30] sm:$0xff]  ;;  %v6685_v5 = vld [vmem:[%s6667_s15] sm:$0xff]  ;;  %v347_v6 = vrot.slane %v6674_v1, 3  ;;  %v379_v7 = vrot.slane %v6674_v1, 1  ;;  %v346_v9 = vrot.slane %v6677_v2, 3  ;;  %v378_v10 = vrot.slane %v6677_v2, 1 }
  0x3d   : > { %v6679_v3 = vshrl.u32 %v798_v0, 7  ;;  %16175 = vst [vmem:[#allocation9_spill] sm:$0xff] %v6685_v5  ;;  %v6690_v8 = vld [vmem:[%s6667_s15 + $0x40] sm:$0xff]  ;;  %v6695_v11 = vld [vmem:[%s6667_s15 + $0x50] sm:$0xff]  ;;  %v345_v13 = vrot.slane %v6682_v4, 3  ;;  %v377_v14 = vrot.slane %v6682_v4, 1 }
  0x3e   : > { %16176 = vst [vmem:[#allocation10_spill] sm:$0xff] %v6690_v8  ;;  %16177 = vst [vmem:[#allocation11_spill] sm:$0xff] %v6695_v11  ;;  %v6698_v12 = vld [vmem:[%s6667_s15 + $0x60] sm:$0xff]  ;;  %v6706_v16 = vld [vmem:[%s6667_s15 + $0x70] sm:$0xff]  ;;  %v348_v18 = vrot.slane %v6685_v5, 3  ;;  %v380_v19 = vrot.slane %v6685_v5, 1  ;;  %v6721_v25 = vsel %vm441_vm0, %v347_v6, %v379_v7  ;;  %v443_v32 = vsel %vm441_vm0, %v346_v9, %v378_v10 }
  0x3f   : > { %16174 = vst [vmem:[#allocation8_spill] sm:$0xff] %v6679_v3  ;;  %16178 = vst [vmem:[#allocation12_spill] sm:$0xff] %v6698_v12  ;;  %v6703_v15 = vsub.s32 0, %v6679_v3  ;;  %v6709_v17 = vld [vmem:[%s6667_s15 + $0x80] sm:$0xff]  ;;  %v6716_v22 = vld [vmem:[%s6667_s15 + $0x90] sm:$0xff]  ;;  %v349_v23 = vrot.slane %v6690_v8, 3  ;;  %v442_v37 = vsel %vm441_vm0, %v345_v13, %v377_v14 }
  0x40   : > { %16180 = vst [vmem:[#allocation14_spill] sm:$0xff] %v6706_v16  ;;  %16181 = vst [vmem:[#allocation15_spill] sm:$0xff] %v6716_v22  ;;  %v381_v24 = vrot.slane %v6690_v8, 1  ;;  %v6725_v27 = vld [vmem:[%s6667_s15 + $0xa0] sm:$0xff]  ;;  %v6728_v28 = vld [vmem:[%s6667_s15 + $0xb0] sm:$0xff]  ;;  %v350_v29 = vrot.slane %v6695_v11, 3  ;;  %v445_v43 = vsel %vm441_vm0, %v348_v18, %v380_v19 }
  0x41   : > { %16179 = vst [vmem:[#allocation13_spill] sm:$0xff] %v6703_v15  ;;  %16182 = vst [vmem:[#allocation16_spill] sm:$0xff] %v6725_v27  ;;  %v351_v30 = vrot.slane %v6698_v12, 3  ;;  %v382_v31 = vrot.slane %v6695_v11, 1  ;;  %v6735_v33 = vld [vmem:[%s6667_s15 + $0xc0] sm:$0xff]  ;;  %v352_v34 = vrot.slane %v6706_v16, 3 }
  0x42   : > { %16183 = vst [vmem:[#allocation17_spill] sm:$0xff] %v6728_v28  ;;  %16184 = vst [vmem:[#allocation18_spill] sm:$0xff] %v6735_v33  ;;  %v353_v35 = vrot.slane %v6709_v17, 3  ;;  %v383_v36 = vrot.slane %v6698_v12, 1  ;;  %v6742_v38 = vld [vmem:[%s6667_s15 + $0xd0] sm:$0xff]  ;;  %v6745_v39 = vld [vmem:[%s6667_s15 + $0xe0] sm:$0xff]  ;;  %v446_v48 = vsel %vm441_vm0, %v349_v23, %v381_v24 }
  0x43   : > { %16185 = vst [vmem:[#allocation19_spill] sm:$0xff] %v6742_v38  ;;  %16186 = vst [vmem:[#allocation20_spill] sm:$0xff] %v6745_v39  ;;  %v354_v40 = vrot.slane %v6716_v22, 3  ;;  %v384_v41 = vrot.slane %v6706_v16, 1  ;;  %v385_v42 = vrot.slane %v6709_v17, 1  ;;  %v6752_v44 = vld [vmem:[%s6667_s15 + $0xf0] sm:$0xff]  ;;  %v447_v52 = vsel %vm441_vm0, %v350_v29, %v382_v31 }
  0x44   : > { %16187 = vst [vmem:[#allocation21_spill] sm:$0xff] %v6752_v44  ;;  %v355_v45 = vrot.slane %v6725_v27, 3  ;;  %v356_v46 = vrot.slane %v6728_v28, 3  ;;  %v386_v47 = vrot.slane %v6716_v22, 1  ;;  %v357_v49 = vrot.slane %v6735_v33, 3  ;;  %s6512_s19 = smov 32  }
  0x45   : > { %v387_v50 = vrot.slane %v6725_v27, 1  ;;  %v388_v51 = vrot.slane %v6728_v28, 1  ;;  %v358_v53 = vrot.slane %v6742_v38, 3  ;;  %v359_v54 = vrot.slane %v6745_v39, 3  ;;  %s6513_s21 = smov 96   ;;  %s6112_s18 = scalar_lea.sflag [#allocation4], %s6661_s16 }
  0x46   : > { %v389_v55 = vrot.slane %v6735_v33, 1  ;;  %v448_v56 = vsel %vm441_vm0, %v351_v30, %v383_v36  ;;  %v360_v57 = vrot.slane %v6752_v44, 3  ;;  %v390_v58 = vrot.slane %v6742_v38, 1  ;;  %p19064_p11 = scmp.ne.s32.totalorder %s16171_s13, 0  ;;  %s6514_s20 = smov [#allocation5]  }
  0x47   : > { %v391_v59 = vrot.slane %v6745_v39, 1  ;;  %v409_v60 = vrot.slane %v6682_v4, 7  ;;  %v392_v61 = vrot.slane %v6752_v44, 1  ;;  %v410_v62 = vrot.slane %v6677_v2, 7  ;;  %s6442_s22 = sshll.u32 %s6514_s20, 4  ;;  %s6443_s22 = int_to_ptr.vmem [resolvable:$false] %s6442_s22 }
  0x48   : > { %v411_v63 = vrot.slane %v6674_v1, 7  ;;  %v412_v0 = vrot.slane %v6685_v5, 7  ;;  %v413_v6 = vrot.slane %v6690_v8, 7  ;;  %v414_v7 = vrot.slane %v6695_v11, 7  ;;  %v6795_v8 = vld [vmem:[%s6667_s15 + $0x8] sm:$0xff]  ;;  %s6444_s23 = scalar_lea.vmem %s6443_s22, 8192 }
  0x49   : > { %v415_v9 = vrot.slane %v6698_v12, 7  ;;  %v416_v10 = vrot.slane %v6706_v16, 7  ;;  %v417_v13 = vrot.slane %v6709_v17, 7  ;;  %v418_v14 = vrot.slane %v6716_v22, 7  ;;  %16188 = vst [vmem:[#allocation22_spill] sm:$0xff] %v6795_v8 }
  0x4a   : > { %v419_v18 = vrot.slane %v6725_v27, 7  ;;  %v420_v19 = vrot.slane %v6728_v28, 7  ;;  %v421_v23 = vrot.slane %v6735_v33, 7  ;;  %v422_v24 = vrot.slane %v6742_v38, 7 }
  0x4b   : > { %v423_v29 = vrot.slane %v6745_v39, 7  ;;  %v424_v30 = vrot.slane %v6752_v44, 7  ;;  %v449_v31 = vsel %vm441_vm0, %v352_v34, %v384_v41  ;;  %v450_v36 = vsel %vm441_vm0, %v353_v35, %v385_v42  ;;  %v6798_v34 = vld [vmem:[%s6667_s15 + $0x18] sm:$0xff]  ;;  %v6801_v35 = vld [vmem:[%s6667_s15 + $0x28] sm:$0xff] }
  0x4c   : > { %v451_v26 = vsel %vm441_vm0, %v354_v40, %v386_v47  ;;  %v452_v21 = vsel %vm441_vm0, %v355_v45, %v387_v50  ;;  %v453_v20 = vsel %vm441_vm0, %v356_v46, %v388_v51  ;;  %v454_v16 = vsel %vm441_vm0, %v357_v49, %v389_v55  ;;  %16189 = vst [vmem:[#allocation23_spill] sm:$0xff] %v6798_v34  ;;  %v6815_v46 = vld [vmem:[%s6667_s15 + $0x38] sm:$0xff]  ;;  %v6818_v47 = vld [vmem:[%s6667_s15 + $0x48] sm:$0xff] }
  0x4d   : > { %v455_v12 = vsel %vm441_vm0, %v358_v53, %v390_v58  ;;  %v456_v11 = vsel %vm441_vm0, %v359_v54, %v391_v59  ;;  %v457_v40 = vsel %vm441_vm0, %v360_v57, %v392_v61  ;;  %v6805_v41 = vsel %vm458_vm1, %v442_v37, %v409_v60  ;;  %16193 = vst [vmem:[#allocation27_spill] sm:$0xff] %v6818_v47  ;;  %v6821_v49 = vld [vmem:[%s6667_s15 + $0x58] sm:$0xff]  ;;  %v6836_v51 = vld [vmem:[%s6667_s15 + $0x68] sm:$0xff] }
  0x4e   : > { %16190 = vst [vmem:[#allocation24_spill] sm:$0xff] %v6805_v41  ;;  %v6808_v42 = vsel %vm458_vm1, %v443_v32, %v410_v62  ;;  %v6812_v45 = vsel %vm458_vm1, %v6721_v25, %v411_v63  ;;  %16194 = vst [vmem:[#allocation28_spill] sm:$0xff] %v6821_v49  ;;  %v6824_v50 = vsel %vm458_vm1, %v445_v43, %v412_v0  ;;  %v6839_v53 = vld [vmem:[%s6667_s15 + $0x78] sm:$0xff]  ;;  %v6842_v54 = vld [vmem:[%s6667_s15 + $0x88] sm:$0xff]  ;;  %vm1195_vm3 = vcmask 1045504  }
  0x4f   : > { %16191 = vst [vmem:[#allocation25_spill] sm:$0xff] %v6808_v42  ;;  %16192 = vst [vmem:[#allocation26_spill] sm:$0xff] %v6812_v45  ;;  %v6827_v37 = vsel %vm458_vm1, %v446_v48, %v413_v6  ;;  %v6830_v32 = vsel %vm458_vm1, %v447_v52, %v414_v7  ;;  %v6833_v25 = vsel %vm458_vm1, %v448_v56, %v415_v9  ;;  %v6857_v56 = vld [vmem:[%s6667_s15 + $0x98] sm:$0xff]  ;;  %v6860_v57 = vld [vmem:[%s6667_s15 + $0xa8] sm:$0xff]  ;;  %v493_v6 = vrot.slane %v6798_v34, 6 }
  0x50   : > { %16195 = vst [vmem:[#allocation29_spill] sm:$0xff] %v6824_v50  ;;  %16196 = vst [vmem:[#allocation30_spill] sm:$0xff] %v6827_v37  ;;  %v6845_v43 = vsel %vm458_vm1, %v449_v31, %v416_v10  ;;  %v6848_v48 = vsel %vm458_vm1, %v450_v36, %v417_v13  ;;  %v6851_v52 = vsel %vm458_vm1, %v451_v26, %v418_v14  ;;  %v6863_v58 = vld [vmem:[%s6667_s15 + $0xb8] sm:$0xff]  ;;  %v6884_v63 = vld [vmem:[%s6667_s15 + $0xe8] sm:$0xff]  ;;  %v495_v7 = vrot.slane %v6818_v47, 6 }
  0x51   : > { %16197 = vst [vmem:[#allocation31_spill] sm:$0xff] %v6830_v32  ;;  %16198 = vst [vmem:[#allocation32_spill] sm:$0xff] %v6833_v25  ;;  %v6854_v55 = vsel %vm458_vm1, %v452_v21, %v419_v18  ;;  %v6866_v59 = vsel %vm458_vm1, %v453_v20, %v420_v19  ;;  %v6869_v60 = vsel %vm458_vm1, %v454_v16, %v421_v23  ;;  %v6878_v21 = vld [vmem:[%s6667_s15 + $0xc8] sm:$0xff]  ;;  %v6881_v62 = vld [vmem:[%s6667_s15 + $0xd8] sm:$0xff]  ;;  %v491_v20 = vrot.slane %v6815_v46, 6 }
  0x52   : > { %16199 = vst [vmem:[#allocation33_spill] sm:$0xff] %v6836_v51  ;;  %16200 = vst [vmem:[#allocation34_spill] sm:$0xff] %v6839_v53  ;;  %v6872_v61 = vsel %vm458_vm1, %v455_v12, %v422_v24  ;;  %v6875_v26 = vsel %vm458_vm1, %v456_v11, %v423_v29  ;;  %v6887_v0 = vsel %vm458_vm1, %v457_v40, %v424_v30  ;;  %v492_v16 = vrot.slane %v6801_v35, 6  ;;  %v6893_v12 = vld [vmem:[%s6667_s15 + $0xf8] sm:$0xff] }
  0x53   : > { %16201 = vst [vmem:[#allocation35_spill] sm:$0xff] %v6845_v43  ;;  %16202 = vst [vmem:[#allocation36_spill] sm:$0xff] %v6848_v48  ;;  %v494_v11 = vrot.slane %v6795_v8, 6  ;;  %v496_v9 = vrot.slane %v6821_v49, 6  ;;  %v497_v10 = vrot.slane %v6836_v51, 6  ;;  %v498_v13 = vrot.slane %v6839_v53, 6 }
  0x54   : > { %16203 = vst [vmem:[#allocation37_spill] sm:$0xff] %v6851_v52  ;;  %16204 = vst [vmem:[#allocation38_spill] sm:$0xff] %v6854_v55  ;;  %v499_v14 = vrot.slane %v6842_v54, 6  ;;  %v500_v18 = vrot.slane %v6857_v56, 6  ;;  %v501_v19 = vrot.slane %v6860_v57, 6  ;;  %v502_v23 = vrot.slane %v6863_v58, 6 }
  0x55   : > { %16205 = vst [vmem:[#allocation39_spill] sm:$0xff] %v6866_v59  ;;  %16206 = vst [vmem:[#allocation40_spill] sm:$0xff] %v6869_v60  ;;  %v503_v24 = vrot.slane %v6878_v21, 6  ;;  %v504_v29 = vrot.slane %v6881_v62, 6  ;;  %v505_v30 = vrot.slane %v6884_v63, 6  ;;  %v506_v31 = vrot.slane %v6893_v12, 6 }
  0x56   : > { %16207 = vst [vmem:[#allocation41_spill] sm:$0xff] %v6872_v61  ;;  %16208 = vst [vmem:[#allocation42_spill] sm:$0xff] %v6875_v26  ;;  %v523_v36 = vrot.slane %v6815_v46, 4  ;;  %v524_v40 = vrot.slane %v6801_v35, 4  ;;  %v525_v48 = vrot.slane %v6798_v34, 4  ;;  %v526_v43 = vrot.slane %v6795_v8, 4 }
  0x57   : > { %16209 = vst [vmem:[#allocation43_spill] sm:$0xff] %v6887_v0  ;;  %16210 = vst [vmem:[#allocation44_spill] sm:$0xff] %v6893_v12  ;;  %v527_v25 = vrot.slane %v6818_v47, 4  ;;  %v528_v32 = vrot.slane %v6821_v49, 4  ;;  %v529_v37 = vrot.slane %v6836_v51, 4  ;;  %v530_v50 = vrot.slane %v6839_v53, 4 }
  0x58   : > { %v531_v45 = vrot.slane %v6842_v54, 4  ;;  %v532_v42 = vrot.slane %v6857_v56, 4  ;;  %v533_v41 = vrot.slane %v6860_v57, 4  ;;  %v534_v5 = vrot.slane %v6863_v58, 4 }
  0x59   : > { %v535_v3 = vrot.slane %v6878_v21, 4  ;;  %v536_v15 = vrot.slane %v6881_v62, 4  ;;  %v537_v0 = vrot.slane %v6884_v63, 4  ;;  %v538_v26 = vrot.slane %v6893_v12, 4 }
  0x5a   : > { %v555_v61 = vrot.slane %v6815_v46, 2  ;;  %v556_v60 = vrot.slane %v6801_v35, 2  ;;  %v557_v59 = vrot.slane %v6798_v34, 2  ;;  %v563_v33 = vrot.slane %v6842_v54, 2 }
  0x5b   : > { %v564_v28 = vrot.slane %v6857_v56, 2  ;;  %v565_v27 = vrot.slane %v6860_v57, 2  ;;  %v566_v22 = vrot.slane %v6863_v58, 2  ;;  %v567_v34 = vrot.slane %v6878_v21, 2 }
  0x5c   : > { %v568_v55 = vrot.slane %v6881_v62, 2  ;;  %v569_v52 = vrot.slane %v6884_v63, 2  ;;  %v570_v44 = vrot.slane %v6893_v12, 2  ;;  %v587_v39 = vsel %vm441_vm0, %v491_v20, %v523_v36 }
  0x5d   : > { %v588_v38 = vsel %vm441_vm0, %v492_v16, %v524_v40  ;;  %v589_v53 = vsel %vm441_vm0, %v493_v6, %v525_v48  ;;  %v6944_v51 = vsel %vm441_vm0, %v494_v11, %v526_v43  ;;  %v6947_v49 = vsel %vm441_vm0, %v495_v7, %v527_v25  ;;  %v16211_v11 = vld [vmem:[#allocation15_spill] sm:$0xff] }
  0x5e   : > { %v6950_v47 = vsel %vm441_vm0, %v496_v9, %v528_v32  ;;  %v6953_v8 = vsel %vm441_vm0, %v497_v10, %v529_v37  ;;  %v595_v12 = vsel %vm441_vm0, %v499_v14, %v531_v45  ;;  %v596_v20 = vsel %vm441_vm0, %v500_v18, %v532_v42  ;;  %v16212_v9 = vld [vmem:[#allocation16_spill] sm:$0xff]  ;;  %v16214_v14 = vld [vmem:[#allocation17_spill] sm:$0xff]  ;;  %v16215_v18 = vld [vmem:[#allocation18_spill] sm:$0xff] }
  0x5f   : > { %v597_v16 = vsel %vm441_vm0, %v501_v19, %v533_v41  ;;  %v598_v48 = vsel %vm441_vm0, %v502_v23, %v534_v5  ;;  %v599_v43 = vsel %vm441_vm0, %v503_v24, %v535_v3  ;;  %v600_v6 = vsel %vm441_vm0, %v504_v29, %v536_v15  ;;  %v16216_v19 = vld [vmem:[#allocation19_spill] sm:$0xff]  ;;  %v16217_v23 = vld [vmem:[#allocation20_spill] sm:$0xff]  ;;  %v16221_v29 = vld [vmem:[#allocation21_spill] sm:$0xff] }
  0x60   : > { %v601_v25 = vsel %vm441_vm0, %v505_v30, %v537_v0  ;;  %v602_v32 = vsel %vm441_vm0, %v506_v31, %v538_v26  ;;  %v6964_v37 = vsel %vm441_vm0, %v498_v13, %v530_v50  ;;  %v6967_v45 = vsel %vm458_vm1, %v587_v39, %v555_v61  ;;  %v16213_v13 = vld [vmem:[#allocation44_spill] sm:$0xff] }
  0x61   : > { %v6970_v42 = vsel %vm458_vm1, %v588_v38, %v556_v60  ;;  %v6973_v5 = vsel %vm458_vm1, %v589_v53, %v557_v59  ;;  %v611_v3 = vsel %vm458_vm1, %v595_v12, %v563_v33  ;;  %v612_v15 = vsel %vm458_vm1, %v596_v20, %v564_v28 }
  0x62   : > { %v613_v41 = vsel %vm458_vm1, %v597_v16, %v565_v27  ;;  %v614_v26 = vsel %vm458_vm1, %v598_v48, %v566_v22  ;;  %v615_v50 = vsel %vm458_vm1, %v599_v43, %v567_v34  ;;  %v616_v0 = vsel %vm458_vm1, %v600_v6, %v568_v55 }
  0x63   : > { %v617_v39 = vsel %vm458_vm1, %v601_v25, %v569_v52  ;;  %v618_v38 = vsel %vm458_vm1, %v602_v32, %v570_v44  ;;  %v645_v22 = vrot.slane %v6842_v54, 5  ;;  %v648_v34 = vrot.slane %v6857_v56, 5 }
  0x64   : > { %v651_v55 = vrot.slane %v6860_v57, 5  ;;  %v654_v52 = vrot.slane %v6863_v58, 5  ;;  %v657_v44 = vrot.slane %v6878_v21, 5  ;;  %v660_v59 = vrot.slane %v6881_v62, 5 }
  0x65   : > { %v663_v61 = vrot.slane %v6884_v63, 5  ;;  %v15716_v12 = vrot.slane %v6709_v17, 5  ;;  %v647_v7 = vrot.slane %v16211_v11, 5  ;;  %v650_v10 = vrot.slane %v16212_v9, 5 }
  0x66   : > { %v666_v54 = vrot.slane %v16213_v13, 5  ;;  %v653_v56 = vrot.slane %v16214_v14, 5  ;;  %v656_v57 = vrot.slane %v16215_v18, 5  ;;  %v659_v58 = vrot.slane %v16216_v19, 5  ;;  %v7033_v13 = vld [vmem:[%s15681_s1] sm:$0xff]  ;;  %v16228_v18 = vld [vmem:[#allocation37_spill] sm:$0xff] }
  0x67   : > { %v662_v21 = vrot.slane %v16217_v23, 5  ;;  %v7006_v62 = vsel %vm619_vm2, %v15716_v12, %v645_v22  ;;  %v7009_v63 = vsel %vm619_vm2, %v647_v7, %v648_v34  ;;  %v7012_v24 = vsel %vm619_vm2, %v650_v10, %v651_v55  ;;  %16227 = vst [vmem:[#allocation45_spill] sm:$0xff] %v7033_v13  ;;  %v16230_v23 = vld [vmem:[#allocation38_spill] sm:$0xff] }
  0x68   : > { %16218 = vst [vmem:[#allocation15_spill] sm:$0xff] %v7006_v62  ;;  %16219 = vst [vmem:[#allocation16_spill] sm:$0xff] %v7009_v63  ;;  %v665_v30 = vrot.slane %v16221_v29, 5  ;;  %v7016_v31 = vsel %vm619_vm2, %v653_v56, %v654_v52  ;;  %v7019_v36 = vsel %vm619_vm2, %v656_v57, %v657_v44  ;;  %v7022_v40 = vsel %vm619_vm2, %v659_v58, %v660_v59 }
  0x69   : > { %16220 = vst [vmem:[#allocation44_spill] sm:$0xff] %v7012_v24  ;;  %16222 = vst [vmem:[#allocation17_spill] sm:$0xff] %v7016_v31  ;;  %v7025_v20 = vsel %vm619_vm2, %v662_v21, %v663_v61  ;;  %v740_v48 = vrot.slane %v611_v3, 5  ;;  %v741_v43 = vrot.slane %v612_v15, 5  ;;  %v742_v6 = vrot.slane %v613_v41, 5  ;;  %v16232_v3 = vld [vmem:[#allocation39_spill] sm:$0xff] }
  0x6a   : > { %16223 = vst [vmem:[#allocation18_spill] sm:$0xff] %v7019_v36  ;;  %16224 = vst [vmem:[#allocation19_spill] sm:$0xff] %v7022_v40  ;;  %v7028_v16 = vsel %vm619_vm2, %v665_v30, %v666_v54  ;;  %v743_v25 = vrot.slane %v614_v26, 5  ;;  %v744_v32 = vrot.slane %v615_v50, 5  ;;  %v745_v11 = vrot.slane %v616_v0, 5  ;;  %v16234_v41 = vld [vmem:[#allocation40_spill] sm:$0xff] }
  0x6b   : > { %16225 = vst [vmem:[#allocation20_spill] sm:$0xff] %v7025_v20  ;;  %16226 = vst [vmem:[#allocation21_spill] sm:$0xff] %v7028_v16  ;;  %v746_v9 = vrot.slane %v617_v39, 5  ;;  %v747_v14 = vrot.slane %v618_v38, 5  ;;  %v7037_v19 = vsel %vm619_vm2, %v16228_v18, %v647_v7  ;;  %v7041_v29 = vsel %vm619_vm2, %v16230_v23, %v650_v10  ;;  %v16236_v50 = vld [vmem:[#allocation41_spill] sm:$0xff]  ;;  %v16238_v39 = vld [vmem:[#allocation42_spill] sm:$0xff] }
  0x6c   : > { %16229 = vst [vmem:[#allocation37_spill] sm:$0xff] %v7037_v19  ;;  %16231 = vst [vmem:[#allocation38_spill] sm:$0xff] %v7041_v29  ;;  %v7045_v15 = vsel %vm619_vm2, %v16232_v3, %v653_v56  ;;  %v7049_v26 = vsel %vm619_vm2, %v16234_v41, %v656_v57  ;;  %v7053_v0 = vsel %vm619_vm2, %v16236_v50, %v659_v58  ;;  %v16240_v7 = vld [vmem:[#allocation43_spill] sm:$0xff]  ;;  %v16245_v23 = vld [vmem:[#allocation13_spill] sm:$0xff]  ;;  %vm2014_vm4 = vcmask 1043456  }
  0x6d   : > { %16233 = vst [vmem:[#allocation39_spill] sm:$0xff] %v7045_v15  ;;  %16235 = vst [vmem:[#allocation40_spill] sm:$0xff] %v7049_v26  ;;  %v7057_v38 = vsel %vm619_vm2, %v16238_v39, %v662_v21  ;;  %v7061_v10 = vsel %vm619_vm2, %v16240_v7, %v665_v30  ;;  %v7064_v18 = vsel %vm619_vm2, %v645_v22, %v740_v48  ;;  %vm3376_vm5 = vcmask 1044480  }
  0x6e   : > { %16237 = vst [vmem:[#allocation41_spill] sm:$0xff] %v7053_v0  ;;  %16239 = vst [vmem:[#allocation42_spill] sm:$0xff] %v7057_v38  ;;  %v7067_v56 = vsel %vm619_vm2, %v648_v34, %v741_v43  ;;  %v7070_v57 = vsel %vm619_vm2, %v651_v55, %v742_v6  ;;  %v7074_v58 = vrot.slane %v7033_v13, %v16245_v23  ;;  %vm5703_vm6 = vcmask 261120  }
  0x6f   : > { %16241 = vst [vmem:[#allocation43_spill] sm:$0xff] %v7061_v10  ;;  %16242 = vst [vmem:[#allocation46_spill] sm:$0xff] %v7064_v18  ;;  %v7077_v21 = vsel %vm619_vm2, %v654_v52, %v743_v25  ;;  %v7080_v3 = vsel %vm619_vm2, %v657_v44, %v744_v32  ;;  %v7083_v30 = vsel %vm619_vm2, %v660_v59, %v745_v11  ;;  %v16251_v52 = vld [vmem:[#allocation8_spill] sm:$0xff]  ;;  %vm5707_vm7 = vcmask 257024  }
  0x70   : > { %16243 = vst [vmem:[#allocation47_spill] sm:$0xff] %v7067_v56  ;;  %16244 = vst [vmem:[#allocation48_spill] sm:$0xff] %v7070_v57  ;;  %v7086_v22 = vsel %vm619_vm2, %v663_v61, %v746_v9  ;;  %v7089_v34 = vsel %vm619_vm2, %v666_v54, %v747_v14  ;;  %v827_v55 = vmul.f32 %v7074_v58, %v7006_v62  ;;  %v16252_v43 = vsub.s32 3, %v16251_v52 }
  0x71   : > { %16246 = vst [vmem:[#allocation49_spill] sm:$0xff] %v7077_v21  ;;  %16247 = vst [vmem:[#allocation50_spill] sm:$0xff] %v7080_v3  ;;  %v828_v48 = vmul.f32 %v7074_v58, %v7064_v18  ;;  %v829_v59 = vmul.f32 %v7074_v58, %v7037_v19  ;;  %v830_v61 = vmul.f32 %v7074_v58, %v7009_v63  ;;  %vm6510_vm8 = vmmov 0  }
  0x72   : > { %16248 = vst [vmem:[#allocation51_spill] sm:$0xff] %v7083_v30  ;;  %16249 = vst [vmem:[#allocation52_spill] sm:$0xff] %v7086_v22  ;;  %v7098_v44 = vrot.slane %v7033_v13, %v16252_v43  ;;  %v831_v54 = vmul.f32 %v7074_v58, %v7067_v56  ;;  %v832_v6 = vmul.f32 %v7074_v58, %v7041_v29 }
  0x73   : > { %16250 = vst [vmem:[#allocation53_spill] sm:$0xff] %v7089_v34  ;;  %v833_v25 = vmul.f32 %v7074_v58, %v7012_v24  ;;  %v834_v32 = vmul.f32 %v7074_v58, %v7070_v57  ;;  %v835_v11 = vmul.f32 %v7074_v58, %v7045_v15  ;;  %v836_v9 = vmul.f32 %v7074_v58, %v7016_v31 }
  0x74   : > { %16253 = vst [vmem:[#allocation54_spill] sm:$0xff] %v7098_v44  ;;  %v837_v14 = vmul.f32 %v7074_v58, %v7077_v21  ;;  %v838_v41 = vmul.f32 %v7074_v58, %v7049_v26  ;;  %v839_v50 = vmul.f32 %v7074_v58, %v7019_v36  ;;  %v840_v39 = vmul.f32 %v7074_v58, %v7080_v3 }
  0x75   : > { %v841_v7 = vmul.f32 %v7074_v58, %v7053_v0  ;;  %v842_v43 = vmul.f32 %v7074_v58, %v7022_v40  ;;  %v843_v12 = vmul.f32 %v7074_v58, %v7083_v30  ;;  %v844_v27 = vmul.f32 %v7074_v58, %v7057_v38 }
  0x76   : > { %v845_v33 = vmul.f32 %v7074_v58, %v7025_v20  ;;  %v846_v28 = vmul.f32 %v7074_v58, %v7086_v22  ;;  %v927_v60 = vmul.f32 %v7098_v44, %v7012_v24  ;;  %v928_v53 = vmul.f32 %v7098_v44, %v7070_v57 }
  0x77   : > { %v929_v23 = vmul.f32 %v7098_v44, %v7045_v15  ;;  %v930_v29 = vmul.f32 %v7098_v44, %v7016_v31  ;;  %v931_v56 = vmul.f32 %v7098_v44, %v7077_v21  ;;  %v932_v63 = vmul.f32 %v7098_v44, %v7049_v26 }
  0x78   : > { %v933_v19 = vmul.f32 %v7098_v44, %v7019_v36  ;;  %v934_v24 = vmul.f32 %v7098_v44, %v7080_v3  ;;  %v935_v57 = vmul.f32 %v7098_v44, %v7053_v0  ;;  %v936_v15 = vmul.f32 %v7098_v44, %v7022_v40 }
  0x79   : > { %v937_v31 = vmul.f32 %v7098_v44, %v7083_v30  ;;  %v938_v21 = vmul.f32 %v7098_v44, %v7057_v38  ;;  %v939_v26 = vmul.f32 %v7098_v44, %v7025_v20  ;;  %v940_v18 = vmul.f32 %v7098_v44, %v7086_v22 }
  0x7a   : > { %v941_v62 = vmul.f32 %v7098_v44, %v7061_v10  ;;  %v942_v0 = vmul.f32 %v7098_v44, %v7028_v16  ;;  %v943_v40 = vmul.f32 %v7098_v44, %v7089_v34  ;;  %v7170_v3 = vadd.f32 %v927_v60, %v827_v55  ;;  %v16286_v44 = vld [vmem:[#allocation24_spill] sm:$0xff] }
  0x7b   : > { %v7172_v30 = vadd.f32 %v928_v53, %v828_v48  ;;  %v7174_v38 = vadd.f32 %v929_v23, %v829_v59  ;;  %v7176_v36 = vadd.f32 %v930_v29, %v830_v61  ;;  %v7178_v20 = vadd.f32 %v931_v56, %v831_v54  ;;  %v16257_v48 = vld [vmem:[#allocation9_spill] sm:$0xff]  ;;  %v16258_v61 = vld [vmem:[#allocation22_spill] sm:$0xff] }
  0x7c   : > { %v7180_v22 = vadd.f32 %v932_v63, %v832_v6  ;;  %v7182_v13 = vadd.f32 %v933_v19, %v833_v25  ;;  %v7184_v10 = vadd.f32 %v934_v24, %v834_v32  ;;  %v7186_v16 = vadd.f32 %v935_v57, %v835_v11  ;;  %v16254_v24 = vld [vmem:[#allocation23_spill] sm:$0xff]  ;;  %v16259_v6 = vld [vmem:[#allocation10_spill] sm:$0xff] }
  0x7d   : > { %v7188_v52 = vadd.f32 %v936_v15, %v836_v9  ;;  %v7190_v60 = vadd.f32 %v937_v31, %v837_v14  ;;  %v7192_v53 = vadd.f32 %v938_v21, %v838_v41  ;;  %v7194_v23 = vadd.f32 %v939_v26, %v839_v50 }
  0x7e   : > { %v7196_v29 = vadd.f32 %v940_v18, %v840_v39  ;;  %v7198_v56 = vadd.f32 %v941_v62, %v841_v7  ;;  %v7200_v63 = vadd.f32 %v942_v0, %v842_v43  ;;  %v7202_v19 = vadd.f32 %v943_v40, %v843_v12  ;;  %v16260_v62 = vld [vmem:[#allocation27_spill] sm:$0xff]  ;;  %v16262_v40 = vld [vmem:[#allocation28_spill] sm:$0xff] }
  0x7f   : > { %v627_v55 = vrot.slane %v16254_v24, 5  ;;  %v7205_v57 = vadd.f32 %v938_v21, %v844_v27  ;;  %v7207_v15 = vadd.f32 %v939_v26, %v845_v33  ;;  %v7209_v31 = vadd.f32 %v940_v18, %v846_v28  ;;  %v16263_v21 = vld [vmem:[#allocation33_spill] sm:$0xff]  ;;  %v16264_v26 = vld [vmem:[#allocation34_spill] sm:$0xff]  ;;  %v16272_v24 = vld [vmem:[#allocation11_spill] sm:$0xff] }
  0x80   : > { %v629_v59 = vrot.slane %v16257_v48, 5  ;;  %v630_v54 = vrot.slane %v16258_v61, 5  ;;  %v632_v25 = vrot.slane %v16259_v6, 5  ;;  %v633_v32 = vrot.slane %v16260_v62, 5  ;;  %v16274_v6 = vld [vmem:[#allocation14_spill] sm:$0xff] }
  0x81   : > { %16255 = vst [vmem:[#allocation23_spill] sm:$0xff] %v7205_v57  ;;  %16256 = vst [vmem:[#allocation55_spill] sm:$0xff] %v7209_v31  ;;  %v16261_v0 = vrot.slane %v16258_v61, 2  ;;  %v636_v27 = vrot.slane %v16262_v40, 5  ;;  %v639_v33 = vrot.slane %v16263_v21, 5  ;;  %v642_v28 = vrot.slane %v16264_v26, 5 }
  0x82   : > { %v16265_v18 = vrot.slane %v16260_v62, 2  ;;  %v16266_v9 = vrot.slane %v16262_v40, 2  ;;  %v16267_v41 = vrot.slane %v16263_v21, 2  ;;  %v16268_v50 = vrot.slane %v16264_v26, 2 }
  0x83   : > { %v606_v12 = vsel %vm458_vm1, %v6944_v51, %v16261_v0  ;;  %v16269_v7 = vrot.slane %v6815_v46, 5  ;;  %v16270_v43 = vrot.slane %v6682_v4, 5  ;;  %v635_v48 = vrot.slane %v16272_v24, 5 }
  0x84   : > { %v607_v11 = vsel %vm458_vm1, %v6947_v49, %v16265_v18  ;;  %v608_v14 = vsel %vm458_vm1, %v6950_v47, %v16266_v9  ;;  %v609_v51 = vsel %vm458_vm1, %v6953_v8, %v16267_v41  ;;  %v610_v39 = vsel %vm458_vm1, %v6964_v37, %v16268_v50  ;;  %v16273_v47 = vld [vmem:[#allocation12_spill] sm:$0xff] }
  0x85   : > { %v7243_v49 = vsel %vm619_vm2, %v16270_v43, %v16269_v7  ;;  %v638_v61 = vrot.slane %v16273_v47, 5  ;;  %v641_v62 = vrot.slane %v16274_v6, 5  ;;  %v16275_v8 = vrot.slane %v6801_v35, 5 }
  0x86   : > { %16271 = vst [vmem:[#allocation9_spill] sm:$0xff] %v7243_v49  ;;  %v16276_v0 = vrot.slane %v6677_v2, 5  ;;  %v16278_v37 = vrot.slane %v6674_v1, 5  ;;  %v7261_v26 = vsel %vm619_vm2, %v629_v59, %v630_v54  ;;  %v7264_v18 = vsel %vm619_vm2, %v632_v25, %v633_v32 }
  0x87   : > { %16280 = vst [vmem:[#allocation27_spill] sm:$0xff] %v7261_v26  ;;  %16281 = vst [vmem:[#allocation28_spill] sm:$0xff] %v7264_v18  ;;  %v7267_v9 = vsel %vm619_vm2, %v635_v48, %v636_v27  ;;  %v7270_v41 = vsel %vm619_vm2, %v638_v61, %v639_v33  ;;  %v7273_v50 = vsel %vm619_vm2, %v641_v62, %v642_v28  ;;  %v732_v7 = vrot.slane %v6967_v45, 5 }
  0x88   : > { %v7253_v40 = vsel %vm619_vm2, %v16276_v0, %v16275_v8  ;;  %v7258_v21 = vsel %vm619_vm2, %v16278_v37, %v627_v55  ;;  %16282 = vst [vmem:[#allocation33_spill] sm:$0xff] %v7267_v9  ;;  %16283 = vst [vmem:[#allocation34_spill] sm:$0xff] %v7270_v41  ;;  %v733_v43 = vrot.slane %v6970_v42, 5  ;;  %v734_v24 = vrot.slane %v6973_v5, 5  ;;  %v16292_v5 = vld [vmem:[#allocation26_spill] sm:$0xff] }
  0x89   : > { %16277 = vst [vmem:[#allocation22_spill] sm:$0xff] %v7253_v40  ;;  %16279 = vst [vmem:[#allocation10_spill] sm:$0xff] %v7258_v21  ;;  %v735_v47 = vrot.slane %v606_v12, 5  ;;  %v736_v6 = vrot.slane %v607_v11, 5  ;;  %v737_v8 = vrot.slane %v608_v14, 5  ;;  %v738_v0 = vrot.slane %v609_v51, 5 }
  0x8a   : > { %16284 = vst [vmem:[#allocation11_spill] sm:$0xff] %v7273_v50  ;;  %v739_v37 = vrot.slane %v610_v39, 5  ;;  %v16285_v57 = vrot.slane %v6682_v4, 5  ;;  %v16288_v41 = vrot.slane %v6677_v2, 5  ;;  %v16289_v50 = vld [vmem:[#allocation25_spill] sm:$0xff]  ;;  %v16291_v42 = vrot.slane %v6674_v1, 5 }
  0x8b   : > { %v16294_v11 = vld [vmem:[#allocation29_spill] sm:$0xff]  ;;  %v16296_v4 = vld [vmem:[#allocation30_spill] sm:$0xff]  ;;  %v16300_v51 = vld [vmem:[#allocation32_spill] sm:$0xff] }
  0x8c   : > { %v7282_v31 = vsel %vm619_vm2, %v16286_v44, %v16285_v57  ;;  %v7288_v45 = vsel %vm619_vm2, %v16289_v50, %v16288_v41  ;;  %v7294_v12 = vsel %vm619_vm2, %v16292_v5, %v16291_v42  ;;  %v7298_v14 = vsel %vm619_vm2, %v16294_v11, %v629_v59  ;;  %v16298_v57 = vld [vmem:[#allocation31_spill] sm:$0xff]  ;;  %v16305_v59 = vld [vmem:[#allocation36_spill] sm:$0xff] }
  0x8d   : > { %16287 = vst [vmem:[#allocation12_spill] sm:$0xff] %v7282_v31  ;;  %16290 = vst [vmem:[#allocation14_spill] sm:$0xff] %v7288_v45  ;;  %v7302_v44 = vsel %vm619_vm2, %v16296_v4, %v632_v25  ;;  %v7306_v2 = vsel %vm619_vm2, %v16298_v57, %v635_v48  ;;  %v7310_v39 = vsel %vm619_vm2, %v16300_v51, %v638_v61  ;;  %v16302_v1 = vld [vmem:[#allocation35_spill] sm:$0xff]  ;;  %v16304_v50 = vrot.slane %v6709_v17, 5 }
  0x8e   : > { %16293 = vst [vmem:[#allocation24_spill] sm:$0xff] %v7294_v12  ;;  %16295 = vst [vmem:[#allocation25_spill] sm:$0xff] %v7298_v14  ;;  %v7314_v41 = vsel %vm619_vm2, %v16302_v1, %v641_v62  ;;  %v16307_v25 = vrot.slane %v6815_v46, 5  ;;  %v16309_v48 = vrot.slane %v6801_v35, 5  ;;  %v7333_v11 = vsel %vm619_vm2, %v627_v55, %v734_v24  ;;  %v16317_v55 = vld [vmem:[#allocation8_spill] sm:$0xff] }
  0x8f   : > { %16297 = vst [vmem:[#allocation26_spill] sm:$0xff] %v7302_v44  ;;  %16299 = vst [vmem:[#allocation29_spill] sm:$0xff] %v7306_v2  ;;  %v7320_v42 = vsel %vm619_vm2, %v16305_v59, %v16304_v50  ;;  %v7336_v62 = vsel %vm619_vm2, %v630_v54, %v735_v47  ;;  %v7339_v17 = vsel %vm619_vm2, %v633_v32, %v736_v6  ;;  %v16319_v54 = vld [vmem:[#allocation45_spill] sm:$0xff]  ;;  %v16321_v32 = vsub.s32 1, %v16317_v55  ;;  %v16331_v59 = vld [vmem:[#allocation18_spill] sm:$0xff] }
  0x90   : > { %16301 = vst [vmem:[#allocation30_spill] sm:$0xff] %v7310_v39  ;;  %16303 = vst [vmem:[#allocation31_spill] sm:$0xff] %v7314_v41  ;;  %v7325_v5 = vsel %vm619_vm2, %v16307_v25, %v732_v7  ;;  %v7330_v61 = vsel %vm619_vm2, %v16309_v48, %v733_v43  ;;  %v7342_v4 = vsel %vm619_vm2, %v636_v27, %v737_v8  ;;  %v16318_v43 = vsub.s32 6, %v16317_v55  ;;  %v16332_v48 = vld [vmem:[#allocation50_spill] sm:$0xff] }
  0x91   : > { %16306 = vst [vmem:[#allocation32_spill] sm:$0xff] %v7320_v42  ;;  %16308 = vst [vmem:[#allocation35_spill] sm:$0xff] %v7325_v5  ;;  %v7345_v46 = vsel %vm619_vm2, %v639_v33, %v738_v0  ;;  %v7348_v35 = vsel %vm619_vm2, %v642_v28, %v739_v37  ;;  %v7352_v7 = vmul.f32 %v7074_v58, %v7282_v31 }
  0x92   : > { %16310 = vst [vmem:[#allocation36_spill] sm:$0xff] %v7330_v61  ;;  %16311 = vst [vmem:[#allocation56_spill] sm:$0xff] %v7333_v11  ;;  %v7357_v24 = vrot.slane %v16319_v54, %v16318_v43  ;;  %v7362_v27 = vrot.slane %v16319_v54, %v16321_v32  ;;  %v7367_v28 = vmul.f32 %v7074_v58, %v7243_v49  ;;  %v16333_v32 = vld [vmem:[#allocation41_spill] sm:$0xff]  ;;  %v16334_v54 = vld [vmem:[#allocation19_spill] sm:$0xff] }
  0x93   : > { %16312 = vst [vmem:[#allocation57_spill] sm:$0xff] %v7336_v62  ;;  %16313 = vst [vmem:[#allocation58_spill] sm:$0xff] %v7339_v17  ;;  %v7371_v47 = vmul.f32 %v7074_v58, %v7325_v5  ;;  %v7375_v6 = vmul.f32 %v7074_v58, %v7288_v45  ;;  %v7379_v8 = vmul.f32 %v7074_v58, %v7253_v40 }
  0x94   : > { %16314 = vst [vmem:[#allocation59_spill] sm:$0xff] %v7342_v4  ;;  %16315 = vst [vmem:[#allocation60_spill] sm:$0xff] %v7345_v46  ;;  %v7383_v0 = vmul.f32 %v7074_v58, %v7330_v61  ;;  %v7387_v37 = vmul.f32 %v7074_v58, %v7294_v12  ;;  %v7391_v57 = vmul.f32 %v7074_v58, %v7258_v21 }
  0x95   : > { %16316 = vst [vmem:[#allocation61_spill] sm:$0xff] %v7348_v35  ;;  %16320 = vst [vmem:[#allocation62_spill] sm:$0xff] %v7357_v24  ;;  %v7395_v51 = vmul.f32 %v7074_v58, %v7333_v11  ;;  %v7399_v1 = vmul.f32 %v7074_v58, %v7298_v14  ;;  %v7403_v50 = vmul.f32 %v7074_v58, %v7261_v26 }
  0x96   : > { %16322 = vst [vmem:[#allocation63_spill] sm:$0xff] %v7362_v27  ;;  %16323 = vst [vmem:[#allocation64_spill] sm:$0xff] %v7375_v6  ;;  %v1036_v25 = vmul.f32 %v7357_v24, %v16331_v59  ;;  %v1037_v43 = vmul.f32 %v7357_v24, %v16332_v48  ;;  %v1038_v33 = vmul.f32 %v7357_v24, %v16333_v32  ;;  %v16335_v27 = vld [vmem:[#allocation51_spill] sm:$0xff]  ;;  %v16340_v6 = vld [vmem:[#allocation21_spill] sm:$0xff] }
  0x97   : > { %16324 = vst [vmem:[#allocation65_spill] sm:$0xff] %v7379_v8  ;;  %16325 = vst [vmem:[#allocation66_spill] sm:$0xff] %v7383_v0  ;;  %v1039_v55 = vmul.f32 %v7357_v24, %v16334_v54  ;;  %v16338_v0 = vld [vmem:[#allocation52_spill] sm:$0xff]  ;;  %v16339_v8 = vld [vmem:[#allocation43_spill] sm:$0xff]  ;;  %v1045_v32 = vmul.f32 %v7357_v24, %v16340_v6  ;;  %v7427_v54 = vmul.f32 %v7074_v58, %v7336_v62 }
  0x98   : > { %16326 = vst [vmem:[#allocation67_spill] sm:$0xff] %v7387_v37  ;;  %16327 = vst [vmem:[#allocation68_spill] sm:$0xff] %v7391_v57  ;;  %v16337_v37 = vld [vmem:[#allocation20_spill] sm:$0xff]  ;;  %v1043_v59 = vmul.f32 %v7357_v24, %v16338_v0  ;;  %v1044_v48 = vmul.f32 %v7357_v24, %v16339_v8  ;;  %v1046_v0 = vmul.f32 %v7357_v24, %v7089_v34 }
  0x99   : > { %16328 = vst [vmem:[#allocation69_spill] sm:$0xff] %v7395_v51  ;;  %16329 = vst [vmem:[#allocation70_spill] sm:$0xff] %v7399_v1  ;;  %v1040_v51 = vmul.f32 %v7357_v24, %v16335_v27  ;;  %v16336_v1 = vld [vmem:[#allocation42_spill] sm:$0xff]  ;;  %v7431_v27 = vmul.f32 %v7074_v58, %v7302_v44  ;;  %v7441_v8 = vmul.f32 %v7074_v58, %v7339_v17 }
  0x9a   : > { %16330 = vst [vmem:[#allocation71_spill] sm:$0xff] %v7403_v50  ;;  %v1041_v57 = vmul.f32 %v7357_v24, %v16336_v1  ;;  %v1042_v50 = vmul.f32 %v7357_v24, %v16337_v37  ;;  %16341 = vst [vmem:[#allocation72_spill] sm:$0xff] %v7427_v54  ;;  %v7435_v37 = vmul.f32 %v7074_v58, %v7264_v18 }
  0x9b   : > { %16342 = vst [vmem:[#allocation73_spill] sm:$0xff] %v7431_v27  ;;  %v7445_v6 = vmul.f32 %v7074_v58, %v7306_v2  ;;  %v7448_v1 = vadd.f32 %v1036_v25, %v7170_v3  ;;  %v7451_v27 = vadd.f32 %v1037_v43, %v7172_v30  ;;  %v7454_v54 = vadd.f32 %v1038_v33, %v7174_v38 }
  0x9c   : > { %16343 = vst [vmem:[#allocation74_spill] sm:$0xff] %v7435_v37  ;;  %v7457_v37 = vadd.f32 %v1039_v55, %v7176_v36  ;;  %v7460_v34 = vadd.f32 %v1040_v51, %v7178_v20  ;;  %v7463_v24 = vadd.f32 %v1041_v57, %v7180_v22  ;;  %v7469_v3 = vadd.f32 %v1043_v59, %v7184_v10 }
  0x9d   : > { %16344 = vst [vmem:[#allocation75_spill] sm:$0xff] %v7445_v6  ;;  %16345 = vst [vmem:[#allocation76_spill] sm:$0xff] %v7448_v1  ;;  %v7466_v6 = vadd.f32 %v1042_v50, %v7182_v13  ;;  %v7472_v30 = vadd.f32 %v1044_v48, %v7186_v16  ;;  %v7475_v38 = vadd.f32 %v1045_v32, %v7188_v52  ;;  %v16369_v1 = vld [vmem:[#allocation46_spill] sm:$0xff] }
  0x9e   : > { %16346 = vst [vmem:[#allocation77_spill] sm:$0xff] %v7451_v27  ;;  %16347 = vst [vmem:[#allocation78_spill] sm:$0xff] %v7454_v54  ;;  %v7478_v36 = vadd.f32 %v1046_v0, %v7190_v60  ;;  %v7481_v20 = vadd.f32 %v1041_v57, %v7192_v53  ;;  %v7484_v22 = vadd.f32 %v1042_v50, %v7194_v23  ;;  %v16363_v0 = vld [vmem:[#allocation55_spill] sm:$0xff] }
  0x9f   : > { %16348 = vst [vmem:[#allocation79_spill] sm:$0xff] %v7457_v37  ;;  %16349 = vst [vmem:[#allocation80_spill] sm:$0xff] %v7460_v34  ;;  %v7487_v13 = vadd.f32 %v1043_v59, %v7196_v29  ;;  %v7491_v10 = vmul.f32 %v7074_v58, %v7267_v9  ;;  %v7494_v16 = vadd.f32 %v1038_v33, %v7198_v56  ;;  %v16365_v33 = vld [vmem:[#allocation34_spill] sm:$0xff]  ;;  %v16366_v57 = vld [vmem:[#allocation11_spill] sm:$0xff] }
  0xa0   : > { %16350 = vst [vmem:[#allocation81_spill] sm:$0xff] %v7463_v24  ;;  %16351 = vst [vmem:[#allocation82_spill] sm:$0xff] %v7466_v6  ;;  %v7497_v52 = vadd.f32 %v1039_v55, %v7200_v63  ;;  %v7500_v60 = vadd.f32 %v1040_v51, %v7202_v19  ;;  %v7504_v53 = vmul.f32 %v7074_v58, %v7342_v4  ;;  %v16367_v59 = vld [vmem:[#allocation54_spill] sm:$0xff]  ;;  %v16368_v54 = vld [vmem:[#allocation15_spill] sm:$0xff] }
  0xa1   : > { %16352 = vst [vmem:[#allocation83_spill] sm:$0xff] %v7469_v3  ;;  %16353 = vst [vmem:[#allocation84_spill] sm:$0xff] %v7472_v30  ;;  %v7508_v23 = vmul.f32 %v7074_v58, %v7310_v39  ;;  %v7511_v29 = vadd.f32 %v1036_v25, %v7207_v15  ;;  %v7514_v56 = vadd.f32 %v1037_v43, %v16363_v0 }
  0xa2   : > { %16354 = vst [vmem:[#allocation85_spill] sm:$0xff] %v7475_v38  ;;  %16355 = vst [vmem:[#allocation86_spill] sm:$0xff] %v7478_v36  ;;  %v7518_v63 = vmul.f32 %v7074_v58, %v16365_v33  ;;  %v7522_v19 = vmul.f32 %v7074_v58, %v7345_v46  ;;  %v7526_v55 = vmul.f32 %v7074_v58, %v7314_v41 }
  0xa3   : > { %16356 = vst [vmem:[#allocation87_spill] sm:$0xff] %v7481_v20  ;;  %16357 = vst [vmem:[#allocation88_spill] sm:$0xff] %v7484_v22  ;;  %v7530_v51 = vmul.f32 %v7074_v58, %v16366_v57  ;;  %v7534_v15 = vmul.f32 %v7074_v58, %v7348_v35  ;;  %v7538_v50 = vmul.f32 %v7074_v58, %v7320_v42 }
  0xa4   : > { %16358 = vst [vmem:[#allocation89_spill] sm:$0xff] %v7487_v13  ;;  %16359 = vst [vmem:[#allocation90_spill] sm:$0xff] %v7494_v16  ;;  %v896_v25 = vmul.f32 %v16367_v59, %v7294_v12  ;;  %v897_v48 = vmul.f32 %v16367_v59, %v7258_v21  ;;  %v898_v43 = vmul.f32 %v16367_v59, %v7333_v11 }
  0xa5   : > { %16360 = vst [vmem:[#allocation91_spill] sm:$0xff] %v7497_v52  ;;  %16361 = vst [vmem:[#allocation92_spill] sm:$0xff] %v7500_v60  ;;  %v899_v32 = vmul.f32 %v16367_v59, %v7298_v14  ;;  %v900_v0 = vmul.f32 %v16367_v59, %v7261_v26  ;;  %v902_v58 = vmul.f32 %v16367_v59, %v7288_v45 }
  0xa6   : > { %16362 = vst [vmem:[#allocation93_spill] sm:$0xff] %v7511_v29  ;;  %16364 = vst [vmem:[#allocation55_spill] sm:$0xff] %v7514_v56  ;;  %v901_v56 = vmul.f32 %v16367_v59, %v7336_v62  ;;  %v903_v29 = vmul.f32 %v16367_v59, %v7253_v40  ;;  %v904_v60 = vmul.f32 %v16367_v59, %v7330_v61 }
  0xa7   : > { %v905_v52 = vmul.f32 %v16367_v59, %v7282_v31  ;;  %v906_v14 = vmul.f32 %v16367_v59, %v7243_v49  ;;  %v907_v26 = vmul.f32 %v16367_v59, %v7325_v5  ;;  %v908_v62 = vmul.f32 %v16367_v59, %v7302_v44  ;;  %v16381_v44 = vld [vmem:[#allocation66_spill] sm:$0xff]  ;;  %v16382_v5 = vld [vmem:[#allocation67_spill] sm:$0xff]  ;;  %v16384_v49 = vld [vmem:[#allocation69_spill] sm:$0xff] }
  0xa8   : > { %v909_v16 = vmul.f32 %v16367_v59, %v7264_v18  ;;  %v910_v13 = vmul.f32 %v16367_v59, %v7339_v17  ;;  %v911_v22 = vmul.f32 %v16367_v59, %v7306_v2  ;;  %v912_v20 = vmul.f32 %v16367_v59, %v7267_v9  ;;  %v16372_v9 = vld [vmem:[#allocation47_spill] sm:$0xff]  ;;  %v16373_v2 = vld [vmem:[#allocation38_spill] sm:$0xff]  ;;  %v16377_v17 = vld [vmem:[#allocation64_spill] sm:$0xff] }
  0xa9   : > { %v913_v36 = vmul.f32 %v16367_v59, %v7342_v4  ;;  %v914_v38 = vmul.f32 %v16367_v59, %v7310_v39  ;;  %v915_v30 = vmul.f32 %v16367_v59, %v16365_v33  ;;  %v916_v3 = vmul.f32 %v16367_v59, %v7345_v46  ;;  %v16370_v39 = vld [vmem:[#allocation37_spill] sm:$0xff]  ;;  %v16371_v4 = vld [vmem:[#allocation16_spill] sm:$0xff]  ;;  %v16385_v31 = vld [vmem:[#allocation70_spill] sm:$0xff] }
  0xaa   : > { %v917_v6 = vmul.f32 %v16367_v59, %v7314_v41  ;;  %v918_v24 = vmul.f32 %v16367_v59, %v16366_v57  ;;  %v919_v34 = vmul.f32 %v16367_v59, %v7348_v35  ;;  %v920_v37 = vmul.f32 %v16367_v59, %v7320_v42  ;;  %v16379_v18 = vld [vmem:[#allocation65_spill] sm:$0xff] }
  0xab   : > { %v921_v27 = vmul.f32 %v16367_v59, %v16368_v54  ;;  %v922_v33 = vmul.f32 %v16367_v59, %v16369_v1  ;;  %v923_v46 = vmul.f32 %v16367_v59, %v16370_v39  ;;  %v924_v41 = vmul.f32 %v16367_v59, %v16371_v4 }
  0xac   : > { %v925_v57 = vmul.f32 %v16367_v59, %v16372_v9  ;;  %v926_v35 = vmul.f32 %v16367_v59, %v16373_v2  ;;  %v7603_v42 = vadd.f32 %v896_v25, %v7352_v7  ;;  %v7606_v54 = vadd.f32 %v897_v48, %v7367_v28  ;;  %v16383_v2 = vld [vmem:[#allocation68_spill] sm:$0xff] }
  0xad   : > { %v7609_v1 = vadd.f32 %v898_v43, %v7371_v47  ;;  %v7612_v39 = vadd.f32 %v899_v32, %v16377_v17  ;;  %v7615_v4 = vadd.f32 %v900_v0, %v16379_v18  ;;  %v7618_v9 = vadd.f32 %v901_v56, %v16381_v44  ;;  %v16387_v32 = vld [vmem:[#allocation71_spill] sm:$0xff]  ;;  %v16389_v0 = vld [vmem:[#allocation72_spill] sm:$0xff] }
  0xae   : > { %16374 = vst [vmem:[#allocation54_spill] sm:$0xff] %v7603_v42  ;;  %16375 = vst [vmem:[#allocation94_spill] sm:$0xff] %v7606_v54  ;;  %v7621_v59 = vadd.f32 %v896_v25, %v16382_v5  ;;  %v7624_v42 = vadd.f32 %v897_v48, %v16383_v2  ;;  %v7627_v54 = vadd.f32 %v898_v43, %v16384_v49 }
  0xaf   : > { %16376 = vst [vmem:[#allocation95_spill] sm:$0xff] %v7609_v1  ;;  %16378 = vst [vmem:[#allocation64_spill] sm:$0xff] %v7612_v39  ;;  %v7630_v1 = vadd.f32 %v902_v58, %v16385_v31  ;;  %v7633_v39 = vadd.f32 %v903_v29, %v16387_v32  ;;  %v7639_v56 = vadd.f32 %v905_v52, %v16382_v5  ;;  %v16430_v58 = vld [vmem:[#allocation59_spill] sm:$0xff] }
  0xb0   : > { %16380 = vst [vmem:[#allocation65_spill] sm:$0xff] %v7615_v4  ;;  %v7636_v4 = vadd.f32 %v904_v60, %v16389_v0  ;;  %v7642_v25 = vadd.f32 %v906_v14, %v16383_v2  ;;  %v7645_v48 = vadd.f32 %v907_v26, %v16384_v49  ;;  %v7648_v43 = vadd.f32 %v908_v62, %v16377_v17  ;;  %v16400_v49 = vld [vmem:[#allocation73_spill] sm:$0xff]  ;;  %v16402_v2 = vld [vmem:[#allocation74_spill] sm:$0xff] }
  0xb1   : > { %16386 = vst [vmem:[#allocation66_spill] sm:$0xff] %v7630_v1  ;;  %16388 = vst [vmem:[#allocation67_spill] sm:$0xff] %v7633_v39  ;;  %v7651_v31 = vadd.f32 %v909_v16, %v16379_v18  ;;  %v7654_v29 = vadd.f32 %v910_v13, %v16381_v44  ;;  %v7657_v60 = vadd.f32 %v911_v22, %v7352_v7  ;;  %v16405_v44 = vld [vmem:[#allocation75_spill] sm:$0xff]  ;;  %v16418_v13 = vld [vmem:[#allocation9_spill] sm:$0xff] }
  0xb2   : > { %16390 = vst [vmem:[#allocation68_spill] sm:$0xff] %v7636_v4  ;;  %16391 = vst [vmem:[#allocation69_spill] sm:$0xff] %v7639_v56  ;;  %v7660_v5 = vadd.f32 %v912_v20, %v7367_v28  ;;  %v7663_v14 = vadd.f32 %v913_v36, %v7371_v47  ;;  %v7666_v26 = vadd.f32 %v914_v38, %v16400_v49  ;;  %v16417_v20 = vld [vmem:[#allocation12_spill] sm:$0xff]  ;;  %v16419_v16 = vld [vmem:[#allocation35_spill] sm:$0xff] }
  0xb3   : > { %16392 = vst [vmem:[#allocation70_spill] sm:$0xff] %v7642_v25  ;;  %16393 = vst [vmem:[#allocation71_spill] sm:$0xff] %v7645_v48  ;;  %v7669_v62 = vadd.f32 %v915_v30, %v16402_v2  ;;  %v7672_v18 = vadd.f32 %v916_v3, %v7441_v8  ;;  %v7675_v17 = vadd.f32 %v917_v6, %v16405_v44  ;;  %v16432_v0 = vld [vmem:[#allocation30_spill] sm:$0xff] }
  0xb4   : > { %16394 = vst [vmem:[#allocation72_spill] sm:$0xff] %v7648_v43  ;;  %16395 = vst [vmem:[#allocation96_spill] sm:$0xff] %v7651_v31  ;;  %v7678_v7 = vadd.f32 %v918_v24, %v7491_v10  ;;  %v7681_v28 = vadd.f32 %v919_v34, %v7504_v53  ;;  %v7684_v47 = vadd.f32 %v920_v37, %v7508_v23  ;;  %v16416_v37 = vld [vmem:[#allocation62_spill] sm:$0xff]  ;;  %v16468_v43 = vld [vmem:[#allocation52_spill] sm:$0xff] }
  0xb5   : > { %16396 = vst [vmem:[#allocation97_spill] sm:$0xff] %v7654_v29  ;;  %16397 = vst [vmem:[#allocation98_spill] sm:$0xff] %v7657_v60  ;;  %v7687_v38 = vadd.f32 %v921_v27, %v7518_v63  ;;  %v7690_v30 = vadd.f32 %v922_v33, %v7522_v19  ;;  %v7693_v8 = vadd.f32 %v923_v46, %v7526_v55  ;;  %v16420_v53 = vld [vmem:[#allocation26_spill] sm:$0xff]  ;;  %v16422_v33 = vld [vmem:[#allocation28_spill] sm:$0xff] }
  0xb6   : > { %16398 = vst [vmem:[#allocation99_spill] sm:$0xff] %v7660_v5  ;;  %16399 = vst [vmem:[#allocation100_spill] sm:$0xff] %v7663_v14  ;;  %v7696_v6 = vadd.f32 %v924_v41, %v7530_v51  ;;  %v7699_v24 = vadd.f32 %v925_v57, %v7534_v15  ;;  %v7702_v34 = vadd.f32 %v926_v35, %v7538_v50  ;;  %v16424_v19 = vld [vmem:[#allocation58_spill] sm:$0xff]  ;;  %v16426_v57 = vld [vmem:[#allocation29_spill] sm:$0xff] }
  0xb7   : > { %16401 = vst [vmem:[#allocation73_spill] sm:$0xff] %v7666_v26  ;;  %16403 = vst [vmem:[#allocation74_spill] sm:$0xff] %v7669_v62  ;;  %v7706_v3 = vmul.f32 %v16416_v37, %v7294_v12  ;;  %v7710_v27 = vmul.f32 %v16416_v37, %v7258_v21  ;;  %v7714_v46 = vmul.f32 %v16416_v37, %v7333_v11  ;;  %v16428_v15 = vld [vmem:[#allocation33_spill] sm:$0xff]  ;;  %v16434_v2 = vld [vmem:[#allocation34_spill] sm:$0xff] }
  0xb8   : > { %16404 = vst [vmem:[#allocation101_spill] sm:$0xff] %v7672_v18  ;;  %16406 = vst [vmem:[#allocation75_spill] sm:$0xff] %v7675_v17  ;;  %v7718_v41 = vmul.f32 %v16416_v37, %v7288_v45  ;;  %v7722_v35 = vmul.f32 %v16416_v37, %v7253_v40  ;;  %v7726_v36 = vmul.f32 %v16416_v37, %v7330_v61  ;;  %v16442_v11 = vld [vmem:[#allocation61_spill] sm:$0xff]  ;;  %v16444_v21 = vld [vmem:[#allocation32_spill] sm:$0xff] }
  0xb9   : > { %16407 = vst [vmem:[#allocation102_spill] sm:$0xff] %v7678_v7  ;;  %16408 = vst [vmem:[#allocation103_spill] sm:$0xff] %v7681_v28  ;;  %v7730_v22 = vmul.f32 %v16416_v37, %v16417_v20  ;;  %v7734_v10 = vmul.f32 %v16416_v37, %v16418_v13  ;;  %v7738_v52 = vmul.f32 %v16416_v37, %v16419_v16  ;;  %v16446_v12 = vld [vmem:[#allocation15_spill] sm:$0xff]  ;;  %v16448_v61 = vld [vmem:[#allocation46_spill] sm:$0xff] }
  0xba   : > { %16409 = vst [vmem:[#allocation104_spill] sm:$0xff] %v7684_v47  ;;  %16410 = vst [vmem:[#allocation105_spill] sm:$0xff] %v7687_v38  ;;  %v7742_v23 = vmul.f32 %v16416_v37, %v16420_v53  ;;  %v7746_v63 = vmul.f32 %v16416_v37, %v16422_v33  ;;  %v7750_v55 = vmul.f32 %v16416_v37, %v16424_v19  ;;  %v16436_v19 = vld [vmem:[#allocation60_spill] sm:$0xff]  ;;  %v16438_v33 = vld [vmem:[#allocation31_spill] sm:$0xff] }
  0xbb   : > { %16411 = vst [vmem:[#allocation106_spill] sm:$0xff] %v7690_v30  ;;  %16412 = vst [vmem:[#allocation107_spill] sm:$0xff] %v7693_v8  ;;  %v7754_v51 = vmul.f32 %v16416_v37, %v16426_v57  ;;  %v7758_v50 = vmul.f32 %v16416_v37, %v16428_v15  ;;  %v7762_v32 = vmul.f32 %v16416_v37, %v16430_v58  ;;  %v16440_v53 = vld [vmem:[#allocation11_spill] sm:$0xff]  ;;  %v16450_v40 = vld [vmem:[#allocation40_spill] sm:$0xff] }
  0xbc   : > { %16413 = vst [vmem:[#allocation108_spill] sm:$0xff] %v7696_v6  ;;  %16414 = vst [vmem:[#allocation109_spill] sm:$0xff] %v7699_v24  ;;  %v7766_v49 = vmul.f32 %v16416_v37, %v16432_v0  ;;  %v7770_v44 = vmul.f32 %v16416_v37, %v16434_v2  ;;  %v7774_v57 = vmul.f32 %v16416_v37, %v16436_v19  ;;  %v16451_v45 = vld [vmem:[#allocation63_spill] sm:$0xff]  ;;  %v16452_v16 = vld [vmem:[#allocation37_spill] sm:$0xff] }
  0xbd   : > { %16415 = vst [vmem:[#allocation110_spill] sm:$0xff] %v7702_v34  ;;  %16421 = vst [vmem:[#allocation62_spill] sm:$0xff] %v7742_v23  ;;  %v7778_v15 = vmul.f32 %v16416_v37, %v16438_v33  ;;  %v7782_v58 = vmul.f32 %v16416_v37, %v16440_v53  ;;  %v7786_v0 = vmul.f32 %v16416_v37, %v16442_v11  ;;  %v16453_v20 = vld [vmem:[#allocation16_spill] sm:$0xff]  ;;  %v16454_v24 = vld [vmem:[#allocation47_spill] sm:$0xff] }
  0xbe   : > { %16423 = vst [vmem:[#allocation111_spill] sm:$0xff] %v7746_v63  ;;  %16425 = vst [vmem:[#allocation112_spill] sm:$0xff] %v7750_v55  ;;  %v7790_v2 = vmul.f32 %v16416_v37, %v16444_v21  ;;  %v7794_v19 = vmul.f32 %v16416_v37, %v16446_v12  ;;  %v7798_v33 = vmul.f32 %v16416_v37, %v16448_v61  ;;  %v16455_v8 = vld [vmem:[#allocation38_spill] sm:$0xff]  ;;  %v16456_v38 = vld [vmem:[#allocation44_spill] sm:$0xff] }
  0xbf   : > { %16427 = vst [vmem:[#allocation113_spill] sm:$0xff] %v7754_v51  ;;  %16429 = vst [vmem:[#allocation114_spill] sm:$0xff] %v7758_v50  ;;  %v7802_v53 = vmul.f32 %v16416_v37, %v16450_v40  ;;  %v7806_v11 = vmul.f32 %v16451_v45, %v16446_v12  ;;  %v1131_v21 = vmul.f32 %v16451_v45, %v16448_v61  ;;  %v16457_v12 = vld [vmem:[#allocation48_spill] sm:$0xff]  ;;  %v16458_v61 = vld [vmem:[#allocation39_spill] sm:$0xff] }
  0xc0   : > { %16431 = vst [vmem:[#allocation115_spill] sm:$0xff] %v7762_v32  ;;  %16433 = vst [vmem:[#allocation116_spill] sm:$0xff] %v7766_v49  ;;  %v1132_v13 = vmul.f32 %v16451_v45, %v16452_v16  ;;  %v1133_v34 = vmul.f32 %v16451_v45, %v16453_v20  ;;  %v1134_v6 = vmul.f32 %v16451_v45, %v16454_v24  ;;  %v16459_v17 = vld [vmem:[#allocation17_spill] sm:$0xff]  ;;  %v16467_v49 = vld [vmem:[#allocation20_spill] sm:$0xff] }
  0xc1   : > { %16435 = vst [vmem:[#allocation117_spill] sm:$0xff] %v7770_v44  ;;  %16437 = vst [vmem:[#allocation118_spill] sm:$0xff] %v7774_v57  ;;  %v1135_v30 = vmul.f32 %v16451_v45, %v16455_v8  ;;  %v1136_v47 = vmul.f32 %v16451_v45, %v16456_v38  ;;  %v1137_v28 = vmul.f32 %v16451_v45, %v16457_v12  ;;  %v16460_v18 = vld [vmem:[#allocation49_spill] sm:$0xff]  ;;  %v16465_v57 = vld [vmem:[#allocation51_spill] sm:$0xff]  ;;  %v1239_v32 = vrot.slane %v1131_v21, 2 }
  0xc2   : > { %16439 = vst [vmem:[#allocation119_spill] sm:$0xff] %v7778_v15  ;;  %16441 = vst [vmem:[#allocation120_spill] sm:$0xff] %v7782_v58  ;;  %v1138_v7 = vmul.f32 %v16451_v45, %v16458_v61  ;;  %v1141_v62 = vmul.f32 %v16451_v45, %v16450_v40  ;;  %v16463_v58 = vld [vmem:[#allocation41_spill] sm:$0xff]  ;;  %v16464_v15 = vld [vmem:[#allocation19_spill] sm:$0xff]  ;;  %v1146_v29 = vmul.f32 %v16451_v45, %v16465_v57  ;;  %v1241_v48 = vrot.slane %v1132_v13, 2 }
  0xc3   : > { %16443 = vst [vmem:[#allocation121_spill] sm:$0xff] %v7786_v0  ;;  %16445 = vst [vmem:[#allocation122_spill] sm:$0xff] %v7790_v2  ;;  %v16461_v2 = vld [vmem:[#allocation18_spill] sm:$0xff]  ;;  %v1144_v5 = vmul.f32 %v16451_v45, %v16463_v58  ;;  %v1145_v60 = vmul.f32 %v16451_v45, %v16464_v15  ;;  %v1148_v40 = vmul.f32 %v16451_v45, %v16467_v49  ;;  %v1242_v58 = vrot.slane %v1133_v34, 2 }
  0xc4   : > { %16447 = vst [vmem:[#allocation123_spill] sm:$0xff] %v7794_v19  ;;  %16449 = vst [vmem:[#allocation124_spill] sm:$0xff] %v7798_v33  ;;  %v1139_v33 = vmul.f32 %v16451_v45, %v16459_v17  ;;  %v1140_v19 = vmul.f32 %v16451_v45, %v16460_v18  ;;  %v1142_v26 = vmul.f32 %v16451_v45, %v16461_v2  ;;  %v16462_v0 = vld [vmem:[#allocation50_spill] sm:$0xff]  ;;  %v1244_v50 = vrot.slane %v1134_v6, 2 }
  0xc5   : > { %v1143_v14 = vmul.f32 %v16451_v45, %v16462_v0  ;;  %v16466_v44 = vld [vmem:[#allocation42_spill] sm:$0xff]  ;;  %v1149_v2 = vmul.f32 %v16451_v45, %v16468_v43  ;;  %v15832_v0 = vrot.slane %v7806_v11, 2  ;;  %v1246_v25 = vrot.slane %v1135_v30, 2 }
  0xc6   : > { %v1147_v31 = vmul.f32 %v16451_v45, %v16466_v44  ;;  %v1247_v15 = vrot.slane %v1136_v47, 2  ;;  %v1249_v51 = vrot.slane %v1137_v28, 2  ;;  %v1251_v56 = vrot.slane %v1138_v7, 2  ;;  %v16469_v7 = vld [vmem:[#allocation23_spill] sm:$0xff] }
  0xc7   : > { %v1252_v57 = vrot.slane %v1139_v33, 2  ;;  %v1254_v55 = vrot.slane %v1140_v19, 2  ;;  %v1256_v4 = vrot.slane %v1141_v62, 2  ;;  %v1257_v44 = vrot.slane %v1142_v26, 2  ;;  %v16470_v33 = vld [vmem:[#allocation76_spill] sm:$0xff]  ;;  %v16471_v19 = vld [vmem:[#allocation77_spill] sm:$0xff] }
  0xc8   : > { %v1259_v63 = vrot.slane %v1143_v14, 2  ;;  %v1261_v39 = vrot.slane %v1144_v5, 2  ;;  %v1262_v49 = vrot.slane %v1145_v60, 2  ;;  %v1264_v23 = vrot.slane %v1146_v29, 2 }
  0xc9   : > { %v1266_v1 = vrot.slane %v1147_v31, 2  ;;  %v1267_v43 = vrot.slane %v1148_v40, 2  ;;  %v1269_v45 = vrot.slane %v1149_v2, 2  ;;  %v7849_v21 = vmul.f32 %v16416_v37, %v16452_v16  ;;  %v16476_v2 = vld [vmem:[#allocation80_spill] sm:$0xff]  ;;  %v16527_v16 = vld [vmem:[#allocation117_spill] sm:$0xff] }
  0xca   : > { %v7853_v47 = vmul.f32 %v16416_v37, %v16453_v20  ;;  %v1098_v28 = vadd.f32 %v7802_v53, %v16469_v7  ;;  %v1240_v5 = vsel %vm1195_vm3, %v15832_v0, %v1239_v32  ;;  %v1243_v29 = vsel %vm1195_vm3, %v1241_v48, %v1242_v58  ;;  %v16482_v7 = vld [vmem:[#allocation83_spill] sm:$0xff]  ;;  %v16525_v20 = vld [vmem:[#allocation116_spill] sm:$0xff] }
  0xcb   : > { %v1245_v40 = vsel %vm1195_vm3, %v1242_v58, %v1244_v50  ;;  %v1248_v31 = vsel %vm1195_vm3, %v1246_v25, %v1247_v15  ;;  %v1250_v60 = vsel %vm1195_vm3, %v1247_v15, %v1249_v51  ;;  %v1253_v14 = vsel %vm1195_vm3, %v1251_v56, %v1252_v57  ;;  %v16472_v56 = vld [vmem:[#allocation78_spill] sm:$0xff] }
  0xcc   : > { %v1255_v26 = vsel %vm1195_vm3, %v1252_v57, %v1254_v55  ;;  %v1258_v62 = vsel %vm1195_vm3, %v1256_v4, %v1257_v44  ;;  %v1260_v30 = vsel %vm1195_vm3, %v1257_v44, %v1259_v63  ;;  %v1263_v6 = vsel %vm1195_vm3, %v1261_v39, %v1262_v49  ;;  %v16474_v4 = vld [vmem:[#allocation79_spill] sm:$0xff] }
  0xcd   : > { %v1265_v34 = vsel %vm1195_vm3, %v1262_v49, %v1264_v23  ;;  %v1268_v48 = vsel %vm1195_vm3, %v1266_v1, %v1267_v43  ;;  %v1270_v13 = vsel %vm1195_vm3, %v1267_v43, %v1269_v45  ;;  %v7873_v25 = vadd.f32 %v1240_v5, %v16470_v33  ;;  %v16478_v49 = vld [vmem:[#allocation81_spill] sm:$0xff]  ;;  %v16480_v1 = vld [vmem:[#allocation82_spill] sm:$0xff] }
  0xce   : > { %v7876_v15 = vadd.f32 %v1239_v32, %v16471_v19  ;;  %v7879_v57 = vadd.f32 %v1243_v29, %v16472_v56  ;;  %v7882_v58 = vadd.f32 %v1245_v40, %v16474_v4  ;;  %v7885_v39 = vadd.f32 %v1244_v50, %v16476_v2  ;;  %v16484_v32 = vld [vmem:[#allocation84_spill] sm:$0xff]  ;;  %v16486_v29 = vld [vmem:[#allocation85_spill] sm:$0xff]  ;;  %v16488_v40 = vld [vmem:[#allocation86_spill] sm:$0xff] }
  0xcf   : > { %v7888_v44 = vadd.f32 %v1248_v31, %v16478_v49  ;;  %v7891_v43 = vadd.f32 %v1250_v60, %v16480_v1  ;;  %v7894_v5 = vadd.f32 %v1249_v51, %v16482_v7  ;;  %v7897_v33 = vadd.f32 %v1253_v14, %v16484_v32  ;;  %v16490_v50 = vld [vmem:[#allocation87_spill] sm:$0xff]  ;;  %v16492_v31 = vld [vmem:[#allocation88_spill] sm:$0xff]  ;;  %v16494_v60 = vld [vmem:[#allocation89_spill] sm:$0xff] }
  0xd0   : > { %16473 = vst [vmem:[#allocation23_spill] sm:$0xff] %v7879_v57  ;;  %16475 = vst [vmem:[#allocation76_spill] sm:$0xff] %v7882_v58  ;;  %v7900_v19 = vadd.f32 %v1255_v26, %v16486_v29  ;;  %v7903_v56 = vadd.f32 %v1254_v55, %v16488_v40  ;;  %v7906_v4 = vadd.f32 %v1258_v62, %v16490_v50  ;;  %v16496_v51 = vld [vmem:[#allocation90_spill] sm:$0xff]  ;;  %v16498_v14 = vld [vmem:[#allocation91_spill] sm:$0xff] }
  0xd1   : > { %16477 = vst [vmem:[#allocation77_spill] sm:$0xff] %v7885_v39  ;;  %16479 = vst [vmem:[#allocation78_spill] sm:$0xff] %v7888_v44  ;;  %v7909_v2 = vadd.f32 %v1260_v30, %v16492_v31  ;;  %v7912_v49 = vadd.f32 %v1259_v63, %v16494_v60  ;;  %v7915_v1 = vadd.f32 %v1263_v6, %v16496_v51  ;;  %v16500_v26 = vld [vmem:[#allocation92_spill] sm:$0xff]  ;;  %v16503_v29 = vld [vmem:[#allocation93_spill] sm:$0xff] }
  0xd2   : > { %16481 = vst [vmem:[#allocation79_spill] sm:$0xff] %v7891_v43  ;;  %16483 = vst [vmem:[#allocation80_spill] sm:$0xff] %v7894_v5  ;;  %v7918_v7 = vadd.f32 %v1265_v34, %v16498_v14  ;;  %v7921_v32 = vadd.f32 %v1264_v23, %v16500_v26  ;;  %v7923_v55 = vadd.f32 %v1268_v48, %v1098_v28  ;;  %v16505_v40 = vld [vmem:[#allocation55_spill] sm:$0xff]  ;;  %v16508_v31 = vld [vmem:[#allocation94_spill] sm:$0xff] }
  0xd3   : > { %16485 = vst [vmem:[#allocation81_spill] sm:$0xff] %v7897_v33  ;;  %16487 = vst [vmem:[#allocation82_spill] sm:$0xff] %v7900_v19  ;;  %v7926_v62 = vadd.f32 %v1270_v13, %v16503_v29  ;;  %v7929_v30 = vadd.f32 %v1269_v45, %v16505_v40  ;;  %v1028_v63 = vmul.f32 %v16416_v37, %v16454_v24  ;;  %v16507_v13 = vld [vmem:[#allocation54_spill] sm:$0xff]  ;;  %v16509_v51 = vld [vmem:[#allocation95_spill] sm:$0xff] }
  0xd4   : > { %16489 = vst [vmem:[#allocation83_spill] sm:$0xff] %v7903_v56  ;;  %16491 = vst [vmem:[#allocation84_spill] sm:$0xff] %v7906_v4  ;;  %v1029_v6 = vmul.f32 %v16416_v37, %v16455_v8  ;;  %v1030_v34 = vmul.f32 %v16416_v37, %v16456_v38  ;;  %v1031_v23 = vmul.f32 %v16416_v37, %v16457_v12  ;;  %v16510_v26 = vld [vmem:[#allocation64_spill] sm:$0xff]  ;;  %v16511_v40 = vld [vmem:[#allocation65_spill] sm:$0xff] }
  0xd5   : > { %16493 = vst [vmem:[#allocation85_spill] sm:$0xff] %v7909_v2  ;;  %16495 = vst [vmem:[#allocation86_spill] sm:$0xff] %v7912_v49  ;;  %v1032_v28 = vmul.f32 %v16416_v37, %v16458_v61  ;;  %v1033_v48 = vmul.f32 %v16416_v37, %v16459_v17  ;;  %v1034_v45 = vmul.f32 %v16416_v37, %v16460_v18  ;;  %v16521_v8 = vld [vmem:[#allocation114_spill] sm:$0xff]  ;;  %v16523_v24 = vld [vmem:[#allocation115_spill] sm:$0xff] }
  0xd6   : > { %16497 = vst [vmem:[#allocation87_spill] sm:$0xff] %v7915_v1  ;;  %16499 = vst [vmem:[#allocation88_spill] sm:$0xff] %v7918_v7  ;;  %v7947_v50 = vadd.f32 %v7706_v3, %v16507_v13  ;;  %v7951_v60 = vadd.f32 %v7710_v27, %v16508_v31  ;;  %v7955_v14 = vadd.f32 %v7714_v46, %v16509_v51  ;;  %v16513_v13 = vld [vmem:[#allocation62_spill] sm:$0xff]  ;;  %v16514_v31 = vld [vmem:[#allocation67_spill] sm:$0xff] }
  0xd7   : > { %16501 = vst [vmem:[#allocation89_spill] sm:$0xff] %v7921_v32  ;;  %16502 = vst [vmem:[#allocation90_spill] sm:$0xff] %v7923_v55  ;;  %v7959_v29 = vadd.f32 %v7718_v41, %v16510_v26  ;;  %v7963_v0 = vadd.f32 %v7722_v35, %v16511_v40  ;;  %v7967_v37 = vadd.f32 %v7726_v36, %v7618_v9  ;;  %v16512_v41 = vld [vmem:[#allocation66_spill] sm:$0xff]  ;;  %v16515_v51 = vld [vmem:[#allocation111_spill] sm:$0xff] }
  0xd8   : > { %16504 = vst [vmem:[#allocation91_spill] sm:$0xff] %v7926_v62  ;;  %16506 = vst [vmem:[#allocation92_spill] sm:$0xff] %v7929_v30  ;;  %v7971_v3 = vadd.f32 %v7730_v22, %v7621_v59  ;;  %v7975_v27 = vadd.f32 %v7734_v10, %v7624_v42  ;;  %v7979_v46 = vadd.f32 %v7738_v52, %v7627_v54  ;;  %v16516_v36 = vld [vmem:[#allocation68_spill] sm:$0xff]  ;;  %v16518_v22 = vld [vmem:[#allocation69_spill] sm:$0xff] }
  0xd9   : > { %v7983_v35 = vadd.f32 %v16513_v13, %v16512_v41  ;;  %v7987_v9 = vadd.f32 %v16515_v51, %v16514_v31  ;;  %v16517_v26 = vld [vmem:[#allocation112_spill] sm:$0xff]  ;;  %v16519_v40 = vld [vmem:[#allocation113_spill] sm:$0xff]  ;;  %v16520_v10 = vld [vmem:[#allocation70_spill] sm:$0xff] }
  0xda   : > { %v7991_v59 = vadd.f32 %v16517_v26, %v16516_v36  ;;  %v7995_v42 = vadd.f32 %v16519_v40, %v16518_v22  ;;  %v7999_v54 = vadd.f32 %v16521_v8, %v16520_v10  ;;  %v16522_v52 = vld [vmem:[#allocation71_spill] sm:$0xff]  ;;  %v16524_v13 = vld [vmem:[#allocation72_spill] sm:$0xff]  ;;  %v16529_v26 = vld [vmem:[#allocation97_spill] sm:$0xff] }
  0xdb   : > { %v8003_v41 = vadd.f32 %v16523_v24, %v16522_v52  ;;  %v8007_v31 = vadd.f32 %v16525_v20, %v16524_v13  ;;  %v16526_v51 = vld [vmem:[#allocation96_spill] sm:$0xff]  ;;  %v16530_v30 = vld [vmem:[#allocation118_spill] sm:$0xff]  ;;  %v16533_v62 = vld [vmem:[#allocation119_spill] sm:$0xff] }
  0xdc   : > { %v8011_v36 = vadd.f32 %v16527_v16, %v16526_v51  ;;  %v8015_v22 = vadd.f32 %v16530_v30, %v16529_v26  ;;  %v16532_v40 = vld [vmem:[#allocation98_spill] sm:$0xff]  ;;  %v16535_v10 = vld [vmem:[#allocation99_spill] sm:$0xff]  ;;  %v16536_v55 = vld [vmem:[#allocation120_spill] sm:$0xff] }
  0xdd   : > { %v8019_v8 = vadd.f32 %v16533_v62, %v16532_v40  ;;  %v8023_v24 = vadd.f32 %v16536_v55, %v16535_v10  ;;  %v16538_v52 = vld [vmem:[#allocation100_spill] sm:$0xff]  ;;  %v16539_v32 = vld [vmem:[#allocation121_spill] sm:$0xff]  ;;  %v16542_v7 = vld [vmem:[#allocation122_spill] sm:$0xff] }
  0xde   : > { %16528 = vst [vmem:[#allocation93_spill] sm:$0xff] %v8011_v36  ;;  %16531 = vst [vmem:[#allocation55_spill] sm:$0xff] %v8015_v22  ;;  %v8027_v20 = vadd.f32 %v16539_v32, %v16538_v52  ;;  %v16541_v13 = vld [vmem:[#allocation73_spill] sm:$0xff]  ;;  %v16544_v51 = vld [vmem:[#allocation74_spill] sm:$0xff] }
  0xdf   : > { %16534 = vst [vmem:[#allocation54_spill] sm:$0xff] %v8019_v8  ;;  %16537 = vst [vmem:[#allocation94_spill] sm:$0xff] %v8023_v24  ;;  %v8031_v16 = vadd.f32 %v16542_v7, %v16541_v13  ;;  %v16545_v36 = vld [vmem:[#allocation123_spill] sm:$0xff]  ;;  %v16547_v26 = vld [vmem:[#allocation101_spill] sm:$0xff] }
  0xe0   : > { %16540 = vst [vmem:[#allocation95_spill] sm:$0xff] %v8027_v20  ;;  %v8035_v30 = vadd.f32 %v16545_v36, %v16544_v51  ;;  %v16548_v22 = vld [vmem:[#allocation124_spill] sm:$0xff]  ;;  %v16550_v40 = vld [vmem:[#allocation75_spill] sm:$0xff]  ;;  %v16552_v10 = vld [vmem:[#allocation102_spill] sm:$0xff] }
  0xe1   : > { %16543 = vst [vmem:[#allocation64_spill] sm:$0xff] %v8031_v16  ;;  %v8039_v62 = vadd.f32 %v16548_v22, %v16547_v26  ;;  %v8043_v55 = vadd.f32 %v7849_v21, %v16550_v40  ;;  %v8047_v32 = vadd.f32 %v7853_v47, %v16552_v10  ;;  %v16554_v52 = vld [vmem:[#allocation103_spill] sm:$0xff]  ;;  %v16556_v7 = vld [vmem:[#allocation104_spill] sm:$0xff]  ;;  %v16558_v36 = vld [vmem:[#allocation105_spill] sm:$0xff] }
  0xe2   : > { %16546 = vst [vmem:[#allocation65_spill] sm:$0xff] %v8035_v30  ;;  %v8050_v20 = vadd.f32 %v1028_v63, %v16554_v52  ;;  %v8053_v13 = vadd.f32 %v1029_v6, %v16556_v7  ;;  %v8056_v51 = vadd.f32 %v1030_v34, %v16558_v36  ;;  %v16560_v30 = vld [vmem:[#allocation106_spill] sm:$0xff]  ;;  %v16562_v26 = vld [vmem:[#allocation107_spill] sm:$0xff]  ;;  %v16564_v21 = vld [vmem:[#allocation108_spill] sm:$0xff] }
  0xe3   : > { %16549 = vst [vmem:[#allocation66_spill] sm:$0xff] %v8039_v62  ;;  %16551 = vst [vmem:[#allocation62_spill] sm:$0xff] %v8043_v55  ;;  %v8059_v22 = vadd.f32 %v1031_v23, %v16560_v30  ;;  %v8062_v62 = vadd.f32 %v1032_v28, %v16562_v26  ;;  %v8065_v40 = vadd.f32 %v1033_v48, %v16564_v21  ;;  %v16566_v47 = vld [vmem:[#allocation109_spill] sm:$0xff]  ;;  %v16568_v63 = vld [vmem:[#allocation110_spill] sm:$0xff] }
  0xe4   : > { %16553 = vst [vmem:[#allocation67_spill] sm:$0xff] %v8047_v32  ;;  %16555 = vst [vmem:[#allocation111_spill] sm:$0xff] %v8050_v20  ;;  %v8068_v10 = vadd.f32 %v1034_v45, %v16566_v47  ;;  %v8072_v52 = vadd.f32 %v7802_v53, %v16568_v63  ;;  %v16570_v6 = vld [vmem:[#allocation12_spill] sm:$0xff]  ;;  %v16571_v7 = vld [vmem:[#allocation63_spill] sm:$0xff] }
  0xe5   : > { %16557 = vst [vmem:[#allocation68_spill] sm:$0xff] %v8053_v13  ;;  %16559 = vst [vmem:[#allocation112_spill] sm:$0xff] %v8056_v51  ;;  %v1105_v34 = vmul.f32 %v16571_v7, %v16570_v6  ;;  %v16572_v36 = vld [vmem:[#allocation9_spill] sm:$0xff]  ;;  %v16573_v30 = vld [vmem:[#allocation35_spill] sm:$0xff] }
  0xe6   : > { %16561 = vst [vmem:[#allocation69_spill] sm:$0xff] %v8059_v22  ;;  %16563 = vst [vmem:[#allocation113_spill] sm:$0xff] %v8062_v62  ;;  %v1106_v23 = vmul.f32 %v16571_v7, %v16572_v36  ;;  %v1107_v28 = vmul.f32 %v16571_v7, %v16573_v30  ;;  %v16574_v26 = vld [vmem:[#allocation14_spill] sm:$0xff]  ;;  %v16576_v47 = vld [vmem:[#allocation36_spill] sm:$0xff] }
  0xe7   : > { %16565 = vst [vmem:[#allocation70_spill] sm:$0xff] %v8065_v40  ;;  %16567 = vst [vmem:[#allocation114_spill] sm:$0xff] %v8068_v10  ;;  %v1108_v48 = vmul.f32 %v16571_v7, %v16574_v26  ;;  %v16575_v21 = vld [vmem:[#allocation22_spill] sm:$0xff]  ;;  %v1110_v10 = vmul.f32 %v16571_v7, %v16576_v47  ;;  %v16577_v53 = vld [vmem:[#allocation24_spill] sm:$0xff]  ;;  %v1196_v16 = vrot.slane %v1105_v34, 2 }
  0xe8   : > { %16569 = vst [vmem:[#allocation71_spill] sm:$0xff] %v8072_v52  ;;  %v1109_v45 = vmul.f32 %v16571_v7, %v16575_v21  ;;  %v1111_v63 = vmul.f32 %v16571_v7, %v16577_v53  ;;  %v16578_v52 = vld [vmem:[#allocation10_spill] sm:$0xff]  ;;  %v16579_v40 = vld [vmem:[#allocation56_spill] sm:$0xff]  ;;  %v16580_v62 = vld [vmem:[#allocation25_spill] sm:$0xff]  ;;  %v1197_v24 = vrot.slane %v1106_v23, 2  ;;  %v8134_v19 = vrot.slane %v1107_v28, 2 }
  0xe9   : > { %v1112_v6 = vmul.f32 %v16571_v7, %v16578_v52  ;;  %v1113_v36 = vmul.f32 %v16571_v7, %v16579_v40  ;;  %v1114_v30 = vmul.f32 %v16571_v7, %v16580_v62  ;;  %v16581_v22 = vld [vmem:[#allocation27_spill] sm:$0xff]  ;;  %v16582_v51 = vld [vmem:[#allocation57_spill] sm:$0xff]  ;;  %v16583_v47 = vld [vmem:[#allocation26_spill] sm:$0xff]  ;;  %v8136_v5 = vrot.slane %v1110_v10, 2 }
  0xea   : > { %v1115_v26 = vmul.f32 %v16571_v7, %v16581_v22  ;;  %v8098_v21 = vmul.f32 %v16571_v7, %v16582_v51  ;;  %v1117_v13 = vmul.f32 %v16571_v7, %v16583_v47  ;;  %v16584_v53 = vld [vmem:[#allocation28_spill] sm:$0xff]  ;;  %v16585_v52 = vld [vmem:[#allocation58_spill] sm:$0xff]  ;;  %v16586_v40 = vld [vmem:[#allocation29_spill] sm:$0xff]  ;;  %v1202_v33 = vrot.slane %v1109_v45, 2 }
  0xeb   : > { %v1118_v20 = vmul.f32 %v16571_v7, %v16584_v53  ;;  %v8106_v32 = vmul.f32 %v16571_v7, %v16585_v52  ;;  %v1120_v62 = vmul.f32 %v16571_v7, %v16586_v40  ;;  %v16587_v55 = vld [vmem:[#allocation33_spill] sm:$0xff]  ;;  %v16588_v51 = vld [vmem:[#allocation59_spill] sm:$0xff]  ;;  %v16589_v47 = vld [vmem:[#allocation30_spill] sm:$0xff]  ;;  %v1207_v43 = vrot.slane %v1112_v6, 2 }
  0xec   : > { %v1121_v22 = vmul.f32 %v16571_v7, %v16587_v55  ;;  %v8114_v8 = vmul.f32 %v16571_v7, %v16588_v51  ;;  %v1123_v1 = vmul.f32 %v16571_v7, %v16589_v47  ;;  %v16590_v53 = vld [vmem:[#allocation34_spill] sm:$0xff]  ;;  %v16591_v52 = vld [vmem:[#allocation60_spill] sm:$0xff]  ;;  %v16592_v40 = vld [vmem:[#allocation31_spill] sm:$0xff]  ;;  %v8141_v44 = vrot.slane %v1113_v36, 2 }
  0xed   : > { %v1124_v49 = vmul.f32 %v16571_v7, %v16590_v53  ;;  %v8122_v2 = vmul.f32 %v16571_v7, %v16591_v52  ;;  %v1126_v4 = vmul.f32 %v16571_v7, %v16592_v40  ;;  %v16593_v55 = vld [vmem:[#allocation11_spill] sm:$0xff]  ;;  %v16594_v23 = vld [vmem:[#allocation61_spill] sm:$0xff]  ;;  %v16595_v56 = vld [vmem:[#allocation32_spill] sm:$0xff]  ;;  %v1201_v53 = vrot.slane %v1108_v48, 2 }
  0xee   : > { %v1127_v34 = vmul.f32 %v16571_v7, %v16593_v55  ;;  %v8130_v51 = vmul.f32 %v16571_v7, %v16594_v23  ;;  %v1129_v47 = vmul.f32 %v16571_v7, %v16595_v56  ;;  %v8139_v52 = vsel %vm1195_vm3, %v1196_v16, %v1197_v24 }
  0xef   : > { %v1206_v40 = vrot.slane %v1111_v63, 2  ;;  %v1211_v55 = vrot.slane %v1114_v30, 2  ;;  %v1212_v39 = vrot.slane %v1115_v26, 2  ;;  %v1214_v23 = vrot.slane %v8098_v21, 2 }
  0xf0   : > { %v1216_v58 = vrot.slane %v1117_v13, 2  ;;  %v1217_v57 = vrot.slane %v1118_v20, 2  ;;  %v15840_v7 = vrot.slane %v8106_v32, 2  ;;  %v1221_v28 = vrot.slane %v1120_v62, 2 }
  0xf1   : > { %v1222_v48 = vrot.slane %v1121_v22, 2  ;;  %v15839_v10 = vrot.slane %v8114_v8, 2  ;;  %v1226_v45 = vrot.slane %v1123_v1, 2  ;;  %v1227_v56 = vrot.slane %v1124_v49, 2 }
  0xf2   : > { %v15838_v16 = vrot.slane %v8122_v2, 2  ;;  %v1231_v63 = vrot.slane %v1126_v4, 2  ;;  %v1232_v6 = vrot.slane %v1127_v34, 2  ;;  %v15837_v36 = vrot.slane %v8130_v51, 2 }
  0xf3   : > { %v1236_v30 = vrot.slane %v1129_v47, 2  ;;  %v8150_v26 = vsel %vm1195_vm3, %v1197_v24, %v8134_v19  ;;  %v8153_v20 = vsel %vm1195_vm3, %v1201_v53, %v1202_v33  ;;  %v8157_v62 = vsel %vm1195_vm3, %v1202_v33, %v8136_v5 }
  0xf4   : > { %v1208_v49 = vsel %vm1195_vm3, %v1206_v40, %v1207_v43  ;;  %v1210_v4 = vsel %vm1195_vm3, %v1207_v43, %v8141_v44  ;;  %v1213_v1 = vsel %vm1195_vm3, %v1211_v55, %v1212_v39  ;;  %v1215_v13 = vsel %vm1195_vm3, %v1212_v39, %v1214_v23 }
  0xf5   : > { %v8165_v22 = vsel %vm1195_vm3, %v1216_v58, %v1217_v57  ;;  %v8170_v24 = vsel %vm1195_vm3, %v1217_v57, %v15840_v7  ;;  %v8173_v33 = vsel %vm1195_vm3, %v1221_v28, %v1222_v48  ;;  %v8178_v40 = vsel %vm1195_vm3, %v1222_v48, %v15839_v10  ;;  %v16617_v10 = vld [vmem:[#allocation51_spill] sm:$0xff] }
  0xf6   : > { %v8181_v43 = vsel %vm1195_vm3, %v1226_v45, %v1227_v56  ;;  %v8186_v58 = vsel %vm1195_vm3, %v1227_v56, %v15838_v16  ;;  %v8189_v39 = vsel %vm1195_vm3, %v1231_v63, %v1232_v6  ;;  %v8194_v57 = vsel %vm1195_vm3, %v1232_v6, %v15837_v36  ;;  %v16606_v45 = vld [vmem:[#allocation45_spill] sm:$0xff]  ;;  %v16616_v36 = vld [vmem:[#allocation19_spill] sm:$0xff] }
  0xf7   : > { %v16596_v55 = vrot.slane %v7806_v11, 2  ;;  %v8203_v47 = vadd.f32 %v8139_v52, %v7947_v50  ;;  %v8207_v56 = vadd.f32 %v8150_v26, %v7951_v60  ;;  %v8211_v53 = vadd.f32 %v8134_v19, %v7955_v14  ;;  %v16604_v60 = vld [vmem:[#allocation8_spill] sm:$0xff] }
  0xf8   : > { %v8215_v34 = vadd.f32 %v8153_v20, %v7959_v29  ;;  %v8219_v11 = vadd.f32 %v8157_v62, %v7963_v0  ;;  %v8223_v50 = vadd.f32 %v8136_v5, %v7967_v37  ;;  %v8226_v28 = vadd.f32 %v1208_v49, %v7971_v3 }
  0xf9   : > { %v8199_v21 = vsel %vm1195_vm3, %v1236_v30, %v16596_v55  ;;  %16597 = vst [vmem:[#allocation115_spill] sm:$0xff] %v8203_v47  ;;  %16598 = vst [vmem:[#allocation72_spill] sm:$0xff] %v8207_v56  ;;  %v16605_v48 = vsub.s32 4, %v16604_v60  ;;  %v8234_v63 = vadd.f32 %v1210_v4, %v7975_v27  ;;  %v8238_v29 = vadd.f32 %v8141_v44, %v7979_v46  ;;  %v16612_v30 = vld [vmem:[#allocation40_spill] sm:$0xff] }
  0xfa   : > { %16599 = vst [vmem:[#allocation116_spill] sm:$0xff] %v8211_v53  ;;  %16600 = vst [vmem:[#allocation96_spill] sm:$0xff] %v8215_v34  ;;  %v8241_v0 = vadd.f32 %v1213_v1, %v7983_v35  ;;  %v8244_v37 = vadd.f32 %v1215_v13, %v7987_v9  ;;  %v8247_v3 = vadd.f32 %v1214_v23, %v7991_v59  ;;  %v16613_v23 = vld [vmem:[#allocation18_spill] sm:$0xff] }
  0xfb   : > { %16601 = vst [vmem:[#allocation117_spill] sm:$0xff] %v8219_v11  ;;  %16602 = vst [vmem:[#allocation97_spill] sm:$0xff] %v8223_v50  ;;  %v8231_v14 = vrot.slane %v16606_v45, %v16605_v48  ;;  %v16614_v13 = vld [vmem:[#allocation50_spill] sm:$0xff]  ;;  %v16615_v48 = vld [vmem:[#allocation41_spill] sm:$0xff] }
  0xfc   : > { %16603 = vst [vmem:[#allocation118_spill] sm:$0xff] %v8226_v28  ;;  %16607 = vst [vmem:[#allocation98_spill] sm:$0xff] %v8234_v63 }
  0xfd   : > { %16608 = vst [vmem:[#allocation119_spill] sm:$0xff] %v8238_v29  ;;  %16609 = vst [vmem:[#allocation99_spill] sm:$0xff] %v8241_v0  ;;  %v8251_v6 = vmul.f32 %v8231_v14, %v16456_v38  ;;  %v1406_v27 = vmul.f32 %v8231_v14, %v16457_v12  ;;  %v1407_v46 = vmul.f32 %v8231_v14, %v16458_v61  ;;  %v16619_v61 = vld [vmem:[#allocation20_spill] sm:$0xff] }
  0xfe   : > { %16610 = vst [vmem:[#allocation120_spill] sm:$0xff] %v8244_v37  ;;  %16611 = vst [vmem:[#allocation100_spill] sm:$0xff] %v8247_v3  ;;  %v1408_v35 = vmul.f32 %v8231_v14, %v16459_v17  ;;  %v1409_v9 = vmul.f32 %v8231_v14, %v16460_v18  ;;  %v1410_v59 = vmul.f32 %v8231_v14, %v16612_v30  ;;  %v16618_v17 = vld [vmem:[#allocation42_spill] sm:$0xff]  ;;  %v16620_v12 = vld [vmem:[#allocation52_spill] sm:$0xff] }
  0xff   : > { %v1411_v1 = vmul.f32 %v8231_v14, %v16613_v23  ;;  %v1412_v55 = vmul.f32 %v8231_v14, %v16614_v13  ;;  %v1413_v45 = vmul.f32 %v8231_v14, %v16615_v48  ;;  %v1414_v16 = vmul.f32 %v8231_v14, %v16616_v36  ;;  %v16621_v3 = vld [vmem:[#allocation43_spill] sm:$0xff]  ;;  %v16622_v13 = vld [vmem:[#allocation21_spill] sm:$0xff] }
 0x100   : > { %v1415_v7 = vmul.f32 %v8231_v14, %v16617_v10  ;;  %v1416_v18 = vmul.f32 %v8231_v14, %v16618_v17  ;;  %v1417_v30 = vmul.f32 %v8231_v14, %v16619_v61  ;;  %v1418_v38 = vmul.f32 %v8231_v14, %v16620_v12  ;;  %v16623_v23 = vld [vmem:[#allocation53_spill] sm:$0xff] }
 0x101   : > { %v1419_v37 = vmul.f32 %v8231_v14, %v16621_v3  ;;  %v1420_v48 = vmul.f32 %v8231_v14, %v16622_v13  ;;  %v1421_v36 = vmul.f32 %v8231_v14, %v16623_v23  ;;  %v15846_v10 = vrot.slane %v8251_v6, 2 }
 0x102   : > { %v1523_v0 = vrot.slane %v1406_v27, 2  ;;  %v1525_v29 = vrot.slane %v1407_v46, 2  ;;  %v1526_v17 = vrot.slane %v1408_v35, 2  ;;  %v1528_v63 = vrot.slane %v1409_v9, 2 }
 0x103   : > { %v1530_v28 = vrot.slane %v1410_v59, 2  ;;  %v1531_v61 = vrot.slane %v1411_v1, 2  ;;  %v1533_v50 = vrot.slane %v1412_v55, 2  ;;  %v1535_v11 = vrot.slane %v1413_v45, 2 }
 0x104   : > { %v1536_v12 = vrot.slane %v1414_v16, 2  ;;  %v1538_v34 = vrot.slane %v1415_v7, 2  ;;  %v1540_v53 = vrot.slane %v1416_v18, 2  ;;  %v1541_v3 = vrot.slane %v1417_v30, 2  ;;  %v16638_v30 = vld [vmem:[#allocation82_spill] sm:$0xff] }
 0x105   : > { %v1543_v56 = vrot.slane %v1418_v38, 2  ;;  %v8287_v13 = vadd.f32 %v1208_v49, %v7995_v42  ;;  %v1545_v47 = vrot.slane %v1419_v37, 2  ;;  %v1546_v23 = vrot.slane %v1420_v48, 2  ;;  %v16630_v37 = vld [vmem:[#allocation78_spill] sm:$0xff]  ;;  %v16644_v48 = vld [vmem:[#allocation85_spill] sm:$0xff] }
 0x106   : > { %v1548_v60 = vrot.slane %v1421_v36, 2  ;;  %v8290_v27 = vadd.f32 %v1210_v4, %v7999_v54  ;;  %v8294_v46 = vadd.f32 %v8141_v44, %v8003_v41  ;;  %v8298_v16 = vadd.f32 %v8153_v20, %v8007_v31 }
 0x107   : > { %v1524_v18 = vsel %vm1195_vm3, %v15846_v10, %v1523_v0  ;;  %v1527_v38 = vsel %vm1195_vm3, %v1525_v29, %v1526_v17  ;;  %v1529_v42 = vsel %vm1195_vm3, %v1526_v17, %v1528_v63  ;;  %v1532_v7 = vsel %vm1195_vm3, %v1530_v28, %v1531_v61  ;;  %v16624_v28 = vld [vmem:[#allocation23_spill] sm:$0xff]  ;;  %v16700_v10 = vld [vmem:[#allocation12_spill] sm:$0xff] }
 0x108   : > { %v1534_v54 = vsel %vm1195_vm3, %v1531_v61, %v1533_v50  ;;  %v1537_v36 = vsel %vm1195_vm3, %v1535_v11, %v1536_v12  ;;  %v1539_v44 = vsel %vm1195_vm3, %v1536_v12, %v1538_v34  ;;  %v1542_v41 = vsel %vm1195_vm3, %v1540_v53, %v1541_v3  ;;  %v16626_v11 = vld [vmem:[#allocation76_spill] sm:$0xff]  ;;  %v16628_v12 = vld [vmem:[#allocation77_spill] sm:$0xff] }
 0x109   : > { %v1544_v31 = vsel %vm1195_vm3, %v1541_v3, %v1543_v56  ;;  %v1547_v20 = vsel %vm1195_vm3, %v1545_v47, %v1546_v23  ;;  %v1549_v49 = vsel %vm1195_vm3, %v1546_v23, %v1548_v60  ;;  %v8314_v4 = vadd.f32 %v1524_v18, %v7873_v25  ;;  %v16632_v47 = vld [vmem:[#allocation79_spill] sm:$0xff]  ;;  %v16634_v25 = vld [vmem:[#allocation80_spill] sm:$0xff]  ;;  %v16646_v18 = vld [vmem:[#allocation86_spill] sm:$0xff] }
 0x10a   : > { %v8317_v17 = vadd.f32 %v1523_v0, %v7876_v15  ;;  %v8320_v61 = vadd.f32 %v1527_v38, %v16624_v28  ;;  %v8323_v29 = vadd.f32 %v1529_v42, %v16626_v11  ;;  %v8326_v53 = vadd.f32 %v1528_v63, %v16628_v12  ;;  %v16636_v15 = vld [vmem:[#allocation81_spill] sm:$0xff]  ;;  %v16640_v23 = vld [vmem:[#allocation83_spill] sm:$0xff]  ;;  %v16642_v63 = vld [vmem:[#allocation84_spill] sm:$0xff] }
 0x10b   : > { %v8329_v3 = vadd.f32 %v1532_v7, %v16630_v37  ;;  %v8332_v35 = vadd.f32 %v1534_v54, %v16632_v47  ;;  %v8335_v9 = vadd.f32 %v1533_v50, %v16634_v25  ;;  %v8338_v0 = vadd.f32 %v1537_v36, %v16636_v15  ;;  %v16648_v50 = vld [vmem:[#allocation87_spill] sm:$0xff]  ;;  %v16650_v7 = vld [vmem:[#allocation88_spill] sm:$0xff]  ;;  %v16652_v36 = vld [vmem:[#allocation89_spill] sm:$0xff] }
 0x10c   : > { %16625 = vst [vmem:[#allocation121_spill] sm:$0xff] %v8320_v61  ;;  %16627 = vst [vmem:[#allocation73_spill] sm:$0xff] %v8323_v29  ;;  %v8341_v59 = vadd.f32 %v1539_v44, %v16638_v30  ;;  %v8344_v1 = vadd.f32 %v1538_v34, %v16640_v23  ;;  %v8347_v55 = vadd.f32 %v1542_v41, %v16642_v63  ;;  %v16654_v34 = vld [vmem:[#allocation90_spill] sm:$0xff]  ;;  %v16656_v11 = vld [vmem:[#allocation93_spill] sm:$0xff] }
 0x10d   : > { %16629 = vst [vmem:[#allocation122_spill] sm:$0xff] %v8326_v53  ;;  %16631 = vst [vmem:[#allocation74_spill] sm:$0xff] %v8329_v3  ;;  %v8350_v45 = vadd.f32 %v1544_v31, %v16644_v48  ;;  %v8353_v38 = vadd.f32 %v1543_v56, %v16646_v18  ;;  %v8356_v42 = vadd.f32 %v1547_v20, %v16648_v50  ;;  %v16657_v37 = vld [vmem:[#allocation55_spill] sm:$0xff]  ;;  %v16660_v15 = vld [vmem:[#allocation92_spill] sm:$0xff] }
 0x10e   : > { %16633 = vst [vmem:[#allocation123_spill] sm:$0xff] %v8332_v35  ;;  %16635 = vst [vmem:[#allocation101_spill] sm:$0xff] %v8335_v9  ;;  %v8359_v54 = vadd.f32 %v1549_v49, %v16650_v7  ;;  %v8362_v44 = vadd.f32 %v1548_v60, %v16652_v36  ;;  %v8365_v28 = vadd.f32 %v1542_v41, %v16654_v34  ;;  %v16658_v25 = vld [vmem:[#allocation91_spill] sm:$0xff]  ;;  %v16662_v30 = vld [vmem:[#allocation54_spill] sm:$0xff] }
 0x10f   : > { %16637 = vst [vmem:[#allocation124_spill] sm:$0xff] %v8338_v0  ;;  %16639 = vst [vmem:[#allocation75_spill] sm:$0xff] %v8341_v59  ;;  %v8369_v12 = vadd.f32 %v8157_v62, %v16656_v11  ;;  %v8373_v47 = vadd.f32 %v8136_v5, %v16657_v37  ;;  %v8376_v20 = vadd.f32 %v1544_v31, %v16658_v25  ;;  %v16663_v41 = vld [vmem:[#allocation94_spill] sm:$0xff]  ;;  %v16664_v62 = vld [vmem:[#allocation95_spill] sm:$0xff] }
 0x110   : > { %16641 = vst [vmem:[#allocation102_spill] sm:$0xff] %v8344_v1  ;;  %16643 = vst [vmem:[#allocation103_spill] sm:$0xff] %v8347_v55  ;;  %v8379_v49 = vadd.f32 %v1543_v56, %v16660_v15  ;;  %v8383_v60 = vadd.f32 %v8139_v52, %v16662_v30  ;;  %v8387_v23 = vadd.f32 %v8150_v26, %v16663_v41  ;;  %v16665_v5 = vld [vmem:[#allocation64_spill] sm:$0xff]  ;;  %v16666_v31 = vld [vmem:[#allocation65_spill] sm:$0xff]  ;;  %v16668_v52 = vrot.slane %v8106_v32, 2 }
 0x111   : > { %16645 = vst [vmem:[#allocation104_spill] sm:$0xff] %v8350_v45  ;;  %16647 = vst [vmem:[#allocation105_spill] sm:$0xff] %v8353_v38  ;;  %v8391_v63 = vadd.f32 %v8134_v19, %v16664_v62  ;;  %v8395_v48 = vadd.f32 %v8165_v22, %v16665_v5  ;;  %v8399_v56 = vadd.f32 %v8170_v24, %v16666_v31  ;;  %v16667_v18 = vld [vmem:[#allocation66_spill] sm:$0xff]  ;;  %v16670_v36 = vld [vmem:[#allocation67_spill] sm:$0xff]  ;;  %v16672_v22 = vrot.slane %v8114_v8, 2 }
 0x112   : > { %16649 = vst [vmem:[#allocation106_spill] sm:$0xff] %v8356_v42  ;;  %16651 = vst [vmem:[#allocation107_spill] sm:$0xff] %v8359_v54  ;;  %v8404_v50 = vadd.f32 %v16668_v52, %v16667_v18  ;;  %v16669_v7 = vld [vmem:[#allocation62_spill] sm:$0xff]  ;;  %v8412_v19 = vadd.f32 %v8178_v40, %v16670_v36  ;;  %v16671_v34 = vld [vmem:[#allocation111_spill] sm:$0xff] }
 0x113   : > { %16653 = vst [vmem:[#allocation108_spill] sm:$0xff] %v8362_v44  ;;  %16655 = vst [vmem:[#allocation109_spill] sm:$0xff] %v8365_v28  ;;  %v8408_v26 = vadd.f32 %v8173_v33, %v16669_v7  ;;  %v8417_v11 = vadd.f32 %v16672_v22, %v16671_v34  ;;  %v16674_v24 = vld [vmem:[#allocation68_spill] sm:$0xff]  ;;  %v16678_v15 = vld [vmem:[#allocation69_spill] sm:$0xff]  ;;  %v16679_v33 = vrot.slane %v8122_v2, 2 }
 0x114   : > { %16659 = vst [vmem:[#allocation110_spill] sm:$0xff] %v8376_v20  ;;  %16661 = vst [vmem:[#allocation63_spill] sm:$0xff] %v8379_v49  ;;  %v8421_v37 = vadd.f32 %v8181_v43, %v16674_v24  ;;  %v16676_v32 = vld [vmem:[#allocation112_spill] sm:$0xff]  ;;  %v16681_v40 = vld [vmem:[#allocation113_spill] sm:$0xff]  ;;  %v16686_v43 = vrot.slane %v8130_v51, 2 }
 0x115   : > { %16673 = vst [vmem:[#allocation45_spill] sm:$0xff] %v8417_v11  ;;  %v8425_v25 = vadd.f32 %v8186_v58, %v16676_v32  ;;  %v8430_v30 = vadd.f32 %v16679_v33, %v16678_v15  ;;  %v8434_v41 = vadd.f32 %v8189_v39, %v16681_v40  ;;  %v16683_v8 = vld [vmem:[#allocation70_spill] sm:$0xff]  ;;  %v16688_v58 = vld [vmem:[#allocation71_spill] sm:$0xff]  ;;  %v16690_v2 = vld [vmem:[#allocation24_spill] sm:$0xff] }
 0x116   : > { %16675 = vst [vmem:[#allocation23_spill] sm:$0xff] %v8421_v37  ;;  %v8438_v62 = vadd.f32 %v8194_v57, %v16683_v8  ;;  %v16685_v5 = vld [vmem:[#allocation114_spill] sm:$0xff]  ;;  %v8447_v18 = vadd.f32 %v8199_v21, %v16688_v58  ;;  %v1374_v52 = vmul.f32 %v8231_v14, %v16690_v2  ;;  %v16691_v7 = vld [vmem:[#allocation8_spill] sm:$0xff]  ;;  %v16694_v32 = vld [vmem:[#allocation25_spill] sm:$0xff] }
 0x117   : > { %16677 = vst [vmem:[#allocation76_spill] sm:$0xff] %v8425_v25  ;;  %16680 = vst [vmem:[#allocation77_spill] sm:$0xff] %v8430_v30  ;;  %v8443_v31 = vadd.f32 %v16686_v43, %v16685_v5  ;;  %v16692_v57 = vld [vmem:[#allocation10_spill] sm:$0xff]  ;;  %v16693_v24 = vld [vmem:[#allocation56_spill] sm:$0xff]  ;;  %v1377_v15 = vmul.f32 %v8231_v14, %v16694_v32  ;;  %v1383_v32 = vmul.f32 %v8231_v14, %v16700_v10 }
 0x118   : > { %16682 = vst [vmem:[#allocation78_spill] sm:$0xff] %v8434_v41  ;;  %16684 = vst [vmem:[#allocation79_spill] sm:$0xff] %v8438_v62  ;;  %v1375_v22 = vmul.f32 %v8231_v14, %v16692_v57  ;;  %v1376_v51 = vmul.f32 %v8231_v14, %v16693_v24  ;;  %v16695_v21 = vld [vmem:[#allocation27_spill] sm:$0xff]  ;;  %v16696_v40 = vld [vmem:[#allocation57_spill] sm:$0xff]  ;;  %v1470_v37 = vrot.slane %v1374_v52, 2 }
 0x119   : > { %16687 = vst [vmem:[#allocation80_spill] sm:$0xff] %v8443_v31  ;;  %16689 = vst [vmem:[#allocation81_spill] sm:$0xff] %v8447_v18  ;;  %v1378_v33 = vmul.f32 %v8231_v14, %v16695_v21  ;;  %v8464_v8 = vmul.f32 %v8231_v14, %v16696_v40  ;;  %v16697_v5 = vld [vmem:[#allocation14_spill] sm:$0xff]  ;;  %v16699_v39 = vld [vmem:[#allocation36_spill] sm:$0xff]  ;;  %v1475_v42 = vrot.slane %v1377_v15, 2  ;;  %v1485_v9 = vrot.slane %v1383_v32, 2 }
 0x11a   : > { %v1380_v43 = vmul.f32 %v8231_v14, %v16697_v5  ;;  %v16698_v58 = vld [vmem:[#allocation22_spill] sm:$0xff]  ;;  %v8472_v36 = vmul.f32 %v8231_v14, %v16699_v39  ;;  %v16701_v28 = vld [vmem:[#allocation9_spill] sm:$0xff]  ;;  %v16702_v24 = vld [vmem:[#allocation35_spill] sm:$0xff]  ;;  %v1471_v44 = vrot.slane %v1375_v22, 2 }
 0x11b   : > { %v1381_v34 = vmul.f32 %v8231_v14, %v16698_v58  ;;  %v1384_v21 = vmul.f32 %v8231_v14, %v16701_v28  ;;  %v8480_v40 = vmul.f32 %v8231_v14, %v16702_v24  ;;  %v16703_v57 = vld [vmem:[#allocation26_spill] sm:$0xff]  ;;  %v16704_v2 = vld [vmem:[#allocation28_spill] sm:$0xff]  ;;  %v16706_v31 = vld [vmem:[#allocation29_spill] sm:$0xff]  ;;  %v1476_v11 = vrot.slane %v1378_v33, 2 }
 0x11c   : > { %v1386_v5 = vmul.f32 %v8231_v14, %v16703_v57  ;;  %v1387_v58 = vmul.f32 %v8231_v14, %v16704_v2  ;;  %v16705_v18 = vld [vmem:[#allocation58_spill] sm:$0xff]  ;;  %v1389_v10 = vmul.f32 %v8231_v14, %v16706_v31  ;;  %v16707_v62 = vld [vmem:[#allocation33_spill] sm:$0xff]  ;;  %v16708_v41 = vld [vmem:[#allocation59_spill] sm:$0xff]  ;;  %v1480_v55 = vrot.slane %v1380_v43, 2 }
 0x11d   : > { %v8488_v39 = vmul.f32 %v8231_v14, %v16705_v18  ;;  %v1390_v28 = vmul.f32 %v8231_v14, %v16707_v62  ;;  %v8496_v24 = vmul.f32 %v8231_v14, %v16708_v41  ;;  %v16709_v30 = vld [vmem:[#allocation30_spill] sm:$0xff]  ;;  %v16711_v20 = vld [vmem:[#allocation60_spill] sm:$0xff]  ;;  %v16712_v25 = vld [vmem:[#allocation31_spill] sm:$0xff]  ;;  %v8508_v62 = vrot.slane %v1376_v51, 2 }
 0x11e   : > { %v1392_v57 = vmul.f32 %v8231_v14, %v16709_v30  ;;  %v16710_v49 = vld [vmem:[#allocation34_spill] sm:$0xff]  ;;  %v8504_v18 = vmul.f32 %v8231_v14, %v16711_v20  ;;  %v1395_v31 = vmul.f32 %v8231_v14, %v16712_v25  ;;  %v16713_v54 = vld [vmem:[#allocation11_spill] sm:$0xff]  ;;  %v1478_v30 = vrot.slane %v8464_v8, 2  ;;  %v16714_v38 = vld [vmem:[#allocation61_spill] sm:$0xff] }
 0x11f   : > { %v1393_v2 = vmul.f32 %v8231_v14, %v16710_v49  ;;  %v1396_v41 = vmul.f32 %v8231_v14, %v16713_v54  ;;  %v8515_v49 = vmul.f32 %v8231_v14, %v16714_v38  ;;  %v16715_v20 = vld [vmem:[#allocation32_spill] sm:$0xff]  ;;  %v1481_v25 = vrot.slane %v1381_v34, 2  ;;  %v16716_v52 = vld [vmem:[#allocation15_spill] sm:$0xff]  ;;  %v16717_v51 = vld [vmem:[#allocation46_spill] sm:$0xff] }
 0x120   : > { %v1398_v45 = vmul.f32 %v8231_v14, %v16715_v20  ;;  %v1399_v22 = vmul.f32 %v8231_v14, %v16716_v52  ;;  %v8523_v1 = vmul.f32 %v8231_v14, %v16717_v51  ;;  %v16718_v15 = vld [vmem:[#allocation37_spill] sm:$0xff]  ;;  %v16719_v8 = vld [vmem:[#allocation16_spill] sm:$0xff]  ;;  %v16720_v38 = vld [vmem:[#allocation47_spill] sm:$0xff]  ;;  %v1472_v43 = vsel %vm1195_vm3, %v1470_v37, %v1471_v44 }
 0x121   : > { %v1401_v33 = vmul.f32 %v8231_v14, %v16718_v15  ;;  %v1402_v54 = vmul.f32 %v8231_v14, %v16719_v8  ;;  %v8531_v59 = vmul.f32 %v8231_v14, %v16720_v38  ;;  %v16721_v20 = vld [vmem:[#allocation38_spill] sm:$0xff]  ;;  %v1474_v52 = vsel %vm1195_vm3, %v1471_v44, %v8508_v62 }
 0x122   : > { %v1404_v34 = vmul.f32 %v8231_v14, %v16721_v20  ;;  %v1477_v51 = vsel %vm1195_vm3, %v1475_v42, %v1476_v11  ;;  %v1479_v0 = vsel %vm1195_vm3, %v1476_v11, %v1478_v30  ;;  %v1482_v8 = vsel %vm1195_vm3, %v1480_v55, %v1481_v25 }
 0x123   : > { %v1486_v35 = vrot.slane %v1384_v21, 2  ;;  %v1490_v3 = vrot.slane %v1386_v5, 2  ;;  %v1491_v53 = vrot.slane %v1387_v58, 2  ;;  %v1495_v37 = vrot.slane %v1389_v10, 2 }
 0x124   : > { %v1496_v20 = vrot.slane %v1390_v28, 2  ;;  %v15851_v44 = vrot.slane %v8496_v24, 2  ;;  %v1500_v29 = vrot.slane %v1392_v57, 2  ;;  %v1501_v42 = vrot.slane %v1393_v2, 2 }
 0x125   : > { %v15850_v11 = vrot.slane %v8504_v18, 2  ;;  %v1505_v61 = vrot.slane %v1395_v31, 2  ;;  %v1506_v15 = vrot.slane %v1396_v41, 2  ;;  %v15849_v32 = vrot.slane %v8515_v49, 2 }
 0x126   : > { %v1510_v55 = vrot.slane %v1398_v45, 2  ;;  %v1511_v21 = vrot.slane %v1399_v22, 2  ;;  %v15847_v38 = vrot.slane %v8523_v1, 2  ;;  %v1515_v5 = vrot.slane %v1401_v33, 2 }
 0x127   : > { %v1516_v58 = vrot.slane %v1402_v54, 2  ;;  %v16722_v14 = vrot.slane %v8472_v36, 2  ;;  %v1487_v28 = vsel %vm1195_vm3, %v1485_v9, %v1486_v35  ;;  %v15848_v2 = vrot.slane %v8531_v59, 2 }
 0x128   : > { %v1520_v57 = vrot.slane %v1404_v34, 2  ;;  %v16723_v31 = vrot.slane %v8480_v40, 2  ;;  %v1492_v45 = vsel %vm1195_vm3, %v1490_v3, %v1491_v53  ;;  %v16724_v22 = vrot.slane %v8488_v39, 2 }
 0x129   : > { %v1484_v10 = vsel %vm1195_vm3, %v1481_v25, %v16722_v14  ;;  %v1497_v54 = vsel %vm1195_vm3, %v1495_v37, %v1496_v20  ;;  %v1499_v25 = vsel %vm1195_vm3, %v1496_v20, %v15851_v44  ;;  %v1502_v9 = vsel %vm1195_vm3, %v1500_v29, %v1501_v42  ;;  %v16726_v37 = vld [vmem:[#allocation115_spill] sm:$0xff] }
 0x12a   : > { %v1489_v41 = vsel %vm1195_vm3, %v1486_v35, %v16723_v31  ;;  %v1494_v33 = vsel %vm1195_vm3, %v1491_v53, %v16724_v22  ;;  %v1504_v34 = vsel %vm1195_vm3, %v1501_v42, %v15850_v11  ;;  %v8569_v35 = vsel %vm1195_vm3, %v1505_v61, %v1506_v15  ;;  %v16732_v22 = vld [vmem:[#allocation96_spill] sm:$0xff]  ;;  %v16746_v11 = vld [vmem:[#allocation99_spill] sm:$0xff] }
 0x12b   : > { %v1509_v3 = vsel %vm1195_vm3, %v1506_v15, %v15849_v32  ;;  %v8575_v53 = vsel %vm1195_vm3, %v1510_v55, %v1511_v21  ;;  %v8580_v20 = vsel %vm1195_vm3, %v1511_v21, %v15847_v38  ;;  %v8583_v29 = vsel %vm1195_vm3, %v1515_v5, %v1516_v58  ;;  %v16728_v55 = vld [vmem:[#allocation72_spill] sm:$0xff] }
 0x12c   : > { %v8588_v61 = vsel %vm1195_vm3, %v1516_v58, %v15848_v2  ;;  %v16725_v14 = vrot.slane %v8251_v6, 2  ;;  %v8596_v42 = vadd.f32 %v1472_v43, %v16726_v37  ;;  %v8599_v31 = vadd.f32 %v1474_v52, %v16728_v55  ;;  %v16730_v21 = vld [vmem:[#allocation116_spill] sm:$0xff]  ;;  %v16734_v58 = vld [vmem:[#allocation117_spill] sm:$0xff] }
 0x12d   : > { %v8603_v5 = vadd.f32 %v8508_v62, %v16730_v21  ;;  %v8606_v38 = vadd.f32 %v1477_v51, %v16732_v22  ;;  %v8609_v2 = vadd.f32 %v1479_v0, %v16734_v58  ;;  %v8614_v6 = vld [vmem:[%s15681_s1] sm:$0xff]  ;;  %v16738_v37 = vld [vmem:[#allocation97_spill] sm:$0xff]  ;;  %v16740_v21 = vld [vmem:[#allocation118_spill] sm:$0xff]  ;;  %v8635_v44 = vadd.f32 %v1482_v8, %v16746_v11 }
 0x12e   : > { %v8593_v15 = vsel %vm1195_vm3, %v1520_v57, %v16725_v14  ;;  %16727 = vst [vmem:[#allocation82_spill] sm:$0xff] %v8596_v42  ;;  %16729 = vst [vmem:[#allocation83_spill] sm:$0xff] %v8599_v31  ;;  %v16736_v57 = vsub.s32 7, %v16691_v7  ;;  %v8622_v55 = vadd.f32 %v1478_v30, %v16738_v37  ;;  %v8625_v32 = vadd.f32 %v1472_v43, %v16740_v21  ;;  %v16742_v51 = vld [vmem:[#allocation98_spill] sm:$0xff]  ;;  %v16744_v0 = vld [vmem:[#allocation119_spill] sm:$0xff] }
 0x12f   : > { %16731 = vst [vmem:[#allocation84_spill] sm:$0xff] %v8603_v5  ;;  %16733 = vst [vmem:[#allocation85_spill] sm:$0xff] %v8606_v38  ;;  %v8628_v22 = vadd.f32 %v1474_v52, %v16742_v51  ;;  %v8632_v58 = vadd.f32 %v8508_v62, %v16744_v0  ;;  %v16749_v38 = vld [vmem:[#allocation50_spill] sm:$0xff]  ;;  %v16750_v37 = vld [vmem:[#allocation41_spill] sm:$0xff] }
 0x130   : > { %16735 = vst [vmem:[#allocation86_spill] sm:$0xff] %v8609_v2  ;;  %v8619_v14 = vrot.slane %v8614_v6, %v16736_v57  ;;  %16739 = vst [vmem:[#allocation88_spill] sm:$0xff] %v8622_v55  ;;  %v16748_v2 = vld [vmem:[#allocation18_spill] sm:$0xff]  ;;  %v16751_v21 = vld [vmem:[#allocation19_spill] sm:$0xff] }
 0x131   : > { %16741 = vst [vmem:[#allocation89_spill] sm:$0xff] %v8625_v32  ;;  %16743 = vst [vmem:[#allocation90_spill] sm:$0xff] %v8628_v22  ;;  %v16752_v51 = vld [vmem:[#allocation51_spill] sm:$0xff]  ;;  %v16753_v0 = vld [vmem:[#allocation42_spill] sm:$0xff] }
 0x132   : > { %16737 = vst [vmem:[#allocation87_spill] sm:$0xff] %v8619_v14  ;;  %16745 = vst [vmem:[#allocation93_spill] sm:$0xff] %v8632_v58  ;;  %v8639_v57 = vmul.f32 %v8619_v14, %v16748_v2  ;;  %v1691_v30 = vmul.f32 %v8619_v14, %v16749_v38  ;;  %v1692_v43 = vmul.f32 %v8619_v14, %v16750_v37  ;;  %v16754_v11 = vld [vmem:[#allocation20_spill] sm:$0xff]  ;;  %v16756_v32 = vld [vmem:[#allocation43_spill] sm:$0xff] }
 0x133   : > { %16747 = vst [vmem:[#allocation55_spill] sm:$0xff] %v8635_v44  ;;  %v1693_v52 = vmul.f32 %v8619_v14, %v16751_v21  ;;  %v1694_v62 = vmul.f32 %v8619_v14, %v16752_v51  ;;  %v1695_v8 = vmul.f32 %v8619_v14, %v16753_v0  ;;  %v1696_v44 = vmul.f32 %v8619_v14, %v16754_v11  ;;  %v16755_v58 = vld [vmem:[#allocation52_spill] sm:$0xff]  ;;  %v16757_v5 = vld [vmem:[#allocation21_spill] sm:$0xff] }
 0x134   : > { %v1697_v22 = vmul.f32 %v8619_v14, %v16755_v58  ;;  %v1698_v55 = vmul.f32 %v8619_v14, %v16756_v32  ;;  %v1699_v31 = vmul.f32 %v8619_v14, %v16757_v5  ;;  %v16758_v42 = vld [vmem:[#allocation53_spill] sm:$0xff]  ;;  %v16759_v37 = vld [vmem:[#allocation120_spill] sm:$0xff]  ;;  %v16762_v0 = vrot.slane %v8472_v36, 2 }
 0x135   : > { %v1700_v21 = vmul.f32 %v8619_v14, %v16758_v42  ;;  %v8662_v51 = vadd.f32 %v1484_v10, %v16759_v37  ;;  %v16761_v38 = vld [vmem:[#allocation100_spill] sm:$0xff]  ;;  %v8670_v11 = vadd.f32 %v1487_v28, %v8287_v13  ;;  %v8673_v58 = vadd.f32 %v1489_v41, %v8290_v27 }
 0x136   : > { %v8667_v2 = vadd.f32 %v16762_v0, %v16761_v38  ;;  %v16766_v5 = vrot.slane %v8480_v40, 2  ;;  %v15854_v42 = vrot.slane %v8639_v57, 2  ;;  %v1804_v10 = vrot.slane %v1691_v30, 2 }
 0x137   : > { %16760 = vst [vmem:[#allocation91_spill] sm:$0xff] %v8662_v51  ;;  %16764 = vst [vmem:[#allocation54_spill] sm:$0xff] %v8670_v11  ;;  %v1806_v37 = vrot.slane %v1692_v43, 2  ;;  %v1807_v51 = vrot.slane %v1693_v52, 2  ;;  %v1809_v14 = vrot.slane %v1694_v62, 2  ;;  %v1811_v36 = vrot.slane %v1695_v8, 2 }
 0x138   : > { %16763 = vst [vmem:[#allocation92_spill] sm:$0xff] %v8667_v2  ;;  %16765 = vst [vmem:[#allocation94_spill] sm:$0xff] %v8673_v58  ;;  %v8678_v32 = vadd.f32 %v16766_v5, %v8294_v46  ;;  %v1812_v38 = vrot.slane %v1696_v44, 2  ;;  %v1814_v0 = vrot.slane %v1697_v22, 2  ;;  %v1816_v2 = vrot.slane %v1698_v55, 2  ;;  %v16784_v22 = vld [vmem:[#allocation122_spill] sm:$0xff] }
 0x139   : > { %v1817_v13 = vrot.slane %v1699_v31, 2  ;;  %v1819_v28 = vrot.slane %v1700_v21, 2  ;;  %v8682_v27 = vadd.f32 %v1492_v45, %v8298_v16  ;;  %v8685_v41 = vadd.f32 %v1494_v33, %v8369_v12  ;;  %v16791_v52 = vld [vmem:[#allocation75_spill] sm:$0xff]  ;;  %v16793_v62 = vld [vmem:[#allocation102_spill] sm:$0xff]  ;;  %v16873_v58 = vld [vmem:[#allocation44_spill] sm:$0xff] }
 0x13a   : > { %16767 = vst [vmem:[#allocation95_spill] sm:$0xff] %v8678_v32  ;;  %v16770_v46 = vrot.slane %v8488_v39, 2  ;;  %v8693_v5 = vadd.f32 %v1497_v54, %v8383_v60  ;;  %v8696_v44 = vadd.f32 %v1499_v25, %v8387_v23  ;;  %v16774_v31 = vrot.slane %v8496_v24, 2  ;;  %v16875_v11 = vld [vmem:[#allocation39_spill] sm:$0xff] }
 0x13b   : > { %16768 = vst [vmem:[#allocation64_spill] sm:$0xff] %v8682_v27  ;;  %16769 = vst [vmem:[#allocation65_spill] sm:$0xff] %v8685_v41  ;;  %v8704_v16 = vadd.f32 %v1502_v9, %v8395_v48  ;;  %v1805_v12 = vsel %vm1195_vm3, %v15854_v42, %v1804_v10  ;;  %v1808_v60 = vsel %vm1195_vm3, %v1806_v37, %v1807_v51  ;;  %v16795_v37 = vld [vmem:[#allocation103_spill] sm:$0xff]  ;;  %v16872_v41 = vld [vmem:[#allocation38_spill] sm:$0xff] }
 0x13c   : > { %v8690_v40 = vadd.f32 %v16770_v46, %v8373_v47  ;;  %16772 = vst [vmem:[#allocation62_spill] sm:$0xff] %v8693_v5  ;;  %16773 = vst [vmem:[#allocation67_spill] sm:$0xff] %v8696_v44  ;;  %v8701_v55 = vadd.f32 %v16774_v31, %v8391_v63  ;;  %v8710_v47 = vadd.f32 %v1504_v34, %v8399_v56  ;;  %v16778_v63 = vrot.slane %v8504_v18, 2  ;;  %v16783_v34 = vld [vmem:[#allocation73_spill] sm:$0xff]  ;;  %v16869_v44 = vld [vmem:[#allocation16_spill] sm:$0xff] }
 0x13d   : > { %16776 = vst [vmem:[#allocation68_spill] sm:$0xff] %v8704_v16  ;;  %v1810_v23 = vsel %vm1195_vm3, %v1807_v51, %v1809_v14  ;;  %v1813_v39 = vsel %vm1195_vm3, %v1811_v36, %v1812_v38  ;;  %v1815_v48 = vsel %vm1195_vm3, %v1812_v38, %v1814_v0  ;;  %v1818_v45 = vsel %vm1195_vm3, %v1816_v2, %v1817_v13  ;;  %v16797_v38 = vld [vmem:[#allocation104_spill] sm:$0xff]  ;;  %v16799_v46 = vld [vmem:[#allocation105_spill] sm:$0xff] }
 0x13e   : > { %16771 = vst [vmem:[#allocation66_spill] sm:$0xff] %v8690_v40  ;;  %16775 = vst [vmem:[#allocation111_spill] sm:$0xff] %v8701_v55  ;;  %v8718_v24 = vadd.f32 %v16778_v63, %v8404_v50  ;;  %v1820_v33 = vsel %vm1195_vm3, %v1817_v13, %v1819_v28  ;;  %v8725_v56 = vadd.f32 %v8569_v35, %v8408_v26  ;;  %v16782_v50 = vld [vmem:[#allocation121_spill] sm:$0xff]  ;;  %v16785_v26 = vld [vmem:[#allocation74_spill] sm:$0xff] }
 0x13f   : > { %16777 = vst [vmem:[#allocation112_spill] sm:$0xff] %v8710_v47  ;;  %v8728_v54 = vadd.f32 %v1509_v3, %v8412_v19  ;;  %v8731_v25 = vadd.f32 %v1805_v12, %v8314_v4  ;;  %v8734_v18 = vadd.f32 %v1804_v10, %v8317_v17  ;;  %v8737_v9 = vadd.f32 %v1808_v60, %v16782_v50  ;;  %v16786_v19 = vld [vmem:[#allocation123_spill] sm:$0xff]  ;;  %v16787_v4 = vld [vmem:[#allocation101_spill] sm:$0xff]  ;;  %v16789_v17 = vld [vmem:[#allocation124_spill] sm:$0xff] }
 0x140   : > { %16779 = vst [vmem:[#allocation69_spill] sm:$0xff] %v8718_v24  ;;  %16780 = vst [vmem:[#allocation113_spill] sm:$0xff] %v8725_v56  ;;  %v8740_v2 = vadd.f32 %v1810_v23, %v16783_v34  ;;  %v8743_v30 = vadd.f32 %v1809_v14, %v16784_v22  ;;  %v8746_v35 = vadd.f32 %v1813_v39, %v16785_v26  ;;  %v16801_v63 = vld [vmem:[#allocation45_spill] sm:$0xff]  ;;  %v16802_v50 = vrot.slane %v8515_v49, 2  ;;  %v16804_v34 = vld [vmem:[#allocation106_spill] sm:$0xff] }
 0x141   : > { %16781 = vst [vmem:[#allocation70_spill] sm:$0xff] %v8728_v54  ;;  %v8749_v3 = vadd.f32 %v1815_v48, %v16786_v19  ;;  %v8752_v43 = vadd.f32 %v1814_v0, %v16787_v4  ;;  %v8755_v21 = vadd.f32 %v1818_v45, %v16789_v17  ;;  %v8758_v51 = vadd.f32 %v1820_v33, %v16791_v52  ;;  %v16806_v22 = vld [vmem:[#allocation107_spill] sm:$0xff]  ;;  %v16808_v26 = vld [vmem:[#allocation108_spill] sm:$0xff]  ;;  %v16814_v49 = vld [vmem:[#allocation110_spill] sm:$0xff] }
 0x142   : > { %v8761_v8 = vadd.f32 %v1819_v28, %v16793_v62  ;;  %v8764_v36 = vadd.f32 %v1813_v39, %v16795_v37  ;;  %v8767_v13 = vadd.f32 %v1815_v48, %v16797_v38  ;;  %v8770_v31 = vadd.f32 %v1814_v0, %v16799_v46  ;;  %v16810_v19 = vld [vmem:[#allocation23_spill] sm:$0xff]  ;;  %v16812_v0 = vld [vmem:[#allocation76_spill] sm:$0xff]  ;;  %v16822_v37 = vld [vmem:[#allocation78_spill] sm:$0xff] }
 0x143   : > { %16788 = vst [vmem:[#allocation114_spill] sm:$0xff] %v8752_v43  ;;  %16790 = vst [vmem:[#allocation71_spill] sm:$0xff] %v8755_v21  ;;  %v8775_v45 = vadd.f32 %v16802_v50, %v16801_v63  ;;  %v8778_v33 = vadd.f32 %v1808_v60, %v16804_v34  ;;  %v8781_v28 = vadd.f32 %v1810_v23, %v16806_v22  ;;  %v16816_v52 = vld [vmem:[#allocation63_spill] sm:$0xff]  ;;  %v8803_v23 = vld [vmem:[%s15681_s1 + $0x8] ss:$0 sm:$0xff]  ;;  %v16820_v62 = vrot.slane %v8523_v1, 2 }
 0x144   : > { %16792 = vst [vmem:[#allocation115_spill] sm:$0xff] %v8758_v51  ;;  %16794 = vst [vmem:[#allocation72_spill] sm:$0xff] %v8761_v8  ;;  %v8784_v39 = vadd.f32 %v1809_v14, %v16808_v26  ;;  %v8788_v48 = vadd.f32 %v8575_v53, %v16810_v19  ;;  %v8792_v4 = vadd.f32 %v8580_v20, %v16812_v0  ;;  %v16819_v14 = vld [vmem:[#allocation77_spill] sm:$0xff]  ;;  %v16824_v38 = vld [vmem:[#allocation79_spill] sm:$0xff]  ;;  %v16827_v46 = vrot.slane %v8531_v59, 2 }
 0x145   : > { %16796 = vst [vmem:[#allocation116_spill] sm:$0xff] %v8764_v36  ;;  %16798 = vst [vmem:[#allocation96_spill] sm:$0xff] %v8767_v13  ;;  %v8795_v17 = vadd.f32 %v1805_v12, %v16814_v49  ;;  %v8798_v60 = vadd.f32 %v1804_v10, %v16816_v52  ;;  %v8808_v53 = vadd.f32 %v16820_v62, %v16819_v14  ;;  %v16826_v10 = vld [vmem:[#allocation80_spill] sm:$0xff]  ;;  %v16829_v50 = vld [vmem:[#allocation81_spill] sm:$0xff]  ;;  %v16831_v1 = vsub.s32 2, %v16691_v7 }
 0x146   : > { %16800 = vst [vmem:[#allocation117_spill] sm:$0xff] %v8770_v31  ;;  %16803 = vst [vmem:[#allocation97_spill] sm:$0xff] %v8775_v45  ;;  %v8812_v20 = vadd.f32 %v8583_v29, %v16822_v37  ;;  %v8816_v12 = vadd.f32 %v8588_v61, %v16824_v38  ;;  %v8821_v63 = vadd.f32 %v16827_v46, %v16826_v10  ;;  %v16833_v29 = vsub.s32 5, %v16691_v7  ;;  %v16835_v61 = vld [vmem:[#allocation24_spill] sm:$0xff]  ;;  %v16837_v59 = vld [vmem:[#allocation87_spill] sm:$0xff] }
 0x147   : > { %16805 = vst [vmem:[#allocation118_spill] sm:$0xff] %v8778_v33  ;;  %16807 = vst [vmem:[#allocation98_spill] sm:$0xff] %v8781_v28  ;;  %v8825_v34 = vadd.f32 %v8593_v15, %v16829_v50  ;;  %v8830_v22 = vrot.slane %v8614_v6, %v16831_v1  ;;  %v8839_v19 = vmul.f32 %v8803_v23, %v16835_v61  ;;  %v16838_v49 = vld [vmem:[#allocation10_spill] sm:$0xff]  ;;  %v16840_v14 = vld [vmem:[#allocation56_spill] sm:$0xff] }
 0x148   : > { %16809 = vst [vmem:[#allocation119_spill] sm:$0xff] %v8784_v39  ;;  %16811 = vst [vmem:[#allocation99_spill] sm:$0xff] %v8788_v48  ;;  %v8835_v26 = vrot.slane %v8614_v6, %v16833_v29  ;;  %v1656_v0 = vmul.f32 %v16837_v59, %v16835_v61  ;;  %v1657_v15 = vmul.f32 %v16837_v59, %v16838_v49  ;;  %v16843_v37 = vld [vmem:[#allocation14_spill] sm:$0xff]  ;;  %v16845_v50 = vld [vmem:[#allocation36_spill] sm:$0xff] }
 0x149   : > { %16813 = vst [vmem:[#allocation120_spill] sm:$0xff] %v8792_v4  ;;  %16815 = vst [vmem:[#allocation100_spill] sm:$0xff] %v8795_v17  ;;  %v8847_v52 = vmul.f32 %v8803_v23, %v16838_v49  ;;  %v8851_v62 = vmul.f32 %v8803_v23, %v16840_v14  ;;  %v8855_v6 = vmul.f32 %v16837_v59, %v16840_v14  ;;  %v16844_v10 = vld [vmem:[#allocation22_spill] sm:$0xff]  ;;  %v16847_v29 = vld [vmem:[#allocation12_spill] sm:$0xff] }
 0x14a   : > { %16817 = vst [vmem:[#allocation121_spill] sm:$0xff] %v8798_v60  ;;  %16818 = vst [vmem:[#allocation73_spill] sm:$0xff] %v8803_v23  ;;  %v1659_v38 = vmul.f32 %v16837_v59, %v16843_v37  ;;  %v1660_v46 = vmul.f32 %v16837_v59, %v16844_v10  ;;  %v8863_v1 = vmul.f32 %v16837_v59, %v16845_v50  ;;  %v16848_v7 = vld [vmem:[#allocation9_spill] sm:$0xff]  ;;  %v16850_v23 = vld [vmem:[#allocation26_spill] sm:$0xff]  ;;  %v1746_v47 = vrot.slane %v1656_v0, 2 }
 0x14b   : > { %16821 = vst [vmem:[#allocation122_spill] sm:$0xff] %v8808_v53  ;;  %16823 = vst [vmem:[#allocation74_spill] sm:$0xff] %v8812_v20  ;;  %v1662_v42 = vmul.f32 %v16837_v59, %v16847_v29  ;;  %v16851_v14 = vld [vmem:[#allocation28_spill] sm:$0xff]  ;;  %v16852_v61 = vld [vmem:[#allocation58_spill] sm:$0xff]  ;;  %v1747_v16 = vrot.slane %v1657_v15, 2  ;;  %v1681_v5 = vmul.f32 %v16837_v59, %v16869_v44  ;;  %v8924_v27 = vmul.f32 %v16837_v59, %v16872_v41 }
 0x14c   : > { %16825 = vst [vmem:[#allocation123_spill] sm:$0xff] %v8816_v12  ;;  %16828 = vst [vmem:[#allocation101_spill] sm:$0xff] %v8821_v63  ;;  %v1666_v49 = vmul.f32 %v16837_v59, %v16851_v14  ;;  %v8879_v50 = vmul.f32 %v16837_v59, %v16852_v61  ;;  %v16853_v10 = vld [vmem:[#allocation29_spill] sm:$0xff]  ;;  %v16856_v63 = vld [vmem:[#allocation30_spill] sm:$0xff]  ;;  %v1751_v55 = vrot.slane %v1659_v38, 2  ;;  %v8929_v0 = vmul.f32 %v16837_v59, %v16873_v58 }
 0x14d   : > { %16830 = vst [vmem:[#allocation124_spill] sm:$0xff] %v8825_v34  ;;  %16832 = vst [vmem:[#allocation75_spill] sm:$0xff] %v8830_v22  ;;  %v1668_v37 = vmul.f32 %v16837_v59, %v16853_v10  ;;  %v16854_v29 = vld [vmem:[#allocation33_spill] sm:$0xff]  ;;  %v16855_v34 = vld [vmem:[#allocation59_spill] sm:$0xff]  ;;  %v8937_v60 = vmul.f32 %v16837_v59, %v16875_v11  ;;  %v8950_v13 = vsel %vm1195_vm3, %v1746_v47, %v1747_v16  ;;  %v16883_v51 = vrot.slane %v8863_v1, 2 }
 0x14e   : > { %16834 = vst [vmem:[#allocation102_spill] sm:$0xff] %v8835_v26  ;;  %16836 = vst [vmem:[#allocation103_spill] sm:$0xff] %v8839_v19  ;;  %v1665_v26 = vmul.f32 %v16837_v59, %v16850_v23  ;;  %v1671_v23 = vmul.f32 %v16837_v59, %v16856_v63  ;;  %v16857_v12 = vld [vmem:[#allocation34_spill] sm:$0xff]  ;;  %v16858_v20 = vld [vmem:[#allocation60_spill] sm:$0xff] }
 0x14f   : > { %16839 = vst [vmem:[#allocation104_spill] sm:$0xff] %v8847_v52  ;;  %16841 = vst [vmem:[#allocation105_spill] sm:$0xff] %v8851_v62  ;;  %v1663_v62 = vmul.f32 %v16837_v59, %v16848_v7  ;;  %v16849_v52 = vld [vmem:[#allocation35_spill] sm:$0xff]  ;;  %v1669_v7 = vmul.f32 %v16837_v59, %v16854_v29  ;;  %v1672_v14 = vmul.f32 %v16837_v59, %v16857_v12  ;;  %v16862_v48 = vld [vmem:[#allocation61_spill] sm:$0xff] }
 0x150   : > { %16842 = vst [vmem:[#allocation45_spill] sm:$0xff] %v8855_v6  ;;  %16846 = vst [vmem:[#allocation106_spill] sm:$0xff] %v8863_v1  ;;  %v8871_v19 = vmul.f32 %v16837_v59, %v16849_v52  ;;  %v8887_v52 = vmul.f32 %v16837_v59, %v16855_v34  ;;  %v8895_v61 = vmul.f32 %v16837_v59, %v16858_v20  ;;  %v16860_v53 = vld [vmem:[#allocation31_spill] sm:$0xff]  ;;  %v16864_v45 = vld [vmem:[#allocation32_spill] sm:$0xff]  ;;  %v1761_v43 = vrot.slane %v1665_v26, 2 }
 0x151   : > { %v1674_v10 = vmul.f32 %v16837_v59, %v16860_v53  ;;  %v16861_v4 = vld [vmem:[#allocation11_spill] sm:$0xff]  ;;  %v8903_v34 = vmul.f32 %v16837_v59, %v16862_v48  ;;  %v1677_v63 = vmul.f32 %v16837_v59, %v16864_v45  ;;  %v16866_v56 = vld [vmem:[#allocation46_spill] sm:$0xff]  ;;  %v16868_v24 = vld [vmem:[#allocation37_spill] sm:$0xff]  ;;  %v1752_v48 = vrot.slane %v1660_v46, 2  ;;  %16879 = vst [vmem:[#allocation110_spill] sm:$0xff] %v8950_v13 }
 0x152   : > { %16859 = vst [vmem:[#allocation107_spill] sm:$0xff] %v8895_v61  ;;  %v1675_v29 = vmul.f32 %v16837_v59, %v16861_v4  ;;  %v16865_v54 = vld [vmem:[#allocation15_spill] sm:$0xff]  ;;  %v8911_v20 = vmul.f32 %v16837_v59, %v16866_v56  ;;  %v1680_v53 = vmul.f32 %v16837_v59, %v16868_v24  ;;  %v16874_v15 = vld [vmem:[#allocation48_spill] sm:$0xff]  ;;  %v1756_v46 = vrot.slane %v1662_v42, 2  ;;  %v16876_v17 = vld [vmem:[#allocation17_spill] sm:$0xff] }
 0x153   : > { %16863 = vst [vmem:[#allocation108_spill] sm:$0xff] %v8903_v34  ;;  %v1678_v12 = vmul.f32 %v16837_v59, %v16865_v54  ;;  %v16870_v45 = vld [vmem:[#allocation47_spill] sm:$0xff]  ;;  %v8933_v38 = vmul.f32 %v16837_v59, %v16874_v15  ;;  %v1757_v4 = vrot.slane %v1663_v62, 2  ;;  %v8941_v39 = vmul.f32 %v16837_v59, %v16876_v17  ;;  %v16877_v28 = vld [vmem:[#allocation49_spill] sm:$0xff]  ;;  %v16878_v33 = vld [vmem:[#allocation40_spill] sm:$0xff] }
 0x154   : > { %16867 = vst [vmem:[#allocation23_spill] sm:$0xff] %v8911_v20  ;;  %v8920_v40 = vmul.f32 %v16837_v59, %v16870_v45  ;;  %v8945_v32 = vmul.f32 %v16837_v59, %v16877_v28  ;;  %v1689_v31 = vmul.f32 %v16837_v59, %v16878_v33  ;;  %v16880_v42 = vrot.slane %v8855_v6, 2 }
 0x155   : > { %v8958_v36 = vsel %vm1195_vm3, %v1751_v55, %v1752_v48  ;;  %v8964_v21 = vsel %vm1195_vm3, %v1752_v48, %v16883_v51  ;;  %v1762_v59 = vrot.slane %v1666_v49, 2  ;;  %v8968_v13 = vsel %vm1195_vm3, %v1756_v46, %v1757_v4 }
 0x156   : > { %16871 = vst [vmem:[#allocation76_spill] sm:$0xff] %v8920_v40  ;;  %v8955_v62 = vsel %vm1195_vm3, %v1747_v16, %v16880_v42  ;;  %16882 = vst [vmem:[#allocation77_spill] sm:$0xff] %v8958_v36  ;;  %v1766_v6 = vrot.slane %v1668_v37, 2  ;;  %v1767_v16 = vrot.slane %v1669_v7, 2  ;;  %v15869_v42 = vrot.slane %v8887_v52, 2 }
 0x157   : > { %16881 = vst [vmem:[#allocation63_spill] sm:$0xff] %v8955_v62  ;;  %v1771_v55 = vrot.slane %v1671_v23, 2  ;;  %v1772_v36 = vrot.slane %v1672_v14, 2  ;;  %v15868_v8 = vrot.slane %v8895_v61, 2  ;;  %v1776_v62 = vrot.slane %v1674_v10, 2 }
 0x158   : > { %v1777_v1 = vrot.slane %v1675_v29, 2  ;;  %v15867_v51 = vrot.slane %v8903_v34, 2  ;;  %v1781_v48 = vrot.slane %v1677_v63, 2  ;;  %v1782_v26 = vrot.slane %v1678_v12, 2 }
 0x159   : > { %v16884_v49 = vrot.slane %v8871_v19, 2  ;;  %v8979_v37 = vsel %vm1195_vm3, %v1761_v43, %v1762_v59  ;;  %v16885_v7 = vrot.slane %v8879_v50, 2  ;;  %v15865_v14 = vrot.slane %v8911_v20, 2 }
 0x15a   : > { %v1786_v10 = vrot.slane %v1680_v53, 2  ;;  %v1787_v29 = vrot.slane %v1681_v5, 2  ;;  %v15866_v63 = vrot.slane %v8920_v40, 2  ;;  %v1801_v12 = vrot.slane %v1689_v31, 2 }
 0x15b   : > { %v8976_v47 = vsel %vm1195_vm3, %v1757_v4, %v16884_v49  ;;  %v8984_v23 = vsel %vm1195_vm3, %v1762_v59, %v16885_v7  ;;  %v8989_v46 = vsel %vm1195_vm3, %v1766_v6, %v1767_v16  ;;  %v8994_v43 = vsel %vm1195_vm3, %v1767_v16, %v15869_v42 }
 0x15c   : > { %v8997_v4 = vsel %vm1195_vm3, %v1771_v55, %v1772_v36  ;;  %v9002_v59 = vsel %vm1195_vm3, %v1772_v36, %v15868_v8  ;;  %v9005_v5 = vsel %vm1195_vm3, %v1776_v62, %v1777_v1  ;;  %v9010_v31 = vsel %vm1195_vm3, %v1777_v1, %v15867_v51  ;;  %v16896_v36 = vld [vmem:[#allocation50_spill] sm:$0xff] }
 0x15d   : > { %16886 = vst [vmem:[#allocation78_spill] sm:$0xff] %v8997_v4  ;;  %16887 = vst [vmem:[#allocation79_spill] sm:$0xff] %v9002_v59  ;;  %v9013_v53 = vsel %vm1195_vm3, %v1781_v48, %v1782_v26  ;;  %v1791_v6 = vrot.slane %v8924_v27, 2  ;;  %v9019_v16 = vsel %vm1195_vm3, %v1782_v26, %v15865_v14  ;;  %v9025_v49 = vsel %vm1195_vm3, %v1786_v10, %v1787_v29  ;;  %v16895_v27 = vld [vmem:[#allocation18_spill] sm:$0xff] }
 0x15e   : > { %16888 = vst [vmem:[#allocation80_spill] sm:$0xff] %v9005_v5  ;;  %16889 = vst [vmem:[#allocation81_spill] sm:$0xff] %v9010_v31  ;;  %v9030_v1 = vsel %vm1195_vm3, %v1787_v29, %v15866_v63  ;;  %v16894_v48 = vrot.slane %v8639_v57, 2  ;;  %v9040_v7 = vmul.f32 %v8830_v22, %v16865_v54  ;;  %v1950_v10 = vmul.f32 %v8830_v22, %v16866_v56  ;;  %v16899_v54 = vld [vmem:[#allocation51_spill] sm:$0xff] }
 0x15f   : > { %16890 = vst [vmem:[#allocation87_spill] sm:$0xff] %v9013_v53  ;;  %16891 = vst [vmem:[#allocation125_spill] sm:$0xff] %v9019_v16  ;;  %v1951_v14 = vmul.f32 %v8830_v22, %v16868_v24  ;;  %v1952_v29 = vmul.f32 %v8830_v22, %v16869_v44  ;;  %v1953_v63 = vmul.f32 %v8830_v22, %v16870_v45  ;;  %v16897_v45 = vld [vmem:[#allocation41_spill] sm:$0xff]  ;;  %v16898_v24 = vld [vmem:[#allocation19_spill] sm:$0xff] }
 0x160   : > { %16892 = vst [vmem:[#allocation126_spill] sm:$0xff] %v9025_v49  ;;  %16893 = vst [vmem:[#allocation127_spill] sm:$0xff] %v9030_v1  ;;  %v9036_v26 = vsel %vm1195_vm3, %v1801_v12, %v16894_v48  ;;  %v1954_v57 = vmul.f32 %v8830_v22, %v16872_v41  ;;  %v1955_v12 = vmul.f32 %v8830_v22, %v16873_v58  ;;  %v16902_v58 = vld [vmem:[#allocation52_spill] sm:$0xff]  ;;  %v2058_v40 = vrot.slane %v1950_v10, 4 }
 0x161   : > { %v1956_v48 = vmul.f32 %v8830_v22, %v16874_v15  ;;  %v1957_v51 = vmul.f32 %v8830_v22, %v16875_v11  ;;  %v1958_v8 = vmul.f32 %v8830_v22, %v16876_v17  ;;  %v1959_v42 = vmul.f32 %v8830_v22, %v16877_v28  ;;  %v16900_v11 = vld [vmem:[#allocation42_spill] sm:$0xff]  ;;  %v16901_v15 = vld [vmem:[#allocation20_spill] sm:$0xff] }
 0x162   : > { %v1960_v55 = vmul.f32 %v8830_v22, %v16878_v33  ;;  %v1961_v62 = vmul.f32 %v8830_v22, %v16895_v27  ;;  %v1962_v41 = vmul.f32 %v8830_v22, %v16896_v36  ;;  %v1963_v44 = vmul.f32 %v8830_v22, %v16897_v45 }
 0x163   : > { %v1964_v56 = vmul.f32 %v8830_v22, %v16898_v24  ;;  %v1965_v17 = vmul.f32 %v8830_v22, %v16899_v54  ;;  %v1966_v28 = vmul.f32 %v8830_v22, %v16900_v11  ;;  %v1967_v33 = vmul.f32 %v8830_v22, %v16901_v15 }
 0x164   : > { %v1968_v27 = vmul.f32 %v8830_v22, %v16902_v58  ;;  %v15888_v36 = vrot.slane %v9040_v7, 4  ;;  %v2060_v1 = vrot.slane %v1951_v14, 4  ;;  %v2061_v45 = vrot.slane %v1952_v29, 4  ;;  %v16904_v29 = vld [vmem:[#allocation109_spill] sm:$0xff] }
 0x165   : > { %v2063_v49 = vrot.slane %v1953_v63, 4  ;;  %v2065_v20 = vrot.slane %v1954_v57, 4  ;;  %v2066_v24 = vrot.slane %v1955_v12, 4  ;;  %v2068_v16 = vrot.slane %v1956_v48, 4  ;;  %v16918_v48 = vld [vmem:[#allocation98_spill] sm:$0xff] }
 0x166   : > { %v2070_v53 = vrot.slane %v1957_v51, 4  ;;  %v2071_v54 = vrot.slane %v1958_v8, 4  ;;  %v2073_v34 = vrot.slane %v1959_v42, 4  ;;  %v2075_v31 = vrot.slane %v1960_v55, 4 }
 0x167   : > { %v2076_v11 = vrot.slane %v1961_v62, 4  ;;  %v2078_v5 = vrot.slane %v1962_v41, 4  ;;  %v2080_v61 = vrot.slane %v1963_v44, 4  ;;  %v2081_v15 = vrot.slane %v1964_v56, 4 }
 0x168   : > { %v2083_v59 = vrot.slane %v1965_v17, 4  ;;  %v2085_v4 = vrot.slane %v1966_v28, 4  ;;  %v2086_v58 = vrot.slane %v1967_v33, 4  ;;  %v2088_v22 = vrot.slane %v1968_v27, 4 }
 0x169   : > { %v16903_v10 = vrot.slane %v8929_v0, 2  ;;  %v15889_v63 = vrot.slane %v8945_v32, 2  ;;  %v1917_v8 = vadd.f32 %v9036_v26, %v16904_v29  ;;  %v2059_v41 = vsel %vm2014_vm4, %v15888_v36, %v2058_v40  ;;  %v16920_v29 = vld [vmem:[#allocation119_spill] sm:$0xff]  ;;  %v16985_v36 = vld [vmem:[#allocation69_spill] sm:$0xff] }
 0x16a   : > { %v2062_v44 = vsel %vm2014_vm4, %v2060_v1, %v2061_v45  ;;  %v2064_v56 = vsel %vm2014_vm4, %v2061_v45, %v2063_v49  ;;  %v2067_v33 = vsel %vm2014_vm4, %v2065_v20, %v2066_v24  ;;  %v2069_v28 = vsel %vm2014_vm4, %v2066_v24, %v2068_v16 }
 0x16b   : > { %v9084_v14 = vsel %vm1195_vm3, %v1791_v6, %v16903_v10  ;;  %v2072_v17 = vsel %vm2014_vm4, %v2070_v53, %v2071_v54  ;;  %v2074_v42 = vsel %vm2014_vm4, %v2071_v54, %v2073_v34  ;;  %v2077_v51 = vsel %vm2014_vm4, %v2075_v31, %v2076_v11 }
 0x16c   : > { %v2079_v6 = vsel %vm2014_vm4, %v2076_v11, %v2078_v5  ;;  %v2082_v62 = vsel %vm2014_vm4, %v2080_v61, %v2081_v15  ;;  %v2084_v55 = vsel %vm2014_vm4, %v2081_v15, %v2083_v59  ;;  %v2087_v1 = vsel %vm2014_vm4, %v2085_v4, %v2086_v58 }
 0x16d   : > { %v2089_v45 = vsel %vm2014_vm4, %v2086_v58, %v2088_v22  ;;  %v9105_v20 = vadd.f32 %v2059_v41, %v8731_v25  ;;  %v9108_v24 = vadd.f32 %v2058_v40, %v8734_v18  ;;  %v9111_v54 = vadd.f32 %v2062_v44, %v8737_v9  ;;  %v16905_v25 = vld [vmem:[#allocation114_spill] sm:$0xff]  ;;  %v16906_v40 = vld [vmem:[#allocation71_spill] sm:$0xff]  ;;  %v16923_v44 = vld [vmem:[#allocation100_spill] sm:$0xff] }
 0x16e   : > { %v9114_v31 = vadd.f32 %v2064_v56, %v8740_v2  ;;  %v9117_v11 = vadd.f32 %v2063_v49, %v8743_v30  ;;  %v9120_v61 = vadd.f32 %v2067_v33, %v8746_v35  ;;  %v9123_v58 = vadd.f32 %v2069_v28, %v8749_v3  ;;  %v16907_v9 = vld [vmem:[#allocation115_spill] sm:$0xff]  ;;  %v16908_v2 = vld [vmem:[#allocation72_spill] sm:$0xff]  ;;  %v16914_v3 = vld [vmem:[#allocation117_spill] sm:$0xff] }
 0x16f   : > { %v9126_v15 = vadd.f32 %v2068_v16, %v16905_v25  ;;  %v9129_v18 = vadd.f32 %v2072_v17, %v16906_v40  ;;  %v9132_v4 = vadd.f32 %v2074_v42, %v16907_v9  ;;  %v9135_v53 = vadd.f32 %v2073_v34, %v16908_v2  ;;  %v16910_v30 = vld [vmem:[#allocation116_spill] sm:$0xff]  ;;  %v16916_v16 = vld [vmem:[#allocation118_spill] sm:$0xff]  ;;  %v16925_v33 = vld [vmem:[#allocation121_spill] sm:$0xff] }
 0x170   : > { %v9138_v49 = vadd.f32 %v2077_v51, %v16910_v30  ;;  %v16912_v35 = vld [vmem:[#allocation96_spill] sm:$0xff]  ;;  %v9144_v57 = vadd.f32 %v2078_v5, %v16914_v3  ;;  %v9147_v12 = vadd.f32 %v2082_v62, %v16916_v16  ;;  %v9150_v10 = vadd.f32 %v2084_v55, %v16918_v48  ;;  %v16933_v55 = vld [vmem:[#allocation110_spill] sm:$0xff]  ;;  %v16937_v9 = vld [vmem:[#allocation45_spill] sm:$0xff] }
 0x171   : > { %16909 = vst [vmem:[#allocation109_spill] sm:$0xff] %v9135_v53  ;;  %v9141_v27 = vadd.f32 %v2079_v6, %v16912_v35  ;;  %v9153_v41 = vadd.f32 %v2083_v59, %v16920_v29  ;;  %v9155_v34 = vadd.f32 %v2087_v1, %v1917_v8  ;;  %v9158_v56 = vadd.f32 %v2089_v45, %v16923_v44  ;;  %v16934_v45 = vld [vmem:[#allocation83_spill] sm:$0xff]  ;;  %v16936_v40 = vld [vmem:[#allocation84_spill] sm:$0xff]  ;;  %v16939_v30 = vld [vmem:[#allocation85_spill] sm:$0xff] }
 0x172   : > { %16911 = vst [vmem:[#allocation114_spill] sm:$0xff] %v9138_v49  ;;  %16915 = vst [vmem:[#allocation115_spill] sm:$0xff] %v9144_v57  ;;  %v9161_v28 = vadd.f32 %v2088_v22, %v16925_v33  ;;  %v16927_v5 = vrot.slane %v8933_v38, 2  ;;  %v16928_v17 = vrot.slane %v8929_v0, 2  ;;  %v16929_v51 = vrot.slane %v8941_v39, 2  ;;  %v16932_v22 = vld [vmem:[#allocation82_spill] sm:$0xff] }
 0x173   : > { %16913 = vst [vmem:[#allocation71_spill] sm:$0xff] %v9141_v27  ;;  %16917 = vst [vmem:[#allocation72_spill] sm:$0xff] %v9147_v12  ;;  %v16930_v6 = vrot.slane %v8937_v60, 2  ;;  %v9180_v1 = vadd.f32 %v16933_v55, %v16932_v22  ;;  %v16935_v0 = vld [vmem:[#allocation63_spill] sm:$0xff]  ;;  %v16938_v2 = vrot.slane %v16937_v9, 2  ;;  %v16940_v35 = vld [vmem:[#allocation77_spill] sm:$0xff] }
 0x174   : > { %16919 = vst [vmem:[#allocation116_spill] sm:$0xff] %v9150_v10  ;;  %16921 = vst [vmem:[#allocation96_spill] sm:$0xff] %v9153_v41  ;;  %v1795_v42 = vsel %vm1195_vm3, %v16928_v17, %v16927_v5  ;;  %v16931_v8 = vmov %v16929_v51  ;;  %v9184_v25 = vadd.f32 %v16935_v0, %v16934_v45  ;;  %v9193_v3 = vadd.f32 %v16940_v35, %v16939_v30  ;;  %v16941_v39 = vld [vmem:[#allocation86_spill] sm:$0xff]  ;;  %v16942_v48 = vld [vmem:[#allocation88_spill] sm:$0xff] }
 0x175   : > { %16922 = vst [vmem:[#allocation117_spill] sm:$0xff] %v9155_v34  ;;  %16924 = vst [vmem:[#allocation118_spill] sm:$0xff] %v9158_v56  ;;  %v1798_v59 = vsel %vm1195_vm3, %v16930_v6, %v16929_v51  ;;  %v1800_v62 = vsel %vm1195_vm3, %v16931_v8, %v15889_v63  ;;  %v9189_v60 = vadd.f32 %v16938_v2, %v16936_v40  ;;  %v16943_v29 = vld [vmem:[#allocation106_spill] sm:$0xff]  ;;  %v16945_v5 = vld [vmem:[#allocation89_spill] sm:$0xff]  ;;  %v16948_v22 = vrot.slane %v8871_v19, 2 }
 0x176   : > { %16926 = vst [vmem:[#allocation98_spill] sm:$0xff] %v9161_v28  ;;  %v9197_v16 = vadd.f32 %v8964_v21, %v16941_v39  ;;  %v16944_v44 = vrot.slane %v16943_v29, 2  ;;  %v9206_v17 = vadd.f32 %v8968_v13, %v16945_v5  ;;  %v16946_v51 = vld [vmem:[#allocation90_spill] sm:$0xff]  ;;  %v16947_v8 = vld [vmem:[#allocation93_spill] sm:$0xff]  ;;  %v16949_v21 = vld [vmem:[#allocation55_spill] sm:$0xff]  ;;  %v16952_v13 = vrot.slane %v8879_v50, 2 }
 0x177   : > { %v9210_v6 = vadd.f32 %v8976_v47, %v16946_v51  ;;  %v9215_v55 = vadd.f32 %v16948_v22, %v16947_v8  ;;  %v9219_v45 = vadd.f32 %v8979_v37, %v16949_v21  ;;  %v16950_v0 = vld [vmem:[#allocation91_spill] sm:$0xff]  ;;  %v16951_v9 = vld [vmem:[#allocation92_spill] sm:$0xff]  ;;  %v16953_v47 = vld [vmem:[#allocation54_spill] sm:$0xff]  ;;  %v16957_v37 = vrot.slane %v8887_v52, 2 }
 0x178   : > { %v9202_v33 = vadd.f32 %v16944_v44, %v16942_v48  ;;  %v9223_v40 = vadd.f32 %v8984_v23, %v16950_v0  ;;  %v9228_v2 = vadd.f32 %v16952_v13, %v16951_v9  ;;  %v9232_v30 = vadd.f32 %v8989_v46, %v16953_v47  ;;  %v16954_v19 = vld [vmem:[#allocation94_spill] sm:$0xff]  ;;  %v16956_v39 = vld [vmem:[#allocation95_spill] sm:$0xff]  ;;  %v16959_v23 = vld [vmem:[#allocation64_spill] sm:$0xff] }
 0x179   : > { %v9236_v35 = vadd.f32 %v8994_v43, %v16954_v19  ;;  %v9241_v48 = vadd.f32 %v16957_v37, %v16956_v39  ;;  %v16960_v29 = vld [vmem:[#allocation78_spill] sm:$0xff]  ;;  %v16962_v50 = vld [vmem:[#allocation65_spill] sm:$0xff]  ;;  %v16963_v5 = vld [vmem:[#allocation79_spill] sm:$0xff] }
 0x17a   : > { %v9245_v44 = vadd.f32 %v16960_v29, %v16959_v23  ;;  %v9249_v51 = vadd.f32 %v16963_v5, %v16962_v50  ;;  %v16965_v8 = vld [vmem:[#allocation66_spill] sm:$0xff]  ;;  %v16966_v46 = vld [vmem:[#allocation107_spill] sm:$0xff]  ;;  %v16970_v0 = vld [vmem:[#allocation80_spill] sm:$0xff] }
 0x17b   : > { %16955 = vst [vmem:[#allocation119_spill] sm:$0xff] %v9236_v35  ;;  %16958 = vst [vmem:[#allocation100_spill] sm:$0xff] %v9241_v48  ;;  %v16967_v22 = vrot.slane %v16966_v46, 2  ;;  %v16969_v43 = vld [vmem:[#allocation62_spill] sm:$0xff]  ;;  %v16972_v52 = vld [vmem:[#allocation67_spill] sm:$0xff] }
 0x17c   : > { %16961 = vst [vmem:[#allocation121_spill] sm:$0xff] %v9245_v44  ;;  %16964 = vst [vmem:[#allocation82_spill] sm:$0xff] %v9249_v51  ;;  %v9258_v9 = vadd.f32 %v16970_v0, %v16969_v43  ;;  %v16973_v13 = vld [vmem:[#allocation81_spill] sm:$0xff]  ;;  %v16975_v19 = vld [vmem:[#allocation111_spill] sm:$0xff] }
 0x17d   : > { %v9254_v21 = vadd.f32 %v16967_v22, %v16965_v8  ;;  %v9262_v47 = vadd.f32 %v16973_v13, %v16972_v52  ;;  %v16976_v39 = vld [vmem:[#allocation108_spill] sm:$0xff]  ;;  %v16980_v50 = vld [vmem:[#allocation87_spill] sm:$0xff]  ;;  %v16983_v8 = vld [vmem:[#allocation125_spill] sm:$0xff] }
 0x17e   : > { %16971 = vst [vmem:[#allocation83_spill] sm:$0xff] %v9258_v9  ;;  %v16977_v37 = vrot.slane %v16976_v39, 2  ;;  %v16979_v29 = vld [vmem:[#allocation68_spill] sm:$0xff]  ;;  %v16986_v43 = vld [vmem:[#allocation23_spill] sm:$0xff]  ;;  %v16989_v52 = vld [vmem:[#allocation113_spill] sm:$0xff] }
 0x17f   : > { %16968 = vst [vmem:[#allocation110_spill] sm:$0xff] %v9254_v21  ;;  %16974 = vst [vmem:[#allocation63_spill] sm:$0xff] %v9262_v47  ;;  %v9271_v5 = vadd.f32 %v16980_v50, %v16979_v29  ;;  %v16982_v46 = vld [vmem:[#allocation112_spill] sm:$0xff]  ;;  %v16987_v0 = vrot.slane %v16986_v43, 2  ;;  %v16990_v13 = vld [vmem:[#allocation126_spill] sm:$0xff] }
 0x180   : > { %v9267_v23 = vadd.f32 %v16977_v37, %v16975_v19  ;;  %v9275_v22 = vadd.f32 %v16983_v8, %v16982_v46  ;;  %v9284_v47 = vadd.f32 %v16990_v13, %v16989_v52  ;;  %v16992_v39 = vld [vmem:[#allocation70_spill] sm:$0xff]  ;;  %v16993_v19 = vld [vmem:[#allocation127_spill] sm:$0xff]  ;;  %v16996_v29 = vld [vmem:[#allocation76_spill] sm:$0xff]  ;;  %v17004_v52 = vrot.slane %v8933_v38, 2 }
 0x181   : > { %16981 = vst [vmem:[#allocation45_spill] sm:$0xff] %v9271_v5  ;;  %v9280_v63 = vadd.f32 %v16987_v0, %v16985_v36  ;;  %v9288_v37 = vadd.f32 %v16993_v19, %v16992_v39  ;;  %v16997_v50 = vrot.slane %v16996_v29, 2  ;;  %v16999_v46 = vld [vmem:[#allocation99_spill] sm:$0xff]  ;;  %v17001_v43 = vld [vmem:[#allocation120_spill] sm:$0xff]  ;;  %v17003_v0 = vld [vmem:[#allocation122_spill] sm:$0xff]  ;;  %v17011_v29 = vrot.slane %v8945_v32, 2 }
 0x182   : > { %16978 = vst [vmem:[#allocation84_spill] sm:$0xff] %v9267_v23  ;;  %16984 = vst [vmem:[#allocation85_spill] sm:$0xff] %v9275_v22  ;;  %v16995_v23 = vld [vmem:[#allocation97_spill] sm:$0xff]  ;;  %v9297_v8 = vadd.f32 %v9084_v14, %v16999_v46  ;;  %v9300_v36 = vadd.f32 %v1795_v42, %v17001_v43  ;;  %v9305_v13 = vadd.f32 %v17004_v52, %v17003_v0  ;;  %v17008_v19 = vld [vmem:[#allocation123_spill] sm:$0xff] }
 0x183   : > { %16988 = vst [vmem:[#allocation77_spill] sm:$0xff] %v9280_v63  ;;  %16991 = vst [vmem:[#allocation86_spill] sm:$0xff] %v9284_v47  ;;  %v9293_v5 = vadd.f32 %v16997_v50, %v16995_v23  ;;  %v17006_v47 = vld [vmem:[#allocation74_spill] sm:$0xff]  ;;  %v17010_v23 = vld [vmem:[#allocation101_spill] sm:$0xff] }
 0x184   : > { %16994 = vst [vmem:[#allocation88_spill] sm:$0xff] %v9288_v37  ;;  %17000 = vst [vmem:[#allocation89_spill] sm:$0xff] %v9297_v8  ;;  %v9308_v39 = vadd.f32 %v1798_v59, %v17006_v47  ;;  %v9311_v37 = vadd.f32 %v1800_v62, %v17008_v19  ;;  %v9316_v50 = vadd.f32 %v17011_v29, %v17010_v23  ;;  %v17013_v14 = vld [vmem:[#allocation124_spill] sm:$0xff]  ;;  %v17016_v43 = vld [vmem:[#allocation75_spill] sm:$0xff] }
 0x185   : > { %16998 = vst [vmem:[#allocation106_spill] sm:$0xff] %v9293_v5  ;;  %17002 = vst [vmem:[#allocation90_spill] sm:$0xff] %v9300_v36  ;;  %v9320_v42 = vadd.f32 %v9036_v26, %v17013_v14  ;;  %v17015_v46 = vld [vmem:[#allocation12_spill] sm:$0xff]  ;;  %v17017_v0 = vld [vmem:[#allocation9_spill] sm:$0xff] }
 0x186   : > { %17005 = vst [vmem:[#allocation93_spill] sm:$0xff] %v9305_v13  ;;  %17007 = vst [vmem:[#allocation55_spill] sm:$0xff] %v9308_v39  ;;  %v1924_v38 = vmul.f32 %v17016_v43, %v17015_v46  ;;  %v1925_v52 = vmul.f32 %v17016_v43, %v17017_v0  ;;  %v17018_v59 = vld [vmem:[#allocation35_spill] sm:$0xff]  ;;  %v17019_v62 = vld [vmem:[#allocation14_spill] sm:$0xff] }
 0x187   : > { %17009 = vst [vmem:[#allocation91_spill] sm:$0xff] %v9311_v37  ;;  %17012 = vst [vmem:[#allocation92_spill] sm:$0xff] %v9316_v50  ;;  %v1926_v47 = vmul.f32 %v17016_v43, %v17018_v59  ;;  %v1927_v19 = vmul.f32 %v17016_v43, %v17019_v62  ;;  %v17020_v37 = vld [vmem:[#allocation22_spill] sm:$0xff]  ;;  %v17021_v23 = vld [vmem:[#allocation36_spill] sm:$0xff] }
 0x188   : > { %17014 = vst [vmem:[#allocation54_spill] sm:$0xff] %v9320_v42  ;;  %v1928_v32 = vmul.f32 %v17016_v43, %v17020_v37  ;;  %v1929_v29 = vmul.f32 %v17016_v43, %v17021_v23  ;;  %v17022_v26 = vld [vmem:[#allocation24_spill] sm:$0xff]  ;;  %v17023_v42 = vld [vmem:[#allocation10_spill] sm:$0xff]  ;;  %v17025_v39 = vld [vmem:[#allocation25_spill] sm:$0xff]  ;;  %v2015_v9 = vrot.slane %v1924_v38, 4  ;;  %v2016_v21 = vrot.slane %v1925_v52, 4 }
 0x189   : > { %v1930_v14 = vmul.f32 %v17016_v43, %v17022_v26  ;;  %v1931_v46 = vmul.f32 %v17016_v43, %v17023_v42  ;;  %v17024_v50 = vld [vmem:[#allocation56_spill] sm:$0xff]  ;;  %v1933_v59 = vmul.f32 %v17016_v43, %v17025_v39  ;;  %v17026_v13 = vld [vmem:[#allocation27_spill] sm:$0xff]  ;;  %v17027_v36 = vld [vmem:[#allocation57_spill] sm:$0xff]  ;;  %v9382_v34 = vrot.slane %v1926_v47, 4 }
 0x18a   : > { %v1932_v0 = vmul.f32 %v17016_v43, %v17024_v50  ;;  %v1934_v62 = vmul.f32 %v17016_v43, %v17026_v13  ;;  %v9346_v37 = vmul.f32 %v17016_v43, %v17027_v36  ;;  %v17028_v23 = vld [vmem:[#allocation26_spill] sm:$0xff]  ;;  %v17029_v26 = vld [vmem:[#allocation28_spill] sm:$0xff]  ;;  %v17031_v50 = vld [vmem:[#allocation29_spill] sm:$0xff]  ;;  %v2021_v41 = vrot.slane %v1928_v32, 4 }
 0x18b   : > { %v1936_v8 = vmul.f32 %v17016_v43, %v17028_v23  ;;  %v1937_v5 = vmul.f32 %v17016_v43, %v17029_v26  ;;  %v17030_v42 = vld [vmem:[#allocation58_spill] sm:$0xff]  ;;  %v1939_v39 = vmul.f32 %v17016_v43, %v17031_v50  ;;  %v17032_v22 = vld [vmem:[#allocation33_spill] sm:$0xff]  ;;  %v17033_v36 = vld [vmem:[#allocation59_spill] sm:$0xff]  ;;  %v9384_v10 = vrot.slane %v1929_v29, 4 }
 0x18c   : > { %v9354_v63 = vmul.f32 %v17016_v43, %v17030_v42  ;;  %v1940_v13 = vmul.f32 %v17016_v43, %v17032_v22  ;;  %v9362_v51 = vmul.f32 %v17016_v43, %v17033_v36  ;;  %v17035_v23 = vld [vmem:[#allocation30_spill] sm:$0xff]  ;;  %v17037_v42 = vld [vmem:[#allocation60_spill] sm:$0xff]  ;;  %v17039_v50 = vld [vmem:[#allocation31_spill] sm:$0xff]  ;;  %v2026_v12 = vrot.slane %v1931_v46, 4 }
 0x18d   : > { %v1942_v44 = vmul.f32 %v17016_v43, %v17035_v23  ;;  %v17036_v26 = vld [vmem:[#allocation34_spill] sm:$0xff]  ;;  %v9370_v56 = vmul.f32 %v17016_v43, %v17037_v42  ;;  %v1945_v48 = vmul.f32 %v17016_v43, %v17039_v50  ;;  %v17040_v22 = vld [vmem:[#allocation11_spill] sm:$0xff]  ;;  %v17041_v52 = vld [vmem:[#allocation61_spill] sm:$0xff]  ;;  %v9387_v42 = vsel %vm2014_vm4, %v2015_v9, %v2016_v21 }
 0x18e   : > { %17034 = vst [vmem:[#allocation94_spill] sm:$0xff] %v9362_v51  ;;  %v1943_v28 = vmul.f32 %v17016_v43, %v17036_v26  ;;  %v1946_v38 = vmul.f32 %v17016_v43, %v17040_v22  ;;  %v9378_v36 = vmul.f32 %v17016_v43, %v17041_v52  ;;  %v17043_v35 = vld [vmem:[#allocation32_spill] sm:$0xff]  ;;  %v2020_v26 = vrot.slane %v1927_v19, 4 }
 0x18f   : > { %17038 = vst [vmem:[#allocation95_spill] sm:$0xff] %v9370_v56  ;;  %v1948_v23 = vmul.f32 %v17016_v43, %v17043_v35  ;;  %v2025_v50 = vrot.slane %v1930_v14, 4  ;;  %v9389_v57 = vrot.slane %v1932_v0, 4  ;;  %v2030_v22 = vrot.slane %v1933_v59, 4 }
 0x190   : > { %17042 = vst [vmem:[#allocation64_spill] sm:$0xff] %v9378_v36  ;;  %v2031_v27 = vrot.slane %v1934_v62, 4  ;;  %v15894_v52 = vrot.slane %v9346_v37, 4  ;;  %v2035_v49 = vrot.slane %v1936_v8, 4  ;;  %v2036_v53 = vrot.slane %v1937_v5, 4 }
 0x191   : > { %v15893_v43 = vrot.slane %v9354_v63, 4  ;;  %v2040_v47 = vrot.slane %v1939_v39, 4  ;;  %v2041_v19 = vrot.slane %v1940_v13, 4  ;;  %v15892_v32 = vrot.slane %v9362_v51, 4 }
 0x192   : > { %v2045_v29 = vrot.slane %v1942_v44, 4  ;;  %v2046_v35 = vrot.slane %v1943_v28, 4  ;;  %v15891_v9 = vrot.slane %v9370_v56, 4  ;;  %v2050_v14 = vrot.slane %v1945_v48, 4 }
 0x193   : > { %v2051_v46 = vrot.slane %v1946_v38, 4  ;;  %v15890_v0 = vrot.slane %v9378_v36, 4  ;;  %v2055_v59 = vrot.slane %v1948_v23, 4  ;;  %v9398_v62 = vsel %vm2014_vm4, %v2016_v21, %v9382_v34 }
 0x194   : > { %v9401_v5 = vsel %vm2014_vm4, %v2020_v26, %v2021_v41  ;;  %v9405_v8 = vsel %vm2014_vm4, %v2021_v41, %v9384_v10  ;;  %v2027_v28 = vsel %vm2014_vm4, %v2025_v50, %v2026_v12  ;;  %v9410_v48 = vsel %vm2014_vm4, %v2026_v12, %v9389_v57 }
 0x195   : > { %v2032_v44 = vsel %vm2014_vm4, %v2030_v22, %v2031_v27  ;;  %v2034_v21 = vsel %vm2014_vm4, %v2031_v27, %v15894_v52  ;;  %v9417_v13 = vsel %vm2014_vm4, %v2035_v49, %v2036_v53  ;;  %v9422_v41 = vsel %vm2014_vm4, %v2036_v53, %v15893_v43  ;;  %v17069_v52 = vld [vmem:[#allocation50_spill] sm:$0xff] }
 0x196   : > { %v9425_v39 = vsel %vm2014_vm4, %v2040_v47, %v2041_v19  ;;  %v9430_v12 = vsel %vm2014_vm4, %v2041_v19, %v15892_v32  ;;  %v9433_v22 = vsel %vm2014_vm4, %v2045_v29, %v2046_v35  ;;  %v9438_v49 = vsel %vm2014_vm4, %v2046_v35, %v15891_v9  ;;  %v17062_v29 = vld [vmem:[#allocation102_spill] sm:$0xff]  ;;  %v17067_v9 = vld [vmem:[#allocation40_spill] sm:$0xff] }
 0x197   : > { %17044 = vst [vmem:[#allocation78_spill] sm:$0xff] %v9425_v39  ;;  %17045 = vst [vmem:[#allocation65_spill] sm:$0xff] %v9430_v12  ;;  %v9441_v27 = vsel %vm2014_vm4, %v2050_v14, %v2051_v46  ;;  %v9446_v53 = vsel %vm2014_vm4, %v2051_v46, %v15890_v0  ;;  %v17050_v50 = vrot.slane %v9040_v7, 4  ;;  %v9455_v26 = vadd.f32 %v9387_v42, %v9180_v1  ;;  %v17066_v0 = vld [vmem:[#allocation49_spill] sm:$0xff]  ;;  %v17068_v32 = vld [vmem:[#allocation18_spill] sm:$0xff] }
 0x198   : > { %17046 = vst [vmem:[#allocation79_spill] sm:$0xff] %v9433_v22  ;;  %17047 = vst [vmem:[#allocation66_spill] sm:$0xff] %v9438_v49  ;;  %v9459_v35 = vadd.f32 %v9398_v62, %v9184_v25  ;;  %v9463_v38 = vadd.f32 %v9382_v34, %v9189_v60  ;;  %v9467_v47 = vadd.f32 %v9401_v5, %v9193_v3  ;;  %v17061_v3 = vld [vmem:[#allocation44_spill] sm:$0xff] }
 0x199   : > { %17048 = vst [vmem:[#allocation107_spill] sm:$0xff] %v9441_v27  ;;  %17049 = vst [vmem:[#allocation62_spill] sm:$0xff] %v9446_v53  ;;  %v9451_v23 = vsel %vm2014_vm4, %v2055_v59, %v17050_v50  ;;  %v9471_v7 = vadd.f32 %v9405_v8, %v9197_v16  ;;  %v9475_v1 = vadd.f32 %v9384_v10, %v9202_v33  ;;  %v17063_v16 = vld [vmem:[#allocation48_spill] sm:$0xff]  ;;  %v17064_v33 = vld [vmem:[#allocation39_spill] sm:$0xff] }
 0x19a   : > { %17051 = vst [vmem:[#allocation80_spill] sm:$0xff] %v9451_v23  ;;  %17052 = vst [vmem:[#allocation67_spill] sm:$0xff] %v9455_v26  ;;  %v9478_v19 = vadd.f32 %v2027_v28, %v9206_v17  ;;  %v9482_v25 = vadd.f32 %v9410_v48, %v9210_v6  ;;  %v9486_v60 = vadd.f32 %v9389_v57, %v9215_v55  ;;  %v17065_v17 = vld [vmem:[#allocation17_spill] sm:$0xff] }
 0x19b   : > { %17053 = vst [vmem:[#allocation81_spill] sm:$0xff] %v9459_v35  ;;  %17054 = vst [vmem:[#allocation111_spill] sm:$0xff] %v9463_v38  ;;  %v9490_v14 = vmul.f32 %v17062_v29, %v17061_v3  ;;  %v2225_v46 = vmul.f32 %v17062_v29, %v17063_v16  ;;  %v2226_v59 = vmul.f32 %v17062_v29, %v17064_v33  ;;  %v17076_v38 = vld [vmem:[#allocation43_spill] sm:$0xff]  ;;  %v17077_v35 = vld [vmem:[#allocation21_spill] sm:$0xff] }
 0x19c   : > { %17055 = vst [vmem:[#allocation108_spill] sm:$0xff] %v9467_v47  ;;  %17056 = vst [vmem:[#allocation68_spill] sm:$0xff] %v9471_v7  ;;  %v2227_v50 = vmul.f32 %v17062_v29, %v17065_v17  ;;  %v2228_v6 = vmul.f32 %v17062_v29, %v17066_v0  ;;  %v2229_v55 = vmul.f32 %v17062_v29, %v17067_v9  ;;  %v17074_v7 = vld [vmem:[#allocation20_spill] sm:$0xff]  ;;  %v17078_v26 = vld [vmem:[#allocation53_spill] sm:$0xff] }
 0x19d   : > { %17057 = vst [vmem:[#allocation87_spill] sm:$0xff] %v9475_v1  ;;  %17058 = vst [vmem:[#allocation112_spill] sm:$0xff] %v9478_v19  ;;  %v2230_v43 = vmul.f32 %v17062_v29, %v17068_v32  ;;  %v2231_v3 = vmul.f32 %v17062_v29, %v17069_v52  ;;  %v17072_v19 = vld [vmem:[#allocation51_spill] sm:$0xff]  ;;  %v17073_v1 = vld [vmem:[#allocation42_spill] sm:$0xff]  ;;  %v2236_v9 = vmul.f32 %v17062_v29, %v17074_v7  ;;  %v2342_v23 = vrot.slane %v2225_v46, 4 }
 0x19e   : > { %17059 = vst [vmem:[#allocation125_spill] sm:$0xff] %v9482_v25  ;;  %17060 = vst [vmem:[#allocation69_spill] sm:$0xff] %v9486_v60  ;;  %v17070_v60 = vld [vmem:[#allocation41_spill] sm:$0xff]  ;;  %v17071_v25 = vld [vmem:[#allocation19_spill] sm:$0xff]  ;;  %v2234_v17 = vmul.f32 %v17062_v29, %v17072_v19  ;;  %v2235_v0 = vmul.f32 %v17062_v29, %v17073_v1  ;;  %v2238_v52 = vmul.f32 %v17062_v29, %v17076_v38  ;;  %v15899_v19 = vrot.slane %v9490_v14, 4 }
 0x19f   : > { %v2232_v16 = vmul.f32 %v17062_v29, %v17070_v60  ;;  %v2233_v33 = vmul.f32 %v17062_v29, %v17071_v25  ;;  %v17075_v47 = vld [vmem:[#allocation52_spill] sm:$0xff]  ;;  %v2239_v60 = vmul.f32 %v17062_v29, %v17077_v35  ;;  %v2240_v25 = vmul.f32 %v17062_v29, %v17078_v26 }
 0x1a0   : > { %v2237_v32 = vmul.f32 %v17062_v29, %v17075_v47  ;;  %v2344_v36 = vrot.slane %v2226_v59, 4  ;;  %v2345_v1 = vrot.slane %v2227_v50, 4  ;;  %v2347_v53 = vrot.slane %v2228_v6, 4  ;;  %v17108_v50 = vld [vmem:[#allocation118_spill] sm:$0xff] }
 0x1a1   : > { %v2349_v27 = vrot.slane %v2229_v55, 4  ;;  %v2350_v7 = vrot.slane %v2230_v43, 4  ;;  %v2352_v56 = vrot.slane %v2231_v3, 4  ;;  %v2354_v49 = vrot.slane %v2232_v16, 4  ;;  %v17110_v55 = vld [vmem:[#allocation98_spill] sm:$0xff] }
 0x1a2   : > { %v2355_v47 = vrot.slane %v2233_v33, 4  ;;  %v2357_v22 = vrot.slane %v2234_v17, 4  ;;  %v2359_v51 = vrot.slane %v2235_v0, 4  ;;  %v2360_v38 = vrot.slane %v2236_v9, 4  ;;  %v17107_v33 = vld [vmem:[#allocation100_spill] sm:$0xff] }
 0x1a3   : > { %v2362_v12 = vrot.slane %v2237_v32, 4  ;;  %v9526_v35 = vadd.f32 %v2032_v44, %v9219_v45  ;;  %v2364_v39 = vrot.slane %v2238_v52, 4  ;;  %v2365_v26 = vrot.slane %v2239_v60, 4  ;;  %v17106_v60 = vld [vmem:[#allocation119_spill] sm:$0xff] }
 0x1a4   : > { %v2367_v29 = vrot.slane %v2240_v25, 4  ;;  %v9529_v46 = vadd.f32 %v2034_v21, %v9223_v40  ;;  %v17079_v59 = vrot.slane %v9346_v37, 4  ;;  %v9537_v3 = vadd.f32 %v2027_v28, %v9232_v30 }
 0x1a5   : > { %v2343_v32 = vsel %vm2014_vm4, %v15899_v19, %v2342_v23  ;;  %v2346_v45 = vsel %vm2014_vm4, %v2344_v36, %v2345_v1  ;;  %v2348_v52 = vsel %vm2014_vm4, %v2345_v1, %v2347_v53  ;;  %v2351_v9 = vsel %vm2014_vm4, %v2349_v27, %v2350_v7  ;;  %v17164_v19 = vld [vmem:[#allocation9_spill] sm:$0xff] }
 0x1a6   : > { %v9534_v43 = vadd.f32 %v17079_v59, %v9228_v2  ;;  %v2353_v40 = vsel %vm2014_vm4, %v2350_v7, %v2352_v56  ;;  %v2356_v0 = vsel %vm2014_vm4, %v2354_v49, %v2355_v47  ;;  %v2358_v2 = vsel %vm2014_vm4, %v2355_v47, %v2357_v22 }
 0x1a7   : > { %v2361_v37 = vsel %vm2014_vm4, %v2359_v51, %v2360_v38  ;;  %v2363_v30 = vsel %vm2014_vm4, %v2360_v38, %v2362_v12  ;;  %v2366_v28 = vsel %vm2014_vm4, %v2364_v39, %v2365_v26  ;;  %v2368_v44 = vsel %vm2014_vm4, %v2365_v26, %v2367_v29 }
 0x1a8   : > { %v9553_v36 = vadd.f32 %v2343_v32, %v9105_v20  ;;  %v9556_v21 = vadd.f32 %v2342_v23, %v9108_v24  ;;  %v9559_v27 = vadd.f32 %v2346_v45, %v9111_v54  ;;  %v9562_v49 = vadd.f32 %v2348_v52, %v9114_v31  ;;  %v17090_v31 = vld [vmem:[#allocation109_spill] sm:$0xff]  ;;  %v17113_v45 = vld [vmem:[#allocation82_spill] sm:$0xff] }
 0x1a9   : > { %v9565_v51 = vadd.f32 %v2347_v53, %v9117_v11  ;;  %v9568_v38 = vadd.f32 %v2351_v9, %v9120_v61  ;;  %v9571_v39 = vadd.f32 %v2353_v40, %v9123_v58  ;;  %v9574_v20 = vadd.f32 %v2352_v56, %v9126_v15  ;;  %v17092_v11 = vld [vmem:[#allocation114_spill] sm:$0xff]  ;;  %v17094_v61 = vld [vmem:[#allocation71_spill] sm:$0xff]  ;;  %v17098_v15 = vld [vmem:[#allocation72_spill] sm:$0xff] }
 0x1aa   : > { %17080 = vst [vmem:[#allocation23_spill] sm:$0xff] %v9553_v36  ;;  %17081 = vst [vmem:[#allocation113_spill] sm:$0xff] %v9556_v21  ;;  %v9577_v24 = vadd.f32 %v2356_v0, %v9129_v18  ;;  %v9580_v54 = vadd.f32 %v2358_v2, %v9132_v4  ;;  %v9583_v23 = vadd.f32 %v2357_v22, %v17090_v31  ;;  %v17096_v58 = vld [vmem:[#allocation115_spill] sm:$0xff]  ;;  %v17100_v18 = vld [vmem:[#allocation116_spill] sm:$0xff] }
 0x1ab   : > { %17082 = vst [vmem:[#allocation126_spill] sm:$0xff] %v9559_v27  ;;  %17083 = vst [vmem:[#allocation70_spill] sm:$0xff] %v9562_v49  ;;  %v9586_v53 = vadd.f32 %v2361_v37, %v17092_v11  ;;  %v9589_v26 = vadd.f32 %v2363_v30, %v17094_v61  ;;  %v9592_v47 = vadd.f32 %v2362_v12, %v17096_v58  ;;  %v17102_v4 = vld [vmem:[#allocation96_spill] sm:$0xff]  ;;  %v17104_v22 = vld [vmem:[#allocation117_spill] sm:$0xff] }
 0x1ac   : > { %17084 = vst [vmem:[#allocation127_spill] sm:$0xff] %v9565_v51  ;;  %17085 = vst [vmem:[#allocation97_spill] sm:$0xff] %v9568_v38  ;;  %v9595_v56 = vadd.f32 %v2366_v28, %v17098_v15  ;;  %v9598_v7 = vadd.f32 %v2368_v44, %v17100_v18  ;;  %v9601_v1 = vadd.f32 %v2367_v29, %v17102_v4  ;;  %v17112_v32 = vld [vmem:[#allocation121_spill] sm:$0xff]  ;;  %v17116_v0 = vld [vmem:[#allocation63_spill] sm:$0xff] }
 0x1ad   : > { %17086 = vst [vmem:[#allocation76_spill] sm:$0xff] %v9571_v39  ;;  %17087 = vst [vmem:[#allocation99_spill] sm:$0xff] %v9574_v20  ;;  %v9604_v25 = vadd.f32 %v2361_v37, %v17104_v22  ;;  %v9608_v16 = vadd.f32 %v9410_v48, %v17106_v60  ;;  %v9612_v17 = vadd.f32 %v9389_v57, %v17107_v33  ;;  %v17114_v48 = vld [vmem:[#allocation110_spill] sm:$0xff]  ;;  %v17115_v57 = vld [vmem:[#allocation83_spill] sm:$0xff] }
 0x1ae   : > { %17088 = vst [vmem:[#allocation120_spill] sm:$0xff] %v9577_v24  ;;  %17089 = vst [vmem:[#allocation122_spill] sm:$0xff] %v9580_v54  ;;  %v9615_v6 = vadd.f32 %v2363_v30, %v17108_v50  ;;  %v9618_v59 = vadd.f32 %v2362_v12, %v17110_v55  ;;  %v9622_v29 = vadd.f32 %v9401_v5, %v17112_v32  ;;  %v17117_v2 = vld [vmem:[#allocation84_spill] sm:$0xff]  ;;  %v17118_v37 = vld [vmem:[#allocation45_spill] sm:$0xff] }
 0x1af   : > { %17091 = vst [vmem:[#allocation74_spill] sm:$0xff] %v9583_v23  ;;  %17093 = vst [vmem:[#allocation123_spill] sm:$0xff] %v9586_v53  ;;  %v9626_v52 = vadd.f32 %v9405_v8, %v17113_v45  ;;  %v9630_v9 = vadd.f32 %v9384_v10, %v17114_v48  ;;  %v9634_v40 = vadd.f32 %v9387_v42, %v17115_v57  ;;  %v17119_v30 = vld [vmem:[#allocation85_spill] sm:$0xff]  ;;  %v17121_v42 = vrot.slane %v9354_v63, 4  ;;  %v17122_v31 = vld [vmem:[#allocation86_spill] sm:$0xff] }
 0x1b0   : > { %17095 = vst [vmem:[#allocation101_spill] sm:$0xff] %v9589_v26  ;;  %17097 = vst [vmem:[#allocation124_spill] sm:$0xff] %v9592_v47  ;;  %v9638_v12 = vadd.f32 %v9398_v62, %v17116_v0  ;;  %v9642_v5 = vadd.f32 %v9382_v34, %v17117_v2  ;;  %v9646_v8 = vadd.f32 %v9417_v13, %v17118_v37  ;;  %v17120_v28 = vld [vmem:[#allocation77_spill] sm:$0xff]  ;;  %v17123_v62 = vld [vmem:[#allocation78_spill] sm:$0xff] }
 0x1b1   : > { %17099 = vst [vmem:[#allocation75_spill] sm:$0xff] %v9595_v56  ;;  %17101 = vst [vmem:[#allocation109_spill] sm:$0xff] %v9598_v7  ;;  %v9650_v10 = vadd.f32 %v9422_v41, %v17119_v30  ;;  %v9655_v44 = vadd.f32 %v17121_v42, %v17120_v28  ;;  %v9659_v11 = vadd.f32 %v17123_v62, %v17122_v31  ;;  %v17124_v61 = vld [vmem:[#allocation88_spill] sm:$0xff]  ;;  %v17125_v34 = vld [vmem:[#allocation65_spill] sm:$0xff] }
 0x1b2   : > { %17103 = vst [vmem:[#allocation114_spill] sm:$0xff] %v9601_v1  ;;  %17105 = vst [vmem:[#allocation71_spill] sm:$0xff] %v9604_v25  ;;  %v9663_v58 = vadd.f32 %v17125_v34, %v17124_v61  ;;  %v17126_v15 = vld [vmem:[#allocation106_spill] sm:$0xff]  ;;  %v17130_v41 = vld [vmem:[#allocation89_spill] sm:$0xff] }
 0x1b3   : > { %17109 = vst [vmem:[#allocation115_spill] sm:$0xff] %v9615_v6  ;;  %17111 = vst [vmem:[#allocation72_spill] sm:$0xff] %v9618_v59  ;;  %v17127_v13 = vld [vmem:[#allocation94_spill] sm:$0xff]  ;;  %v17131_v22 = vld [vmem:[#allocation79_spill] sm:$0xff] }
 0x1b4   : > { %v17128_v18 = vrot.slane %v17127_v13, 4  ;;  %v9672_v60 = vadd.f32 %v17131_v22, %v17130_v41  ;;  %v17133_v63 = vld [vmem:[#allocation90_spill] sm:$0xff]  ;;  %v17136_v55 = vld [vmem:[#allocation93_spill] sm:$0xff]  ;;  %v17137_v32 = vld [vmem:[#allocation95_spill] sm:$0xff] }
 0x1b5   : > { %v17134_v33 = vld [vmem:[#allocation66_spill] sm:$0xff]  ;;  %v17138_v45 = vrot.slane %v17137_v32, 4  ;;  %v17140_v57 = vld [vmem:[#allocation55_spill] sm:$0xff]  ;;  %v17146_v42 = vld [vmem:[#allocation92_spill] sm:$0xff] }
 0x1b6   : > { %v9668_v4 = vadd.f32 %v17128_v18, %v17126_v15  ;;  %17132 = vst [vmem:[#allocation96_spill] sm:$0xff] %v9672_v60  ;;  %v9676_v50 = vadd.f32 %v17134_v33, %v17133_v63  ;;  %v17141_v0 = vld [vmem:[#allocation107_spill] sm:$0xff]  ;;  %v17144_v30 = vld [vmem:[#allocation62_spill] sm:$0xff]  ;;  %v17147_v31 = vld [vmem:[#allocation64_spill] sm:$0xff] }
 0x1b7   : > { %v9681_v48 = vadd.f32 %v17138_v45, %v17136_v55  ;;  %v9685_v2 = vadd.f32 %v17141_v0, %v17140_v57  ;;  %v17143_v37 = vld [vmem:[#allocation91_spill] sm:$0xff]  ;;  %v17148_v62 = vrot.slane %v17147_v31, 4  ;;  %v17150_v34 = vld [vmem:[#allocation54_spill] sm:$0xff]  ;;  %v17151_v15 = vld [vmem:[#allocation80_spill] sm:$0xff] }
 0x1b8   : > { %17129 = vst [vmem:[#allocation116_spill] sm:$0xff] %v9668_v4  ;;  %17135 = vst [vmem:[#allocation117_spill] sm:$0xff] %v9676_v50  ;;  %v9689_v28 = vadd.f32 %v17144_v30, %v17143_v37  ;;  %v9698_v13 = vadd.f32 %v17151_v15, %v17150_v34  ;;  %v17153_v18 = vld [vmem:[#allocation24_spill] sm:$0xff]  ;;  %v17154_v41 = vld [vmem:[#allocation102_spill] sm:$0xff] }
 0x1b9   : > { %17139 = vst [vmem:[#allocation119_spill] sm:$0xff] %v9681_v48  ;;  %17142 = vst [vmem:[#allocation100_spill] sm:$0xff] %v9685_v2  ;;  %v9694_v61 = vadd.f32 %v17148_v62, %v17146_v42  ;;  %v2193_v22 = vmul.f32 %v17154_v41, %v17153_v18  ;;  %v17155_v63 = vld [vmem:[#allocation10_spill] sm:$0xff]  ;;  %v17156_v55 = vld [vmem:[#allocation56_spill] sm:$0xff] }
 0x1ba   : > { %17145 = vst [vmem:[#allocation118_spill] sm:$0xff] %v9689_v28  ;;  %17152 = vst [vmem:[#allocation121_spill] sm:$0xff] %v9698_v13  ;;  %v2194_v33 = vmul.f32 %v17154_v41, %v17155_v63  ;;  %v2195_v32 = vmul.f32 %v17154_v41, %v17156_v55  ;;  %v17157_v45 = vld [vmem:[#allocation25_spill] sm:$0xff]  ;;  %v17158_v0 = vld [vmem:[#allocation27_spill] sm:$0xff] }
 0x1bb   : > { %17149 = vst [vmem:[#allocation98_spill] sm:$0xff] %v9694_v61  ;;  %v2196_v57 = vmul.f32 %v17154_v41, %v17157_v45  ;;  %v2197_v37 = vmul.f32 %v17154_v41, %v17158_v0  ;;  %v17159_v30 = vld [vmem:[#allocation57_spill] sm:$0xff]  ;;  %v17160_v31 = vld [vmem:[#allocation14_spill] sm:$0xff]  ;;  %v17162_v18 = vld [vmem:[#allocation36_spill] sm:$0xff]  ;;  %v2203_v0 = vmul.f32 %v17154_v41, %v17164_v19 }
 0x1bc   : > { %v9712_v42 = vmul.f32 %v17154_v41, %v17159_v30  ;;  %v2199_v62 = vmul.f32 %v17154_v41, %v17160_v31  ;;  %v17161_v34 = vld [vmem:[#allocation22_spill] sm:$0xff]  ;;  %v9720_v63 = vmul.f32 %v17154_v41, %v17162_v18  ;;  %v17163_v55 = vld [vmem:[#allocation12_spill] sm:$0xff]  ;;  %v17165_v36 = vld [vmem:[#allocation35_spill] sm:$0xff] }
 0x1bd   : > { %v2200_v15 = vmul.f32 %v17154_v41, %v17161_v34  ;;  %v2202_v45 = vmul.f32 %v17154_v41, %v17163_v55  ;;  %v9728_v30 = vmul.f32 %v17154_v41, %v17165_v36  ;;  %v17166_v59 = vld [vmem:[#allocation26_spill] sm:$0xff]  ;;  %v17167_v25 = vld [vmem:[#allocation28_spill] sm:$0xff]  ;;  %v17169_v47 = vld [vmem:[#allocation29_spill] sm:$0xff]  ;;  %v2294_v36 = vrot.slane %v2196_v57, 4 }
 0x1be   : > { %v2205_v6 = vmul.f32 %v17154_v41, %v17166_v59  ;;  %v2206_v1 = vmul.f32 %v17154_v41, %v17167_v25  ;;  %v17168_v7 = vld [vmem:[#allocation58_spill] sm:$0xff]  ;;  %v2208_v26 = vmul.f32 %v17154_v41, %v17169_v47  ;;  %v17170_v53 = vld [vmem:[#allocation33_spill] sm:$0xff]  ;;  %v17171_v54 = vld [vmem:[#allocation59_spill] sm:$0xff]  ;;  %v2290_v25 = vrot.slane %v2194_v33, 4 }
 0x1bf   : > { %v9736_v56 = vmul.f32 %v17154_v41, %v17168_v7  ;;  %v2209_v23 = vmul.f32 %v17154_v41, %v17170_v53  ;;  %v9744_v24 = vmul.f32 %v17154_v41, %v17171_v54  ;;  %v17172_v20 = vld [vmem:[#allocation30_spill] sm:$0xff]  ;;  %v17174_v49 = vld [vmem:[#allocation60_spill] sm:$0xff]  ;;  %v17175_v21 = vld [vmem:[#allocation31_spill] sm:$0xff]  ;;  %v2289_v7 = vrot.slane %v2193_v22, 4 }
 0x1c0   : > { %v2211_v39 = vmul.f32 %v17154_v41, %v17172_v20  ;;  %v17173_v38 = vld [vmem:[#allocation34_spill] sm:$0xff]  ;;  %v9752_v27 = vmul.f32 %v17154_v41, %v17174_v49  ;;  %v2214_v47 = vmul.f32 %v17154_v41, %v17175_v21  ;;  %v9756_v53 = vrot.slane %v2195_v32, 4  ;;  %v17176_v59 = vld [vmem:[#allocation11_spill] sm:$0xff]  ;;  %v17177_v55 = vld [vmem:[#allocation61_spill] sm:$0xff] }
 0x1c1   : > { %v2212_v51 = vmul.f32 %v17154_v41, %v17173_v38  ;;  %v2215_v54 = vmul.f32 %v17154_v41, %v17176_v59  ;;  %v2295_v19 = vrot.slane %v2197_v37, 4  ;;  %v2297_v20 = vrot.slane %v9712_v42, 4  ;;  %v17178_v49 = vld [vmem:[#allocation32_spill] sm:$0xff]  ;;  %v17179_v22 = vld [vmem:[#allocation15_spill] sm:$0xff]  ;;  %v17180_v32 = vld [vmem:[#allocation46_spill] sm:$0xff] }
 0x1c2   : > { %v9763_v38 = vmul.f32 %v17154_v41, %v17177_v55  ;;  %v2217_v18 = vmul.f32 %v17154_v41, %v17178_v49  ;;  %v2299_v34 = vrot.slane %v2199_v62, 4  ;;  %v2300_v21 = vrot.slane %v2200_v15, 4  ;;  %v17181_v57 = vld [vmem:[#allocation37_spill] sm:$0xff]  ;;  %v17182_v42 = vld [vmem:[#allocation16_spill] sm:$0xff]  ;;  %v17183_v55 = vld [vmem:[#allocation47_spill] sm:$0xff] }
 0x1c3   : > { %v2218_v33 = vmul.f32 %v17154_v41, %v17179_v22  ;;  %v9771_v31 = vmul.f32 %v17154_v41, %v17180_v32  ;;  %v2220_v37 = vmul.f32 %v17154_v41, %v17181_v57  ;;  %v2221_v59 = vmul.f32 %v17154_v41, %v17182_v42  ;;  %v17184_v49 = vld [vmem:[#allocation38_spill] sm:$0xff] }
 0x1c4   : > { %v9779_v13 = vmul.f32 %v17154_v41, %v17183_v55  ;;  %v2223_v62 = vmul.f32 %v17154_v41, %v17184_v49  ;;  %v2291_v15 = vsel %vm2014_vm4, %v2289_v7, %v2290_v25  ;;  %v2293_v22 = vsel %vm2014_vm4, %v2290_v25, %v9756_v53 }
 0x1c5   : > { %v2296_v32 = vsel %vm2014_vm4, %v2294_v36, %v2295_v19  ;;  %v2298_v61 = vsel %vm2014_vm4, %v2295_v19, %v2297_v20  ;;  %v2302_v57 = vrot.slane %v9720_v63, 4  ;;  %v2304_v28 = vrot.slane %v2202_v45, 4 }
 0x1c6   : > { %v2301_v42 = vsel %vm2014_vm4, %v2299_v34, %v2300_v21  ;;  %v2305_v2 = vrot.slane %v2203_v0, 4  ;;  %v2307_v55 = vrot.slane %v9728_v30, 4  ;;  %v2309_v48 = vrot.slane %v2205_v6, 4 }
 0x1c7   : > { %v2310_v50 = vrot.slane %v2206_v1, 4  ;;  %v2312_v41 = vrot.slane %v9736_v56, 4  ;;  %v2314_v7 = vrot.slane %v2208_v26, 4  ;;  %v2315_v49 = vrot.slane %v2209_v23, 4 }
 0x1c8   : > { %v2317_v25 = vrot.slane %v9744_v24, 4  ;;  %v2319_v60 = vrot.slane %v2211_v39, 4  ;;  %v2320_v36 = vrot.slane %v2212_v51, 4  ;;  %v2322_v19 = vrot.slane %v9752_v27, 4 }
 0x1c9   : > { %v2324_v4 = vrot.slane %v2214_v47, 4  ;;  %v2325_v63 = vrot.slane %v2215_v54, 4  ;;  %v2327_v45 = vrot.slane %v9763_v38, 4  ;;  %v2329_v34 = vrot.slane %v2217_v18, 4  ;;  %v17186_v18 = vld [vmem:[#allocation67_spill] sm:$0xff] }
 0x1ca   : > { %v2330_v0 = vrot.slane %v2218_v33, 4  ;;  %v2332_v30 = vrot.slane %v9771_v31, 4  ;;  %v2334_v6 = vrot.slane %v2220_v37, 4  ;;  %v2335_v1 = vrot.slane %v2221_v59, 4  ;;  %v17187_v33 = vld [vmem:[#allocation81_spill] sm:$0xff] }
 0x1cb   : > { %v2303_v56 = vsel %vm2014_vm4, %v2300_v21, %v2302_v57  ;;  %v2306_v23 = vsel %vm2014_vm4, %v2304_v28, %v2305_v2  ;;  %v2337_v24 = vrot.slane %v9779_v13, 4  ;;  %v2339_v39 = vrot.slane %v2223_v62, 4 }
 0x1cc   : > { %v2308_v51 = vsel %vm2014_vm4, %v2305_v2, %v2307_v55  ;;  %v2311_v27 = vsel %vm2014_vm4, %v2309_v48, %v2310_v50  ;;  %v2313_v54 = vsel %vm2014_vm4, %v2310_v50, %v2312_v41  ;;  %v2316_v38 = vsel %vm2014_vm4, %v2314_v7, %v2315_v49  ;;  %v17189_v7 = vld [vmem:[#allocation108_spill] sm:$0xff] }
 0x1cd   : > { %v2318_v26 = vsel %vm2014_vm4, %v2315_v49, %v2317_v25  ;;  %v2321_v47 = vsel %vm2014_vm4, %v2319_v60, %v2320_v36  ;;  %v2323_v59 = vsel %vm2014_vm4, %v2320_v36, %v2322_v19  ;;  %v2326_v21 = vsel %vm2014_vm4, %v2324_v4, %v2325_v63  ;;  %v17188_v4 = vld [vmem:[#allocation111_spill] sm:$0xff] }
 0x1ce   : > { %v2328_v28 = vsel %vm2014_vm4, %v2325_v63, %v2327_v45  ;;  %v2331_v13 = vsel %vm2014_vm4, %v2329_v34, %v2330_v0  ;;  %v2333_v2 = vsel %vm2014_vm4, %v2330_v0, %v2332_v30  ;;  %v2336_v48 = vsel %vm2014_vm4, %v2334_v6, %v2335_v1  ;;  %v17190_v63 = vld [vmem:[#allocation68_spill] sm:$0xff]  ;;  %v17191_v0 = vld [vmem:[#allocation87_spill] sm:$0xff] }
 0x1cf   : > { %v2338_v50 = vsel %vm2014_vm4, %v2335_v1, %v2337_v24  ;;  %v17185_v31 = vrot.slane %v9490_v14, 4  ;;  %v9816_v60 = vadd.f32 %v2291_v15, %v17186_v18  ;;  %v9819_v37 = vadd.f32 %v2293_v22, %v17187_v33  ;;  %v17192_v6 = vld [vmem:[#allocation112_spill] sm:$0xff]  ;;  %v17195_v18 = vld [vmem:[#allocation69_spill] sm:$0xff] }
 0x1d0   : > { %v9823_v62 = vadd.f32 %v9756_v53, %v17188_v4  ;;  %v9826_v36 = vadd.f32 %v2296_v32, %v17189_v7  ;;  %v9829_v34 = vadd.f32 %v2298_v61, %v17190_v63  ;;  %v9832_v14 = vadd.f32 %v2297_v20, %v17191_v0  ;;  %v17239_v63 = vld [vmem:[#allocation40_spill] sm:$0xff] }
 0x1d1   : > { %v2341_v49 = vsel %vm2014_vm4, %v2339_v39, %v17185_v31  ;;  %v9835_v1 = vadd.f32 %v2291_v15, %v17192_v6  ;;  %v17193_v39 = vld [vmem:[#allocation125_spill] sm:$0xff]  ;;  %v9842_v33 = vadd.f32 %v9756_v53, %v17195_v18  ;;  %v9845_v4 = vadd.f32 %v2301_v42, %v9526_v35  ;;  %v17240_v6 = vld [vmem:[#allocation42_spill] sm:$0xff]  ;;  %v17241_v18 = vld [vmem:[#allocation20_spill] sm:$0xff] }
 0x1d2   : > { %v9838_v31 = vadd.f32 %v2293_v22, %v17193_v39  ;;  %v9848_v32 = vadd.f32 %v2303_v56, %v9529_v46  ;;  %v9851_v61 = vadd.f32 %v2302_v57, %v9534_v43  ;;  %v9854_v20 = vadd.f32 %v2306_v23, %v9537_v3 }
 0x1d3   : > { %17196 = vst [vmem:[#allocation110_spill] sm:$0xff] %v9842_v33  ;;  %17197 = vst [vmem:[#allocation83_spill] sm:$0xff] %v9845_v4  ;;  %v9857_v15 = vadd.f32 %v2308_v51, %v9608_v16  ;;  %v9860_v22 = vadd.f32 %v2307_v55, %v9612_v17  ;;  %v9863_v53 = vadd.f32 %v2311_v27, %v9622_v29  ;;  %v17230_v51 = vld [vmem:[#allocation14_spill] sm:$0xff]  ;;  %v17231_v27 = vld [vmem:[#allocation73_spill] sm:$0xff] }
 0x1d4   : > { %17194 = vst [vmem:[#allocation82_spill] sm:$0xff] %v9838_v31  ;;  %17198 = vst [vmem:[#allocation63_spill] sm:$0xff] %v9848_v32  ;;  %v9866_v35 = vadd.f32 %v2313_v54, %v9626_v52  ;;  %v9869_v46 = vadd.f32 %v2312_v41, %v9630_v9  ;;  %v9872_v43 = vadd.f32 %v2316_v38, %v9634_v40  ;;  %v17232_v38 = vld [vmem:[#allocation22_spill] sm:$0xff]  ;;  %v17273_v32 = vld [vmem:[#allocation75_spill] sm:$0xff] }
 0x1d5   : > { %17199 = vst [vmem:[#allocation84_spill] sm:$0xff] %v9851_v61  ;;  %17200 = vst [vmem:[#allocation45_spill] sm:$0xff] %v9854_v20  ;;  %v9875_v3 = vadd.f32 %v2318_v26, %v9638_v12  ;;  %v9878_v16 = vadd.f32 %v2317_v25, %v9642_v5  ;;  %v9881_v17 = vadd.f32 %v2321_v47, %v9646_v8  ;;  %v17214_v12 = vld [vmem:[#allocation116_spill] sm:$0xff]  ;;  %v17218_v8 = vld [vmem:[#allocation117_spill] sm:$0xff] }
 0x1d6   : > { %17201 = vst [vmem:[#allocation85_spill] sm:$0xff] %v9857_v15  ;;  %17202 = vst [vmem:[#allocation77_spill] sm:$0xff] %v9860_v22  ;;  %v9884_v29 = vadd.f32 %v2323_v59, %v9650_v10  ;;  %v9887_v52 = vadd.f32 %v2322_v19, %v9655_v44  ;;  %v9890_v9 = vadd.f32 %v2326_v21, %v9659_v11  ;;  %v17216_v5 = vld [vmem:[#allocation96_spill] sm:$0xff]  ;;  %v17220_v10 = vld [vmem:[#allocation119_spill] sm:$0xff] }
 0x1d7   : > { %17203 = vst [vmem:[#allocation86_spill] sm:$0xff] %v9863_v53  ;;  %17204 = vst [vmem:[#allocation78_spill] sm:$0xff] %v9866_v35  ;;  %v9893_v40 = vadd.f32 %v2328_v28, %v9663_v58  ;;  %v9896_v55 = vadd.f32 %v2327_v45, %v17214_v12  ;;  %v9899_v57 = vadd.f32 %v2331_v13, %v17216_v5  ;;  %v17222_v44 = vld [vmem:[#allocation100_spill] sm:$0xff]  ;;  %v17224_v11 = vld [vmem:[#allocation118_spill] sm:$0xff] }
 0x1d8   : > { %17205 = vst [vmem:[#allocation88_spill] sm:$0xff] %v9869_v46  ;;  %17206 = vst [vmem:[#allocation65_spill] sm:$0xff] %v9872_v43  ;;  %v9902_v42 = vadd.f32 %v2333_v2, %v17218_v8  ;;  %v9905_v41 = vadd.f32 %v2332_v30, %v17220_v10  ;;  %v9908_v25 = vadd.f32 %v2336_v48, %v17222_v44  ;;  %v17226_v58 = vld [vmem:[#allocation98_spill] sm:$0xff]  ;;  %v17228_v45 = vld [vmem:[#allocation121_spill] sm:$0xff] }
 0x1d9   : > { %17207 = vst [vmem:[#allocation106_spill] sm:$0xff] %v9875_v3  ;;  %17208 = vst [vmem:[#allocation94_spill] sm:$0xff] %v9878_v16  ;;  %v9911_v19 = vadd.f32 %v2338_v50, %v17224_v11  ;;  %v9914_v56 = vadd.f32 %v2337_v24, %v17226_v58  ;;  %v9917_v23 = vadd.f32 %v2341_v49, %v17228_v45  ;;  %v17233_v26 = vld [vmem:[#allocation36_spill] sm:$0xff]  ;;  %v17235_v24 = vld [vmem:[#allocation9_spill] sm:$0xff] }
 0x1da   : > { %17209 = vst [vmem:[#allocation89_spill] sm:$0xff] %v9881_v17  ;;  %17210 = vst [vmem:[#allocation79_spill] sm:$0xff] %v9884_v29  ;;  %v9921_v54 = vmul.f32 %v17231_v27, %v17230_v51  ;;  %v9925_v30 = vmul.f32 %v17231_v27, %v17232_v38  ;;  %v9929_v47 = vmul.f32 %v17231_v27, %v17233_v26  ;;  %v17234_v59 = vld [vmem:[#allocation12_spill] sm:$0xff]  ;;  %v17236_v13 = vld [vmem:[#allocation41_spill] sm:$0xff] }
 0x1db   : > { %17211 = vst [vmem:[#allocation90_spill] sm:$0xff] %v9887_v52  ;;  %17212 = vst [vmem:[#allocation66_spill] sm:$0xff] %v9890_v9  ;;  %v9933_v21 = vmul.f32 %v17231_v27, %v17234_v59  ;;  %v9937_v28 = vmul.f32 %v17231_v27, %v17235_v24  ;;  %v2511_v2 = vmul.f32 %v17231_v27, %v17236_v13  ;;  %v17237_v48 = vld [vmem:[#allocation19_spill] sm:$0xff]  ;;  %v17242_v5 = vld [vmem:[#allocation52_spill] sm:$0xff] }
 0x1dc   : > { %17213 = vst [vmem:[#allocation93_spill] sm:$0xff] %v9893_v40  ;;  %17215 = vst [vmem:[#allocation95_spill] sm:$0xff] %v9896_v55  ;;  %v2512_v50 = vmul.f32 %v17231_v27, %v17237_v48  ;;  %v17238_v49 = vld [vmem:[#allocation51_spill] sm:$0xff]  ;;  %v2508_v0 = vmul.f32 %v17231_v27, %v17239_v63  ;;  %v2514_v39 = vmul.f32 %v17231_v27, %v17240_v6  ;;  %v17243_v10 = vld [vmem:[#allocation18_spill] sm:$0xff] }
 0x1dd   : > { %17217 = vst [vmem:[#allocation55_spill] sm:$0xff] %v9899_v57  ;;  %17219 = vst [vmem:[#allocation107_spill] sm:$0xff] %v9902_v42  ;;  %v2513_v7 = vmul.f32 %v17231_v27, %v17238_v49  ;;  %v2515_v12 = vmul.f32 %v17231_v27, %v17241_v18  ;;  %v2516_v8 = vmul.f32 %v17231_v27, %v17242_v5  ;;  %v17244_v11 = vld [vmem:[#allocation43_spill] sm:$0xff]  ;;  %v17245_v45 = vld [vmem:[#allocation21_spill] sm:$0xff] }
 0x1de   : > { %17221 = vst [vmem:[#allocation91_spill] sm:$0xff] %v9905_v41  ;;  %17223 = vst [vmem:[#allocation62_spill] sm:$0xff] %v9908_v25  ;;  %v2509_v44 = vmul.f32 %v17231_v27, %v17243_v10  ;;  %v2517_v58 = vmul.f32 %v17231_v27, %v17244_v11  ;;  %v2518_v51 = vmul.f32 %v17231_v27, %v17245_v45  ;;  %v17246_v38 = vld [vmem:[#allocation53_spill] sm:$0xff]  ;;  %v17247_v59 = vld [vmem:[#allocation35_spill] sm:$0xff]  ;;  %v2625_v45 = vrot.slane %v2511_v2, 4 }
 0x1df   : > { %17225 = vst [vmem:[#allocation92_spill] sm:$0xff] %v9911_v19  ;;  %17227 = vst [vmem:[#allocation64_spill] sm:$0xff] %v9914_v56  ;;  %v2519_v26 = vmul.f32 %v17231_v27, %v17246_v38  ;;  %v9963_v24 = vmul.f32 %v17231_v27, %v17247_v59  ;;  %v17248_v13 = vld [vmem:[#allocation26_spill] sm:$0xff]  ;;  %v9972_v49 = vld [vmem:[%s15681_s1 + $0x8] ss:$0 sm:$0xff]  ;;  %v2626_v38 = vrot.slane %v2512_v50, 4 }
 0x1e0   : > { %17229 = vst [vmem:[#allocation54_spill] sm:$0xff] %v9917_v23  ;;  %v9967_v48 = vmul.f32 %v17231_v27, %v17248_v13  ;;  %v17249_v63 = vld [vmem:[#allocation28_spill] sm:$0xff]  ;;  %v17250_v18 = vld [vmem:[#allocation50_spill] sm:$0xff]  ;;  %v2628_v27 = vrot.slane %v2513_v7, 4  ;;  %v2620_v59 = vrot.slane %v2508_v0, 4  ;;  %v2630_v13 = vrot.slane %v2514_v39, 4 }
 0x1e1   : > { %v9976_v6 = vmul.f32 %v9972_v49, %v17249_v63  ;;  %v2510_v5 = vmul.f32 %v9972_v49, %v17250_v18  ;;  %v17251_v10 = vld [vmem:[#allocation58_spill] sm:$0xff]  ;;  %v2631_v23 = vrot.slane %v2515_v12, 4  ;;  %v2633_v56 = vrot.slane %v2516_v8, 4  ;;  %v17252_v63 = vld [vmem:[#allocation29_spill] sm:$0xff]  ;;  %v17263_v29 = vld [vmem:[#allocation127_spill] sm:$0xff] }
 0x1e2   : > { %v9982_v11 = vmul.f32 %v9972_v49, %v17251_v10  ;;  %v2621_v19 = vrot.slane %v2509_v44, 4  ;;  %v2635_v25 = vrot.slane %v2517_v58, 4  ;;  %v2636_v41 = vrot.slane %v2518_v51, 4  ;;  %v17253_v18 = vld [vmem:[#allocation33_spill] sm:$0xff]  ;;  %v17254_v10 = vld [vmem:[#allocation59_spill] sm:$0xff]  ;;  %v17255_v7 = vld [vmem:[#allocation30_spill] sm:$0xff] }
 0x1e3   : > { %v2638_v42 = vrot.slane %v2519_v26, 4  ;;  %v9986_v57 = vmul.f32 %v9972_v49, %v17252_v63  ;;  %v9990_v55 = vmul.f32 %v9972_v49, %v17253_v18  ;;  %v9994_v2 = vmul.f32 %v9972_v49, %v17254_v10  ;;  %v17256_v39 = vld [vmem:[#allocation34_spill] sm:$0xff]  ;;  %v17257_v58 = vld [vmem:[#allocation60_spill] sm:$0xff]  ;;  %v17258_v26 = vld [vmem:[#allocation31_spill] sm:$0xff] }
 0x1e4   : > { %v2623_v50 = vrot.slane %v2510_v5, 4  ;;  %v9998_v0 = vmul.f32 %v9972_v49, %v17255_v7  ;;  %v10002_v12 = vmul.f32 %v9972_v49, %v17256_v39  ;;  %v2627_v8 = vsel %vm2014_vm4, %v2625_v45, %v2626_v38  ;;  %v17259_v10 = vld [vmem:[#allocation11_spill] sm:$0xff]  ;;  %v17261_v9 = vld [vmem:[#allocation126_spill] sm:$0xff]  ;;  %v17265_v3 = vld [vmem:[#allocation76_spill] sm:$0xff] }
 0x1e5   : > { %v2629_v44 = vsel %vm2014_vm4, %v2626_v38, %v2628_v27  ;;  %v10008_v51 = vmul.f32 %v9972_v49, %v17257_v58  ;;  %v10012_v63 = vmul.f32 %v9972_v49, %v17258_v26  ;;  %v2632_v5 = vsel %vm2014_vm4, %v2630_v13, %v2631_v23  ;;  %v17260_v26 = vld [vmem:[#allocation113_spill] sm:$0xff]  ;;  %v17262_v52 = vld [vmem:[#allocation70_spill] sm:$0xff]  ;;  %v17266_v43 = vld [vmem:[#allocation99_spill] sm:$0xff] }
 0x1e6   : > { %v2634_v18 = vsel %vm2014_vm4, %v2631_v23, %v2633_v56  ;;  %v10018_v7 = vmul.f32 %v9972_v49, %v17259_v10  ;;  %v10021_v45 = vsel %vm2014_vm4, %v2620_v59, %v2621_v19  ;;  %v2637_v38 = vsel %vm2014_vm4, %v2635_v25, %v2636_v41  ;;  %v17264_v10 = vld [vmem:[#allocation97_spill] sm:$0xff]  ;;  %v17267_v25 = vld [vmem:[#allocation120_spill] sm:$0xff]  ;;  %v17270_v15 = vld [vmem:[#allocation123_spill] sm:$0xff] }
 0x1e7   : > { %v2639_v39 = vsel %vm2014_vm4, %v2636_v41, %v2638_v42  ;;  %v10026_v58 = vsel %vm2014_vm4, %v2621_v19, %v2623_v50  ;;  %v2720_v40 = vadd.f32 %v2623_v50, %v17260_v26  ;;  %v2721_v13 = vadd.f32 %v2627_v8, %v17261_v9  ;;  %v17268_v41 = vld [vmem:[#allocation122_spill] sm:$0xff]  ;;  %v17271_v20 = vld [vmem:[#allocation101_spill] sm:$0xff]  ;;  %v17272_v61 = vld [vmem:[#allocation124_spill] sm:$0xff] }
 0x1e8   : > { %v2722_v23 = vadd.f32 %v2629_v44, %v17262_v52  ;;  %v2723_v17 = vadd.f32 %v2628_v27, %v17263_v29  ;;  %v2724_v16 = vadd.f32 %v2632_v5, %v17264_v10  ;;  %v2725_v59 = vadd.f32 %v2634_v18, %v17265_v3  ;;  %v17269_v19 = vld [vmem:[#allocation74_spill] sm:$0xff]  ;;  %v17274_v4 = vld [vmem:[#allocation109_spill] sm:$0xff]  ;;  %v17276_v31 = vld [vmem:[#allocation71_spill] sm:$0xff] }
 0x1e9   : > { %v2726_v46 = vadd.f32 %v2633_v56, %v17266_v43  ;;  %v2727_v35 = vadd.f32 %v2637_v38, %v17267_v25  ;;  %v2728_v53 = vadd.f32 %v2639_v39, %v17268_v41  ;;  %v2729_v22 = vadd.f32 %v2638_v42, %v17269_v19  ;;  %v17275_v33 = vld [vmem:[#allocation114_spill] sm:$0xff]  ;;  %v17277_v38 = vld [vmem:[#allocation115_spill] sm:$0xff]  ;;  %v17278_v25 = vld [vmem:[#allocation72_spill] sm:$0xff] }
 0x1ea   : > { %v2730_v26 = vadd.f32 %v2632_v5, %v17270_v15  ;;  %v2731_v9 = vadd.f32 %v2634_v18, %v17271_v20  ;;  %v2732_v52 = vadd.f32 %v2633_v56, %v17272_v61  ;;  %v2733_v29 = vadd.f32 %v2627_v8, %v17273_v32  ;;  %v10052_v20 = vld [vmem:[%s15682_s2] ss:$0 sm:$0xff]  ;;  %v17293_v41 = vld [vmem:[#allocation15_spill] sm:$0xff] }
 0x1eb   : > { %v2734_v10 = vadd.f32 %v2629_v44, %v17274_v4  ;;  %v2735_v3 = vadd.f32 %v2628_v27, %v17275_v33  ;;  %v2736_v43 = vadd.f32 %v10021_v45, %v17276_v31  ;;  %v2737_v39 = vadd.f32 %v10026_v58, %v17277_v38 }
 0x1ec   : > { %v2738_v42 = vadd.f32 %v2623_v50, %v17278_v25  ;;  %v10055_v61 = vadd.f32 %v10052_v20, %v2720_v40  ;;  %v10058_v4 = vadd.f32 %v10052_v20, %v2721_v13  ;;  %v10061_v33 = vadd.f32 %v10052_v20, %v2722_v23  ;;  %v17292_v23 = vld [vmem:[#allocation32_spill] sm:$0xff] }
 0x1ed   : > { %v10064_v31 = vadd.f32 %v10052_v20, %v2723_v17  ;;  %v10067_v32 = vadd.f32 %v10052_v20, %v2724_v16  ;;  %v10070_v15 = vadd.f32 %v10052_v20, %v2725_v59  ;;  %v10073_v56 = vadd.f32 %v10052_v20, %v2726_v46 }
 0x1ee   : > { %17279 = vst [vmem:[#allocation80_spill] sm:$0xff] %v10058_v4  ;;  %v10076_v40 = vadd.f32 %v10052_v20, %v2727_v35  ;;  %v10079_v27 = vadd.f32 %v10052_v20, %v2728_v53  ;;  %v10082_v50 = vadd.f32 %v10052_v20, %v2729_v22  ;;  %v10085_v17 = vadd.f32 %v10052_v20, %v2730_v26  ;;  %v17289_v22 = vld [vmem:[#allocation61_spill] sm:$0xff]  ;;  %v17294_v26 = vld [vmem:[#allocation46_spill] sm:$0xff] }
 0x1ef   : > { %17280 = vst [vmem:[#allocation24_spill] sm:$0xff] %v10064_v31  ;;  %17281 = vst [vmem:[#allocation102_spill] sm:$0xff] %v10067_v32  ;;  %v10088_v16 = vadd.f32 %v10052_v20, %v2731_v9  ;;  %v10091_v8 = vadd.f32 %v10052_v20, %v2732_v52  ;;  %v10094_v46 = vadd.f32 %v10052_v20, %v2733_v29  ;;  %v17295_v52 = vld [vmem:[#allocation37_spill] sm:$0xff] }
 0x1f0   : > { %17282 = vst [vmem:[#allocation10_spill] sm:$0xff] %v10073_v56  ;;  %17283 = vst [vmem:[#allocation56_spill] sm:$0xff] %v10076_v40  ;;  %v10097_v35 = vadd.f32 %v10052_v20, %v2734_v10  ;;  %v10100_v53 = vadd.f32 %v10052_v20, %v2735_v3  ;;  %v10104_v44 = vmul.f32 %v9972_v49, %v17289_v22  ;;  %v17296_v10 = vld [vmem:[#allocation103_spill] sm:$0xff]  ;;  %v2571_v22 = vrot.slane %v9925_v30, 4  ;;  %v17305_v32 = vld [vmem:[#allocation17_spill] sm:$0xff] }
 0x1f1   : > { %17284 = vst [vmem:[#allocation25_spill] sm:$0xff] %v10082_v50  ;;  %17285 = vst [vmem:[#allocation27_spill] sm:$0xff] %v10085_v17  ;;  %v10107_v5 = vadd.f32 %v10052_v20, %v2736_v43  ;;  %v10110_v18 = vadd.f32 %v10052_v20, %v2737_v39  ;;  %v10113_v13 = vadd.f32 %v10052_v20, %v2738_v42  ;;  %v2565_v3 = vrot.slane %v17296_v10, 4  ;;  %v17297_v43 = vld [vmem:[#allocation104_spill] sm:$0xff]  ;;  %v17298_v39 = vld [vmem:[#allocation105_spill] sm:$0xff] }
 0x1f2   : > { %17286 = vst [vmem:[#allocation57_spill] sm:$0xff] %v10091_v8  ;;  %17287 = vst [vmem:[#allocation67_spill] sm:$0xff] %v10094_v46  ;;  %v2496_v59 = vmul.f32 %v9972_v49, %v17292_v23  ;;  %v2497_v19 = vmul.f32 %v9972_v49, %v17293_v41  ;;  %v10121_v9 = vmul.f32 %v9972_v49, %v17294_v26  ;;  %v2566_v38 = vrot.slane %v17297_v43, 4  ;;  %v17301_v43 = vld [vmem:[#allocation38_spill] sm:$0xff]  ;;  %v17302_v17 = vld [vmem:[#allocation44_spill] sm:$0xff] }
 0x1f3   : > { %17288 = vst [vmem:[#allocation81_spill] sm:$0xff] %v10100_v53  ;;  %17290 = vst [vmem:[#allocation111_spill] sm:$0xff] %v10107_v5  ;;  %v2499_v29 = vmul.f32 %v9972_v49, %v17295_v52  ;;  %v2570_v42 = vrot.slane %v9921_v54, 4  ;;  %v2575_v41 = vrot.slane %v9933_v21, 4  ;;  %v2576_v26 = vrot.slane %v9937_v28, 4  ;;  %v17299_v5 = vld [vmem:[#allocation16_spill] sm:$0xff] }
 0x1f4   : > { %17291 = vst [vmem:[#allocation108_spill] sm:$0xff] %v10113_v13  ;;  %v2500_v46 = vmul.f32 %v9972_v49, %v17299_v5  ;;  %v17300_v52 = vld [vmem:[#allocation47_spill] sm:$0xff]  ;;  %v2502_v25 = vmul.f32 %v9972_v49, %v17301_v43  ;;  %v2578_v54 = vrot.slane %v9963_v24, 4  ;;  %v2503_v30 = vmul.f32 %v9972_v49, %v17302_v17  ;;  %v17303_v23 = vld [vmem:[#allocation48_spill] sm:$0xff]  ;;  %v17306_v43 = vld [vmem:[#allocation49_spill] sm:$0xff] }
 0x1f5   : > { %v10137_v10 = vmul.f32 %v9972_v49, %v17300_v52  ;;  %v10146_v21 = vmul.f32 %v9972_v49, %v17303_v23  ;;  %v2580_v28 = vrot.slane %v9967_v48, 4  ;;  %v2581_v5 = vrot.slane %v9976_v6, 4  ;;  %v17304_v40 = vld [vmem:[#allocation39_spill] sm:$0xff] }
 0x1f6   : > { %v2505_v52 = vmul.f32 %v9972_v49, %v17304_v40  ;;  %v2506_v4 = vmul.f32 %v9972_v49, %v17305_v32  ;;  %v10156_v24 = vmul.f32 %v9972_v49, %v17306_v43  ;;  %v2567_v17 = vsel %vm2014_vm4, %v2565_v3, %v2566_v38 }
 0x1f7   : > { %v17307_v13 = vrot.slane %v17298_v39, 4  ;;  %v2572_v48 = vsel %vm2014_vm4, %v2570_v42, %v2571_v22  ;;  %v17308_v6 = vrot.slane %v9929_v47, 4  ;;  %v2577_v40 = vsel %vm2014_vm4, %v2575_v41, %v2576_v26 }
 0x1f8   : > { %v2579_v32 = vsel %vm2014_vm4, %v2576_v26, %v2578_v54  ;;  %v2583_v8 = vrot.slane %v9982_v11, 4  ;;  %v2585_v49 = vrot.slane %v9986_v57, 4  ;;  %v2586_v3 = vrot.slane %v9990_v55, 4 }
 0x1f9   : > { %v2569_v23 = vsel %vm2014_vm4, %v2566_v38, %v17307_v13  ;;  %v2574_v53 = vsel %vm2014_vm4, %v2571_v22, %v17308_v6  ;;  %v2582_v43 = vsel %vm2014_vm4, %v2580_v28, %v2581_v5  ;;  %v2588_v13 = vrot.slane %v9994_v2, 4 }
 0x1fa   : > { %v2590_v38 = vrot.slane %v9998_v0, 4  ;;  %v2591_v42 = vrot.slane %v10002_v12, 4  ;;  %v2593_v22 = vrot.slane %v10008_v51, 4  ;;  %v2595_v41 = vrot.slane %v10012_v63, 4 }
 0x1fb   : > { %v2596_v26 = vrot.slane %v10018_v7, 4  ;;  %v2598_v11 = vrot.slane %v10104_v44, 4  ;;  %v2600_v6 = vrot.slane %v2496_v59, 4  ;;  %v2601_v57 = vrot.slane %v2497_v19, 4 }
 0x1fc   : > { %v2603_v55 = vrot.slane %v10121_v9, 4  ;;  %v2605_v50 = vrot.slane %v2499_v29, 4  ;;  %v2606_v28 = vrot.slane %v2500_v46, 4  ;;  %v2608_v2 = vrot.slane %v10137_v10, 4 }
 0x1fd   : > { %v2610_v56 = vrot.slane %v2502_v25, 4  ;;  %v2611_v0 = vrot.slane %v2503_v30, 4  ;;  %v2613_v12 = vrot.slane %v10146_v21, 4  ;;  %v2615_v31 = vrot.slane %v2505_v52, 4 }
 0x1fe   : > { %v2616_v51 = vrot.slane %v2506_v4, 4  ;;  %v2618_v63 = vrot.slane %v10156_v24, 4  ;;  %v2584_v7 = vsel %vm2014_vm4, %v2581_v5, %v2583_v8  ;;  %v2587_v44 = vsel %vm2014_vm4, %v2585_v49, %v2586_v3 }
 0x1ff   : > { %v2589_v59 = vsel %vm2014_vm4, %v2586_v3, %v2588_v13  ;;  %v2592_v19 = vsel %vm2014_vm4, %v2590_v38, %v2591_v42  ;;  %v2594_v46 = vsel %vm2014_vm4, %v2591_v42, %v2593_v22  ;;  %v2597_v9 = vsel %vm2014_vm4, %v2595_v41, %v2596_v26 }
 0x200   : > { %v2599_v29 = vsel %vm2014_vm4, %v2596_v26, %v2598_v11  ;;  %v2602_v25 = vsel %vm2014_vm4, %v2600_v6, %v2601_v57  ;;  %v2604_v4 = vsel %vm2014_vm4, %v2601_v57, %v2603_v55  ;;  %v2607_v10 = vsel %vm2014_vm4, %v2605_v50, %v2606_v28  ;;  %v17311_v6 = vld [vmem:[#allocation82_spill] sm:$0xff] }
 0x201   : > { %v2609_v30 = vsel %vm2014_vm4, %v2606_v28, %v2608_v2  ;;  %v2612_v21 = vsel %vm2014_vm4, %v2610_v56, %v2611_v0  ;;  %v2614_v5 = vsel %vm2014_vm4, %v2611_v0, %v2613_v12  ;;  %v2617_v52 = vsel %vm2014_vm4, %v2615_v31, %v2616_v51  ;;  %v17312_v28 = vld [vmem:[#allocation110_spill] sm:$0xff] }
 0x202   : > { %v2619_v24 = vsel %vm2014_vm4, %v2616_v51, %v2618_v63  ;;  %v2685_v49 = vadd.f32 %v2567_v17, %v9816_v60  ;;  %v2686_v3 = vadd.f32 %v2569_v23, %v9819_v37  ;;  %v17309_v38 = vrot.slane %v17298_v39, 4  ;;  %v17313_v17 = vld [vmem:[#allocation83_spill] sm:$0xff]  ;;  %v17315_v39 = vld [vmem:[#allocation84_spill] sm:$0xff]  ;;  %v17316_v51 = vld [vmem:[#allocation45_spill] sm:$0xff] }
 0x203   : > { %v2688_v50 = vadd.f32 %v2572_v48, %v9826_v36  ;;  %v2689_v41 = vadd.f32 %v2574_v53, %v9829_v34  ;;  %v17310_v56 = vrot.slane %v9929_v47, 4  ;;  %v2691_v31 = vadd.f32 %v2577_v40, %v9835_v1  ;;  %v17314_v23 = vld [vmem:[#allocation63_spill] sm:$0xff]  ;;  %v17317_v48 = vld [vmem:[#allocation85_spill] sm:$0xff]  ;;  %v17319_v47 = vld [vmem:[#allocation86_spill] sm:$0xff] }
 0x204   : > { %v2687_v42 = vadd.f32 %v17309_v38, %v9823_v62  ;;  %v2692_v57 = vadd.f32 %v2579_v32, %v17311_v6  ;;  %v2693_v60 = vadd.f32 %v2578_v54, %v17312_v28  ;;  %v2694_v37 = vadd.f32 %v2582_v43, %v17313_v17  ;;  %v17318_v53 = vld [vmem:[#allocation77_spill] sm:$0xff]  ;;  %v17321_v40 = vld [vmem:[#allocation88_spill] sm:$0xff]  ;;  %v17323_v28 = vld [vmem:[#allocation106_spill] sm:$0xff] }
 0x205   : > { %v2690_v26 = vadd.f32 %v17310_v56, %v9832_v14  ;;  %v2695_v0 = vadd.f32 %v2584_v7, %v17314_v23  ;;  %v2696_v62 = vadd.f32 %v2583_v8, %v17315_v39  ;;  %v2697_v36 = vadd.f32 %v2587_v44, %v17316_v51  ;;  %v17320_v56 = vld [vmem:[#allocation78_spill] sm:$0xff]  ;;  %v17322_v6 = vld [vmem:[#allocation65_spill] sm:$0xff]  ;;  %v17326_v39 = vld [vmem:[#allocation79_spill] sm:$0xff] }
 0x206   : > { %v2698_v34 = vadd.f32 %v2589_v59, %v17317_v48  ;;  %v2699_v38 = vadd.f32 %v2588_v13, %v17318_v53  ;;  %v2700_v14 = vadd.f32 %v2592_v19, %v17319_v47  ;;  %v2701_v1 = vadd.f32 %v2594_v46, %v17320_v56  ;;  %v17324_v17 = vld [vmem:[#allocation94_spill] sm:$0xff]  ;;  %v17325_v23 = vld [vmem:[#allocation89_spill] sm:$0xff]  ;;  %v17330_v47 = vld [vmem:[#allocation95_spill] sm:$0xff] }
 0x207   : > { %v2702_v32 = vadd.f32 %v2593_v22, %v17321_v40  ;;  %v2703_v54 = vadd.f32 %v2597_v9, %v17322_v6  ;;  %v2704_v43 = vadd.f32 %v2599_v29, %v17323_v28  ;;  %v2705_v7 = vadd.f32 %v2598_v11, %v17324_v17  ;;  %v17327_v51 = vld [vmem:[#allocation90_spill] sm:$0xff]  ;;  %v17329_v53 = vld [vmem:[#allocation93_spill] sm:$0xff]  ;;  %v17331_v56 = vld [vmem:[#allocation55_spill] sm:$0xff] }
 0x208   : > { %v2706_v8 = vadd.f32 %v2602_v25, %v17325_v23  ;;  %v2707_v44 = vadd.f32 %v2604_v4, %v17326_v39  ;;  %v2708_v59 = vadd.f32 %v2603_v55, %v17327_v51  ;;  %v17328_v48 = vld [vmem:[#allocation66_spill] sm:$0xff]  ;;  %v2710_v19 = vadd.f32 %v2609_v30, %v17329_v53  ;;  %v17332_v40 = vld [vmem:[#allocation107_spill] sm:$0xff]  ;;  %v17335_v17 = vld [vmem:[#allocation92_spill] sm:$0xff] }
 0x209   : > { %v2709_v13 = vadd.f32 %v2607_v10, %v17328_v48  ;;  %v2711_v46 = vadd.f32 %v2608_v2, %v17330_v47  ;;  %v2712_v22 = vadd.f32 %v2612_v21, %v17331_v56  ;;  %v2713_v9 = vadd.f32 %v2614_v5, %v17332_v40  ;;  %v17333_v6 = vld [vmem:[#allocation91_spill] sm:$0xff]  ;;  %v17334_v28 = vld [vmem:[#allocation62_spill] sm:$0xff]  ;;  %v17336_v23 = vld [vmem:[#allocation64_spill] sm:$0xff] }
 0x20a   : > { %v2714_v29 = vadd.f32 %v2613_v12, %v17333_v6  ;;  %v2715_v11 = vadd.f32 %v2617_v52, %v17334_v28  ;;  %v2716_v25 = vadd.f32 %v2619_v24, %v17335_v17  ;;  %v2717_v4 = vadd.f32 %v2618_v63, %v17336_v23  ;;  %v17337_v39 = vld [vmem:[#allocation54_spill] sm:$0xff]  ;;  %v17338_v10 = vld [vmem:[#allocation23_spill] sm:$0xff]  ;;  %v17370_v56 = vld [vmem:[#allocation108_spill] sm:$0xff] }
 0x20b   : > { %v2718_v55 = vadd.f32 %v10021_v45, %v17337_v39  ;;  %v2719_v30 = vadd.f32 %v10026_v58, %v17338_v10  ;;  %v2746_v2 = vadd.f32 %v10052_v20, %v2685_v49  ;;  %v2747_v21 = vadd.f32 %v10052_v20, %v2686_v3 }
 0x20c   : > { %v10242_v5 = vadd.f32 %v10052_v20, %v2687_v42  ;;  %v2749_v12 = vadd.f32 %v10052_v20, %v2688_v50  ;;  %v2750_v52 = vadd.f32 %v10052_v20, %v2689_v41  ;;  %v10247_v24 = vadd.f32 %v10052_v20, %v2690_v26 }
 0x20d   : > { %v2752_v63 = vadd.f32 %v10052_v20, %v2691_v31  ;;  %v2753_v45 = vadd.f32 %v10052_v20, %v2692_v57  ;;  %v10252_v58 = vadd.f32 %v10052_v20, %v2693_v60  ;;  %v2755_v49 = vadd.f32 %v10052_v20, %v2694_v37 }
 0x20e   : > { %17339 = vst [vmem:[#allocation68_spill] sm:$0xff] %v10242_v5  ;;  %17340 = vst [vmem:[#allocation87_spill] sm:$0xff] %v10247_v24  ;;  %v2756_v3 = vadd.f32 %v10052_v20, %v2695_v0  ;;  %v10257_v42 = vadd.f32 %v10052_v20, %v2696_v62  ;;  %v2758_v50 = vadd.f32 %v10052_v20, %v2697_v36  ;;  %v10306_v53 = vmax.f32 %v2747_v21, 0.0  ;;  %v17382_v24 = vld [vmem:[#allocation80_spill] sm:$0xff] }
 0x20f   : > { %17341 = vst [vmem:[#allocation112_spill] sm:$0xff] %v10252_v58  ;;  %v2759_v41 = vadd.f32 %v10052_v20, %v2698_v34  ;;  %v10262_v26 = vadd.f32 %v10052_v20, %v2699_v38  ;;  %v2761_v31 = vadd.f32 %v10052_v20, %v2700_v14  ;;  %v2762_v57 = vadd.f32 %v10052_v20, %v2701_v1 }
 0x210   : > { %17342 = vst [vmem:[#allocation125_spill] sm:$0xff] %v10257_v42  ;;  %v10267_v60 = vadd.f32 %v10052_v20, %v2702_v32  ;;  %v2764_v37 = vadd.f32 %v10052_v20, %v2703_v54  ;;  %v2765_v0 = vadd.f32 %v10052_v20, %v2704_v43  ;;  %v10272_v62 = vadd.f32 %v10052_v20, %v2705_v7 }
 0x211   : > { %17343 = vst [vmem:[#allocation69_spill] sm:$0xff] %v10262_v26  ;;  %v2767_v36 = vadd.f32 %v10052_v20, %v2706_v8  ;;  %v2768_v34 = vadd.f32 %v10052_v20, %v2707_v44  ;;  %v10277_v38 = vadd.f32 %v10052_v20, %v2708_v59  ;;  %v2770_v14 = vadd.f32 %v10052_v20, %v2709_v13 }
 0x212   : > { %17344 = vst [vmem:[#allocation116_spill] sm:$0xff] %v10267_v60  ;;  %17345 = vst [vmem:[#allocation96_spill] sm:$0xff] %v10272_v62  ;;  %v2771_v1 = vadd.f32 %v10052_v20, %v2710_v19  ;;  %v10282_v32 = vadd.f32 %v10052_v20, %v2711_v46  ;;  %v2773_v54 = vadd.f32 %v10052_v20, %v2712_v22  ;;  %v10304_v13 = vmax.f32 %v2746_v2, 0.0 }
 0x213   : > { %17346 = vst [vmem:[#allocation117_spill] sm:$0xff] %v10277_v38  ;;  %v10286_v43 = vadd.f32 %v10052_v20, %v2713_v9  ;;  %v10289_v7 = vadd.f32 %v10052_v20, %v2714_v29  ;;  %v10292_v8 = vadd.f32 %v10052_v20, %v2715_v11  ;;  %v10295_v44 = vadd.f32 %v10052_v20, %v2716_v25 }
 0x214   : > { %17347 = vst [vmem:[#allocation119_spill] sm:$0xff] %v10282_v32  ;;  %v10298_v51 = vadd.f32 %v10052_v20, %v2717_v4  ;;  %v10301_v59 = vadd.f32 %v10052_v20, %v2718_v55  ;;  %v2780_v48 = vadd.f32 %v10052_v20, %v2719_v30  ;;  %17350 = vst [vmem:[#allocation98_spill] sm:$0xff] %v10304_v13  ;;  %v10309_v47 = vmax.f32 %v2749_v12, 0.0 }
 0x215   : > { %17348 = vst [vmem:[#allocation100_spill] sm:$0xff] %v10289_v7  ;;  %17351 = vst [vmem:[#allocation121_spill] sm:$0xff] %v10306_v53  ;;  %v10311_v46 = vmax.f32 %v2750_v52, 0.0  ;;  %v10314_v22 = vmax.f32 %v2752_v63, 0.0  ;;  %v10316_v40 = vmax.f32 %v2753_v45, 0.0  ;;  %v10319_v6 = vmax.f32 %v2755_v49, 0.0 }
 0x216   : > { %17349 = vst [vmem:[#allocation118_spill] sm:$0xff] %v10298_v51  ;;  %17352 = vst [vmem:[#allocation14_spill] sm:$0xff] %v10309_v47  ;;  %v10321_v20 = vmax.f32 %v2756_v3, 0.0  ;;  %v10324_v28 = vmax.f32 %v2758_v50, 0.0  ;;  %v10326_v11 = vmax.f32 %v2759_v41, 0.0  ;;  %v10329_v25 = vmax.f32 %v2761_v31, 0.0 }
 0x217   : > { %17353 = vst [vmem:[#allocation73_spill] sm:$0xff] %v10311_v46  ;;  %17354 = vst [vmem:[#allocation22_spill] sm:$0xff] %v10319_v6  ;;  %v10331_v23 = vmax.f32 %v2762_v57, 0.0  ;;  %v10334_v39 = vmax.f32 %v2764_v37, 0.0  ;;  %v10336_v55 = vmax.f32 %v2765_v0, 0.0  ;;  %v10339_v30 = vmax.f32 %v2780_v48, 0.0 }
 0x218   : > { %17355 = vst [vmem:[#allocation36_spill] sm:$0xff] %v10324_v28  ;;  %17356 = vst [vmem:[#allocation12_spill] sm:$0xff] %v10326_v11  ;;  %v10342_v2 = vmax.f32 %v10061_v33, 0.0  ;;  %v10345_v21 = vmax.f32 %v10070_v15, 0.0  ;;  %v10348_v12 = vmax.f32 %v10079_v27, 0.0  ;;  %v10351_v52 = vmax.f32 %v10088_v16, 0.0 }
 0x219   : > { %17357 = vst [vmem:[#allocation9_spill] sm:$0xff] %v10329_v25  ;;  %17358 = vst [vmem:[#allocation41_spill] sm:$0xff] %v10331_v23  ;;  %v10354_v63 = vmax.f32 %v10097_v35, 0.0  ;;  %v10356_v45 = vmax.f32 %v2767_v36, 0.0  ;;  %v10358_v49 = vmax.f32 %v2768_v34, 0.0  ;;  %v10362_v33 = vmax.f32 %v10110_v18, 0.0 }
 0x21a   : > { %17359 = vst [vmem:[#allocation19_spill] sm:$0xff] %v10334_v39  ;;  %17360 = vst [vmem:[#allocation51_spill] sm:$0xff] %v10336_v55  ;;  %v17364_v50 = vld [vmem:[#allocation24_spill] sm:$0xff]  ;;  %v17365_v41 = vld [vmem:[#allocation10_spill] sm:$0xff]  ;;  %v3045_v34 = vrot.slane %v10339_v30, 6  ;;  %v3046_v48 = vrot.slane %v10342_v2, 6 }
 0x21b   : > { %17361 = vst [vmem:[#allocation40_spill] sm:$0xff] %v10339_v30  ;;  %17362 = vst [vmem:[#allocation42_spill] sm:$0xff] %v10356_v45  ;;  %v17366_v16 = vld [vmem:[#allocation25_spill] sm:$0xff]  ;;  %v3047_v3 = vrot.slane %v10345_v21, 6  ;;  %v3048_v18 = vrot.slane %v10348_v12, 6  ;;  %v3049_v10 = vrot.slane %v10351_v52, 6 }
 0x21c   : > { %17363 = vst [vmem:[#allocation20_spill] sm:$0xff] %v10358_v49  ;;  %v17367_v37 = vld [vmem:[#allocation57_spill] sm:$0xff]  ;;  %v3050_v4 = vrot.slane %v10354_v63, 6  ;;  %v10376_v17 = vmax.f32 %v2770_v14, 0.0  ;;  %v10378_v19 = vmax.f32 %v2771_v1, 0.0  ;;  %v3051_v29 = vrot.slane %v10362_v33, 6 }
 0x21d   : > { %v17368_v0 = vld [vmem:[#allocation81_spill] sm:$0xff]  ;;  %v10383_v35 = vmax.f32 %v2773_v54, 0.0  ;;  %v3081_v57 = vrot.slane %v10339_v30, 4  ;;  %v3082_v31 = vrot.slane %v10342_v2, 4  ;;  %v3083_v27 = vrot.slane %v10345_v21, 4 }
 0x21e   : > { %17369 = vst [vmem:[#allocation52_spill] sm:$0xff] %v10378_v19  ;;  %v3084_v15 = vrot.slane %v10348_v12, 4  ;;  %v17372_v14 = vmax.f32 %v10055_v61, 0.0  ;;  %v17373_v9 = vmax.f32 %v17364_v50, 0.0  ;;  %v17374_v36 = vmax.f32 %v17365_v41, 0.0 }
 0x21f   : > { %17371 = vst [vmem:[#allocation18_spill] sm:$0xff] %v10383_v35  ;;  %v17375_v32 = vmax.f32 %v17366_v16, 0.0  ;;  %v17376_v60 = vmax.f32 %v17367_v37, 0.0  ;;  %v17377_v5 = vmax.f32 %v17368_v0, 0.0  ;;  %v10428_v58 = vmax.f32 %v17382_v24, 0.0 }
 0x220   : > { %v3117_v1 = vsel %vm441_vm0, %v17372_v14, %v3045_v34  ;;  %v3118_v38 = vsel %vm441_vm0, %v17373_v9, %v3046_v48  ;;  %v3119_v54 = vsel %vm441_vm0, %v17374_v36, %v3047_v3  ;;  %v3085_v14 = vrot.slane %v10351_v52, 4 }
 0x221   : > { %v3120_v62 = vsel %vm441_vm0, %v17375_v32, %v3048_v18  ;;  %v3121_v26 = vsel %vm441_vm0, %v17376_v60, %v3049_v10  ;;  %v3122_v34 = vsel %vm441_vm0, %v17377_v5, %v3050_v4  ;;  %v3086_v9 = vrot.slane %v10354_v63, 4 }
 0x222   : > { %v3087_v48 = vrot.slane %v10362_v33, 4  ;;  %v17378_v3 = vmax.f32 %v17370_v56, 0.0  ;;  %v10414_v32 = vmax.f32 %v10286_v43, 0.0  ;;  %v10418_v60 = vmax.f32 %v10292_v8, 0.0 }
 0x223   : > { %v10421_v5 = vmax.f32 %v10295_v44, 0.0  ;;  %v10425_v10 = vmax.f32 %v10301_v59, 0.0  ;;  %v10434_v43 = vsel %vm458_vm1, %v3117_v1, %v3081_v57  ;;  %v10437_v8 = vsel %vm458_vm1, %v3118_v38, %v3082_v31  ;;  %v17384_v59 = vld [vmem:[#allocation56_spill] sm:$0xff]  ;;  %v17385_v38 = vld [vmem:[#allocation27_spill] sm:$0xff] }
 0x224   : > { %v3123_v36 = vsel %vm441_vm0, %v17378_v3, %v3051_v29  ;;  %17379 = vst [vmem:[#allocation43_spill] sm:$0xff] %v10414_v32  ;;  %17380 = vst [vmem:[#allocation21_spill] sm:$0xff] %v10418_v60  ;;  %v17383_v29 = vld [vmem:[#allocation102_spill] sm:$0xff]  ;;  %v10440_v44 = vsel %vm458_vm1, %v3119_v54, %v3083_v27  ;;  %v10443_v4 = vsel %vm458_vm1, %v3120_v62, %v3084_v15  ;;  %v10446_v18 = vmax.f32 %v17384_v59, 0.0  ;;  %v17386_v27 = vld [vmem:[#allocation67_spill] sm:$0xff] }
 0x225   : > { %17381 = vst [vmem:[#allocation53_spill] sm:$0xff] %v10421_v5  ;;  %v10431_v3 = vmax.f32 %v17383_v29, 0.0  ;;  %v10449_v24 = vsel %vm458_vm1, %v3121_v26, %v3085_v14  ;;  %v10452_v29 = vsel %vm458_vm1, %v3122_v34, %v3086_v9  ;;  %v10455_v57 = vsel %vm458_vm1, %v3123_v36, %v3087_v48  ;;  %v17387_v62 = vld [vmem:[#allocation111_spill] sm:$0xff] }
 0x226   : > { %v10458_v31 = vmax.f32 %v17385_v38, 0.0  ;;  %v10461_v1 = vmax.f32 %v17386_v27, 0.0  ;;  %v10464_v15 = vmax.f32 %v17387_v62, 0.0  ;;  %v15922_v26 = vrot.slane %v10339_v30, 5 }
 0x227   : > { %v17389_v14 = vmax.f32 %v10055_v61, 0.0  ;;  %v15923_v9 = vrot.slane %v10428_v58, 5  ;;  %v3221_v48 = vrot.slane %v10342_v2, 5  ;;  %v17390_v36 = vmax.f32 %v17364_v50, 0.0 }
 0x228   : > { %17388 = vst [vmem:[#allocation35_spill] sm:$0xff] %v10464_v15  ;;  %v15924_v27 = vrot.slane %v10431_v3, 5  ;;  %v3226_v61 = vrot.slane %v10345_v21, 5  ;;  %v17392_v50 = vmax.f32 %v17365_v41, 0.0  ;;  %v3231_v21 = vrot.slane %v10348_v12, 5 }
 0x229   : > { %v3218_v38 = vrot.slane %v17389_v14, 5  ;;  %v3223_v59 = vrot.slane %v17390_v36, 5  ;;  %v10536_v14 = vsel %vm619_vm2, %v15923_v9, %v3221_v48  ;;  %v15927_v9 = vrot.slane %v10458_v31, 5 }
 0x22a   : > { %17391 = vst [vmem:[#allocation26_spill] sm:$0xff] %v10536_v14  ;;  %v3228_v36 = vrot.slane %v17392_v50, 5  ;;  %v3236_v41 = vrot.slane %v10351_v52, 5  ;;  %v15928_v54 = vrot.slane %v10461_v1, 5  ;;  %v17408_v7 = vrot.slane %v10309_v47, 3 }
 0x22b   : > { %v10529_v62 = vsel %vm619_vm2, %v15922_v26, %v3218_v38  ;;  %v10539_v2 = vsel %vm619_vm2, %v3221_v48, %v3223_v59  ;;  %v10547_v38 = vsel %vm619_vm2, %v15924_v27, %v3226_v61  ;;  %v17394_v26 = vmax.f32 %v17366_v16, 0.0 }
 0x22c   : > { %17393 = vst [vmem:[#allocation28_spill] sm:$0xff] %v10547_v38  ;;  %v10554_v48 = vsel %vm619_vm2, %v3226_v61, %v3228_v36  ;;  %v17395_v59 = vmax.f32 %v17367_v37, 0.0  ;;  %v17396_v27 = vrot.slane %v10446_v18, 5  ;;  %v3241_v16 = vrot.slane %v10354_v63, 5 }
 0x22d   : > { %v3233_v34 = vrot.slane %v17394_v26, 5  ;;  %v17398_v26 = vmax.f32 %v17368_v0, 0.0  ;;  %v10574_v52 = vsel %vm619_vm2, %v15927_v9, %v3236_v41  ;;  %v17406_v9 = vrot.slane %v10314_v22, 3 }
 0x22e   : > { %v3238_v50 = vrot.slane %v17395_v59, 5  ;;  %v10563_v51 = vsel %vm619_vm2, %v17396_v27, %v3231_v21  ;;  %17399 = vst [vmem:[#allocation58_spill] sm:$0xff] %v10574_v52  ;;  %v3246_v27 = vrot.slane %v10362_v33, 5  ;;  %v10585_v63 = vsel %vm619_vm2, %v15928_v54, %v3241_v16 }
 0x22f   : > { %17397 = vst [vmem:[#allocation50_spill] sm:$0xff] %v10563_v51  ;;  %v10566_v12 = vsel %vm619_vm2, %v3231_v21, %v3233_v34  ;;  %v3243_v61 = vrot.slane %v17398_v26, 5  ;;  %v2961_v34 = vrot.slane %v10464_v15, 7  ;;  %17401 = vst [vmem:[#allocation33_spill] sm:$0xff] %v10585_v63  ;;  %v17402_v21 = vmax.f32 %v17370_v56, 0.0 }
 0x230   : > { %v10577_v37 = vsel %vm619_vm2, %v3236_v41, %v3238_v50  ;;  %v17403_v26 = vrot.slane %v10319_v6, 1  ;;  %v17404_v41 = vrot.slane %v10319_v6, 3  ;;  %v17405_v33 = vrot.slane %v10314_v22, 1 }
 0x231   : > { %17400 = vst [vmem:[#allocation29_spill] sm:$0xff] %v10577_v37  ;;  %v3244_v0 = vsel %vm619_vm2, %v3241_v16, %v3243_v61  ;;  %v3248_v59 = vrot.slane %v17402_v21, 5  ;;  %v17407_v54 = vrot.slane %v10309_v47, 1  ;;  %v17409_v56 = vrot.slane %v10464_v15, 5 }
 0x232   : > { %v2980_v50 = vsel %vm441_vm0, %v17404_v41, %v17403_v26  ;;  %v2981_v36 = vsel %vm441_vm0, %v17406_v9, %v17405_v33  ;;  %v17411_v21 = vrot.slane %v10304_v13, 1  ;;  %v17412_v26 = vrot.slane %v10304_v13, 3 }
 0x233   : > { %v2982_v16 = vsel %vm441_vm0, %v17408_v7, %v17407_v54  ;;  %v10608_v61 = vsel %vm619_vm2, %v17409_v56, %v3246_v27  ;;  %v17413_v63 = vrot.slane %v10324_v28, 1  ;;  %v17414_v9 = vrot.slane %v10324_v28, 3 }
 0x234   : > { %17410 = vst [vmem:[#allocation59_spill] sm:$0xff] %v10608_v61  ;;  %v2983_v41 = vsel %vm441_vm0, %v17412_v26, %v17411_v21  ;;  %v17415_v52 = vrot.slane %v10329_v25, 1  ;;  %v17416_v7 = vrot.slane %v10329_v25, 3  ;;  %v3249_v56 = vsel %vm619_vm2, %v3246_v27, %v3248_v59 }
 0x235   : > { %v2984_v33 = vsel %vm441_vm0, %v17414_v9, %v17413_v63  ;;  %v17417_v61 = vrot.slane %v10334_v39, 1  ;;  %v17418_v51 = vrot.slane %v10334_v39, 3  ;;  %v17419_v26 = vrot.slane %v10356_v45, 1 }
 0x236   : > { %v2985_v54 = vsel %vm441_vm0, %v17416_v7, %v17415_v52  ;;  %v17420_v38 = vrot.slane %v10356_v45, 3  ;;  %v17421_v9 = vrot.slane %v10376_v17, 1  ;;  %v17422_v14 = vrot.slane %v10376_v17, 3 }
 0x237   : > { %v2986_v21 = vsel %vm441_vm0, %v17418_v51, %v17417_v61  ;;  %v17423_v27 = vrot.slane %v10383_v35, 1  ;;  %v17424_v59 = vrot.slane %v10383_v35, 3  ;;  %v17425_v51 = vrot.slane %v10418_v60, 1 }
 0x238   : > { %v2987_v63 = vsel %vm441_vm0, %v17420_v38, %v17419_v26  ;;  %v2988_v52 = vsel %vm441_vm0, %v17422_v14, %v17421_v9  ;;  %v17426_v61 = vrot.slane %v10418_v60, 3  ;;  %v17427_v38 = vrot.slane %v10425_v10, 1 }
 0x239   : > { %v2989_v7 = vsel %vm441_vm0, %v17424_v59, %v17423_v27  ;;  %v17428_v26 = vrot.slane %v10425_v10, 3  ;;  %v17429_v14 = vrot.slane %v10428_v58, 1  ;;  %v17430_v9 = vrot.slane %v10428_v58, 3 }
 0x23a   : > { %v2990_v30 = vsel %vm441_vm0, %v17426_v61, %v17425_v51  ;;  %v17431_v27 = vrot.slane %v10431_v3, 1  ;;  %v17432_v59 = vrot.slane %v10431_v3, 3  ;;  %v17433_v51 = vrot.slane %v10446_v18, 1 }
 0x23b   : > { %v2991_v42 = vsel %vm441_vm0, %v17428_v26, %v17427_v38  ;;  %v2992_v5 = vsel %vm441_vm0, %v17430_v9, %v17429_v14  ;;  %v17434_v61 = vrot.slane %v10446_v18, 3  ;;  %v17435_v38 = vrot.slane %v10458_v31, 1 }
 0x23c   : > { %v2993_v32 = vsel %vm441_vm0, %v17432_v59, %v17431_v27  ;;  %v17436_v26 = vrot.slane %v10458_v31, 3  ;;  %v17437_v14 = vrot.slane %v10461_v1, 1  ;;  %v17438_v9 = vrot.slane %v10461_v1, 3 }
 0x23d   : > { %v2994_v19 = vsel %vm441_vm0, %v17434_v61, %v17433_v51  ;;  %v17439_v27 = vrot.slane %v10464_v15, 1  ;;  %v17440_v59 = vrot.slane %v10464_v15, 3  ;;  %v17441_v51 = vrot.slane %v10319_v6, 7 }
 0x23e   : > { %v2995_v49 = vsel %vm441_vm0, %v17436_v26, %v17435_v38  ;;  %v2996_v55 = vsel %vm441_vm0, %v17438_v9, %v17437_v14  ;;  %v17443_v37 = vrot.slane %v10314_v22, 7  ;;  %v17445_v26 = vrot.slane %v10309_v47, 7 }
 0x23f   : > { %v2997_v23 = vsel %vm441_vm0, %v17440_v59, %v17439_v27  ;;  %v10689_v61 = vsel %vm458_vm1, %v2980_v50, %v17441_v51  ;;  %v17447_v9 = vrot.slane %v10304_v13, 7  ;;  %v17449_v27 = vrot.slane %v10324_v28, 7  ;;  %v17485_v28 = vld [vmem:[#allocation125_spill] sm:$0xff] }
 0x240   : > { %17442 = vst [vmem:[#allocation30_spill] sm:$0xff] %v10689_v61  ;;  %v10694_v38 = vsel %vm458_vm1, %v2981_v36, %v17443_v37  ;;  %v10699_v14 = vsel %vm458_vm1, %v2982_v16, %v17445_v26  ;;  %v17451_v59 = vrot.slane %v10329_v25, 7  ;;  %v17453_v36 = vrot.slane %v10334_v39, 7 }
 0x241   : > { %17444 = vst [vmem:[#allocation34_spill] sm:$0xff] %v10694_v38  ;;  %17446 = vst [vmem:[#allocation60_spill] sm:$0xff] %v10699_v14  ;;  %v10704_v15 = vsel %vm458_vm1, %v2983_v41, %v17447_v9  ;;  %v10709_v50 = vsel %vm458_vm1, %v2984_v33, %v17449_v27  ;;  %v17455_v51 = vrot.slane %v10356_v45, 7  ;;  %v17457_v26 = vrot.slane %v10376_v17, 7 }
 0x242   : > { %17448 = vst [vmem:[#allocation31_spill] sm:$0xff] %v10704_v15  ;;  %17450 = vst [vmem:[#allocation11_spill] sm:$0xff] %v10709_v50  ;;  %v10714_v37 = vsel %vm458_vm1, %v2985_v54, %v17451_v59  ;;  %v10719_v16 = vsel %vm458_vm1, %v2986_v21, %v17453_v36  ;;  %v17459_v9 = vrot.slane %v10383_v35, 7  ;;  %v17461_v27 = vrot.slane %v10418_v60, 7  ;;  %v17484_v15 = vld [vmem:[#allocation53_spill] sm:$0xff]  ;;  %v17498_v35 = vld [vmem:[#allocation96_spill] sm:$0xff] }
 0x243   : > { %17452 = vst [vmem:[#allocation113_spill] sm:$0xff] %v10714_v37  ;;  %17454 = vst [vmem:[#allocation126_spill] sm:$0xff] %v10719_v16  ;;  %v10724_v41 = vsel %vm458_vm1, %v2987_v63, %v17455_v51  ;;  %v10729_v33 = vsel %vm458_vm1, %v2988_v52, %v17457_v26  ;;  %v17463_v59 = vrot.slane %v10425_v10, 7  ;;  %v17465_v36 = vrot.slane %v10428_v58, 7 }
 0x244   : > { %17456 = vst [vmem:[#allocation70_spill] sm:$0xff] %v10724_v41  ;;  %17458 = vst [vmem:[#allocation127_spill] sm:$0xff] %v10729_v33  ;;  %v10734_v54 = vsel %vm458_vm1, %v2989_v7, %v17459_v9  ;;  %v10739_v21 = vsel %vm458_vm1, %v2990_v30, %v17461_v27  ;;  %v17466_v51 = vrot.slane %v10431_v3, 7  ;;  %v17467_v7 = vrot.slane %v10446_v18, 7 }
 0x245   : > { %17460 = vst [vmem:[#allocation97_spill] sm:$0xff] %v10734_v54  ;;  %17462 = vst [vmem:[#allocation76_spill] sm:$0xff] %v10739_v21  ;;  %v10744_v63 = vsel %vm458_vm1, %v2991_v42, %v17463_v59  ;;  %v3010_v52 = vsel %vm458_vm1, %v2992_v5, %v17465_v36  ;;  %v3333_v30 = vrot.slane %v10434_v43, 3  ;;  %v3334_v27 = vrot.slane %v10437_v8, 3  ;;  %v17492_v54 = vld [vmem:[#allocation68_spill] sm:$0xff] }
 0x246   : > { %17464 = vst [vmem:[#allocation99_spill] sm:$0xff] %v10744_v63  ;;  %v3011_v26 = vsel %vm458_vm1, %v2993_v32, %v17466_v51  ;;  %v3012_v9 = vsel %vm458_vm1, %v2994_v19, %v17467_v7  ;;  %v3335_v41 = vrot.slane %v10440_v44, 3  ;;  %v3336_v42 = vrot.slane %v10443_v4, 3 }
 0x247   : > { %v3337_v59 = vrot.slane %v10449_v24, 3  ;;  %v17468_v5 = vrot.slane %v10458_v31, 7  ;;  %v17469_v32 = vrot.slane %v10461_v1, 7  ;;  %v3338_v19 = vrot.slane %v10452_v29, 3 }
 0x248   : > { %v3339_v43 = vrot.slane %v10455_v57, 3  ;;  %v10769_v8 = vsel %vm458_vm1, %v2997_v23, %v2961_v34  ;;  %v3034_v44 = vrot.slane %v10321_v20, 6  ;;  %v3035_v4 = vrot.slane %v10316_v40, 6  ;;  %v17475_v34 = vld [vmem:[#allocation29_spill] sm:$0xff] }
 0x249   : > { %v3013_v36 = vsel %vm458_vm1, %v2995_v49, %v17468_v5  ;;  %v3014_v51 = vsel %vm458_vm1, %v2996_v55, %v17469_v32  ;;  %17470 = vst [vmem:[#allocation120_spill] sm:$0xff] %v10769_v8  ;;  %v3036_v24 = vrot.slane %v10311_v46, 6  ;;  %v3037_v49 = vrot.slane %v10306_v53, 6  ;;  %v17477_v32 = vld [vmem:[#allocation41_spill] sm:$0xff] }
 0x24a   : > { %v3038_v7 = vrot.slane %v10326_v11, 6  ;;  %v10778_v55 = vsel %vm3376_vm5, %v10529_v62, %v3333_v30  ;;  %v10782_v29 = vsel %vm3376_vm5, %v10539_v2, %v3334_v27  ;;  %v10786_v23 = vsel %vm3376_vm5, %v10554_v48, %v3335_v41  ;;  %v17478_v62 = vld [vmem:[#allocation51_spill] sm:$0xff]  ;;  %v17481_v48 = vld [vmem:[#allocation20_spill] sm:$0xff] }
 0x24b   : > { %17471 = vst [vmem:[#allocation122_spill] sm:$0xff] %v10778_v55  ;;  %17472 = vst [vmem:[#allocation74_spill] sm:$0xff] %v10782_v29  ;;  %v10790_v57 = vsel %vm3376_vm5, %v10566_v12, %v3336_v42  ;;  %v10794_v5 = vsel %vm3376_vm5, %v17475_v34, %v3337_v59  ;;  %v3039_v16 = vrot.slane %v17477_v32, 6  ;;  %v3040_v30 = vrot.slane %v17478_v62, 6  ;;  %v17482_v27 = vld [vmem:[#allocation52_spill] sm:$0xff]  ;;  %v17483_v12 = vld [vmem:[#allocation43_spill] sm:$0xff] }
 0x24c   : > { %17473 = vst [vmem:[#allocation123_spill] sm:$0xff] %v10786_v23  ;;  %17474 = vst [vmem:[#allocation101_spill] sm:$0xff] %v10790_v57  ;;  %v10799_v37 = vsel %vm3376_vm5, %v3244_v0, %v3338_v19  ;;  %v10802_v2 = vsel %vm3376_vm5, %v3249_v56, %v3339_v43  ;;  %v3041_v41 = vrot.slane %v17481_v48, 6  ;;  %v3042_v50 = vrot.slane %v17482_v27, 6 }
 0x24d   : > { %17476 = vst [vmem:[#allocation124_spill] sm:$0xff] %v10794_v5  ;;  %17479 = vst [vmem:[#allocation75_spill] sm:$0xff] %v10799_v37  ;;  %v3043_v42 = vrot.slane %v17483_v12, 6  ;;  %v3044_v14 = vrot.slane %v17484_v15, 6  ;;  %v3070_v59 = vrot.slane %v10321_v20, 4  ;;  %v3071_v34 = vrot.slane %v10316_v40, 4 }
 0x24e   : > { %17480 = vst [vmem:[#allocation109_spill] sm:$0xff] %v10802_v2  ;;  %v3072_v38 = vrot.slane %v10311_v46, 4  ;;  %v3073_v0 = vrot.slane %v10306_v53, 4  ;;  %v3074_v19 = vrot.slane %v10326_v11, 4  ;;  %v3075_v56 = vrot.slane %v17477_v32, 4  ;;  %v10825_v11 = vld [vmem:[%s15683_s3] sm:$0xff] }
 0x24f   : > { %v3076_v43 = vrot.slane %v17478_v62, 4  ;;  %v3077_v61 = vrot.slane %v17481_v48, 4  ;;  %v3078_v45 = vrot.slane %v17482_v27, 4  ;;  %v3079_v39 = vrot.slane %v17483_v12, 4  ;;  %17487 = vst [vmem:[#allocation114_spill] sm:$0xff] %v10825_v11  ;;  %v17488_v32 = vld [vmem:[#allocation112_spill] sm:$0xff] }
 0x250   : > { %v3080_v25 = vrot.slane %v17484_v15, 4  ;;  %v17486_v13 = vmax.f32 %v17485_v28, 0.0  ;;  %v17489_v53 = vmax.f32 %v17488_v32, 0.0  ;;  %v17490_v48 = vld [vmem:[#allocation87_spill] sm:$0xff]  ;;  %v17493_v33 = vmax.f32 %v17492_v54, 0.0  ;;  %v17496_v15 = vld [vmem:[#allocation116_spill] sm:$0xff] }
 0x251   : > { %v17491_v63 = vmax.f32 %v17490_v48, 0.0  ;;  %v17497_v60 = vmax.f32 %v17496_v15, 0.0  ;;  %v17500_v48 = vld [vmem:[#allocation117_spill] sm:$0xff]  ;;  %v17502_v54 = vld [vmem:[#allocation119_spill] sm:$0xff]  ;;  %v17504_v2 = vld [vmem:[#allocation40_spill] sm:$0xff] }
 0x252   : > { %v3106_v46 = vsel %vm441_vm0, %v17486_v13, %v3034_v44  ;;  %v3107_v62 = vsel %vm441_vm0, %v17489_v53, %v3035_v4  ;;  %v3109_v47 = vsel %vm441_vm0, %v17493_v33, %v3037_v49  ;;  %v17494_v13 = vld [vmem:[#allocation69_spill] sm:$0xff]  ;;  %v17499_v53 = vmax.f32 %v17498_v35, 0.0 }
 0x253   : > { %v3108_v21 = vsel %vm441_vm0, %v17491_v63, %v3036_v24  ;;  %v17495_v44 = vmax.f32 %v17494_v13, 0.0  ;;  %v3111_v32 = vsel %vm441_vm0, %v17497_v60, %v3039_v16  ;;  %v17501_v63 = vmax.f32 %v17500_v48, 0.0  ;;  %v17533_v48 = vld [vmem:[#allocation58_spill] sm:$0xff] }
 0x254   : > { %v3112_v4 = vsel %vm441_vm0, %v17499_v53, %v3040_v30  ;;  %v17503_v33 = vmax.f32 %v17502_v54, 0.0  ;;  %v17505_v13 = vrot.slane %v17504_v2, 5  ;;  %v17508_v60 = vrot.slane %v10428_v58, 5  ;;  %v17510_v30 = vld [vmem:[#allocation13_spill] sm:$0xff] }
 0x255   : > { %v3110_v8 = vsel %vm441_vm0, %v17495_v44, %v3038_v7  ;;  %v3113_v24 = vsel %vm441_vm0, %v17501_v63, %v3041_v41  ;;  %v17506_v7 = vrot.slane %v10425_v10, 5  ;;  %v10866_v53 = vrot.slane %v10825_v11, %v17510_v30 }
 0x256   : > { %v3114_v49 = vsel %vm441_vm0, %v17503_v33, %v3042_v50  ;;  %v10862_v16 = vsel %vm619_vm2, %v3010_v52, %v17508_v60  ;;  %v17512_v41 = vrot.slane %v10431_v3, 5  ;;  %v17514_v2 = vrot.slane %v10446_v18, 5 }
 0x257   : > { %v10857_v44 = vsel %vm619_vm2, %v17506_v7, %v17505_v13  ;;  %17509 = vst [vmem:[#allocation115_spill] sm:$0xff] %v10862_v16  ;;  %17511 = vst [vmem:[#allocation72_spill] sm:$0xff] %v10866_v53  ;;  %v17516_v13 = vrot.slane %v10458_v31, 5  ;;  %v17518_v52 = vrot.slane %v10461_v1, 5  ;;  %v10894_v18 = vmul.f32 %v10866_v53, %v10778_v55  ;;  %v17521_v31 = vld [vmem:[#allocation26_spill] sm:$0xff] }
 0x258   : > { %17507 = vst [vmem:[#allocation71_spill] sm:$0xff] %v10857_v44  ;;  %v10871_v50 = vsel %vm619_vm2, %v3011_v26, %v17512_v41  ;;  %v10876_v63 = vsel %vm619_vm2, %v3012_v9, %v17514_v2  ;;  %v10890_v3 = vmul.f32 %v10866_v53, %v10857_v44  ;;  %v10898_v26 = vmul.f32 %v10866_v53, %v10862_v16  ;;  %v17529_v2 = vld [vmem:[#allocation50_spill] sm:$0xff] }
 0x259   : > { %17513 = vst [vmem:[#allocation61_spill] sm:$0xff] %v10871_v50  ;;  %17515 = vst [vmem:[#allocation32_spill] sm:$0xff] %v10876_v63  ;;  %v10881_v58 = vsel %vm619_vm2, %v3013_v36, %v17516_v13  ;;  %v10886_v33 = vsel %vm619_vm2, %v3014_v51, %v17518_v52  ;;  %v10902_v9 = vmul.f32 %v10866_v53, %v17521_v31  ;;  %v17525_v51 = vld [vmem:[#allocation28_spill] sm:$0xff] }
 0x25a   : > { %17517 = vst [vmem:[#allocation15_spill] sm:$0xff] %v10881_v58  ;;  %17519 = vst [vmem:[#allocation46_spill] sm:$0xff] %v10886_v33  ;;  %v10906_v1 = vmul.f32 %v10866_v53, %v10782_v29  ;;  %v10910_v36 = vmul.f32 %v10866_v53, %v10871_v50  ;;  %v10914_v7 = vmul.f32 %v10866_v53, %v17525_v51 }
 0x25b   : > { %17520 = vst [vmem:[#allocation37_spill] sm:$0xff] %v10898_v26  ;;  %17522 = vst [vmem:[#allocation103_spill] sm:$0xff] %v10902_v9  ;;  %v10918_v60 = vmul.f32 %v10866_v53, %v10786_v23  ;;  %v10922_v41 = vmul.f32 %v10866_v53, %v10876_v63  ;;  %v10926_v13 = vmul.f32 %v10866_v53, %v17529_v2 }
 0x25c   : > { %17523 = vst [vmem:[#allocation104_spill] sm:$0xff] %v10906_v1  ;;  %17524 = vst [vmem:[#allocation105_spill] sm:$0xff] %v10910_v36  ;;  %v10930_v52 = vmul.f32 %v10866_v53, %v10790_v57  ;;  %v10934_v30 = vmul.f32 %v10866_v53, %v10881_v58  ;;  %v10938_v35 = vmul.f32 %v10866_v53, %v17533_v48  ;;  %v17541_v36 = vld [vmem:[#allocation118_spill] sm:$0xff] }
 0x25d   : > { %17526 = vst [vmem:[#allocation16_spill] sm:$0xff] %v10914_v7  ;;  %17527 = vst [vmem:[#allocation47_spill] sm:$0xff] %v10918_v60  ;;  %v10942_v15 = vmul.f32 %v10866_v53, %v10794_v5  ;;  %v17542_v1 = vmax.f32 %v17541_v36, 0.0  ;;  %v10959_v9 = vsel %vm458_vm1, %v3106_v46, %v3070_v59  ;;  %v10972_v26 = vsel %vm458_vm1, %v3109_v47, %v3073_v0 }
 0x25e   : > { %17528 = vst [vmem:[#allocation38_spill] sm:$0xff] %v10922_v41  ;;  %17530 = vst [vmem:[#allocation44_spill] sm:$0xff] %v10926_v13  ;;  %v10946_v41 = vmul.f32 %v10866_v53, %v10886_v33  ;;  %v17537_v13 = vld [vmem:[#allocation33_spill] sm:$0xff]  ;;  %v10981_v46 = vsel %vm458_vm1, %v3112_v4, %v3076_v43  ;;  %v3201_v59 = vrot.slane %v17482_v27, 5  ;;  %v3132_v47 = vsel %vm458_vm1, %v3114_v49, %v3078_v45 }
 0x25f   : > { %17531 = vst [vmem:[#allocation48_spill] sm:$0xff] %v10930_v52  ;;  %17532 = vst [vmem:[#allocation39_spill] sm:$0xff] %v10934_v30  ;;  %v10950_v60 = vmul.f32 %v10866_v53, %v17537_v13  ;;  %v17539_v52 = vld [vmem:[#allocation100_spill] sm:$0xff]  ;;  %v17550_v49 = vld [vmem:[#allocation21_spill] sm:$0xff] }
 0x260   : > { %17534 = vst [vmem:[#allocation17_spill] sm:$0xff] %v10938_v35  ;;  %17535 = vst [vmem:[#allocation49_spill] sm:$0xff] %v10942_v15  ;;  %v17540_v7 = vmax.f32 %v17539_v52, 0.0  ;;  %v3116_v35 = vsel %vm441_vm0, %v17542_v1, %v3044_v14  ;;  %v10963_v15 = vmul.f32 %v10866_v53, %v10799_v37  ;;  %v10978_v14 = vsel %vm458_vm1, %v3111_v32, %v3075_v56 }
 0x261   : > { %17536 = vst [vmem:[#allocation82_spill] sm:$0xff] %v10946_v41  ;;  %17538 = vst [vmem:[#allocation110_spill] sm:$0xff] %v10950_v60  ;;  %v10966_v41 = vsel %vm458_vm1, %v3107_v62, %v3071_v34  ;;  %v10969_v60 = vsel %vm458_vm1, %v3108_v21, %v3072_v38  ;;  %v17545_v62 = vmax.f32 %v17502_v54, 0.0  ;;  %v10987_v38 = vsel %vm458_vm1, %v3113_v24, %v3077_v61  ;;  %v17549_v24 = vld [vmem:[#allocation18_spill] sm:$0xff] }
 0x262   : > { %v3115_v30 = vsel %vm441_vm0, %v17540_v7, %v3043_v42  ;;  %v10975_v42 = vsel %vm458_vm1, %v3110_v8, %v3074_v19  ;;  %17543 = vst [vmem:[#allocation83_spill] sm:$0xff] %v10978_v14  ;;  %17544 = vst [vmem:[#allocation63_spill] sm:$0xff] %v10981_v46  ;;  %v3206_v21 = vrot.slane %v17483_v12, 5  ;;  %v17547_v8 = vmov %v17540_v7  ;;  %v17554_v7 = vld [vmem:[#allocation53_spill] sm:$0xff] }
 0x263   : > { %v3203_v34 = vrot.slane %v17545_v62, 5  ;;  %17546 = vst [vmem:[#allocation84_spill] sm:$0xff] %v10987_v38  ;;  %v3208_v0 = vrot.slane %v17547_v8, 5  ;;  %v3133_v32 = vsel %vm458_vm1, %v3115_v30, %v3079_v39  ;;  %v3134_v19 = vsel %vm458_vm1, %v3116_v35, %v3080_v25  ;;  %v17551_v35 = vld [vmem:[#allocation8_spill] sm:$0xff]  ;;  %v17570_v38 = vld [vmem:[#allocation97_spill] sm:$0xff] }
 0x264   : > { %v17548_v54 = vmax.f32 %v17485_v28, 0.0  ;;  %v3200_v12 = vrot.slane %v10376_v17, 5  ;;  %v3205_v39 = vrot.slane %v17549_v24, 5  ;;  %v3210_v25 = vrot.slane %v17550_v49, 5  ;;  %v17558_v24 = vld [vmem:[#allocation120_spill] sm:$0xff] }
 0x265   : > { %v3204_v4 = vsel %vm619_vm2, %v3201_v59, %v3203_v34  ;;  %v17552_v30 = vsub.s32 3, %v17551_v35  ;;  %v3209_v28 = vsel %vm619_vm2, %v3206_v21, %v3208_v0  ;;  %v3211_v52 = vrot.slane %v17554_v7, 5  ;;  %v17556_v34 = vld [vmem:[#allocation35_spill] sm:$0xff] }
 0x266   : > { %v10999_v43 = vrot.slane %v17548_v54, 5  ;;  %v17555_v62 = vmax.f32 %v17541_v36, 0.0  ;;  %v3330_v54 = vrot.slane %v3132_v47, 3  ;;  %v3331_v17 = vrot.slane %v3133_v32, 3 }
 0x267   : > { %v11010_v1 = vrot.slane %v10825_v11, %v17552_v30  ;;  %v3332_v61 = vrot.slane %v3134_v19, 3  ;;  %v17557_v45 = vrot.slane %v17556_v34, 5  ;;  %v17583_v46 = vrot.slane %v10321_v20, 5 }
 0x268   : > { %v3213_v8 = vrot.slane %v17555_v62, 5 }
 0x269   : > { %17553 = vst [vmem:[#allocation45_spill] sm:$0xff] %v11010_v1  ;;  %v11020_v49 = vsel %vm619_vm2, %v17558_v24, %v17557_v45  ;;  %v3541_v30 = vmul.f32 %v11010_v1, %v10857_v44  ;;  %v3542_v0 = vmul.f32 %v11010_v1, %v10778_v55  ;;  %v3543_v7 = vmul.f32 %v11010_v1, %v10862_v16 }
 0x26a   : > { %17559 = vst [vmem:[#allocation85_spill] sm:$0xff] %v11020_v49  ;;  %v3544_v36 = vmul.f32 %v11010_v1, %v17521_v31  ;;  %v3545_v47 = vmul.f32 %v11010_v1, %v10782_v29  ;;  %v3546_v32 = vmul.f32 %v11010_v1, %v10871_v50  ;;  %v3547_v19 = vmul.f32 %v11010_v1, %v17525_v51  ;;  %v17562_v51 = vld [vmem:[#allocation112_spill] sm:$0xff]  ;;  %v17575_v31 = vld [vmem:[#allocation99_spill] sm:$0xff] }
 0x26b   : > { %v3548_v45 = vmul.f32 %v11010_v1, %v10786_v23  ;;  %v3549_v62 = vmul.f32 %v11010_v1, %v10876_v63  ;;  %v3550_v34 = vmul.f32 %v11010_v1, %v17529_v2  ;;  %v3551_v24 = vmul.f32 %v11010_v1, %v10790_v57  ;;  %v17560_v2 = vld [vmem:[#allocation59_spill] sm:$0xff]  ;;  %v17561_v23 = vld [vmem:[#allocation109_spill] sm:$0xff] }
 0x26c   : > { %v3552_v56 = vmul.f32 %v11010_v1, %v10881_v58  ;;  %v3553_v27 = vmul.f32 %v11010_v1, %v17533_v48  ;;  %v3554_v55 = vmul.f32 %v11010_v1, %v10794_v5  ;;  %v11052_v44 = vmul.f32 %v11010_v1, %v10886_v33 }
 0x26d   : > { %v11056_v63 = vmul.f32 %v11010_v1, %v17537_v13  ;;  %v11060_v57 = vmul.f32 %v11010_v1, %v10799_v37  ;;  %v3214_v58 = vsel %vm619_vm2, %v3211_v52, %v3213_v8  ;;  %v3558_v48 = vmul.f32 %v11010_v1, %v11020_v49  ;;  %v17564_v13 = vld [vmem:[#allocation14_spill] sm:$0xff]  ;;  %v17568_v49 = vld [vmem:[#allocation127_spill] sm:$0xff] }
 0x26e   : > { %v3559_v5 = vmul.f32 %v11010_v1, %v17560_v2  ;;  %v3560_v33 = vmul.f32 %v11010_v1, %v17561_v23  ;;  %v17563_v50 = vmax.f32 %v17562_v51, 0.0  ;;  %v11073_v16 = vsel %vm619_vm2, %v3200_v12, %v3201_v59 }
 0x26f   : > { %17565 = vst [vmem:[#allocation77_spill] sm:$0xff] %v11073_v16  ;;  %v11076_v37 = vsel %vm619_vm2, %v3205_v39, %v3206_v21  ;;  %v11079_v8 = vsel %vm619_vm2, %v3210_v25, %v3211_v52  ;;  %v11083_v2 = vsel %vm619_vm2, %v17568_v49, %v3200_v12  ;;  %v11087_v23 = vsel %vm619_vm2, %v17570_v38, %v3205_v39 }
 0x270   : > { %v3168_v29 = vrot.slane %v17563_v50, 5  ;;  %17566 = vst [vmem:[#allocation86_spill] sm:$0xff] %v11076_v37  ;;  %17567 = vst [vmem:[#allocation78_spill] sm:$0xff] %v11079_v8  ;;  %v17572_v50 = vld [vmem:[#allocation76_spill] sm:$0xff]  ;;  %v17574_v59 = vrot.slane %v10425_v10, 5  ;;  %v11100_v52 = vsel %vm3376_vm5, %v3204_v4, %v3330_v54  ;;  %v11103_v12 = vsel %vm3376_vm5, %v3209_v28, %v3331_v17 }
 0x271   : > { %17569 = vst [vmem:[#allocation88_spill] sm:$0xff] %v11083_v2  ;;  %17571 = vst [vmem:[#allocation65_spill] sm:$0xff] %v11087_v23  ;;  %v11091_v51 = vsel %vm619_vm2, %v17572_v50, %v3210_v25  ;;  %v11106_v49 = vsel %vm3376_vm5, %v3214_v58, %v3332_v61  ;;  %v3425_v38 = vmul.f32 %v10866_v53, %v11083_v2 }
 0x272   : > { %17573 = vst [vmem:[#allocation106_spill] sm:$0xff] %v11091_v51  ;;  %v11097_v21 = vsel %vm619_vm2, %v17575_v31, %v17574_v59  ;;  %17577 = vst [vmem:[#allocation89_spill] sm:$0xff] %v11100_v52  ;;  %v3426_v39 = vmul.f32 %v10866_v53, %v11073_v16  ;;  %v3427_v10 = vmul.f32 %v10866_v53, %v11100_v52  ;;  %v17580_v59 = vld [vmem:[#allocation73_spill] sm:$0xff]  ;;  %v17581_v52 = vld [vmem:[#allocation87_spill] sm:$0xff] }
 0x273   : > { %17576 = vst [vmem:[#allocation94_spill] sm:$0xff] %v11097_v21  ;;  %17578 = vst [vmem:[#allocation79_spill] sm:$0xff] %v11103_v12  ;;  %v3428_v31 = vmul.f32 %v10866_v53, %v11087_v23  ;;  %v3537_v4 = vmul.f32 %v11010_v1, %v11091_v51  ;;  %v3538_v25 = vmul.f32 %v11010_v1, %v11079_v8  ;;  %v3171_v23 = vrot.slane %v17580_v59, 5 }
 0x274   : > { %17579 = vst [vmem:[#allocation90_spill] sm:$0xff] %v11106_v49  ;;  %v3539_v58 = vmul.f32 %v11010_v1, %v11106_v49  ;;  %v3540_v61 = vmul.f32 %v11010_v1, %v11097_v21  ;;  %v3429_v28 = vmul.f32 %v10866_v53, %v11076_v37  ;;  %v3430_v54 = vmul.f32 %v10866_v53, %v11103_v12 }
 0x275   : > { %v3431_v17 = vmul.f32 %v10866_v53, %v11091_v51  ;;  %v3432_v50 = vmul.f32 %v10866_v53, %v11079_v8  ;;  %v17582_v16 = vmax.f32 %v17581_v52, 0.0  ;;  %v3433_v1 = vmul.f32 %v10866_v53, %v11106_v49 }
 0x276   : > { %v3434_v37 = vmul.f32 %v10866_v53, %v11097_v21  ;;  %v17584_v12 = vrot.slane %v10319_v6, 5  ;;  %v17586_v8 = vmov %v17583_v46  ;;  %v17588_v52 = vrot.slane %v10314_v22, 5  ;;  %v17590_v21 = vld [vmem:[#allocation98_spill] sm:$0xff] }
 0x277   : > { %v3173_v2 = vrot.slane %v17582_v16, 5  ;;  %v11150_v59 = vsel %vm619_vm2, %v17586_v8, %v10999_v43  ;;  %v17587_v16 = vrot.slane %v10316_v40, 5  ;;  %v11160_v14 = vadd.f32 %v3537_v4, %v3425_v38 }
 0x278   : > { %v11144_v51 = vsel %vm619_vm2, %v17584_v12, %v17583_v46  ;;  %v11162_v6 = vadd.f32 %v3538_v25, %v3426_v39  ;;  %v11164_v46 = vadd.f32 %v3539_v58, %v3427_v10  ;;  %v11166_v12 = vadd.f32 %v3540_v61, %v3428_v31  ;;  %v17594_v10 = vld [vmem:[#allocation37_spill] sm:$0xff] }
 0x279   : > { %17585 = vst [vmem:[#allocation66_spill] sm:$0xff] %v11144_v51  ;;  %v11157_v49 = vsel %vm619_vm2, %v17588_v52, %v17587_v16  ;;  %v11168_v20 = vadd.f32 %v3541_v30, %v3429_v28  ;;  %v11170_v43 = vadd.f32 %v3542_v0, %v3430_v54  ;;  %v11172_v8 = vadd.f32 %v3543_v7, %v3431_v17  ;;  %v17596_v30 = vld [vmem:[#allocation103_spill] sm:$0xff]  ;;  %v17598_v7 = vld [vmem:[#allocation104_spill] sm:$0xff]  ;;  %v17618_v28 = vld [vmem:[#allocation121_spill] sm:$0xff] }
 0x27a   : > { %17589 = vst [vmem:[#allocation93_spill] sm:$0xff] %v11157_v49  ;;  %v11174_v51 = vadd.f32 %v3544_v36, %v3432_v50  ;;  %v11176_v16 = vadd.f32 %v3545_v47, %v3433_v1  ;;  %v11178_v52 = vadd.f32 %v3546_v32, %v3434_v37  ;;  %v11181_v38 = vadd.f32 %v3547_v19, %v10890_v3  ;;  %v17600_v36 = vld [vmem:[#allocation105_spill] sm:$0xff]  ;;  %v17602_v37 = vld [vmem:[#allocation16_spill] sm:$0xff]  ;;  %v17604_v3 = vld [vmem:[#allocation47_spill] sm:$0xff] }
 0x27b   : > { %v11184_v39 = vadd.f32 %v3548_v45, %v10894_v18  ;;  %v11187_v31 = vadd.f32 %v3549_v62, %v17594_v10  ;;  %v11190_v0 = vadd.f32 %v3550_v34, %v17596_v30  ;;  %v11193_v4 = vadd.f32 %v3551_v24, %v17598_v7  ;;  %v17606_v18 = vld [vmem:[#allocation38_spill] sm:$0xff]  ;;  %v17608_v45 = vld [vmem:[#allocation44_spill] sm:$0xff] }
 0x27c   : > { %17591 = vst [vmem:[#allocation95_spill] sm:$0xff] %v11178_v52  ;;  %17592 = vst [vmem:[#allocation55_spill] sm:$0xff] %v11181_v38  ;;  %v11196_v1 = vadd.f32 %v3552_v56, %v17600_v36  ;;  %v11199_v47 = vadd.f32 %v3553_v27, %v17602_v37  ;;  %v11202_v32 = vadd.f32 %v3554_v55, %v17604_v3  ;;  %v17610_v34 = vld [vmem:[#allocation48_spill] sm:$0xff]  ;;  %v17612_v56 = vld [vmem:[#allocation39_spill] sm:$0xff]  ;;  %v3176_v54 = vrot.slane %v17618_v28, 5 }
 0x27d   : > { %17593 = vst [vmem:[#allocation107_spill] sm:$0xff] %v11184_v39  ;;  %17595 = vst [vmem:[#allocation91_spill] sm:$0xff] %v11187_v31  ;;  %v11206_v19 = vadd.f32 %v11052_v44, %v17606_v18  ;;  %v11210_v62 = vadd.f32 %v11056_v63, %v17608_v45  ;;  %v11214_v24 = vadd.f32 %v11060_v57, %v17610_v34  ;;  %v17614_v27 = vld [vmem:[#allocation17_spill] sm:$0xff]  ;;  %v17619_v17 = vld [vmem:[#allocation82_spill] sm:$0xff] }
 0x27e   : > { %17597 = vst [vmem:[#allocation62_spill] sm:$0xff] %v11190_v0  ;;  %17599 = vst [vmem:[#allocation92_spill] sm:$0xff] %v11193_v4  ;;  %v11217_v25 = vadd.f32 %v3558_v48, %v17612_v56  ;;  %v11220_v58 = vadd.f32 %v3559_v5, %v17614_v27  ;;  %v17616_v55 = vld [vmem:[#allocation49_spill] sm:$0xff]  ;;  %v11228_v50 = vadd.f32 %v11052_v44, %v17619_v17  ;;  %v17621_v10 = vld [vmem:[#allocation110_spill] sm:$0xff]  ;;  %v17624_v5 = vrot.slane %v10316_v40, 5 }
 0x27f   : > { %17601 = vst [vmem:[#allocation64_spill] sm:$0xff] %v11196_v1  ;;  %17603 = vst [vmem:[#allocation54_spill] sm:$0xff] %v11199_v47  ;;  %v11223_v61 = vadd.f32 %v3560_v33, %v17616_v55  ;;  %v11232_v30 = vadd.f32 %v11056_v63, %v17621_v10  ;;  %v11236_v48 = vadd.f32 %v11060_v57, %v10963_v15  ;;  %v17625_v33 = vld [vmem:[#allocation68_spill] sm:$0xff]  ;;  %v17628_v44 = vld [vmem:[#allocation69_spill] sm:$0xff] }
 0x280   : > { %17605 = vst [vmem:[#allocation23_spill] sm:$0xff] %v11202_v32  ;;  %17607 = vst [vmem:[#allocation24_spill] sm:$0xff] %v11206_v19  ;;  %v11241_v7 = vsel %vm619_vm2, %v17624_v5, %v3168_v29  ;;  %v17626_v36 = vmax.f32 %v17625_v33, 0.0  ;;  %v17627_v3 = vld [vmem:[#allocation12_spill] sm:$0xff]  ;;  %v17629_v45 = vmax.f32 %v17628_v44, 0.0  ;;  %v17630_v56 = vld [vmem:[#allocation41_spill] sm:$0xff] }
 0x281   : > { %17609 = vst [vmem:[#allocation10_spill] sm:$0xff] %v11210_v62  ;;  %17611 = vst [vmem:[#allocation25_spill] sm:$0xff] %v11214_v24  ;;  %v3181_v18 = vrot.slane %v17627_v3, 5  ;;  %v3186_v63 = vrot.slane %v17630_v56, 5  ;;  %v17631_v27 = vld [vmem:[#allocation116_spill] sm:$0xff]  ;;  %v17633_v15 = vld [vmem:[#allocation51_spill] sm:$0xff] }
 0x282   : > { %17613 = vst [vmem:[#allocation57_spill] sm:$0xff] %v11217_v25  ;;  %17615 = vst [vmem:[#allocation81_spill] sm:$0xff] %v11220_v58  ;;  %v3178_v37 = vrot.slane %v17626_v36, 5  ;;  %v3183_v34 = vrot.slane %v17629_v45, 5  ;;  %v17632_v55 = vmax.f32 %v17631_v27, 0.0  ;;  %v3191_v57 = vrot.slane %v17633_v15, 5 }
 0x283   : > { %17617 = vst [vmem:[#allocation108_spill] sm:$0xff] %v11223_v61  ;;  %17620 = vst [vmem:[#allocation80_spill] sm:$0xff] %v11228_v50  ;;  %v17634_v17 = vld [vmem:[#allocation96_spill] sm:$0xff]  ;;  %v17636_v29 = vrot.slane %v17564_v13, 5  ;;  %v17640_v45 = vld [vmem:[#allocation117_spill] sm:$0xff]  ;;  %v3174_v27 = vsel %vm619_vm2, %v3171_v23, %v3173_v2 }
 0x284   : > { %17622 = vst [vmem:[#allocation102_spill] sm:$0xff] %v11232_v30  ;;  %17623 = vst [vmem:[#allocation56_spill] sm:$0xff] %v11236_v48  ;;  %v3188_v28 = vrot.slane %v17632_v55, 5  ;;  %v17635_v40 = vmax.f32 %v17634_v17, 0.0  ;;  %v17638_v33 = vld [vmem:[#allocation36_spill] sm:$0xff]  ;;  %v17641_v53 = vmax.f32 %v17640_v45, 0.0 }
 0x285   : > { %v11257_v5 = vsel %vm619_vm2, %v17636_v29, %v3171_v23  ;;  %v3180_v36 = vrot.slane %v17638_v33, 5  ;;  %v17639_v3 = vld [vmem:[#allocation20_spill] sm:$0xff]  ;;  %v17642_v55 = vrot.slane %v17590_v21, 5  ;;  %v17644_v17 = vld [vmem:[#allocation9_spill] sm:$0xff]  ;;  %v17645_v48 = vld [vmem:[#allocation19_spill] sm:$0xff]  ;;  %v3179_v29 = vsel %vm619_vm2, %v3176_v54, %v3178_v37 }
 0x286   : > { %v3193_v10 = vrot.slane %v17635_v40, 5  ;;  %17637 = vst [vmem:[#allocation27_spill] sm:$0xff] %v11257_v5  ;;  %v3196_v44 = vrot.slane %v17639_v3, 5  ;;  %v3198_v56 = vrot.slane %v17641_v53, 5  ;;  %v3185_v40 = vrot.slane %v17644_v17, 5  ;;  %v17647_v45 = vld [vmem:[#allocation42_spill] sm:$0xff] }
 0x287   : > { %v11267_v15 = vsel %vm619_vm2, %v17642_v55, %v3176_v54  ;;  %v3190_v30 = vrot.slane %v17645_v48, 5  ;;  %v11273_v33 = vsel %vm619_vm2, %v3180_v36, %v3181_v18  ;;  %v3184_v3 = vsel %vm619_vm2, %v3181_v18, %v3183_v34  ;;  %v17665_v58 = vld [vmem:[#allocation74_spill] sm:$0xff]  ;;  %v17672_v19 = vld [vmem:[#allocation15_spill] sm:$0xff]  ;;  %v17679_v1 = vld [vmem:[#allocation33_spill] sm:$0xff] }
 0x288   : > { %17643 = vst [vmem:[#allocation67_spill] sm:$0xff] %v11267_v15  ;;  %17646 = vst [vmem:[#allocation111_spill] sm:$0xff] %v11273_v33  ;;  %v3195_v53 = vrot.slane %v17647_v45, 5  ;;  %v11278_v23 = vsel %vm619_vm2, %v3185_v40, %v3186_v63  ;;  %v3189_v2 = vsel %vm619_vm2, %v3186_v63, %v3188_v28  ;;  %v3194_v17 = vsel %vm619_vm2, %v3191_v57, %v3193_v10  ;;  %v17678_v47 = vld [vmem:[#allocation46_spill] sm:$0xff]  ;;  %v17682_v31 = vld [vmem:[#allocation60_spill] sm:$0xff] }
 0x289   : > { %17648 = vst [vmem:[#allocation29_spill] sm:$0xff] %v11278_v23  ;;  %v11282_v55 = vsel %vm619_vm2, %v3190_v30, %v3191_v57  ;;  %v3199_v54 = vsel %vm619_vm2, %v3196_v44, %v3198_v56  ;;  %v3322_v37 = vrot.slane %v10959_v9, 3  ;;  %v3323_v18 = vrot.slane %v10966_v41, 3  ;;  %v17653_v57 = vld [vmem:[#allocation83_spill] sm:$0xff]  ;;  %v17656_v9 = vld [vmem:[#allocation22_spill] sm:$0xff]  ;;  %v17686_v38 = vld [vmem:[#allocation109_spill] sm:$0xff] }
 0x28a   : > { %17649 = vst [vmem:[#allocation52_spill] sm:$0xff] %v11282_v55  ;;  %v11286_v48 = vsel %vm619_vm2, %v3195_v53, %v3196_v44  ;;  %v3324_v34 = vrot.slane %v10969_v60, 3  ;;  %v3325_v45 = vrot.slane %v10972_v26, 3  ;;  %v3326_v63 = vrot.slane %v10975_v42, 3  ;;  %v17655_v44 = vld [vmem:[#allocation84_spill] sm:$0xff]  ;;  %v17658_v41 = vld [vmem:[#allocation30_spill] sm:$0xff] }
 0x28b   : > { %17650 = vst [vmem:[#allocation43_spill] sm:$0xff] %v11286_v48  ;;  %v17651_v28 = vsub.s32 6, %v17551_v35  ;;  %v3327_v10 = vrot.slane %v17653_v57, 3  ;;  %v17654_v48 = vld [vmem:[#allocation63_spill] sm:$0xff]  ;;  %v3329_v56 = vrot.slane %v17655_v44, 3  ;;  %v17657_v61 = vrot.slane %v17656_v9, 5 }
 0x28c   : > { %v3328_v55 = vrot.slane %v17654_v48, 3  ;;  %v17660_v26 = vrot.slane %v10314_v22, 5  ;;  %v17661_v42 = vld [vmem:[#allocation34_spill] sm:$0xff]  ;;  %v17666_v9 = vld [vmem:[#allocation61_spill] sm:$0xff]  ;;  %v17668_v22 = vld [vmem:[#allocation123_spill] sm:$0xff] }
 0x28d   : > { %v11297_v50 = vrot.slane %v10825_v11, %v17651_v28  ;;  %v11306_v60 = vsel %vm619_vm2, %v17658_v41, %v17657_v61  ;;  %v17663_v28 = vld [vmem:[#allocation115_spill] sm:$0xff]  ;;  %v17664_v57 = vld [vmem:[#allocation26_spill] sm:$0xff]  ;;  %v17667_v61 = vld [vmem:[#allocation28_spill] sm:$0xff] }
 0x28e   : > { %17659 = vst [vmem:[#allocation119_spill] sm:$0xff] %v11306_v60  ;;  %v11312_v35 = vsel %vm619_vm2, %v17661_v42, %v17660_v26  ;;  %v17669_v26 = vld [vmem:[#allocation32_spill] sm:$0xff] }
 0x28f   : > { %17652 = vst [vmem:[#allocation125_spill] sm:$0xff] %v11297_v50  ;;  %17662 = vst [vmem:[#allocation40_spill] sm:$0xff] %v11312_v35  ;;  %v3658_v11 = vmul.f32 %v11297_v50, %v17663_v28  ;;  %v3659_v48 = vmul.f32 %v11297_v50, %v17664_v57  ;;  %v3660_v44 = vmul.f32 %v11297_v50, %v17665_v58  ;;  %v17670_v28 = vld [vmem:[#allocation50_spill] sm:$0xff]  ;;  %v17671_v57 = vld [vmem:[#allocation101_spill] sm:$0xff] }
 0x290   : > { %v3661_v25 = vmul.f32 %v11297_v50, %v17666_v9  ;;  %v3662_v41 = vmul.f32 %v11297_v50, %v17667_v61  ;;  %v3663_v24 = vmul.f32 %v11297_v50, %v17668_v22  ;;  %v11328_v42 = vmul.f32 %v11297_v50, %v17669_v26  ;;  %v17674_v61 = vld [vmem:[#allocation58_spill] sm:$0xff]  ;;  %v17676_v22 = vld [vmem:[#allocation124_spill] sm:$0xff] }
 0x291   : > { %v11332_v62 = vmul.f32 %v11297_v50, %v17670_v28  ;;  %v11336_v58 = vmul.f32 %v11297_v50, %v17671_v57  ;;  %v11340_v9 = vmul.f32 %v11297_v50, %v17672_v19  ;;  %v11344_v32 = vmul.f32 %v11297_v50, %v17674_v61  ;;  %v17680_v57 = vld [vmem:[#allocation75_spill] sm:$0xff]  ;;  %v17684_v61 = vld [vmem:[#allocation85_spill] sm:$0xff] }
 0x292   : > { %v11348_v26 = vmul.f32 %v11297_v50, %v17676_v22  ;;  %v3670_v28 = vmul.f32 %v11297_v50, %v17678_v47  ;;  %v3671_v4 = vmul.f32 %v11297_v50, %v17679_v1  ;;  %v3672_v0 = vmul.f32 %v11297_v50, %v17680_v57  ;;  %v17685_v22 = vld [vmem:[#allocation59_spill] sm:$0xff] }
 0x293   : > { %17673 = vst [vmem:[#allocation100_spill] sm:$0xff] %v11340_v9  ;;  %17675 = vst [vmem:[#allocation118_spill] sm:$0xff] %v11344_v32  ;;  %v17681_v19 = vrot.slane %v17564_v13, 5  ;;  %v3673_v32 = vmul.f32 %v11297_v50, %v17684_v61  ;;  %v3675_v47 = vmul.f32 %v11297_v50, %v17686_v38  ;;  %v17687_v1 = vrot.slane %v17590_v21, 5  ;;  %v17688_v9 = vld [vmem:[#allocation31_spill] sm:$0xff]  ;;  %v17695_v61 = vld [vmem:[#allocation126_spill] sm:$0xff] }
 0x294   : > { %17677 = vst [vmem:[#allocation18_spill] sm:$0xff] %v11348_v26  ;;  %v3674_v26 = vmul.f32 %v11297_v50, %v17685_v22  ;;  %v17690_v13 = vld [vmem:[#allocation11_spill] sm:$0xff]  ;;  %v11384_v22 = vsel %vm3376_vm5, %v11150_v59, %v3322_v37  ;;  %v11388_v38 = vsel %vm619_vm2, %v17695_v61, %v3190_v30  ;;  %v17697_v21 = vld [vmem:[#allocation70_spill] sm:$0xff]  ;;  %v11405_v59 = vsel %vm3376_vm5, %v3184_v3, %v3326_v63 }
 0x295   : > { %v11360_v39 = vsel %vm619_vm2, %v17682_v31, %v17681_v19  ;;  %v11372_v57 = vsel %vm619_vm2, %v17688_v9, %v17687_v1  ;;  %v11376_v52 = vsel %vm619_vm2, %v17690_v13, %v3180_v36  ;;  %v17692_v31 = vld [vmem:[#allocation113_spill] sm:$0xff]  ;;  %17694 = vst [vmem:[#allocation112_spill] sm:$0xff] %v11384_v22  ;;  %17696 = vst [vmem:[#allocation14_spill] sm:$0xff] %v11388_v38 }
 0x296   : > { %17683 = vst [vmem:[#allocation21_spill] sm:$0xff] %v11360_v39  ;;  %17689 = vst [vmem:[#allocation53_spill] sm:$0xff] %v11372_v57  ;;  %v11380_v19 = vsel %vm619_vm2, %v17692_v31, %v3185_v40  ;;  %v11392_v1 = vsel %vm619_vm2, %v17697_v21, %v3195_v53  ;;  %v11396_v36 = vsel %vm3376_vm5, %v11241_v7, %v3323_v18  ;;  %v17706_v7 = vld [vmem:[#allocation72_spill] sm:$0xff] }
 0x297   : > { %17691 = vst [vmem:[#allocation35_spill] sm:$0xff] %v11376_v52  ;;  %17693 = vst [vmem:[#allocation120_spill] sm:$0xff] %v11380_v19  ;;  %v11399_v9 = vsel %vm3376_vm5, %v3174_v27, %v3324_v34  ;;  %v11402_v40 = vsel %vm3376_vm5, %v3179_v29, %v3325_v45  ;;  %v11408_v30 = vsel %vm3376_vm5, %v3189_v2, %v3327_v10  ;;  %v17707_v27 = vld [vmem:[#allocation66_spill] sm:$0xff] }
 0x298   : > { %17698 = vst [vmem:[#allocation127_spill] sm:$0xff] %v11392_v1  ;;  %17699 = vst [vmem:[#allocation97_spill] sm:$0xff] %v11396_v36  ;;  %v11411_v37 = vsel %vm3376_vm5, %v3194_v17, %v3328_v55  ;;  %v11414_v53 = vsel %vm3376_vm5, %v3199_v54, %v3329_v56  ;;  %v11418_v18 = vmul.f32 %v17706_v7, %v11306_v60 }
 0x299   : > { %17700 = vst [vmem:[#allocation76_spill] sm:$0xff] %v11399_v9  ;;  %17701 = vst [vmem:[#allocation99_spill] sm:$0xff] %v11402_v40  ;;  %v11422_v29 = vmul.f32 %v17706_v7, %v17707_v27  ;;  %v11426_v3 = vmul.f32 %v17706_v7, %v11384_v22  ;;  %v11430_v2 = vmul.f32 %v17706_v7, %v11312_v35 }
 0x29a   : > { %17702 = vst [vmem:[#allocation73_spill] sm:$0xff] %v11405_v59  ;;  %17703 = vst [vmem:[#allocation87_spill] sm:$0xff] %v11408_v30  ;;  %v11434_v55 = vmul.f32 %v17706_v7, %v11157_v49  ;;  %v11438_v17 = vmul.f32 %v17706_v7, %v11396_v36  ;;  %v11442_v54 = vmul.f32 %v17706_v7, %v11360_v39 }
 0x29b   : > { %17704 = vst [vmem:[#allocation98_spill] sm:$0xff] %v11411_v37  ;;  %17705 = vst [vmem:[#allocation37_spill] sm:$0xff] %v11414_v53  ;;  %v11446_v34 = vmul.f32 %v17706_v7, %v11257_v5  ;;  %v11450_v45 = vmul.f32 %v17706_v7, %v11399_v9  ;;  %v11454_v63 = vmul.f32 %v17706_v7, %v11372_v57 }
 0x29c   : > { %v11458_v10 = vmul.f32 %v17706_v7, %v11267_v15  ;;  %v11462_v56 = vmul.f32 %v17706_v7, %v11402_v40  ;;  %v11466_v61 = vmul.f32 %v17706_v7, %v11376_v52  ;;  %v11470_v13 = vmul.f32 %v17706_v7, %v11273_v33 }
 0x29d   : > { %v11474_v31 = vmul.f32 %v17706_v7, %v11405_v59  ;;  %v11478_v21 = vmul.f32 %v17706_v7, %v11380_v19  ;;  %v11482_v50 = vmul.f32 %v17706_v7, %v11278_v23 }
 0x29e   : > { %17708 = vst [vmem:[#allocation103_spill] sm:$0xff] %v11458_v10  ;;  %17709 = vst [vmem:[#allocation104_spill] sm:$0xff] %v11462_v56  ;;  %v11486_v56 = vmul.f32 %v17706_v7, %v11408_v30  ;;  %v11502_v10 = vadd.f32 %v3661_v25, %v11166_v12  ;;  %v17730_v25 = vld [vmem:[#allocation118_spill] sm:$0xff] }
 0x29f   : > { %17710 = vst [vmem:[#allocation105_spill] sm:$0xff] %v11466_v61  ;;  %17711 = vst [vmem:[#allocation16_spill] sm:$0xff] %v11470_v13  ;;  %v11490_v61 = vmul.f32 %v17706_v7, %v11388_v38  ;;  %v11493_v13 = vadd.f32 %v3658_v11, %v11160_v14  ;;  %v11520_v11 = vadd.f32 %v11336_v58, %v11176_v16  ;;  %v17726_v14 = vld [vmem:[#allocation95_spill] sm:$0xff]  ;;  %v17739_v16 = vld [vmem:[#allocation92_spill] sm:$0xff] }
 0x2a0   : > { %17712 = vst [vmem:[#allocation47_spill] sm:$0xff] %v11474_v31  ;;  %17713 = vst [vmem:[#allocation38_spill] sm:$0xff] %v11478_v21  ;;  %v11496_v31 = vadd.f32 %v3659_v48, %v11162_v6  ;;  %v11499_v21 = vadd.f32 %v3660_v44, %v11164_v46  ;;  %v11516_v6 = vadd.f32 %v11332_v62, %v11174_v51  ;;  %v17727_v46 = vld [vmem:[#allocation100_spill] sm:$0xff]  ;;  %v17733_v48 = vld [vmem:[#allocation18_spill] sm:$0xff] }
 0x2a1   : > { %17714 = vst [vmem:[#allocation44_spill] sm:$0xff] %v11482_v50  ;;  %17715 = vst [vmem:[#allocation48_spill] sm:$0xff] %v11486_v56  ;;  %v11505_v50 = vadd.f32 %v3662_v41, %v11168_v20  ;;  %v11508_v56 = vadd.f32 %v3663_v24, %v11170_v43  ;;  %v11524_v12 = vadd.f32 %v17727_v46, %v17726_v14  ;;  %v17729_v20 = vld [vmem:[#allocation55_spill] sm:$0xff]  ;;  %v17737_v51 = vld [vmem:[#allocation62_spill] sm:$0xff] }
 0x2a2   : > { %17716 = vst [vmem:[#allocation39_spill] sm:$0xff] %v11490_v61  ;;  %17717 = vst [vmem:[#allocation17_spill] sm:$0xff] %v11493_v13  ;;  %v11512_v61 = vadd.f32 %v11328_v42, %v11172_v8  ;;  %v11528_v43 = vadd.f32 %v17730_v25, %v17729_v20  ;;  %v17732_v24 = vld [vmem:[#allocation107_spill] sm:$0xff] }
 0x2a3   : > { %17718 = vst [vmem:[#allocation49_spill] sm:$0xff] %v11496_v31  ;;  %17719 = vst [vmem:[#allocation121_spill] sm:$0xff] %v11499_v21  ;;  %v11532_v8 = vadd.f32 %v17733_v48, %v17732_v24  ;;  %v17735_v44 = vld [vmem:[#allocation91_spill] sm:$0xff]  ;;  %v17747_v24 = vld [vmem:[#allocation24_spill] sm:$0xff] }
 0x2a4   : > { %17720 = vst [vmem:[#allocation82_spill] sm:$0xff] %v11502_v10  ;;  %17721 = vst [vmem:[#allocation110_spill] sm:$0xff] %v11505_v50  ;;  %v11535_v41 = vadd.f32 %v3670_v28, %v17735_v44  ;;  %v17745_v20 = vld [vmem:[#allocation23_spill] sm:$0xff]  ;;  %v17749_v44 = vld [vmem:[#allocation10_spill] sm:$0xff] }
 0x2a5   : > { %17722 = vst [vmem:[#allocation68_spill] sm:$0xff] %v11508_v56  ;;  %17723 = vst [vmem:[#allocation12_spill] sm:$0xff] %v11512_v61  ;;  %v17741_v61 = vld [vmem:[#allocation64_spill] sm:$0xff]  ;;  %v17770_v31 = vld [vmem:[#allocation114_spill] sm:$0xff] }
 0x2a6   : > { %17724 = vst [vmem:[#allocation69_spill] sm:$0xff] %v11516_v6  ;;  %17725 = vst [vmem:[#allocation41_spill] sm:$0xff] %v11520_v11  ;;  %v11538_v6 = vadd.f32 %v3671_v4, %v17737_v51  ;;  %v11541_v11 = vadd.f32 %v3672_v0, %v17739_v16  ;;  %v11544_v14 = vadd.f32 %v3673_v32, %v17741_v61  ;;  %v17751_v51 = vld [vmem:[#allocation25_spill] sm:$0xff]  ;;  %v17757_v61 = vld [vmem:[#allocation108_spill] sm:$0xff] }
 0x2a7   : > { %17728 = vst [vmem:[#allocation116_spill] sm:$0xff] %v11524_v12  ;;  %17731 = vst [vmem:[#allocation51_spill] sm:$0xff] %v11528_v43  ;;  %v17743_v12 = vld [vmem:[#allocation54_spill] sm:$0xff]  ;;  %v11550_v43 = vadd.f32 %v3675_v47, %v17745_v20  ;;  %v17753_v16 = vld [vmem:[#allocation57_spill] sm:$0xff]  ;;  %v11571_v47 = vadd.f32 %v17733_v48, %v17757_v61  ;;  %v11591_v48 = vmul.f32 %v17706_v7, %v11411_v37 }
 0x2a8   : > { %17734 = vst [vmem:[#allocation96_spill] sm:$0xff] %v11532_v8  ;;  %17736 = vst [vmem:[#allocation36_spill] sm:$0xff] %v11535_v41  ;;  %v11547_v56 = vadd.f32 %v3674_v26, %v17743_v12  ;;  %v11553_v8 = vadd.f32 %v3670_v28, %v17747_v24  ;;  %v11556_v41 = vadd.f32 %v3671_v4, %v17749_v44  ;;  %v17755_v32 = vld [vmem:[#allocation81_spill] sm:$0xff]  ;;  %v17759_v28 = vld [vmem:[#allocation52_spill] sm:$0xff] }
 0x2a9   : > { %17738 = vst [vmem:[#allocation20_spill] sm:$0xff] %v11538_v6  ;;  %17740 = vst [vmem:[#allocation117_spill] sm:$0xff] %v11541_v11  ;;  %v11559_v6 = vadd.f32 %v3672_v0, %v17751_v51  ;;  %v11563_v11 = vadd.f32 %v17727_v46, %v17753_v16  ;;  %v11567_v26 = vadd.f32 %v17730_v25, %v17755_v32  ;;  %v17760_v4 = vld [vmem:[#allocation80_spill] sm:$0xff]  ;;  %v17762_v20 = vld [vmem:[#allocation102_spill] sm:$0xff] }
 0x2aa   : > { %17742 = vst [vmem:[#allocation9_spill] sm:$0xff] %v11544_v14  ;;  %17744 = vst [vmem:[#allocation19_spill] sm:$0xff] %v11547_v56  ;;  %v11575_v12 = vmul.f32 %v17706_v7, %v17759_v28  ;;  %v11579_v0 = vadd.f32 %v11328_v42, %v17760_v4  ;;  %v11583_v46 = vadd.f32 %v11332_v62, %v17762_v20  ;;  %v17764_v24 = vld [vmem:[#allocation56_spill] sm:$0xff]  ;;  %v17766_v51 = vld [vmem:[#allocation43_spill] sm:$0xff] }
 0x2ab   : > { %17746 = vst [vmem:[#allocation42_spill] sm:$0xff] %v11550_v43  ;;  %17748 = vst [vmem:[#allocation83_spill] sm:$0xff] %v11553_v8  ;;  %v11587_v25 = vadd.f32 %v11336_v58, %v17764_v24  ;;  %v11595_v44 = vmul.f32 %v17706_v7, %v11392_v1  ;;  %v11599_v42 = vmul.f32 %v17706_v7, %v17766_v51  ;;  %v17767_v16 = vld [vmem:[#allocation45_spill] sm:$0xff]  ;;  %v17768_v10 = vld [vmem:[#allocation8_spill] sm:$0xff] }
 0x2ac   : > { %17750 = vst [vmem:[#allocation63_spill] sm:$0xff] %v11556_v41  ;;  %17752 = vst [vmem:[#allocation84_spill] sm:$0xff] %v11559_v6  ;;  %v11603_v62 = vmul.f32 %v17706_v7, %v11414_v53  ;;  %v3507_v58 = vmul.f32 %v17767_v16, %v11360_v39  ;;  %v3508_v32 = vmul.f32 %v17767_v16, %v11257_v5  ;;  %v17769_v21 = vsub.s32 1, %v17768_v10 }
 0x2ad   : > { %17754 = vst [vmem:[#allocation22_spill] sm:$0xff] %v11563_v11  ;;  %17756 = vst [vmem:[#allocation30_spill] sm:$0xff] %v11567_v26  ;;  %v3509_v61 = vmul.f32 %v17767_v16, %v11399_v9  ;;  %v3510_v4 = vmul.f32 %v17767_v16, %v11372_v57  ;;  %v3511_v20 = vmul.f32 %v17767_v16, %v11267_v15 }
 0x2ae   : > { %17758 = vst [vmem:[#allocation34_spill] sm:$0xff] %v11571_v47  ;;  %17761 = vst [vmem:[#allocation60_spill] sm:$0xff] %v11579_v0  ;;  %v3512_v24 = vmul.f32 %v17767_v16, %v11402_v40  ;;  %v3513_v7 = vmul.f32 %v17767_v16, %v11312_v35  ;;  %v3516_v0 = vmul.f32 %v17767_v16, %v11306_v60 }
 0x2af   : > { %17763 = vst [vmem:[#allocation31_spill] sm:$0xff] %v11583_v46  ;;  %17765 = vst [vmem:[#allocation11_spill] sm:$0xff] %v11587_v25  ;;  %v3514_v25 = vmul.f32 %v17767_v16, %v11157_v49  ;;  %v3515_v46 = vmul.f32 %v17767_v16, %v11396_v36  ;;  %v3517_v57 = vmul.f32 %v17767_v16, %v17707_v27  ;;  %v17782_v27 = vld [vmem:[#allocation26_spill] sm:$0xff] }
 0x2b0   : > { %v3518_v15 = vmul.f32 %v17767_v16, %v11384_v22  ;;  %v3519_v40 = vmul.f32 %v17767_v16, %v11376_v52  ;;  %v3520_v47 = vmul.f32 %v17767_v16, %v11273_v33  ;;  %v3521_v26 = vmul.f32 %v17767_v16, %v11405_v59  ;;  %v17775_v59 = vld [vmem:[#allocation65_spill] sm:$0xff]  ;;  %v17776_v33 = vld [vmem:[#allocation71_spill] sm:$0xff] }
 0x2b1   : > { %v3522_v11 = vmul.f32 %v17767_v16, %v11380_v19  ;;  %v3523_v6 = vmul.f32 %v17767_v16, %v11278_v23  ;;  %v3524_v41 = vmul.f32 %v17767_v16, %v11408_v30  ;;  %v3525_v8 = vmul.f32 %v17767_v16, %v11388_v38  ;;  %v17772_v30 = vld [vmem:[#allocation88_spill] sm:$0xff]  ;;  %v17773_v23 = vld [vmem:[#allocation77_spill] sm:$0xff] }
 0x2b2   : > { %v3526_v43 = vmul.f32 %v17767_v16, %v17759_v28  ;;  %v3527_v56 = vmul.f32 %v17767_v16, %v11411_v37  ;;  %v3528_v14 = vmul.f32 %v17767_v16, %v11392_v1  ;;  %v3529_v50 = vmul.f32 %v17767_v16, %v17766_v51  ;;  %v17774_v19 = vld [vmem:[#allocation89_spill] sm:$0xff] }
 0x2b3   : > { %v11654_v13 = vrot.slane %v17770_v31, %v17769_v21  ;;  %v3530_v38 = vmul.f32 %v17767_v16, %v11414_v53  ;;  %v3531_v28 = vmul.f32 %v17767_v16, %v17772_v30  ;;  %v3532_v37 = vmul.f32 %v17767_v16, %v17773_v23  ;;  %v17778_v21 = vld [vmem:[#allocation122_spill] sm:$0xff]  ;;  %v17780_v53 = vld [vmem:[#allocation115_spill] sm:$0xff] }
 0x2b4   : > { %v3533_v1 = vmul.f32 %v17767_v16, %v17774_v19  ;;  %v3534_v51 = vmul.f32 %v17767_v16, %v17775_v59  ;;  %v17784_v19 = vld [vmem:[#allocation74_spill] sm:$0xff]  ;;  %v17786_v59 = vld [vmem:[#allocation61_spill] sm:$0xff] }
 0x2b5   : > { %17771 = vst [vmem:[#allocation113_spill] sm:$0xff] %v11654_v13  ;;  %v11668_v52 = vmul.f32 %v11654_v13, %v17776_v33  ;;  %v11672_v22 = vmul.f32 %v11654_v13, %v17778_v21  ;;  %v11676_v30 = vmul.f32 %v11654_v13, %v17780_v53  ;;  %v11680_v23 = vmul.f32 %v11654_v13, %v17782_v27 }
 0x2b6   : > { %v11684_v60 = vmul.f32 %v11654_v13, %v17784_v19  ;;  %v11688_v33 = vmul.f32 %v11654_v13, %v17786_v59 }
 0x2b7   : > { %17777 = vst [vmem:[#allocation126_spill] sm:$0xff] %v11668_v52  ;;  %17779 = vst [vmem:[#allocation70_spill] sm:$0xff] %v11672_v22  ;;  %v17788_v52 = vld [vmem:[#allocation28_spill] sm:$0xff]  ;;  %v17790_v22 = vld [vmem:[#allocation123_spill] sm:$0xff] }
 0x2b8   : > { %17781 = vst [vmem:[#allocation72_spill] sm:$0xff] %v11676_v30  ;;  %17783 = vst [vmem:[#allocation95_spill] sm:$0xff] %v11680_v23  ;;  %v11692_v21 = vmul.f32 %v11654_v13, %v17788_v52  ;;  %v11696_v53 = vmul.f32 %v11654_v13, %v17790_v22  ;;  %v17792_v30 = vld [vmem:[#allocation32_spill] sm:$0xff]  ;;  %v17794_v23 = vld [vmem:[#allocation50_spill] sm:$0xff] }
 0x2b9   : > { %17785 = vst [vmem:[#allocation100_spill] sm:$0xff] %v11684_v60  ;;  %17787 = vst [vmem:[#allocation55_spill] sm:$0xff] %v11688_v33  ;;  %v11700_v27 = vmul.f32 %v11654_v13, %v17792_v30  ;;  %v11704_v19 = vmul.f32 %v11654_v13, %v17794_v23  ;;  %v17796_v60 = vld [vmem:[#allocation101_spill] sm:$0xff]  ;;  %v17798_v33 = vld [vmem:[#allocation15_spill] sm:$0xff] }
 0x2ba   : > { %17789 = vst [vmem:[#allocation118_spill] sm:$0xff] %v11692_v21  ;;  %17791 = vst [vmem:[#allocation107_spill] sm:$0xff] %v11696_v53  ;;  %v11708_v59 = vmul.f32 %v11654_v13, %v17796_v60  ;;  %v11712_v52 = vmul.f32 %v11654_v13, %v17798_v33  ;;  %v17800_v21 = vld [vmem:[#allocation58_spill] sm:$0xff]  ;;  %v17802_v53 = vld [vmem:[#allocation124_spill] sm:$0xff] }
 0x2bb   : > { %17793 = vst [vmem:[#allocation18_spill] sm:$0xff] %v11700_v27  ;;  %17795 = vst [vmem:[#allocation91_spill] sm:$0xff] %v11704_v19  ;;  %v11716_v22 = vmul.f32 %v11654_v13, %v17800_v21  ;;  %v11720_v30 = vmul.f32 %v11654_v13, %v17802_v53  ;;  %v17804_v27 = vld [vmem:[#allocation46_spill] sm:$0xff]  ;;  %v17808_v33 = vld [vmem:[#allocation33_spill] sm:$0xff]  ;;  %v11739_v53 = vadd.f32 %v3507_v58, %v11418_v18 }
 0x2bc   : > { %17797 = vst [vmem:[#allocation62_spill] sm:$0xff] %v11708_v59  ;;  %17799 = vst [vmem:[#allocation92_spill] sm:$0xff] %v11712_v52  ;;  %v11724_v23 = vmul.f32 %v11654_v13, %v17804_v27  ;;  %v17806_v19 = vld [vmem:[#allocation86_spill] sm:$0xff]  ;;  %v17807_v59 = vld [vmem:[#allocation79_spill] sm:$0xff]  ;;  %v11732_v52 = vmul.f32 %v11654_v13, %v17808_v33  ;;  %v11742_v27 = vadd.f32 %v3508_v32, %v11422_v29 }
 0x2bd   : > { %17801 = vst [vmem:[#allocation64_spill] sm:$0xff] %v11716_v22  ;;  %17803 = vst [vmem:[#allocation54_spill] sm:$0xff] %v11720_v30  ;;  %v3535_v60 = vmul.f32 %v17767_v16, %v17806_v19  ;;  %v3536_v36 = vmul.f32 %v17767_v16, %v17807_v59  ;;  %v17809_v21 = vld [vmem:[#allocation75_spill] sm:$0xff]  ;;  %v11748_v30 = vadd.f32 %v3510_v4, %v11430_v2 }
 0x2be   : > { %17805 = vst [vmem:[#allocation23_spill] sm:$0xff] %v11724_v23  ;;  %v11736_v22 = vmul.f32 %v11654_v13, %v17809_v21  ;;  %17810 = vst [vmem:[#allocation24_spill] sm:$0xff] %v11739_v53  ;;  %v11745_v23 = vadd.f32 %v3509_v61, %v11426_v3  ;;  %v11751_v16 = vadd.f32 %v3511_v20, %v11434_v55  ;;  %v17817_v4 = vld [vmem:[#allocation103_spill] sm:$0xff]  ;;  %v17819_v20 = vld [vmem:[#allocation104_spill] sm:$0xff] }
 0x2bf   : > { %17811 = vst [vmem:[#allocation10_spill] sm:$0xff] %v11742_v27  ;;  %17813 = vst [vmem:[#allocation57_spill] sm:$0xff] %v11748_v30  ;;  %v11754_v33 = vadd.f32 %v3512_v24, %v11438_v17  ;;  %v11757_v21 = vadd.f32 %v3507_v58, %v11442_v54  ;;  %v11760_v53 = vadd.f32 %v3508_v32, %v11446_v34 }
 0x2c0   : > { %17812 = vst [vmem:[#allocation25_spill] sm:$0xff] %v11745_v23  ;;  %17814 = vst [vmem:[#allocation81_spill] sm:$0xff] %v11751_v16  ;;  %v11763_v27 = vadd.f32 %v3509_v61, %v11450_v45  ;;  %v11766_v23 = vadd.f32 %v3513_v7, %v11454_v63  ;;  %v11769_v30 = vadd.f32 %v3514_v25, %v17817_v4  ;;  %v17857_v4 = vld [vmem:[#allocation66_spill] sm:$0xff] }
 0x2c1   : > { %v11772_v16 = vadd.f32 %v3515_v46, %v17819_v20  ;;  %v11775_v24 = vadd.f32 %v3516_v0, %v11442_v54  ;;  %v11778_v58 = vadd.f32 %v3517_v57, %v11446_v34  ;;  %v11781_v32 = vadd.f32 %v3518_v15, %v11450_v45  ;;  %v17830_v15 = vld [vmem:[#allocation105_spill] sm:$0xff] }
 0x2c2   : > { %17815 = vst [vmem:[#allocation108_spill] sm:$0xff] %v11763_v27  ;;  %17816 = vst [vmem:[#allocation80_spill] sm:$0xff] %v11766_v23  ;;  %v11784_v61 = vadd.f32 %v3519_v40, %v11430_v2  ;;  %v11787_v63 = vadd.f32 %v3520_v47, %v11434_v55  ;;  %v11790_v25 = vadd.f32 %v3521_v26, %v11438_v17  ;;  %v17832_v40 = vld [vmem:[#allocation16_spill] sm:$0xff]  ;;  %v17834_v55 = vld [vmem:[#allocation47_spill] sm:$0xff] }
 0x2c3   : > { %17818 = vst [vmem:[#allocation102_spill] sm:$0xff] %v11769_v30  ;;  %17820 = vst [vmem:[#allocation56_spill] sm:$0xff] %v11772_v16  ;;  %v11793_v46 = vadd.f32 %v3522_v11, %v11418_v18  ;;  %v11796_v54 = vadd.f32 %v3523_v6, %v11422_v29  ;;  %v11799_v57 = vadd.f32 %v3524_v41, %v11426_v3  ;;  %v17836_v17 = vld [vmem:[#allocation38_spill] sm:$0xff]  ;;  %v17838_v18 = vld [vmem:[#allocation44_spill] sm:$0xff] }
 0x2c4   : > { %17821 = vst [vmem:[#allocation45_spill] sm:$0xff] %v11775_v24  ;;  %17822 = vst [vmem:[#allocation114_spill] sm:$0xff] %v11778_v58  ;;  %v11802_v34 = vadd.f32 %v3525_v8, %v17830_v15  ;;  %v11805_v2 = vadd.f32 %v3526_v43, %v17832_v40  ;;  %v11808_v45 = vadd.f32 %v3527_v56, %v17834_v55  ;;  %v17840_v29 = vld [vmem:[#allocation48_spill] sm:$0xff]  ;;  %v17842_v3 = vld [vmem:[#allocation39_spill] sm:$0xff]  ;;  %v16091_v24 = vrot.slane %v11736_v22, 2 }
 0x2c5   : > { %17823 = vst [vmem:[#allocation103_spill] sm:$0xff] %v11781_v32  ;;  %17824 = vst [vmem:[#allocation104_spill] sm:$0xff] %v11784_v61  ;;  %v11811_v26 = vadd.f32 %v3528_v14, %v17836_v17  ;;  %v11814_v11 = vadd.f32 %v3529_v50, %v17838_v18  ;;  %v11817_v6 = vadd.f32 %v3530_v38, %v17840_v29  ;;  %v17849_v38 = vld [vmem:[#allocation94_spill] sm:$0xff]  ;;  %v17854_v0 = vld [vmem:[#allocation125_spill] sm:$0xff] }
 0x2c6   : > { %17825 = vst [vmem:[#allocation128_spill] sm:$0xff] %v11787_v63  ;;  %17826 = vst [vmem:[#allocation129_spill] sm:$0xff] %v11790_v25  ;;  %v11820_v41 = vadd.f32 %v3531_v28, %v17842_v3  ;;  %v11823_v8 = vadd.f32 %v3532_v37, %v11575_v12  ;;  %v11826_v43 = vadd.f32 %v3533_v1, %v11591_v48  ;;  %v17850_v28 = vsub.s32 4, %v17768_v10  ;;  %v17858_v15 = vld [vmem:[#allocation112_spill] sm:$0xff]  ;;  %v17861_v18 = vld [vmem:[#allocation77_spill] sm:$0xff] }
 0x2c7   : > { %17827 = vst [vmem:[#allocation130_spill] sm:$0xff] %v11793_v46  ;;  %17828 = vst [vmem:[#allocation131_spill] sm:$0xff] %v11796_v54  ;;  %v11829_v56 = vadd.f32 %v3534_v51, %v11595_v44  ;;  %v11832_v14 = vadd.f32 %v3535_v60, %v11599_v42  ;;  %v11835_v50 = vadd.f32 %v3536_v36, %v11603_v62  ;;  %v17852_v1 = vsub.s32 7, %v17768_v10  ;;  %v17855_v51 = vld [vmem:[#allocation97_spill] sm:$0xff]  ;;  %v17856_v62 = vld [vmem:[#allocation119_spill] sm:$0xff] }
 0x2c8   : > { %17829 = vst [vmem:[#allocation132_spill] sm:$0xff] %v11799_v57  ;;  %17831 = vst [vmem:[#allocation105_spill] sm:$0xff] %v11802_v34  ;;  %v3773_v47 = vmul.f32 %v11654_v13, %v17849_v38  ;;  %v11842_v37 = vrot.slane %v17770_v31, %v17850_v28  ;;  %v11851_v60 = vmul.f32 %v17854_v0, %v11360_v39  ;;  %v17860_v55 = vld [vmem:[#allocation88_spill] sm:$0xff]  ;;  %v17862_v3 = vld [vmem:[#allocation89_spill] sm:$0xff] }
 0x2c9   : > { %17833 = vst [vmem:[#allocation16_spill] sm:$0xff] %v11805_v2  ;;  %17835 = vst [vmem:[#allocation47_spill] sm:$0xff] %v11808_v45  ;;  %v11847_v12 = vrot.slane %v17770_v31, %v17852_v1  ;;  %v11855_v36 = vmul.f32 %v17854_v0, %v11257_v5  ;;  %v11859_v48 = vmul.f32 %v17854_v0, %v11399_v9  ;;  %v17863_v1 = vld [vmem:[#allocation65_spill] sm:$0xff]  ;;  %v17864_v39 = vld [vmem:[#allocation106_spill] sm:$0xff] }
 0x2ca   : > { %17837 = vst [vmem:[#allocation38_spill] sm:$0xff] %v11811_v26  ;;  %17839 = vst [vmem:[#allocation44_spill] sm:$0xff] %v11814_v11  ;;  %v11863_v44 = vmul.f32 %v17854_v0, %v11312_v35  ;;  %v11867_v31 = vmul.f32 %v17854_v0, %v11157_v49  ;;  %v11871_v42 = vmul.f32 %v17854_v0, %v17855_v51  ;;  %v3897_v5 = vrot.slane %v3773_v47, 2  ;;  %v17865_v49 = vld [vmem:[#allocation126_spill] sm:$0xff]  ;;  %v17875_v57 = vld [vmem:[#allocation91_spill] sm:$0xff] }
 0x2cb   : > { %17841 = vst [vmem:[#allocation48_spill] sm:$0xff] %v11817_v6  ;;  %17843 = vst [vmem:[#allocation39_spill] sm:$0xff] %v11820_v41  ;;  %v11875_v7 = vmul.f32 %v17854_v0, %v17856_v62  ;;  %v11879_v20 = vmul.f32 %v17854_v0, %v17857_v4  ;;  %v11883_v40 = vmul.f32 %v17854_v0, %v17858_v15  ;;  %v3898_v35 = vrot.slane %v17865_v49, 2  ;;  %v17866_v15 = vld [vmem:[#allocation70_spill] sm:$0xff]  ;;  %v17867_v4 = vld [vmem:[#allocation72_spill] sm:$0xff] }
 0x2cc   : > { %17844 = vst [vmem:[#allocation133_spill] sm:$0xff] %v11823_v8  ;;  %17845 = vst [vmem:[#allocation134_spill] sm:$0xff] %v11826_v43  ;;  %v3764_v17 = vmul.f32 %v11654_v13, %v17860_v55  ;;  %v3765_v29 = vmul.f32 %v11654_v13, %v17861_v18  ;;  %v11891_v28 = vmul.f32 %v11654_v13, %v17862_v3  ;;  %v3902_v62 = vrot.slane %v17867_v4, 2  ;;  %v17869_v43 = vld [vmem:[#allocation95_spill] sm:$0xff]  ;;  %v17870_v41 = vld [vmem:[#allocation100_spill] sm:$0xff] }
 0x2cd   : > { %17846 = vst [vmem:[#allocation135_spill] sm:$0xff] %v11829_v56  ;;  %17847 = vst [vmem:[#allocation136_spill] sm:$0xff] %v11832_v14  ;;  %v3767_v10 = vmul.f32 %v11654_v13, %v17863_v1  ;;  %v11899_v9 = vmul.f32 %v11654_v13, %v17807_v59  ;;  %v3770_v51 = vmul.f32 %v11654_v13, %v17864_v39  ;;  %v17868_v14 = vld [vmem:[#allocation78_spill] sm:$0xff]  ;;  %v3903_v8 = vrot.slane %v17869_v43, 2  ;;  %v17871_v6 = vld [vmem:[#allocation55_spill] sm:$0xff] }
 0x2ce   : > { %17848 = vst [vmem:[#allocation137_spill] sm:$0xff] %v11835_v50  ;;  %17851 = vst [vmem:[#allocation138_spill] sm:$0xff] %v11842_v37  ;;  %v16085_v50 = vrot.slane %v17866_v15, 2  ;;  %v3771_v56 = vmul.f32 %v11654_v13, %v17868_v14  ;;  %v16086_v37 = vrot.slane %v17870_v41, 2  ;;  %v3907_v11 = vrot.slane %v17871_v6, 2  ;;  %v17872_v26 = vld [vmem:[#allocation118_spill] sm:$0xff] }
 0x2cf   : > { %17853 = vst [vmem:[#allocation139_spill] sm:$0xff] %v11847_v12  ;;  %17859 = vst [vmem:[#allocation125_spill] sm:$0xff] %v11883_v40  ;;  %v3768_v12 = vmul.f32 %v11654_v13, %v17806_v19  ;;  %v11912_v47 = vsel %vm1195_vm3, %v3897_v5, %v3898_v35  ;;  %v3908_v45 = vrot.slane %v17872_v26, 2  ;;  %v17873_v4 = vld [vmem:[#allocation107_spill] sm:$0xff]  ;;  %v11922_v34 = vsel %vm1195_vm3, %v3902_v62, %v3903_v8  ;;  %v17874_v6 = vld [vmem:[#allocation18_spill] sm:$0xff] }
 0x2d0   : > { %v11917_v49 = vsel %vm1195_vm3, %v3898_v35, %v16085_v50  ;;  %v16087_v2 = vrot.slane %v17873_v4, 2  ;;  %v11927_v43 = vsel %vm1195_vm3, %v3903_v8, %v16086_v37  ;;  %v3912_v5 = vrot.slane %v17874_v6, 2  ;;  %v17876_v26 = vld [vmem:[#allocation62_spill] sm:$0xff]  ;;  %v17877_v50 = vld [vmem:[#allocation92_spill] sm:$0xff]  ;;  %v17880_v32 = vld [vmem:[#allocation23_spill] sm:$0xff] }
 0x2d1   : > { %v3913_v54 = vrot.slane %v17875_v57, 2  ;;  %v11932_v46 = vsel %vm1195_vm3, %v3907_v11, %v3908_v45  ;;  %v16090_v62 = vrot.slane %v17876_v26, 2  ;;  %v3917_v25 = vrot.slane %v17877_v50, 2  ;;  %v17878_v8 = vld [vmem:[#allocation64_spill] sm:$0xff]  ;;  %v17879_v61 = vld [vmem:[#allocation54_spill] sm:$0xff]  ;;  %v17882_v50 = vld [vmem:[#allocation35_spill] sm:$0xff] }
 0x2d2   : > { %v11937_v35 = vsel %vm1195_vm3, %v3908_v45, %v16087_v2  ;;  %v3918_v37 = vrot.slane %v17878_v8, 2  ;;  %v3922_v57 = vrot.slane %v17880_v32, 2  ;;  %v17881_v58 = vld [vmem:[#allocation90_spill] sm:$0xff]  ;;  %v3923_v2 = vrot.slane %v11732_v52, 2  ;;  %v17884_v8 = vld [vmem:[#allocation111_spill] sm:$0xff]  ;;  %v17887_v30 = vld [vmem:[#allocation73_spill] sm:$0xff] }
 0x2d3   : > { %v3914_v63 = vsel %vm1195_vm3, %v3912_v5, %v3913_v54  ;;  %v3772_v11 = vmul.f32 %v11654_v13, %v17881_v58  ;;  %v3916_v45 = vsel %vm1195_vm3, %v3913_v54, %v16090_v62  ;;  %v11954_v5 = vmul.f32 %v17854_v0, %v17882_v50  ;;  %v17889_v27 = vld [vmem:[#allocation120_spill] sm:$0xff] }
 0x2d4   : > { %v11958_v6 = vmul.f32 %v17854_v0, %v17884_v8  ;;  %v3919_v32 = vsel %vm1195_vm3, %v3917_v25, %v3918_v37  ;;  %v17886_v13 = vrot.slane %v17879_v61, 2  ;;  %v11966_v54 = vmul.f32 %v17854_v0, %v17887_v30 }
 0x2d5   : > { %17883 = vst [vmem:[#allocation126_spill] sm:$0xff] %v11954_v5  ;;  %v3882_v52 = vrot.slane %v3764_v17, 2  ;;  %v3924_v62 = vsel %vm1195_vm3, %v3922_v57, %v3923_v2  ;;  %v3926_v50 = vsel %vm1195_vm3, %v3923_v2, %v16091_v24  ;;  %v3883_v5 = vrot.slane %v3765_v29, 2  ;;  %v17890_v17 = vld [vmem:[#allocation29_spill] sm:$0xff]  ;;  %v17893_v29 = vld [vmem:[#allocation14_spill] sm:$0xff]  ;;  %v17901_v24 = vld [vmem:[#allocation43_spill] sm:$0xff] }
 0x2d6   : > { %17885 = vst [vmem:[#allocation70_spill] sm:$0xff] %v11958_v6  ;;  %v3921_v16 = vsel %vm1195_vm3, %v3918_v37, %v17886_v13  ;;  %17888 = vst [vmem:[#allocation72_spill] sm:$0xff] %v11966_v54  ;;  %v3885_v8 = vrot.slane %v11891_v28, 2  ;;  %v3887_v6 = vrot.slane %v3767_v10, 2  ;;  %v3888_v25 = vrot.slane %v3768_v12, 2  ;;  %v17891_v54 = vld [vmem:[#allocation87_spill] sm:$0xff] }
 0x2d7   : > { %v3890_v23 = vrot.slane %v11899_v9, 2  ;;  %v3892_v40 = vrot.slane %v3770_v51, 2  ;;  %v3893_v13 = vrot.slane %v3771_v56, 2  ;;  %v3895_v37 = vrot.slane %v3772_v11, 2  ;;  %v17895_v9 = vld [vmem:[#allocation52_spill] sm:$0xff]  ;;  %v17897_v12 = vld [vmem:[#allocation98_spill] sm:$0xff] }
 0x2d8   : > { %v11976_v30 = vmul.f32 %v17854_v0, %v17889_v27  ;;  %v11980_v57 = vmul.f32 %v17854_v0, %v17890_v17  ;;  %v11984_v2 = vmul.f32 %v17854_v0, %v17891_v54  ;;  %v11988_v10 = vmul.f32 %v17854_v0, %v17893_v29  ;;  %v17899_v28 = vld [vmem:[#allocation127_spill] sm:$0xff]  ;;  %v17903_v17 = vld [vmem:[#allocation37_spill] sm:$0xff] }
 0x2d9   : > { %v11992_v56 = vmul.f32 %v17854_v0, %v17895_v9  ;;  %v11996_v51 = vmul.f32 %v17854_v0, %v17897_v12  ;;  %v12000_v11 = vmul.f32 %v17854_v0, %v17899_v28  ;;  %v12004_v54 = vmul.f32 %v17854_v0, %v17901_v24 }
 0x2da   : > { %17892 = vst [vmem:[#allocation95_spill] sm:$0xff] %v11984_v2  ;;  %17894 = vst [vmem:[#allocation100_spill] sm:$0xff] %v11988_v10  ;;  %v12008_v29 = vmul.f32 %v17854_v0, %v17903_v17  ;;  %v3884_v27 = vsel %vm1195_vm3, %v3882_v52, %v3883_v5  ;;  %v3886_v9 = vsel %vm1195_vm3, %v3883_v5, %v3885_v8  ;;  %v17916_v10 = vld [vmem:[#allocation68_spill] sm:$0xff] }
 0x2db   : > { %17896 = vst [vmem:[#allocation55_spill] sm:$0xff] %v11992_v56  ;;  %17898 = vst [vmem:[#allocation118_spill] sm:$0xff] %v11996_v51  ;;  %v3889_v56 = vsel %vm1195_vm3, %v3887_v6, %v3888_v25  ;;  %v12015_v12 = vmul.f32 %v17854_v0, %v17860_v55  ;;  %v3891_v28 = vsel %vm1195_vm3, %v3888_v25, %v3890_v23  ;;  %v17906_v55 = vld [vmem:[#allocation17_spill] sm:$0xff]  ;;  %v17914_v51 = vld [vmem:[#allocation110_spill] sm:$0xff] }
 0x2dc   : > { %17900 = vst [vmem:[#allocation107_spill] sm:$0xff] %v12000_v11  ;;  %17902 = vst [vmem:[#allocation18_spill] sm:$0xff] %v12004_v54  ;;  %v3894_v11 = vsel %vm1195_vm3, %v3892_v40, %v3893_v13  ;;  %v3896_v24 = vsel %vm1195_vm3, %v3893_v13, %v3895_v37  ;;  %v3647_v17 = vmul.f32 %v17854_v0, %v17861_v18  ;;  %v17908_v25 = vld [vmem:[#allocation49_spill] sm:$0xff]  ;;  %v17912_v54 = vld [vmem:[#allocation82_spill] sm:$0xff] }
 0x2dd   : > { %17904 = vst [vmem:[#allocation91_spill] sm:$0xff] %v12008_v29  ;;  %17905 = vst [vmem:[#allocation62_spill] sm:$0xff] %v12015_v12  ;;  %v3648_v52 = vmul.f32 %v17854_v0, %v17862_v3  ;;  %v3649_v5 = vmul.f32 %v17854_v0, %v17863_v1  ;;  %v3650_v6 = vmul.f32 %v17854_v0, %v17806_v19  ;;  %v17910_v40 = vld [vmem:[#allocation121_spill] sm:$0xff]  ;;  %v17918_v2 = vld [vmem:[#allocation12_spill] sm:$0xff] }
 0x2de   : > { %v12029_v12 = vadd.f32 %v3884_v27, %v17906_v55  ;;  %v12032_v29 = vadd.f32 %v3886_v9, %v17908_v25  ;;  %v12035_v13 = vadd.f32 %v3885_v8, %v17910_v40  ;;  %v12038_v18 = vadd.f32 %v3889_v56, %v17912_v54  ;;  %v17920_v27 = vld [vmem:[#allocation69_spill] sm:$0xff]  ;;  %v17924_v8 = vld [vmem:[#allocation116_spill] sm:$0xff]  ;;  %v17926_v54 = vld [vmem:[#allocation51_spill] sm:$0xff] }
 0x2df   : > { %v12041_v3 = vadd.f32 %v3891_v28, %v17914_v51  ;;  %v12044_v1 = vadd.f32 %v3890_v23, %v17916_v10  ;;  %v12047_v19 = vadd.f32 %v3894_v11, %v17918_v2  ;;  %v12050_v55 = vadd.f32 %v3896_v24, %v17920_v27  ;;  %v17922_v9 = vld [vmem:[#allocation41_spill] sm:$0xff]  ;;  %v17928_v51 = vld [vmem:[#allocation96_spill] sm:$0xff] }
 0x2e0   : > { %17907 = vst [vmem:[#allocation92_spill] sm:$0xff] %v12029_v12  ;;  %17909 = vst [vmem:[#allocation64_spill] sm:$0xff] %v12032_v29  ;;  %v12053_v25 = vadd.f32 %v3895_v37, %v17922_v9  ;;  %v12057_v40 = vadd.f32 %v11912_v47, %v17924_v8  ;;  %v12061_v56 = vadd.f32 %v11917_v49, %v17926_v54  ;;  %v17929_v23 = vrot.slane %v17866_v15, 2  ;;  %v17931_v2 = vld [vmem:[#allocation36_spill] sm:$0xff]  ;;  %v17935_v11 = vld [vmem:[#allocation117_spill] sm:$0xff] }
 0x2e1   : > { %17911 = vst [vmem:[#allocation54_spill] sm:$0xff] %v12035_v13  ;;  %17913 = vst [vmem:[#allocation23_spill] sm:$0xff] %v12038_v18  ;;  %v12070_v24 = vadd.f32 %v11922_v34, %v17931_v2  ;;  %v17933_v28 = vld [vmem:[#allocation20_spill] sm:$0xff]  ;;  %v17936_v47 = vrot.slane %v17870_v41, 2  ;;  %v17938_v49 = vld [vmem:[#allocation9_spill] sm:$0xff]  ;;  %v17943_v34 = vrot.slane %v17873_v4, 2 }
 0x2e2   : > { %17915 = vst [vmem:[#allocation17_spill] sm:$0xff] %v12041_v3  ;;  %17917 = vst [vmem:[#allocation49_spill] sm:$0xff] %v12044_v1  ;;  %v12066_v10 = vadd.f32 %v17929_v23, %v17928_v51  ;;  %v12074_v37 = vadd.f32 %v11927_v43, %v17933_v28  ;;  %v12083_v9 = vadd.f32 %v11932_v46, %v17938_v49  ;;  %v17940_v15 = vld [vmem:[#allocation19_spill] sm:$0xff]  ;;  %v17942_v54 = vld [vmem:[#allocation42_spill] sm:$0xff] }
 0x2e3   : > { %17919 = vst [vmem:[#allocation121_spill] sm:$0xff] %v12047_v19  ;;  %17921 = vst [vmem:[#allocation82_spill] sm:$0xff] %v12050_v55  ;;  %v12079_v27 = vadd.f32 %v17936_v47, %v17935_v11  ;;  %v12087_v8 = vadd.f32 %v11937_v35, %v17940_v15  ;;  %v12092_v51 = vadd.f32 %v17943_v34, %v17942_v54  ;;  %v17945_v43 = vld [vmem:[#allocation83_spill] sm:$0xff]  ;;  %v17949_v28 = vld [vmem:[#allocation84_spill] sm:$0xff]  ;;  %v17950_v11 = vrot.slane %v17876_v26, 2 }
 0x2e4   : > { %17923 = vst [vmem:[#allocation110_spill] sm:$0xff] %v12053_v25  ;;  %17925 = vst [vmem:[#allocation68_spill] sm:$0xff] %v12057_v40  ;;  %v12095_v23 = vadd.f32 %v3914_v63, %v17945_v43  ;;  %v17947_v2 = vld [vmem:[#allocation63_spill] sm:$0xff]  ;;  %v17952_v47 = vld [vmem:[#allocation22_spill] sm:$0xff]  ;;  %v17957_v54 = vrot.slane %v17879_v61, 2  ;;  %v3651_v63 = vmul.f32 %v17854_v0, %v17807_v59  ;;  %v3653_v61 = vmul.f32 %v17854_v0, %v17868_v14 }
 0x2e5   : > { %17927 = vst [vmem:[#allocation12_spill] sm:$0xff] %v12061_v56  ;;  %17930 = vst [vmem:[#allocation69_spill] sm:$0xff] %v12066_v10  ;;  %v12098_v41 = vadd.f32 %v3916_v45, %v17947_v2  ;;  %v12103_v46 = vadd.f32 %v17950_v11, %v17949_v28  ;;  %v12106_v49 = vadd.f32 %v3919_v32, %v17952_v47  ;;  %v17954_v35 = vld [vmem:[#allocation30_spill] sm:$0xff]  ;;  %v17959_v45 = vld [vmem:[#allocation60_spill] sm:$0xff]  ;;  %v17964_v32 = vrot.slane %v11736_v22, 2 }
 0x2e6   : > { %17932 = vst [vmem:[#allocation41_spill] sm:$0xff] %v12070_v24  ;;  %17934 = vst [vmem:[#allocation116_spill] sm:$0xff] %v12074_v37  ;;  %v12109_v15 = vadd.f32 %v3921_v16, %v17954_v35  ;;  %v17956_v4 = vld [vmem:[#allocation34_spill] sm:$0xff]  ;;  %v12119_v43 = vadd.f32 %v3924_v62, %v17959_v45  ;;  %v17961_v26 = vld [vmem:[#allocation31_spill] sm:$0xff]  ;;  %v3652_v16 = vmul.f32 %v17854_v0, %v17864_v39 }
 0x2e7   : > { %17937 = vst [vmem:[#allocation51_spill] sm:$0xff] %v12079_v27  ;;  %17939 = vst [vmem:[#allocation96_spill] sm:$0xff] %v12083_v9  ;;  %v12114_v34 = vadd.f32 %v17957_v54, %v17956_v4  ;;  %v12122_v2 = vadd.f32 %v3926_v50, %v17961_v26  ;;  %v17963_v28 = vld [vmem:[#allocation11_spill] sm:$0xff]  ;;  %v3654_v47 = vmul.f32 %v17854_v0, %v17881_v58  ;;  %v17967_v4 = vld [vmem:[#allocation122_spill] sm:$0xff] }
 0x2e8   : > { %17941 = vst [vmem:[#allocation36_spill] sm:$0xff] %v12087_v8  ;;  %17944 = vst [vmem:[#allocation20_spill] sm:$0xff] %v12092_v51  ;;  %v12127_v11 = vadd.f32 %v17964_v32, %v17963_v28  ;;  %v3655_v62 = vmul.f32 %v17854_v0, %v17849_v38  ;;  %v17966_v35 = vld [vmem:[#allocation71_spill] sm:$0xff]  ;;  %v3657_v22 = vmul.f32 %v17854_v0, %v17967_v4  ;;  %v17968_v54 = vld [vmem:[#allocation24_spill] sm:$0xff] }
 0x2e9   : > { %17946 = vst [vmem:[#allocation117_spill] sm:$0xff] %v12095_v23  ;;  %17948 = vst [vmem:[#allocation9_spill] sm:$0xff] %v12098_v41  ;;  %v3656_v50 = vmul.f32 %v17854_v0, %v17966_v35  ;;  %v12143_v45 = vadd.f32 %v11851_v60, %v17968_v54  ;;  %v17969_v26 = vld [vmem:[#allocation10_spill] sm:$0xff]  ;;  %v17970_v32 = vld [vmem:[#allocation25_spill] sm:$0xff]  ;;  %v12163_v0 = vadd.f32 %v11871_v42, %v11754_v33 }
 0x2ea   : > { %17951 = vst [vmem:[#allocation19_spill] sm:$0xff] %v12103_v46  ;;  %17953 = vst [vmem:[#allocation42_spill] sm:$0xff] %v12106_v49  ;;  %v12147_v28 = vadd.f32 %v11855_v36, %v17969_v26  ;;  %v12151_v59 = vadd.f32 %v11859_v48, %v17970_v32  ;;  %v12167_v60 = vadd.f32 %v11875_v7, %v11757_v21  ;;  %v17977_v48 = vld [vmem:[#allocation108_spill] sm:$0xff]  ;;  %v17978_v54 = vld [vmem:[#allocation125_spill] sm:$0xff] }
 0x2eb   : > { %17955 = vst [vmem:[#allocation83_spill] sm:$0xff] %v12109_v15  ;;  %17958 = vst [vmem:[#allocation63_spill] sm:$0xff] %v12114_v34  ;;  %v12171_v36 = vadd.f32 %v11879_v20, %v11760_v53  ;;  %v17981_v26 = vld [vmem:[#allocation126_spill] sm:$0xff]  ;;  %v17986_v42 = vld [vmem:[#allocation56_spill] sm:$0xff] }
 0x2ec   : > { %17960 = vst [vmem:[#allocation84_spill] sm:$0xff] %v12119_v43  ;;  %17962 = vst [vmem:[#allocation22_spill] sm:$0xff] %v12122_v2  ;;  %v17972_v43 = vld [vmem:[#allocation81_spill] sm:$0xff]  ;;  %v17984_v32 = vld [vmem:[#allocation70_spill] sm:$0xff] }
 0x2ed   : > { %17965 = vst [vmem:[#allocation30_spill] sm:$0xff] %v12127_v11  ;;  %v17971_v11 = vld [vmem:[#allocation57_spill] sm:$0xff]  ;;  %v12159_v34 = vadd.f32 %v11867_v31, %v17972_v43  ;;  %17974 = vst [vmem:[#allocation60_spill] sm:$0xff] %v12163_v0  ;;  %v17983_v43 = vld [vmem:[#allocation102_spill] sm:$0xff] }
 0x2ee   : > { %v12155_v2 = vadd.f32 %v11863_v44, %v17971_v11  ;;  %17975 = vst [vmem:[#allocation31_spill] sm:$0xff] %v12167_v60  ;;  %17976 = vst [vmem:[#allocation11_spill] sm:$0xff] %v12171_v36  ;;  %v12175_v44 = vadd.f32 %v17978_v54, %v17977_v48  ;;  %v17980_v11 = vld [vmem:[#allocation80_spill] sm:$0xff]  ;;  %v12183_v33 = vadd.f32 %v17984_v32, %v17983_v43  ;;  %v17989_v7 = vld [vmem:[#allocation45_spill] sm:$0xff] }
 0x2ef   : > { %17973 = vst [vmem:[#allocation34_spill] sm:$0xff] %v12159_v34  ;;  %v12179_v31 = vadd.f32 %v17981_v26, %v17980_v11  ;;  %v17987_v15 = vld [vmem:[#allocation72_spill] sm:$0xff]  ;;  %v12191_v53 = vadd.f32 %v11976_v30, %v17989_v7  ;;  %v17991_v20 = vld [vmem:[#allocation114_spill] sm:$0xff]  ;;  %v17993_v54 = vld [vmem:[#allocation103_spill] sm:$0xff] }
 0x2f0   : > { %17979 = vst [vmem:[#allocation24_spill] sm:$0xff] %v12175_v44  ;;  %17985 = vst [vmem:[#allocation25_spill] sm:$0xff] %v12183_v33  ;;  %v12187_v21 = vadd.f32 %v17987_v15, %v17986_v42  ;;  %v12195_v48 = vadd.f32 %v11980_v57, %v17991_v20  ;;  %v17994_v49 = vld [vmem:[#allocation95_spill] sm:$0xff]  ;;  %v17996_v26 = vld [vmem:[#allocation104_spill] sm:$0xff] }
 0x2f1   : > { %17982 = vst [vmem:[#allocation10_spill] sm:$0xff] %v12179_v31  ;;  %17990 = vst [vmem:[#allocation81_spill] sm:$0xff] %v12191_v53  ;;  %v12199_v11 = vadd.f32 %v17994_v49, %v17993_v54  ;;  %v17997_v31 = vld [vmem:[#allocation100_spill] sm:$0xff]  ;;  %v18000_v33 = vld [vmem:[#allocation55_spill] sm:$0xff] }
 0x2f2   : > { %17988 = vst [vmem:[#allocation57_spill] sm:$0xff] %v12187_v21  ;;  %17992 = vst [vmem:[#allocation108_spill] sm:$0xff] %v12195_v48  ;;  %v12203_v43 = vadd.f32 %v17997_v31, %v17996_v26  ;;  %v17999_v32 = vld [vmem:[#allocation128_spill] sm:$0xff]  ;;  %v18002_v42 = vld [vmem:[#allocation129_spill] sm:$0xff] }
 0x2f3   : > { %17995 = vst [vmem:[#allocation125_spill] sm:$0xff] %v12199_v11  ;;  %v12207_v15 = vadd.f32 %v18000_v33, %v17999_v32  ;;  %v18003_v21 = vld [vmem:[#allocation118_spill] sm:$0xff]  ;;  %v18006_v53 = vld [vmem:[#allocation107_spill] sm:$0xff]  ;;  %v18011_v54 = vld [vmem:[#allocation132_spill] sm:$0xff] }
 0x2f4   : > { %17998 = vst [vmem:[#allocation80_spill] sm:$0xff] %v12203_v43  ;;  %v12211_v30 = vadd.f32 %v18003_v21, %v18002_v42  ;;  %v18005_v7 = vld [vmem:[#allocation130_spill] sm:$0xff]  ;;  %v18008_v20 = vld [vmem:[#allocation131_spill] sm:$0xff]  ;;  %v18014_v26 = vld [vmem:[#allocation105_spill] sm:$0xff] }
 0x2f5   : > { %18001 = vst [vmem:[#allocation126_spill] sm:$0xff] %v12207_v15  ;;  %v12215_v57 = vadd.f32 %v18006_v53, %v18005_v7  ;;  %v18009_v48 = vld [vmem:[#allocation18_spill] sm:$0xff]  ;;  %v18012_v11 = vld [vmem:[#allocation91_spill] sm:$0xff]  ;;  %v18017_v32 = vld [vmem:[#allocation16_spill] sm:$0xff] }
 0x2f6   : > { %18004 = vst [vmem:[#allocation102_spill] sm:$0xff] %v12211_v30  ;;  %v12219_v49 = vadd.f32 %v18009_v48, %v18008_v20  ;;  %v12223_v31 = vadd.f32 %v18012_v11, %v18011_v54  ;;  %v18015_v43 = vld [vmem:[#allocation62_spill] sm:$0xff]  ;;  %v12230_v15 = vadd.f32 %v3647_v17, %v18017_v32  ;;  %v18019_v21 = vld [vmem:[#allocation47_spill] sm:$0xff]  ;;  %v18025_v20 = vld [vmem:[#allocation48_spill] sm:$0xff] }
 0x2f7   : > { %18007 = vst [vmem:[#allocation70_spill] sm:$0xff] %v12215_v57  ;;  %v12227_v33 = vadd.f32 %v18015_v43, %v18014_v26  ;;  %v12233_v42 = vadd.f32 %v3648_v52, %v18019_v21  ;;  %v18021_v53 = vld [vmem:[#allocation38_spill] sm:$0xff]  ;;  %v18023_v57 = vld [vmem:[#allocation44_spill] sm:$0xff]  ;;  %v18028_v43 = vld [vmem:[#allocation115_spill] sm:$0xff] }
 0x2f8   : > { %18010 = vst [vmem:[#allocation56_spill] sm:$0xff] %v12219_v49  ;;  %18013 = vst [vmem:[#allocation72_spill] sm:$0xff] %v12223_v31  ;;  %v12236_v7 = vadd.f32 %v3649_v5, %v18021_v53  ;;  %v12239_v48 = vadd.f32 %v3650_v6, %v18023_v57  ;;  %v12242_v49 = vadd.f32 %v3651_v63, %v18025_v20  ;;  %v18027_v11 = vld [vmem:[#allocation138_spill] sm:$0xff]  ;;  %v18031_v57 = vld [vmem:[#allocation61_spill] sm:$0xff] }
 0x2f9   : > { %18016 = vst [vmem:[#allocation45_spill] sm:$0xff] %v12227_v33  ;;  %18018 = vst [vmem:[#allocation114_spill] sm:$0xff] %v12230_v15  ;;  %v12246_v54 = vmul.f32 %v18027_v11, %v17966_v35  ;;  %v12250_v17 = vmul.f32 %v18027_v11, %v17967_v4  ;;  %v12254_v52 = vmul.f32 %v18027_v11, %v18028_v43  ;;  %v18029_v5 = vld [vmem:[#allocation26_spill] sm:$0xff]  ;;  %v18032_v21 = vld [vmem:[#allocation28_spill] sm:$0xff] }
 0x2fa   : > { %18020 = vst [vmem:[#allocation103_spill] sm:$0xff] %v12233_v42  ;;  %18022 = vst [vmem:[#allocation95_spill] sm:$0xff] %v12236_v7  ;;  %v12258_v26 = vmul.f32 %v18027_v11, %v18029_v5  ;;  %v18030_v6 = vld [vmem:[#allocation74_spill] sm:$0xff]  ;;  %v12266_v32 = vmul.f32 %v18027_v11, %v18031_v57  ;;  %v12270_v53 = vmul.f32 %v18027_v11, %v18032_v21  ;;  %v18033_v20 = vld [vmem:[#allocation123_spill] sm:$0xff] }
 0x2fb   : > { %18024 = vst [vmem:[#allocation104_spill] sm:$0xff] %v12239_v48  ;;  %18026 = vst [vmem:[#allocation100_spill] sm:$0xff] %v12242_v49  ;;  %v12262_v63 = vmul.f32 %v18027_v11, %v18030_v6  ;;  %v12274_v4 = vmul.f32 %v18027_v11, %v18033_v20  ;;  %v18034_v35 = vld [vmem:[#allocation32_spill] sm:$0xff]  ;;  %v18035_v43 = vld [vmem:[#allocation50_spill] sm:$0xff]  ;;  %v4075_v36 = vmul.f32 %v18027_v11, %v17849_v38 }
 0x2fc   : > { %v12278_v5 = vmul.f32 %v18027_v11, %v18034_v35  ;;  %v12282_v6 = vmul.f32 %v18027_v11, %v18035_v43  ;;  %v18036_v49 = vld [vmem:[#allocation101_spill] sm:$0xff]  ;;  %v18037_v48 = vld [vmem:[#allocation15_spill] sm:$0xff]  ;;  %v18038_v7 = vld [vmem:[#allocation58_spill] sm:$0xff] }
 0x2fd   : > { %v12286_v57 = vmul.f32 %v18027_v11, %v18036_v49  ;;  %v12290_v21 = vmul.f32 %v18027_v11, %v18037_v48  ;;  %v12294_v20 = vmul.f32 %v18027_v11, %v18038_v7  ;;  %v18039_v42 = vld [vmem:[#allocation124_spill] sm:$0xff]  ;;  %v18040_v15 = vld [vmem:[#allocation46_spill] sm:$0xff]  ;;  %v18041_v33 = vld [vmem:[#allocation33_spill] sm:$0xff] }
 0x2fe   : > { %v12298_v35 = vmul.f32 %v18027_v11, %v18039_v42  ;;  %v12302_v43 = vmul.f32 %v18027_v11, %v18040_v15  ;;  %v12306_v49 = vmul.f32 %v18027_v11, %v18041_v33  ;;  %v18042_v31 = vld [vmem:[#allocation75_spill] sm:$0xff]  ;;  %v18043_v30 = vld [vmem:[#allocation85_spill] sm:$0xff]  ;;  %v18049_v33 = vld [vmem:[#allocation134_spill] sm:$0xff] }
 0x2ff   : > { %v12310_v48 = vmul.f32 %v18027_v11, %v18042_v31  ;;  %v12314_v7 = vmul.f32 %v18027_v11, %v18043_v30  ;;  %v18044_v46 = vld [vmem:[#allocation59_spill] sm:$0xff]  ;;  %v18047_v15 = vld [vmem:[#allocation133_spill] sm:$0xff]  ;;  %v12327_v8 = vadd.f32 %v3654_v47, %v18049_v33  ;;  %v18054_v37 = vld [vmem:[#allocation136_spill] sm:$0xff] }
 0x300   : > { %v12318_v42 = vmul.f32 %v18027_v11, %v18044_v46  ;;  %v18045_v41 = vld [vmem:[#allocation39_spill] sm:$0xff]  ;;  %v12324_v51 = vadd.f32 %v3653_v61, %v18047_v15  ;;  %v18051_v9 = vld [vmem:[#allocation109_spill] sm:$0xff]  ;;  %v12337_v24 = vadd.f32 %v3656_v50, %v18054_v37  ;;  %v18061_v47 = vld [vmem:[#allocation112_spill] sm:$0xff] }
 0x301   : > { %v12321_v23 = vadd.f32 %v3652_v16, %v18045_v41  ;;  %18050 = vst [vmem:[#allocation129_spill] sm:$0xff] %v12327_v8  ;;  %v12331_v31 = vmul.f32 %v18027_v11, %v18051_v9  ;;  %v18052_v27 = vld [vmem:[#allocation135_spill] sm:$0xff]  ;;  %v18057_v10 = vld [vmem:[#allocation113_spill] sm:$0xff]  ;;  %v18058_v16 = vld [vmem:[#allocation66_spill] sm:$0xff] }
 0x302   : > { %18048 = vst [vmem:[#allocation55_spill] sm:$0xff] %v12324_v51  ;;  %v12334_v30 = vadd.f32 %v3655_v62, %v18052_v27  ;;  %18055 = vst [vmem:[#allocation130_spill] sm:$0xff] %v12337_v24  ;;  %v18056_v46 = vld [vmem:[#allocation119_spill] sm:$0xff]  ;;  %v3741_v61 = vmul.f32 %v18057_v10, %v18058_v16  ;;  %v18059_v15 = vld [vmem:[#allocation137_spill] sm:$0xff]  ;;  %v3742_v33 = vmul.f32 %v18057_v10, %v18061_v47 }
 0x303   : > { %18046 = vst [vmem:[#allocation128_spill] sm:$0xff] %v12321_v23  ;;  %v3740_v41 = vmul.f32 %v18057_v10, %v18056_v46  ;;  %v12344_v51 = vadd.f32 %v3657_v22, %v18059_v15  ;;  %v18062_v9 = vld [vmem:[#allocation40_spill] sm:$0xff]  ;;  %v18063_v27 = vld [vmem:[#allocation93_spill] sm:$0xff]  ;;  %v18066_v16 = vld [vmem:[#allocation27_spill] sm:$0xff] }
 0x304   : > { %18053 = vst [vmem:[#allocation118_spill] sm:$0xff] %v12334_v30  ;;  %v3743_v8 = vmul.f32 %v18057_v10, %v18062_v9  ;;  %v12352_v62 = vmul.f32 %v18057_v10, %v18063_v27  ;;  %v18064_v37 = vld [vmem:[#allocation97_spill] sm:$0xff]  ;;  %v12362_v22 = vmul.f32 %v18057_v10, %v18066_v16  ;;  %v18067_v15 = vld [vmem:[#allocation76_spill] sm:$0xff]  ;;  %v18069_v27 = vld [vmem:[#allocation67_spill] sm:$0xff]  ;;  %v3843_v55 = vrot.slane %v3741_v61, 2 }
 0x305   : > { %18060 = vst [vmem:[#allocation107_spill] sm:$0xff] %v12344_v51  ;;  %v3745_v50 = vmul.f32 %v18057_v10, %v18064_v37  ;;  %v18065_v46 = vld [vmem:[#allocation21_spill] sm:$0xff]  ;;  %v3748_v47 = vmul.f32 %v18057_v10, %v18067_v15  ;;  %v12372_v30 = vmul.f32 %v18057_v10, %v18069_v27  ;;  %v18070_v37 = vld [vmem:[#allocation99_spill] sm:$0xff]  ;;  %v3842_v25 = vrot.slane %v3740_v41, 2  ;;  %v18074_v27 = vld [vmem:[#allocation120_spill] sm:$0xff] }
 0x306   : > { %v12358_v24 = vmul.f32 %v18057_v10, %v18065_v46  ;;  %v18068_v51 = vld [vmem:[#allocation53_spill] sm:$0xff]  ;;  %v12376_v23 = vmul.f32 %v18057_v10, %v18070_v37  ;;  %v18071_v46 = vld [vmem:[#allocation35_spill] sm:$0xff]  ;;  %v12392_v19 = vmul.f32 %v18057_v10, %v18074_v27  ;;  %v12394_v37 = vrot.slane %v3742_v33, 2  ;;  %v18078_v61 = vld [vmem:[#allocation52_spill] sm:$0xff] }
 0x307   : > { %v12368_v9 = vmul.f32 %v18057_v10, %v18068_v51  ;;  %v12380_v56 = vmul.f32 %v18057_v10, %v18071_v46  ;;  %v18072_v16 = vld [vmem:[#allocation111_spill] sm:$0xff]  ;;  %v18073_v15 = vld [vmem:[#allocation73_spill] sm:$0xff]  ;;  %v3847_v1 = vrot.slane %v3743_v8, 2  ;;  %v12411_v27 = vmul.f32 %v18057_v10, %v18078_v61  ;;  %v18079_v33 = vld [vmem:[#allocation98_spill] sm:$0xff] }
 0x308   : > { %v12384_v40 = vmul.f32 %v18057_v10, %v18072_v16  ;;  %v12388_v51 = vmul.f32 %v18057_v10, %v18073_v15  ;;  %v18075_v3 = vld [vmem:[#allocation29_spill] sm:$0xff]  ;;  %v18076_v16 = vld [vmem:[#allocation87_spill] sm:$0xff]  ;;  %v18077_v15 = vld [vmem:[#allocation14_spill] sm:$0xff]  ;;  %v12415_v8 = vmul.f32 %v18057_v10, %v18079_v33  ;;  %v12430_v44 = vsel %vm1195_vm3, %v3842_v25, %v3843_v55 }
 0x309   : > { %v12399_v18 = vmul.f32 %v18057_v10, %v18075_v3  ;;  %v12403_v13 = vmul.f32 %v18057_v10, %v18076_v16  ;;  %v12407_v41 = vmul.f32 %v18057_v10, %v18077_v15  ;;  %v18080_v46 = vld [vmem:[#allocation127_spill] sm:$0xff]  ;;  %v18082_v12 = vld [vmem:[#allocation37_spill] sm:$0xff]  ;;  %v12432_v61 = vrot.slane %v3745_v50, 2 }
 0x30a   : > { %v12419_v3 = vmul.f32 %v18057_v10, %v18080_v46  ;;  %v18081_v29 = vld [vmem:[#allocation43_spill] sm:$0xff]  ;;  %v12427_v15 = vmul.f32 %v18057_v10, %v18082_v12  ;;  %v12439_v46 = vsel %vm1195_vm3, %v3843_v55, %v12394_v37  ;;  %v12447_v25 = vrot.slane %v3748_v47, 2 }
 0x30b   : > { %v12423_v16 = vmul.f32 %v18057_v10, %v18081_v29  ;;  %v18083_v29 = vrot.slane %v12352_v62, 2  ;;  %v3853_v10 = vrot.slane %v12362_v22, 2  ;;  %v3857_v50 = vrot.slane %v12368_v9, 2 }
 0x30c   : > { %v3858_v33 = vrot.slane %v12372_v30, 2  ;;  %v3862_v38 = vrot.slane %v12380_v56, 2  ;;  %v3863_v55 = vrot.slane %v12384_v40, 2  ;;  %v3867_v34 = vrot.slane %v12392_v19, 2 }
 0x30d   : > { %v12444_v60 = vsel %vm1195_vm3, %v3847_v1, %v18083_v29  ;;  %v3868_v1 = vrot.slane %v12399_v18, 2  ;;  %v12460_v47 = vmul.f32 %v18027_v11, %v17864_v39  ;;  %v4205_v9 = vrot.slane %v4075_v36, 2 }
 0x30e   : > { %v4206_v30 = vrot.slane %v12246_v54, 2  ;;  %v4073_v56 = vmul.f32 %v18027_v11, %v17868_v14  ;;  %v12467_v40 = vmul.f32 %v18027_v11, %v17881_v58  ;;  %v16105_v19 = vrot.slane %v12250_v17, 2 }
 0x30f   : > { %v4210_v18 = vrot.slane %v12254_v52, 2  ;;  %v4211_v29 = vrot.slane %v12258_v26, 2  ;;  %v16104_v36 = vrot.slane %v12262_v63, 2  ;;  %v4215_v54 = vrot.slane %v12266_v32, 2 }
 0x310   : > { %v12472_v22 = vsel %vm1195_vm3, %v4205_v9, %v4206_v30  ;;  %v12480_v0 = vsel %vm1195_vm3, %v4206_v30, %v16105_v19  ;;  %v4216_v12 = vrot.slane %v12270_v53, 2  ;;  %v16107_v58 = vrot.slane %v12274_v4, 2 }
 0x311   : > { %v4220_v52 = vrot.slane %v12278_v5, 2  ;;  %v4212_v9 = vsel %vm1195_vm3, %v4210_v18, %v4211_v29  ;;  %v4214_v26 = vsel %vm1195_vm3, %v4211_v29, %v16104_v36  ;;  %v4221_v14 = vrot.slane %v12282_v6, 2 }
 0x312   : > { %v16106_v32 = vrot.slane %v12286_v57, 2  ;;  %v4217_v39 = vsel %vm1195_vm3, %v4215_v54, %v4216_v12  ;;  %v4219_v53 = vsel %vm1195_vm3, %v4216_v12, %v16107_v58  ;;  %v4225_v30 = vrot.slane %v12290_v21, 2 }
 0x313   : > { %v4226_v5 = vrot.slane %v12294_v20, 2  ;;  %v4222_v18 = vsel %vm1195_vm3, %v4220_v52, %v4221_v14  ;;  %v16108_v6 = vrot.slane %v12298_v35, 2  ;;  %v4230_v36 = vrot.slane %v12302_v43, 2 }
 0x314   : > { %v4224_v29 = vsel %vm1195_vm3, %v4221_v14, %v16106_v32  ;;  %v4231_v19 = vrot.slane %v12306_v49, 2  ;;  %v12506_v12 = vrot.slane %v12310_v48, 2  ;;  %v4235_v21 = vrot.slane %v12314_v7, 2 }
 0x315   : > { %v4227_v54 = vsel %vm1195_vm3, %v4225_v30, %v4226_v5  ;;  %v3872_v20 = vrot.slane %v12407_v41, 2  ;;  %v4229_v52 = vsel %vm1195_vm3, %v4226_v5, %v16108_v6  ;;  %v4236_v14 = vrot.slane %v12318_v42, 2 }
 0x316   : > { %v4238_v32 = vrot.slane %v12331_v31, 2  ;;  %v3873_v43 = vrot.slane %v12411_v27, 2  ;;  %v16109_v30 = vrot.slane %v12415_v8, 2  ;;  %v4232_v49 = vsel %vm1195_vm3, %v4230_v36, %v4231_v19 }
 0x317   : > { %v4234_v48 = vsel %vm1195_vm3, %v4231_v19, %v12506_v12  ;;  %v3877_v7 = vrot.slane %v12419_v3, 2  ;;  %v3878_v41 = vrot.slane %v12423_v16, 2  ;;  %v4237_v58 = vsel %vm1195_vm3, %v4235_v21, %v4236_v14 }
 0x318   : > { %v4239_v5 = vsel %vm1195_vm3, %v4236_v14, %v4238_v32  ;;  %v4200_v31 = vrot.slane %v12460_v47, 2  ;;  %v4201_v27 = vrot.slane %v4073_v56, 2  ;;  %v4203_v6 = vrot.slane %v12467_v40, 2 }
 0x319   : > { %v18084_v36 = vrot.slane %v12352_v62, 2  ;;  %v18085_v3 = vrot.slane %v12358_v24, 2  ;;  %v3856_v21 = vsel %vm1195_vm3, %v3853_v10, %v12447_v25  ;;  %v3859_v14 = vsel %vm1195_vm3, %v3857_v50, %v3858_v33 }
 0x31a   : > { %v18086_v42 = vrot.slane %v12376_v23, 2  ;;  %v3864_v56 = vsel %vm1195_vm3, %v3862_v38, %v3863_v55  ;;  %v18087_v40 = vrot.slane %v12388_v51, 2  ;;  %v18088_v24 = vrot.slane %v12403_v13, 2 }
 0x31b   : > { %v3851_v19 = vsel %vm1195_vm3, %v18084_v36, %v12432_v61  ;;  %v3854_v16 = vsel %vm1195_vm3, %v18085_v3, %v3853_v10  ;;  %v3869_v36 = vsel %vm1195_vm3, %v3867_v34, %v3868_v1  ;;  %v3874_v10 = vsel %vm1195_vm3, %v3872_v20, %v3873_v43 }
 0x31c   : > { %v3861_v47 = vsel %vm1195_vm3, %v3858_v33, %v18086_v42  ;;  %v3866_v62 = vsel %vm1195_vm3, %v3863_v55, %v18087_v40  ;;  %v3871_v3 = vsel %vm1195_vm3, %v3868_v1, %v18088_v24  ;;  %v3876_v50 = vsel %vm1195_vm3, %v3873_v43, %v16109_v30  ;;  %v18100_v30 = vld [vmem:[#allocation24_spill] sm:$0xff] }
 0x31d   : > { %v3879_v33 = vsel %vm1195_vm3, %v3877_v7, %v3878_v41  ;;  %v18089_v38 = vrot.slane %v12427_v15, 2  ;;  %v12558_v55 = vadd.f32 %v12430_v44, %v12143_v45  ;;  %v4202_v34 = vsel %vm1195_vm3, %v4200_v31, %v4201_v27  ;;  %v18095_v45 = vld [vmem:[#allocation60_spill] sm:$0xff] }
 0x31e   : > { %v4204_v1 = vsel %vm1195_vm3, %v4201_v27, %v4203_v6  ;;  %v12564_v20 = vadd.f32 %v12439_v46, %v12147_v28  ;;  %v12568_v43 = vadd.f32 %v12394_v37, %v12151_v59  ;;  %v12572_v7 = vadd.f32 %v12444_v60, %v12155_v2  ;;  %v18096_v27 = vld [vmem:[#allocation31_spill] sm:$0xff] }
 0x31f   : > { %v3881_v42 = vsel %vm1195_vm3, %v3878_v41, %v18089_v38  ;;  %v18093_v41 = vld [vmem:[#allocation34_spill] sm:$0xff]  ;;  %v12579_v31 = vadd.f32 %v12432_v61, %v18095_v45  ;;  %v12582_v24 = vadd.f32 %v3854_v16, %v18096_v27  ;;  %v18098_v28 = vld [vmem:[#allocation11_spill] sm:$0xff]  ;;  %v12589_v59 = vadd.f32 %v12447_v25, %v18100_v30 }
 0x320   : > { %18090 = vst [vmem:[#allocation131_spill] sm:$0xff] %v12564_v20  ;;  %18091 = vst [vmem:[#allocation18_spill] sm:$0xff] %v12568_v43  ;;  %v12575_v40 = vadd.f32 %v3851_v19, %v18093_v41  ;;  %v12585_v38 = vadd.f32 %v3856_v21, %v18098_v28  ;;  %v18102_v43 = vld [vmem:[#allocation92_spill] sm:$0xff]  ;;  %v18108_v45 = vld [vmem:[#allocation23_spill] sm:$0xff]  ;;  %v18113_v30 = vrot.slane %v12250_v17, 2 }
 0x321   : > { %18092 = vst [vmem:[#allocation132_spill] sm:$0xff] %v12572_v7  ;;  %18097 = vst [vmem:[#allocation105_spill] sm:$0xff] %v12582_v24  ;;  %v12592_v2 = vadd.f32 %v4202_v34, %v18102_v43  ;;  %v18104_v7 = vld [vmem:[#allocation64_spill] sm:$0xff]  ;;  %v12602_v27 = vadd.f32 %v12472_v22, %v18108_v45  ;;  %v18110_v24 = vld [vmem:[#allocation17_spill] sm:$0xff] }
 0x322   : > { %18094 = vst [vmem:[#allocation91_spill] sm:$0xff] %v12575_v40  ;;  %18099 = vst [vmem:[#allocation62_spill] sm:$0xff] %v12585_v38  ;;  %v12595_v41 = vadd.f32 %v4204_v1, %v18104_v7  ;;  %v18106_v40 = vld [vmem:[#allocation54_spill] sm:$0xff]  ;;  %v12606_v28 = vadd.f32 %v12480_v0, %v18110_v24  ;;  %v18112_v38 = vld [vmem:[#allocation49_spill] sm:$0xff] }
 0x323   : > { %18101 = vst [vmem:[#allocation16_spill] sm:$0xff] %v12589_v59  ;;  %18103 = vst [vmem:[#allocation47_spill] sm:$0xff] %v12592_v2  ;;  %v12598_v20 = vadd.f32 %v4203_v6, %v18106_v40  ;;  %v12611_v59 = vadd.f32 %v18113_v30, %v18112_v38  ;;  %v18115_v34 = vld [vmem:[#allocation121_spill] sm:$0xff]  ;;  %v18117_v1 = vld [vmem:[#allocation82_spill] sm:$0xff]  ;;  %v18120_v40 = vrot.slane %v12262_v63, 2  ;;  %v18127_v38 = vrot.slane %v12274_v4, 2 }
 0x324   : > { %18105 = vst [vmem:[#allocation38_spill] sm:$0xff] %v12595_v41  ;;  %18109 = vst [vmem:[#allocation48_spill] sm:$0xff] %v12602_v27  ;;  %v12614_v43 = vadd.f32 %v4212_v9, %v18115_v34  ;;  %v12617_v7 = vadd.f32 %v4214_v26, %v18117_v1  ;;  %v18119_v6 = vld [vmem:[#allocation110_spill] sm:$0xff]  ;;  %v18122_v45 = vld [vmem:[#allocation68_spill] sm:$0xff] }
 0x325   : > { %18107 = vst [vmem:[#allocation44_spill] sm:$0xff] %v12598_v20  ;;  %18111 = vst [vmem:[#allocation138_spill] sm:$0xff] %v12606_v28  ;;  %v12622_v22 = vadd.f32 %v18120_v40, %v18119_v6  ;;  %v12625_v27 = vadd.f32 %v4217_v39, %v18122_v45  ;;  %v18124_v0 = vld [vmem:[#allocation12_spill] sm:$0xff]  ;;  %v18126_v17 = vld [vmem:[#allocation69_spill] sm:$0xff]  ;;  %v18134_v6 = vrot.slane %v12286_v57, 2 }
 0x326   : > { %18114 = vst [vmem:[#allocation39_spill] sm:$0xff] %v12611_v59  ;;  %18116 = vst [vmem:[#allocation133_spill] sm:$0xff] %v12614_v43  ;;  %v12628_v24 = vadd.f32 %v4219_v53, %v18124_v0  ;;  %v12633_v30 = vadd.f32 %v18127_v38, %v18126_v17  ;;  %v18129_v9 = vld [vmem:[#allocation41_spill] sm:$0xff]  ;;  %v18131_v26 = vld [vmem:[#allocation116_spill] sm:$0xff]  ;;  %v18141_v17 = vrot.slane %v12298_v35, 2 }
 0x327   : > { %18118 = vst [vmem:[#allocation134_spill] sm:$0xff] %v12617_v7  ;;  %18121 = vst [vmem:[#allocation135_spill] sm:$0xff] %v12622_v22  ;;  %v12636_v34 = vadd.f32 %v4222_v18, %v18129_v9  ;;  %v12639_v1 = vadd.f32 %v4224_v29, %v18131_v26  ;;  %v18133_v63 = vld [vmem:[#allocation51_spill] sm:$0xff]  ;;  %v18136_v39 = vld [vmem:[#allocation96_spill] sm:$0xff] }
 0x328   : > { %18123 = vst [vmem:[#allocation136_spill] sm:$0xff] %v12625_v27  ;;  %18125 = vst [vmem:[#allocation113_spill] sm:$0xff] %v12628_v24  ;;  %v12644_v40 = vadd.f32 %v18134_v6, %v18133_v63  ;;  %v12647_v45 = vadd.f32 %v4227_v54, %v18136_v39  ;;  %v18138_v53 = vld [vmem:[#allocation36_spill] sm:$0xff]  ;;  %v18143_v18 = vld [vmem:[#allocation117_spill] sm:$0xff] }
 0x329   : > { %18128 = vst [vmem:[#allocation137_spill] sm:$0xff] %v12633_v30  ;;  %18130 = vst [vmem:[#allocation34_spill] sm:$0xff] %v12636_v34  ;;  %v12650_v0 = vadd.f32 %v4229_v52, %v18138_v53  ;;  %v18140_v4 = vld [vmem:[#allocation20_spill] sm:$0xff]  ;;  %v12658_v9 = vadd.f32 %v4232_v49, %v18143_v18  ;;  %v18145_v29 = vld [vmem:[#allocation9_spill] sm:$0xff] }
 0x32a   : > { %18132 = vst [vmem:[#allocation60_spill] sm:$0xff] %v12639_v1  ;;  %18135 = vst [vmem:[#allocation31_spill] sm:$0xff] %v12644_v40  ;;  %v12655_v38 = vadd.f32 %v18141_v17, %v18140_v4  ;;  %v12661_v26 = vadd.f32 %v4234_v48, %v18145_v29  ;;  %v18147_v57 = vld [vmem:[#allocation19_spill] sm:$0xff]  ;;  %v18149_v54 = vld [vmem:[#allocation42_spill] sm:$0xff] }
 0x32b   : > { %18137 = vst [vmem:[#allocation11_spill] sm:$0xff] %v12647_v45  ;;  %18139 = vst [vmem:[#allocation24_spill] sm:$0xff] %v12650_v0  ;;  %v12665_v63 = vadd.f32 %v12506_v12, %v18147_v57  ;;  %v12668_v6 = vadd.f32 %v4237_v58, %v18149_v54  ;;  %v18151_v52 = vld [vmem:[#allocation83_spill] sm:$0xff]  ;;  %v18155_v4 = vld [vmem:[#allocation10_spill] sm:$0xff] }
 0x32c   : > { %18142 = vst [vmem:[#allocation92_spill] sm:$0xff] %v12655_v38  ;;  %18144 = vst [vmem:[#allocation64_spill] sm:$0xff] %v12658_v9  ;;  %v12671_v39 = vadd.f32 %v4239_v5, %v18151_v52  ;;  %v18153_v53 = vld [vmem:[#allocation63_spill] sm:$0xff]  ;;  %v12677_v17 = vadd.f32 %v3859_v14, %v18155_v4  ;;  %v18157_v18 = vld [vmem:[#allocation84_spill] sm:$0xff] }
 0x32d   : > { %18146 = vst [vmem:[#allocation54_spill] sm:$0xff] %v12661_v26  ;;  %18148 = vst [vmem:[#allocation23_spill] sm:$0xff] %v12665_v63  ;;  %v12674_v35 = vadd.f32 %v4238_v32, %v18153_v53  ;;  %v12680_v9 = vadd.f32 %v4232_v49, %v18157_v18  ;;  %v18159_v29 = vld [vmem:[#allocation22_spill] sm:$0xff]  ;;  %v18163_v58 = vld [vmem:[#allocation25_spill] sm:$0xff]  ;;  %v18166_v32 = vrot.slane %v12376_v23, 2 }
 0x32e   : > { %18150 = vst [vmem:[#allocation17_spill] sm:$0xff] %v12668_v6  ;;  %18152 = vst [vmem:[#allocation49_spill] sm:$0xff] %v12671_v39  ;;  %v12683_v26 = vadd.f32 %v4234_v48, %v18159_v29  ;;  %v18161_v57 = vld [vmem:[#allocation30_spill] sm:$0xff]  ;;  %v12690_v54 = vadd.f32 %v3861_v47, %v18163_v58  ;;  %v18165_v5 = vld [vmem:[#allocation57_spill] sm:$0xff] }
 0x32f   : > { %18154 = vst [vmem:[#allocation121_spill] sm:$0xff] %v12674_v35  ;;  %18156 = vst [vmem:[#allocation82_spill] sm:$0xff] %v12677_v17  ;;  %v12687_v63 = vadd.f32 %v12506_v12, %v18161_v57  ;;  %v12695_v52 = vadd.f32 %v18166_v32, %v18165_v5  ;;  %v18168_v14 = vld [vmem:[#allocation81_spill] sm:$0xff]  ;;  %v18170_v49 = vld [vmem:[#allocation108_spill] sm:$0xff] }
 0x330   : > { %18158 = vst [vmem:[#allocation110_spill] sm:$0xff] %v12680_v9  ;;  %18160 = vst [vmem:[#allocation68_spill] sm:$0xff] %v12683_v26  ;;  %v12698_v53 = vadd.f32 %v3854_v16, %v18168_v14  ;;  %v12701_v4 = vadd.f32 %v3856_v21, %v18170_v49  ;;  %v18172_v48 = vld [vmem:[#allocation125_spill] sm:$0xff]  ;;  %v18174_v12 = vld [vmem:[#allocation80_spill] sm:$0xff] }
 0x331   : > { %18162 = vst [vmem:[#allocation12_spill] sm:$0xff] %v12687_v63  ;;  %18164 = vst [vmem:[#allocation69_spill] sm:$0xff] %v12690_v54  ;;  %v12705_v18 = vadd.f32 %v12447_v25, %v18172_v48  ;;  %v12709_v29 = vadd.f32 %v12444_v60, %v18174_v12  ;;  %v18176_v47 = vld [vmem:[#allocation126_spill] sm:$0xff]  ;;  %v18182_v21 = vld [vmem:[#allocation56_spill] sm:$0xff]  ;;  %v18191_v12 = vrot.slane %v12388_v51, 2 }
 0x332   : > { %18167 = vst [vmem:[#allocation41_spill] sm:$0xff] %v12695_v52  ;;  %18169 = vst [vmem:[#allocation116_spill] sm:$0xff] %v12698_v53  ;;  %v12712_v57 = vadd.f32 %v3851_v19, %v18176_v47  ;;  %v18178_v23 = vld [vmem:[#allocation102_spill] sm:$0xff]  ;;  %v12724_v32 = vadd.f32 %v12439_v46, %v18182_v21  ;;  %v18184_v25 = vld [vmem:[#allocation72_spill] sm:$0xff] }
 0x333   : > { %18171 = vst [vmem:[#allocation51_spill] sm:$0xff] %v12701_v4  ;;  %18173 = vst [vmem:[#allocation96_spill] sm:$0xff] %v12705_v18  ;;  %v12716_v58 = vadd.f32 %v12432_v61, %v18178_v23  ;;  %v18180_v16 = vld [vmem:[#allocation70_spill] sm:$0xff]  ;;  %v12728_v14 = vadd.f32 %v12394_v37, %v18184_v25  ;;  %v18186_v60 = vld [vmem:[#allocation45_spill] sm:$0xff]  ;;  %v18198_v37 = vrot.slane %v12403_v13, 2 }
 0x334   : > { %18175 = vst [vmem:[#allocation36_spill] sm:$0xff] %v12709_v29  ;;  %18177 = vst [vmem:[#allocation20_spill] sm:$0xff] %v12712_v57  ;;  %v12720_v5 = vadd.f32 %v12430_v44, %v18180_v16  ;;  %v12731_v49 = vadd.f32 %v3864_v56, %v18186_v60  ;;  %v18188_v19 = vld [vmem:[#allocation114_spill] sm:$0xff]  ;;  %v18190_v61 = vld [vmem:[#allocation103_spill] sm:$0xff] }
 0x335   : > { %18179 = vst [vmem:[#allocation117_spill] sm:$0xff] %v12716_v58  ;;  %18183 = vst [vmem:[#allocation19_spill] sm:$0xff] %v12724_v32  ;;  %v12734_v48 = vadd.f32 %v3866_v62, %v18188_v19  ;;  %v12739_v47 = vadd.f32 %v18191_v12, %v18190_v61  ;;  %v18193_v44 = vld [vmem:[#allocation95_spill] sm:$0xff]  ;;  %v18195_v46 = vld [vmem:[#allocation104_spill] sm:$0xff]  ;;  %v18205_v61 = vrot.slane %v12415_v8, 2 }
 0x336   : > { %18181 = vst [vmem:[#allocation9_spill] sm:$0xff] %v12720_v5  ;;  %18185 = vst [vmem:[#allocation42_spill] sm:$0xff] %v12728_v14  ;;  %v12742_v23 = vadd.f32 %v3869_v36, %v18193_v44  ;;  %v12745_v16 = vadd.f32 %v3871_v3, %v18195_v46  ;;  %v18197_v21 = vld [vmem:[#allocation100_spill] sm:$0xff]  ;;  %v18202_v62 = vld [vmem:[#allocation55_spill] sm:$0xff] }
 0x337   : > { %18187 = vst [vmem:[#allocation83_spill] sm:$0xff] %v12731_v49  ;;  %18189 = vst [vmem:[#allocation63_spill] sm:$0xff] %v12734_v48  ;;  %v12750_v25 = vadd.f32 %v18198_v37, %v18197_v21  ;;  %v18200_v56 = vld [vmem:[#allocation128_spill] sm:$0xff]  ;;  %v12756_v19 = vadd.f32 %v3876_v50, %v18202_v62  ;;  %v18204_v51 = vld [vmem:[#allocation129_spill] sm:$0xff]  ;;  %v18211_v21 = vrot.slane %v12427_v15, 2 }
 0x338   : > { %18192 = vst [vmem:[#allocation10_spill] sm:$0xff] %v12739_v47  ;;  %18194 = vst [vmem:[#allocation84_spill] sm:$0xff] %v12742_v23  ;;  %v12753_v60 = vadd.f32 %v3874_v10, %v18200_v56  ;;  %v12761_v12 = vadd.f32 %v18205_v61, %v18204_v51  ;;  %v18207_v36 = vld [vmem:[#allocation118_spill] sm:$0xff]  ;;  %v18210_v13 = vld [vmem:[#allocation107_spill] sm:$0xff] }
 0x339   : > { %18196 = vst [vmem:[#allocation22_spill] sm:$0xff] %v12745_v16  ;;  %18199 = vst [vmem:[#allocation30_spill] sm:$0xff] %v12750_v25  ;;  %v12764_v44 = vadd.f32 %v3879_v33, %v18207_v36  ;;  %v18209_v3 = vld [vmem:[#allocation130_spill] sm:$0xff]  ;;  %v12772_v37 = vadd.f32 %v18211_v21, %v18210_v13  ;;  %v18213_v10 = vld [vmem:[#allocation21_spill] sm:$0xff] }
 0x33a   : > { %18201 = vst [vmem:[#allocation25_spill] sm:$0xff] %v12753_v60  ;;  %18203 = vst [vmem:[#allocation57_spill] sm:$0xff] %v12756_v19  ;;  %v12767_v46 = vadd.f32 %v3881_v42, %v18209_v3  ;;  %v4042_v50 = vmul.f32 %v18027_v11, %v18213_v10  ;;  %v18214_v56 = vld [vmem:[#allocation27_spill] sm:$0xff]  ;;  %v18215_v8 = vld [vmem:[#allocation76_spill] sm:$0xff] }
 0x33b   : > { %18206 = vst [vmem:[#allocation81_spill] sm:$0xff] %v12761_v12  ;;  %18208 = vst [vmem:[#allocation108_spill] sm:$0xff] %v12764_v44  ;;  %v4043_v62 = vmul.f32 %v18027_v11, %v18214_v56  ;;  %v4044_v51 = vmul.f32 %v18027_v11, %v18215_v8  ;;  %v18216_v61 = vld [vmem:[#allocation53_spill] sm:$0xff]  ;;  %v18217_v36 = vld [vmem:[#allocation67_spill] sm:$0xff] }
 0x33c   : > { %18212 = vst [vmem:[#allocation125_spill] sm:$0xff] %v12772_v37  ;;  %v4045_v33 = vmul.f32 %v18027_v11, %v18216_v61  ;;  %v4046_v42 = vmul.f32 %v18027_v11, %v18217_v36  ;;  %v18218_v3 = vld [vmem:[#allocation99_spill] sm:$0xff]  ;;  %v18219_v13 = vld [vmem:[#allocation40_spill] sm:$0xff]  ;;  %v18220_v10 = vld [vmem:[#allocation93_spill] sm:$0xff]  ;;  %v4150_v45 = vrot.slane %v4042_v50, 2 }
 0x33d   : > { %v12786_v15 = vmul.f32 %v18027_v11, %v18218_v3  ;;  %v12790_v21 = vmul.f32 %v18027_v11, %v18219_v13  ;;  %v12794_v56 = vmul.f32 %v18027_v11, %v18220_v10  ;;  %v18221_v37 = vld [vmem:[#allocation97_spill] sm:$0xff]  ;;  %v18222_v61 = vld [vmem:[#allocation115_spill] sm:$0xff]  ;;  %v18224_v36 = vld [vmem:[#allocation26_spill] sm:$0xff]  ;;  %v4151_v40 = vrot.slane %v4043_v62, 2 }
 0x33e   : > { %v12798_v8 = vmul.f32 %v18027_v11, %v18221_v37  ;;  %v18223_v44 = vld [vmem:[#allocation139_spill] sm:$0xff]  ;;  %v18225_v19 = vld [vmem:[#allocation74_spill] sm:$0xff]  ;;  %v18226_v60 = vld [vmem:[#allocation61_spill] sm:$0xff]  ;;  %v4155_v34 = vrot.slane %v4045_v33, 2  ;;  %v4156_v30 = vrot.slane %v4046_v42, 2 }
 0x33f   : > { %v12802_v12 = vmul.f32 %v18223_v44, %v18222_v61  ;;  %v12806_v3 = vmul.f32 %v18223_v44, %v18224_v36  ;;  %v12810_v13 = vmul.f32 %v18223_v44, %v18225_v19  ;;  %v12814_v10 = vmul.f32 %v18223_v44, %v18226_v60  ;;  %v18227_v25 = vld [vmem:[#allocation28_spill] sm:$0xff]  ;;  %v18228_v16 = vld [vmem:[#allocation123_spill] sm:$0xff]  ;;  %v18230_v47 = vld [vmem:[#allocation50_spill] sm:$0xff] }
 0x340   : > { %v12818_v37 = vmul.f32 %v18223_v44, %v18227_v25  ;;  %v12822_v61 = vmul.f32 %v18223_v44, %v18228_v16  ;;  %v18229_v23 = vld [vmem:[#allocation32_spill] sm:$0xff]  ;;  %v12830_v19 = vmul.f32 %v18223_v44, %v18230_v47  ;;  %v18231_v48 = vld [vmem:[#allocation101_spill] sm:$0xff]  ;;  %v18232_v49 = vld [vmem:[#allocation15_spill] sm:$0xff]  ;;  %v12960_v59 = vsel %vm1195_vm3, %v4150_v45, %v4151_v40 }
 0x341   : > { %v12826_v36 = vmul.f32 %v18223_v44, %v18229_v23  ;;  %v12834_v60 = vmul.f32 %v18223_v44, %v18231_v48  ;;  %v12838_v25 = vmul.f32 %v18223_v44, %v18232_v49  ;;  %v18233_v14 = vld [vmem:[#allocation58_spill] sm:$0xff]  ;;  %v18234_v32 = vld [vmem:[#allocation124_spill] sm:$0xff]  ;;  %v18236_v58 = vld [vmem:[#allocation33_spill] sm:$0xff]  ;;  %v18262_v28 = vrot.slane %v12786_v15, 2 }
 0x342   : > { %v12842_v16 = vmul.f32 %v18223_v44, %v18233_v14  ;;  %v12846_v23 = vmul.f32 %v18223_v44, %v18234_v32  ;;  %v18235_v5 = vld [vmem:[#allocation46_spill] sm:$0xff]  ;;  %v12854_v48 = vmul.f32 %v18223_v44, %v18236_v58  ;;  %v18237_v57 = vld [vmem:[#allocation75_spill] sm:$0xff]  ;;  %v18238_v29 = vld [vmem:[#allocation85_spill] sm:$0xff] }
 0x343   : > { %v12850_v47 = vmul.f32 %v18223_v44, %v18235_v5  ;;  %v12858_v49 = vmul.f32 %v18223_v44, %v18237_v57  ;;  %v12862_v14 = vmul.f32 %v18223_v44, %v18238_v29  ;;  %v18239_v18 = vld [vmem:[#allocation119_spill] sm:$0xff]  ;;  %v18240_v4 = vld [vmem:[#allocation66_spill] sm:$0xff]  ;;  %v18242_v52 = vld [vmem:[#allocation109_spill] sm:$0xff] }
 0x344   : > { %v12866_v32 = vmul.f32 %v18027_v11, %v18239_v18  ;;  %v12870_v5 = vmul.f32 %v18027_v11, %v18240_v4  ;;  %v18241_v53 = vld [vmem:[#allocation59_spill] sm:$0xff]  ;;  %v12878_v57 = vmul.f32 %v18223_v44, %v18242_v52  ;;  %v18243_v63 = vld [vmem:[#allocation112_spill] sm:$0xff]  ;;  %v18246_v54 = vld [vmem:[#allocation73_spill] sm:$0xff] }
 0x345   : > { %v12874_v58 = vmul.f32 %v18223_v44, %v18241_v53  ;;  %v12882_v29 = vmul.f32 %v18027_v11, %v18243_v63  ;;  %v18244_v26 = vld [vmem:[#allocation35_spill] sm:$0xff]  ;;  %v12894_v53 = vmul.f32 %v18027_v11, %v18246_v54  ;;  %v18247_v35 = vld [vmem:[#allocation120_spill] sm:$0xff]  ;;  %v18248_v39 = vld [vmem:[#allocation29_spill] sm:$0xff] }
 0x346   : > { %v12886_v18 = vmul.f32 %v18027_v11, %v18244_v26  ;;  %v18245_v9 = vld [vmem:[#allocation111_spill] sm:$0xff]  ;;  %v12898_v52 = vmul.f32 %v18027_v11, %v18247_v35  ;;  %v12902_v63 = vmul.f32 %v18027_v11, %v18248_v39  ;;  %v18250_v38 = vld [vmem:[#allocation14_spill] sm:$0xff]  ;;  %v18251_v0 = vld [vmem:[#allocation52_spill] sm:$0xff]  ;;  %v12916_v35 = vrot.slane %v4044_v51, 2 }
 0x347   : > { %v12890_v4 = vmul.f32 %v18027_v11, %v18245_v9  ;;  %v18249_v6 = vld [vmem:[#allocation87_spill] sm:$0xff]  ;;  %v12910_v9 = vmul.f32 %v18027_v11, %v18250_v38  ;;  %v12914_v54 = vmul.f32 %v18027_v11, %v18251_v0  ;;  %v18252_v1 = vld [vmem:[#allocation98_spill] sm:$0xff]  ;;  %v18255_v50 = vld [vmem:[#allocation37_spill] sm:$0xff]  ;;  %v4165_v45 = vrot.slane %v12866_v32, 2 }
 0x348   : > { %v12906_v26 = vmul.f32 %v18027_v11, %v18249_v6  ;;  %v12920_v39 = vmul.f32 %v18027_v11, %v18252_v1  ;;  %v18253_v24 = vld [vmem:[#allocation127_spill] sm:$0xff]  ;;  %v12933_v62 = vmul.f32 %v18027_v11, %v18255_v50  ;;  %v18256_v51 = vld [vmem:[#allocation88_spill] sm:$0xff]  ;;  %v18257_v33 = vld [vmem:[#allocation77_spill] sm:$0xff]  ;;  %v4166_v20 = vrot.slane %v12870_v5, 2 }
 0x349   : > { %v12925_v38 = vmul.f32 %v18027_v11, %v18253_v24  ;;  %v18254_v27 = vld [vmem:[#allocation43_spill] sm:$0xff]  ;;  %v12937_v1 = vmul.f32 %v18027_v11, %v18256_v51  ;;  %v12941_v42 = vmul.f32 %v18027_v11, %v18257_v33  ;;  %v18258_v6 = vld [vmem:[#allocation89_spill] sm:$0xff]  ;;  %v18260_v7 = vld [vmem:[#allocation86_spill] sm:$0xff]  ;;  %v12964_v33 = vsel %vm1195_vm3, %v4151_v40, %v12916_v35 }
 0x34a   : > { %v12929_v0 = vmul.f32 %v18027_v11, %v18254_v27  ;;  %v12945_v24 = vmul.f32 %v18027_v11, %v18258_v6  ;;  %v18259_v22 = vld [vmem:[#allocation65_spill] sm:$0xff]  ;;  %v12953_v50 = vmul.f32 %v18027_v11, %v18260_v7  ;;  %v18261_v43 = vld [vmem:[#allocation79_spill] sm:$0xff]  ;;  %v4160_v6 = vrot.slane %v12790_v21, 2  ;;  %v18265_v21 = vld [vmem:[#allocation122_spill] sm:$0xff] }
 0x34b   : > { %v12949_v27 = vmul.f32 %v18027_v11, %v18259_v22  ;;  %v12957_v51 = vmul.f32 %v18027_v11, %v18261_v43  ;;  %v12968_v22 = vsel %vm1195_vm3, %v4155_v34, %v4156_v30  ;;  %v12973_v7 = vsel %vm1195_vm3, %v4156_v30, %v18262_v28  ;;  %v18263_v40 = vld [vmem:[#allocation71_spill] sm:$0xff] }
 0x34c   : > { %v4161_v11 = vrot.slane %v12794_v56, 2  ;;  %v12981_v41 = vmul.f32 %v18223_v44, %v18263_v40  ;;  %v12985_v34 = vmul.f32 %v18223_v44, %v18265_v21  ;;  %v4170_v28 = vrot.slane %v12886_v18, 2 }
 0x34d   : > { %v4171_v30 = vrot.slane %v12890_v4, 2  ;;  %v4175_v32 = vrot.slane %v12898_v52, 2  ;;  %v4176_v5 = vrot.slane %v12902_v63, 2  ;;  %v4180_v40 = vrot.slane %v12910_v9, 2 }
 0x34e   : > { %18264 = vst [vmem:[#allocation80_spill] sm:$0xff] %v12981_v41  ;;  %18266 = vst [vmem:[#allocation126_spill] sm:$0xff] %v12985_v34  ;;  %v4181_v17 = vrot.slane %v12914_v54, 2  ;;  %v4185_v2 = vrot.slane %v12925_v38, 2  ;;  %v4186_v18 = vrot.slane %v12929_v0, 2  ;;  %v16113_v56 = vrot.slane %v12981_v41, 2 }
 0x34f   : > { %v16112_v52 = vrot.slane %v12985_v34, 2  ;;  %v4515_v63 = vrot.slane %v12802_v12, 2  ;;  %v4516_v9 = vrot.slane %v12806_v3, 2  ;;  %v16115_v54 = vrot.slane %v12810_v13, 2 }
 0x350   : > { %v4520_v21 = vrot.slane %v12814_v10, 2  ;;  %v4521_v38 = vrot.slane %v12818_v37, 2  ;;  %v16114_v4 = vrot.slane %v12822_v61, 2  ;;  %v4525_v12 = vrot.slane %v12826_v36, 2 }
 0x351   : > { %v4514_v0 = vsel %vm1195_vm3, %v16113_v56, %v16112_v52  ;;  %v4517_v43 = vsel %vm1195_vm3, %v4515_v63, %v4516_v9  ;;  %v4519_v3 = vsel %vm1195_vm3, %v4516_v9, %v16115_v54  ;;  %v4526_v10 = vrot.slane %v12830_v19, 2 }
 0x352   : > { %v13021_v34 = vrot.slane %v12834_v60, 2  ;;  %v4522_v41 = vsel %vm1195_vm3, %v4520_v21, %v4521_v38  ;;  %v4524_v37 = vsel %vm1195_vm3, %v4521_v38, %v16114_v4  ;;  %v4530_v52 = vrot.slane %v12838_v25, 2 }
 0x353   : > { %v4531_v36 = vrot.slane %v12842_v16, 2  ;;  %v13030_v63 = vsel %vm1195_vm3, %v4525_v12, %v4526_v10  ;;  %v13037_v60 = vrot.slane %v12846_v23, 2  ;;  %v4535_v19 = vrot.slane %v12850_v47, 2 }
 0x354   : > { %v13034_v9 = vsel %vm1195_vm3, %v4526_v10, %v13021_v34  ;;  %v4536_v38 = vrot.slane %v12854_v48, 2  ;;  %v4538_v25 = vrot.slane %v12858_v49, 2  ;;  %v4540_v16 = vrot.slane %v12862_v14, 2 }
 0x355   : > { %v13041_v21 = vsel %vm1195_vm3, %v4530_v52, %v4531_v36  ;;  %v4196_v12 = vrot.slane %v12953_v50, 2  ;;  %v4534_v10 = vsel %vm1195_vm3, %v4531_v36, %v13037_v60  ;;  %v4541_v56 = vrot.slane %v12874_v58, 2 }
 0x356   : > { %v4543_v23 = vrot.slane %v12878_v57, 2  ;;  %v4190_v47 = vrot.slane %v12937_v1, 2  ;;  %v4191_v52 = vrot.slane %v12941_v42, 2  ;;  %v4537_v4 = vsel %vm1195_vm3, %v4535_v19, %v4536_v38 }
 0x357   : > { %v4539_v48 = vsel %vm1195_vm3, %v4536_v38, %v4538_v25  ;;  %v18267_v14 = vrot.slane %v12957_v51, 2  ;;  %v4542_v36 = vsel %vm1195_vm3, %v4540_v16, %v4541_v56  ;;  %v4162_v57 = vsel %vm1195_vm3, %v4160_v6, %v4161_v11 }
 0x358   : > { %v4544_v58 = vsel %vm1195_vm3, %v4541_v56, %v4543_v23  ;;  %v18268_v1 = vrot.slane %v12798_v8, 2  ;;  %v4167_v19 = vsel %vm1195_vm3, %v4165_v45, %v4166_v20  ;;  %v4195_v38 = vrot.slane %v12949_v27, 2 }
 0x359   : > { %v4199_v50 = vsel %vm1195_vm3, %v4196_v12, %v18267_v14  ;;  %v18269_v54 = vrot.slane %v12882_v29, 2  ;;  %v4172_v14 = vsel %vm1195_vm3, %v4170_v28, %v4171_v30  ;;  %v18270_v16 = vrot.slane %v12894_v53, 2 }
 0x35a   : > { %v4164_v42 = vsel %vm1195_vm3, %v4161_v11, %v18268_v1  ;;  %v4177_v6 = vsel %vm1195_vm3, %v4175_v32, %v4176_v5  ;;  %v18271_v44 = vrot.slane %v12906_v26, 2  ;;  %v4182_v45 = vsel %vm1195_vm3, %v4180_v40, %v4181_v17 }
 0x35b   : > { %v4169_v49 = vsel %vm1195_vm3, %v4166_v20, %v18269_v54  ;;  %v4174_v56 = vsel %vm1195_vm3, %v4171_v30, %v18270_v16  ;;  %v18272_v27 = vrot.slane %v12920_v39, 2  ;;  %v4325_v20 = vadd.f32 %v4199_v50, %v12767_v46 }
 0x35c   : > { %v4179_v11 = vsel %vm1195_vm3, %v4176_v5, %v18271_v44  ;;  %v4187_v28 = vsel %vm1195_vm3, %v4185_v2, %v4186_v18  ;;  %v18273_v54 = vrot.slane %v12933_v62, 2  ;;  %v4192_v32 = vsel %vm1195_vm3, %v4190_v47, %v4191_v52  ;;  %v18278_v2 = vld [vmem:[#allocation18_spill] sm:$0xff] }
 0x35d   : > { %v4184_v1 = vsel %vm1195_vm3, %v4181_v17, %v18272_v27  ;;  %v18274_v16 = vrot.slane %v12945_v24, 2  ;;  %v4197_v40 = vsel %vm1195_vm3, %v4195_v38, %v4196_v12  ;;  %v13094_v5 = vadd.f32 %v12960_v59, %v12558_v55  ;;  %v18276_v17 = vld [vmem:[#allocation131_spill] sm:$0xff]  ;;  %v18286_v38 = vld [vmem:[#allocation105_spill] sm:$0xff] }
 0x35e   : > { %v4189_v30 = vsel %vm1195_vm3, %v4186_v18, %v18273_v54  ;;  %v13098_v46 = vadd.f32 %v12964_v33, %v18276_v17  ;;  %v13102_v50 = vadd.f32 %v12916_v35, %v18278_v2  ;;  %v18280_v18 = vld [vmem:[#allocation132_spill] sm:$0xff]  ;;  %v18282_v27 = vld [vmem:[#allocation91_spill] sm:$0xff]  ;;  %v18284_v55 = vrot.slane %v12786_v15, 2 }
 0x35f   : > { %v4194_v44 = vsel %vm1195_vm3, %v4191_v52, %v18274_v16  ;;  %18275 = vst [vmem:[#allocation102_spill] sm:$0xff] %v13094_v5  ;;  %v13106_v47 = vadd.f32 %v12968_v22, %v18280_v18  ;;  %v13110_v52 = vadd.f32 %v12973_v7, %v18282_v27  ;;  %v13119_v54 = vadd.f32 %v12960_v59, %v18286_v38  ;;  %v18288_v16 = vld [vmem:[#allocation62_spill] sm:$0xff]  ;;  %v18290_v2 = vld [vmem:[#allocation16_spill] sm:$0xff]  ;;  %v18295_v15 = vld [vmem:[#allocation47_spill] sm:$0xff] }
 0x360   : > { %18277 = vst [vmem:[#allocation70_spill] sm:$0xff] %v13098_v46  ;;  %18279 = vst [vmem:[#allocation56_spill] sm:$0xff] %v13102_v50  ;;  %v13115_v12 = vadd.f32 %v18284_v55, %v12579_v31  ;;  %v13123_v17 = vadd.f32 %v12964_v33, %v18288_v16  ;;  %v13127_v22 = vadd.f32 %v12916_v35, %v18290_v2  ;;  %v18292_v18 = vld [vmem:[#allocation82_spill] sm:$0xff]  ;;  %v18299_v59 = vld [vmem:[#allocation44_spill] sm:$0xff]  ;;  %v18300_v38 = vrot.slane %v12810_v13, 2 }
 0x361   : > { %18281 = vst [vmem:[#allocation72_spill] sm:$0xff] %v13106_v47  ;;  %18283 = vst [vmem:[#allocation45_spill] sm:$0xff] %v13110_v52  ;;  %v13130_v7 = vadd.f32 %v4162_v57, %v18292_v18  ;;  %v13132_v27 = vadd.f32 %v4514_v0, %v4325_v20  ;;  %v13135_v31 = vadd.f32 %v4517_v43, %v18295_v15  ;;  %v18297_v55 = vld [vmem:[#allocation38_spill] sm:$0xff]  ;;  %v18302_v16 = vld [vmem:[#allocation48_spill] sm:$0xff]  ;;  %v18307_v0 = vrot.slane %v12822_v61, 2 }
 0x362   : > { %18285 = vst [vmem:[#allocation114_spill] sm:$0xff] %v13115_v12  ;;  %18287 = vst [vmem:[#allocation103_spill] sm:$0xff] %v13119_v54  ;;  %v13138_v12 = vadd.f32 %v4519_v3, %v18297_v55  ;;  %v13143_v33 = vadd.f32 %v18300_v38, %v18299_v59  ;;  %v18304_v35 = vld [vmem:[#allocation138_spill] sm:$0xff]  ;;  %v18306_v57 = vld [vmem:[#allocation39_spill] sm:$0xff] }
 0x363   : > { %18289 = vst [vmem:[#allocation95_spill] sm:$0xff] %v13123_v17  ;;  %18291 = vst [vmem:[#allocation104_spill] sm:$0xff] %v13127_v22  ;;  %v13146_v17 = vadd.f32 %v4522_v41, %v18302_v16  ;;  %v13149_v2 = vadd.f32 %v4524_v37, %v18304_v35  ;;  %v13154_v20 = vadd.f32 %v18307_v0, %v18306_v57  ;;  %v18309_v43 = vld [vmem:[#allocation133_spill] sm:$0xff]  ;;  %v18311_v18 = vld [vmem:[#allocation134_spill] sm:$0xff] }
 0x364   : > { %18293 = vst [vmem:[#allocation100_spill] sm:$0xff] %v13130_v7  ;;  %18294 = vst [vmem:[#allocation128_spill] sm:$0xff] %v13132_v27  ;;  %v13158_v3 = vadd.f32 %v13030_v63, %v18309_v43  ;;  %v13162_v13 = vadd.f32 %v13034_v9, %v18311_v18  ;;  %v18313_v15 = vld [vmem:[#allocation135_spill] sm:$0xff]  ;;  %v18315_v55 = vld [vmem:[#allocation136_spill] sm:$0xff] }
 0x365   : > { %18296 = vst [vmem:[#allocation55_spill] sm:$0xff] %v13135_v31  ;;  %18298 = vst [vmem:[#allocation129_spill] sm:$0xff] %v13138_v12  ;;  %v13166_v41 = vadd.f32 %v13021_v34, %v18313_v15  ;;  %v13170_v37 = vadd.f32 %v13041_v21, %v18315_v55  ;;  %v18317_v59 = vld [vmem:[#allocation113_spill] sm:$0xff]  ;;  %v18321_v35 = vld [vmem:[#allocation34_spill] sm:$0xff] }
 0x366   : > { %18301 = vst [vmem:[#allocation118_spill] sm:$0xff] %v13143_v33  ;;  %18303 = vst [vmem:[#allocation130_spill] sm:$0xff] %v13146_v17  ;;  %v13173_v61 = vadd.f32 %v4534_v10, %v18317_v59  ;;  %v18319_v38 = vld [vmem:[#allocation137_spill] sm:$0xff]  ;;  %v13180_v57 = vadd.f32 %v4537_v4, %v18321_v35  ;;  %v18323_v0 = vld [vmem:[#allocation60_spill] sm:$0xff] }
 0x367   : > { %18305 = vst [vmem:[#allocation107_spill] sm:$0xff] %v13149_v2  ;;  %18308 = vst [vmem:[#allocation131_spill] sm:$0xff] %v13154_v20  ;;  %v13177_v16 = vadd.f32 %v13037_v60, %v18319_v38  ;;  %v13183_v43 = vadd.f32 %v4539_v48, %v18323_v0  ;;  %v18325_v18 = vld [vmem:[#allocation31_spill] sm:$0xff]  ;;  %v18329_v55 = vld [vmem:[#allocation24_spill] sm:$0xff] }
 0x368   : > { %18310 = vst [vmem:[#allocation18_spill] sm:$0xff] %v13158_v3  ;;  %18312 = vst [vmem:[#allocation132_spill] sm:$0xff] %v13162_v13  ;;  %v13186_v15 = vadd.f32 %v4538_v25, %v18325_v18  ;;  %v18327_v27 = vld [vmem:[#allocation11_spill] sm:$0xff]  ;;  %v13192_v22 = vadd.f32 %v4544_v58, %v18329_v55  ;;  %v18331_v59 = vld [vmem:[#allocation92_spill] sm:$0xff] }
 0x369   : > { %18314 = vst [vmem:[#allocation91_spill] sm:$0xff] %v13166_v41  ;;  %18316 = vst [vmem:[#allocation105_spill] sm:$0xff] %v13170_v37  ;;  %v13189_v7 = vadd.f32 %v4542_v36, %v18327_v27  ;;  %v13195_v54 = vadd.f32 %v4543_v23, %v18331_v59  ;;  %v18333_v38 = vld [vmem:[#allocation64_spill] sm:$0xff]  ;;  %v18335_v35 = vld [vmem:[#allocation54_spill] sm:$0xff] }
 0x36a   : > { %18318 = vst [vmem:[#allocation62_spill] sm:$0xff] %v13173_v61  ;;  %18320 = vst [vmem:[#allocation16_spill] sm:$0xff] %v13177_v16  ;;  %v13198_v52 = vadd.f32 %v4537_v4, %v18333_v38  ;;  %v13201_v47 = vadd.f32 %v4539_v48, %v18335_v35  ;;  %v18337_v0 = vld [vmem:[#allocation23_spill] sm:$0xff]  ;;  %v18339_v18 = vld [vmem:[#allocation17_spill] sm:$0xff] }
 0x36b   : > { %18322 = vst [vmem:[#allocation82_spill] sm:$0xff] %v13180_v57  ;;  %18324 = vst [vmem:[#allocation47_spill] sm:$0xff] %v13183_v43  ;;  %v13204_v50 = vadd.f32 %v4538_v25, %v18337_v0  ;;  %v13208_v46 = vadd.f32 %v13041_v21, %v18339_v18  ;;  %v18341_v36 = vld [vmem:[#allocation49_spill] sm:$0xff]  ;;  %v18347_v59 = vld [vmem:[#allocation110_spill] sm:$0xff]  ;;  %v18354_v0 = vrot.slane %v12798_v8, 2 }
 0x36c   : > { %18326 = vst [vmem:[#allocation38_spill] sm:$0xff] %v13186_v15  ;;  %18328 = vst [vmem:[#allocation44_spill] sm:$0xff] %v13189_v7  ;;  %v13211_v27 = vadd.f32 %v4534_v10, %v18341_v36  ;;  %v18343_v58 = vld [vmem:[#allocation121_spill] sm:$0xff]  ;;  %v13222_v48 = vadd.f32 %v13030_v63, %v18347_v59  ;;  %v18349_v25 = vld [vmem:[#allocation68_spill] sm:$0xff] }
 0x36d   : > { %18330 = vst [vmem:[#allocation48_spill] sm:$0xff] %v13192_v22  ;;  %18332 = vst [vmem:[#allocation138_spill] sm:$0xff] %v13195_v54  ;;  %v13215_v23 = vadd.f32 %v13037_v60, %v18343_v58  ;;  %v18345_v55 = vld [vmem:[#allocation69_spill] sm:$0xff]  ;;  %v13226_v38 = vadd.f32 %v13034_v9, %v18349_v25  ;;  %v18351_v21 = vld [vmem:[#allocation12_spill] sm:$0xff] }
 0x36e   : > { %18334 = vst [vmem:[#allocation39_spill] sm:$0xff] %v13198_v52  ;;  %18336 = vst [vmem:[#allocation133_spill] sm:$0xff] %v13201_v47  ;;  %v13218_v4 = vadd.f32 %v4164_v42, %v18345_v55  ;;  %v13230_v35 = vadd.f32 %v13021_v34, %v18351_v21  ;;  %v18353_v10 = vld [vmem:[#allocation41_spill] sm:$0xff]  ;;  %v18356_v18 = vld [vmem:[#allocation116_spill] sm:$0xff]  ;;  %v18361_v55 = vrot.slane %v12882_v29, 2 }
 0x36f   : > { %18338 = vst [vmem:[#allocation134_spill] sm:$0xff] %v13204_v50  ;;  %18340 = vst [vmem:[#allocation135_spill] sm:$0xff] %v13208_v46  ;;  %v13235_v60 = vadd.f32 %v18354_v0, %v18353_v10  ;;  %v13238_v42 = vadd.f32 %v4167_v19, %v18356_v18  ;;  %v18358_v36 = vld [vmem:[#allocation51_spill] sm:$0xff]  ;;  %v18360_v63 = vld [vmem:[#allocation96_spill] sm:$0xff]  ;;  %v18368_v10 = vrot.slane %v12894_v53, 2 }
 0x370   : > { %18342 = vst [vmem:[#allocation136_spill] sm:$0xff] %v13211_v27  ;;  %18344 = vst [vmem:[#allocation113_spill] sm:$0xff] %v13215_v23  ;;  %v13241_v58 = vadd.f32 %v4169_v49, %v18358_v36  ;;  %v13246_v9 = vadd.f32 %v18361_v55, %v18360_v63  ;;  %v18363_v59 = vld [vmem:[#allocation36_spill] sm:$0xff]  ;;  %v18367_v8 = vld [vmem:[#allocation117_spill] sm:$0xff]  ;;  %v18375_v63 = vrot.slane %v12906_v26, 2 }
 0x371   : > { %18346 = vst [vmem:[#allocation137_spill] sm:$0xff] %v13218_v4  ;;  %18348 = vst [vmem:[#allocation34_spill] sm:$0xff] %v13222_v48  ;;  %v13249_v25 = vadd.f32 %v4172_v14, %v18363_v59  ;;  %v18365_v34 = vld [vmem:[#allocation20_spill] sm:$0xff]  ;;  %v13257_v0 = vadd.f32 %v18368_v10, %v18367_v8  ;;  %v18370_v19 = vld [vmem:[#allocation9_spill] sm:$0xff]  ;;  %v18382_v8 = vrot.slane %v12920_v39, 2 }
 0x372   : > { %18350 = vst [vmem:[#allocation60_spill] sm:$0xff] %v13226_v38  ;;  %18352 = vst [vmem:[#allocation31_spill] sm:$0xff] %v13230_v35  ;;  %v13252_v21 = vadd.f32 %v4174_v56, %v18365_v34  ;;  %v13260_v18 = vadd.f32 %v4177_v6, %v18370_v19  ;;  %v18372_v49 = vld [vmem:[#allocation19_spill] sm:$0xff]  ;;  %v18374_v29 = vld [vmem:[#allocation42_spill] sm:$0xff] }
 0x373   : > { %18355 = vst [vmem:[#allocation11_spill] sm:$0xff] %v13235_v60  ;;  %18357 = vst [vmem:[#allocation24_spill] sm:$0xff] %v13238_v42  ;;  %v13263_v36 = vadd.f32 %v4179_v11, %v18372_v49  ;;  %v13268_v55 = vadd.f32 %v18375_v63, %v18374_v29  ;;  %v18377_v14 = vld [vmem:[#allocation83_spill] sm:$0xff]  ;;  %v18381_v53 = vld [vmem:[#allocation10_spill] sm:$0xff]  ;;  %v18389_v29 = vrot.slane %v12933_v62, 2 }
 0x374   : > { %18359 = vst [vmem:[#allocation92_spill] sm:$0xff] %v13241_v58  ;;  %18362 = vst [vmem:[#allocation64_spill] sm:$0xff] %v13246_v9  ;;  %v13271_v59 = vadd.f32 %v4182_v45, %v18377_v14  ;;  %v18379_v56 = vld [vmem:[#allocation63_spill] sm:$0xff]  ;;  %v13279_v10 = vadd.f32 %v18382_v8, %v18381_v53  ;;  %v18384_v6 = vld [vmem:[#allocation84_spill] sm:$0xff]  ;;  %v18396_v53 = vrot.slane %v12945_v24, 2 }
 0x375   : > { %18364 = vst [vmem:[#allocation54_spill] sm:$0xff] %v13249_v25  ;;  %18366 = vst [vmem:[#allocation23_spill] sm:$0xff] %v13252_v21  ;;  %v13274_v34 = vadd.f32 %v4184_v1, %v18379_v56  ;;  %v13282_v19 = vadd.f32 %v4187_v28, %v18384_v6  ;;  %v18386_v11 = vld [vmem:[#allocation22_spill] sm:$0xff]  ;;  %v18391_v45 = vld [vmem:[#allocation25_spill] sm:$0xff] }
 0x376   : > { %18369 = vst [vmem:[#allocation17_spill] sm:$0xff] %v13257_v0  ;;  %18371 = vst [vmem:[#allocation49_spill] sm:$0xff] %v13260_v18  ;;  %v13285_v49 = vadd.f32 %v4189_v30, %v18386_v11  ;;  %v18388_v26 = vld [vmem:[#allocation30_spill] sm:$0xff]  ;;  %v13293_v14 = vadd.f32 %v4192_v32, %v18391_v45  ;;  %v18393_v1 = vld [vmem:[#allocation57_spill] sm:$0xff]  ;;  %v18401_v11 = vrot.slane %v12957_v51, 2 }
 0x377   : > { %18373 = vst [vmem:[#allocation121_spill] sm:$0xff] %v13263_v36  ;;  %18376 = vst [vmem:[#allocation69_spill] sm:$0xff] %v13268_v55  ;;  %v13290_v63 = vadd.f32 %v18389_v29, %v18388_v26  ;;  %v13296_v56 = vadd.f32 %v4194_v44, %v18393_v1  ;;  %v18395_v39 = vld [vmem:[#allocation81_spill] sm:$0xff]  ;;  %v18398_v28 = vld [vmem:[#allocation108_spill] sm:$0xff] }
 0x378   : > { %18378 = vst [vmem:[#allocation110_spill] sm:$0xff] %v13271_v59  ;;  %18380 = vst [vmem:[#allocation68_spill] sm:$0xff] %v13274_v34  ;;  %v13301_v8 = vadd.f32 %v18396_v53, %v18395_v39  ;;  %v13304_v6 = vadd.f32 %v4197_v40, %v18398_v28  ;;  %v18400_v30 = vld [vmem:[#allocation125_spill] sm:$0xff]  ;;  %v18404_v29 = vld [vmem:[#allocation139_spill] sm:$0xff] }
 0x379   : > { %18383 = vst [vmem:[#allocation12_spill] sm:$0xff] %v13279_v10  ;;  %18385 = vst [vmem:[#allocation41_spill] sm:$0xff] %v13282_v19  ;;  %v13309_v62 = vadd.f32 %v18401_v11, %v18400_v30  ;;  %v18403_v26 = vld [vmem:[#allocation21_spill] sm:$0xff]  ;;  %v18405_v45 = vld [vmem:[#allocation27_spill] sm:$0xff] }
 0x37a   : > { %18387 = vst [vmem:[#allocation116_spill] sm:$0xff] %v13285_v49  ;;  %18390 = vst [vmem:[#allocation51_spill] sm:$0xff] %v13290_v63  ;;  %v13313_v32 = vmul.f32 %v18404_v29, %v18403_v26  ;;  %v13317_v44 = vmul.f32 %v18404_v29, %v18405_v45  ;;  %v18406_v1 = vld [vmem:[#allocation76_spill] sm:$0xff]  ;;  %v18408_v53 = vld [vmem:[#allocation93_spill] sm:$0xff] }
 0x37b   : > { %18392 = vst [vmem:[#allocation96_spill] sm:$0xff] %v13293_v14  ;;  %18394 = vst [vmem:[#allocation36_spill] sm:$0xff] %v13296_v56  ;;  %v13321_v24 = vmul.f32 %v18404_v29, %v18406_v1  ;;  %v18407_v39 = vld [vmem:[#allocation40_spill] sm:$0xff]  ;;  %v13329_v51 = vmul.f32 %v18404_v29, %v18408_v53  ;;  %v18409_v28 = vld [vmem:[#allocation97_spill] sm:$0xff] }
 0x37c   : > { %18397 = vst [vmem:[#allocation20_spill] sm:$0xff] %v13301_v8  ;;  %18399 = vst [vmem:[#allocation117_spill] sm:$0xff] %v13304_v6  ;;  %v13325_v40 = vmul.f32 %v18404_v29, %v18407_v39  ;;  %v13333_v30 = vmul.f32 %v18404_v29, %v18409_v28  ;;  %v18411_v11 = vld [vmem:[#allocation119_spill] sm:$0xff]  ;;  %v18412_v26 = vld [vmem:[#allocation66_spill] sm:$0xff]  ;;  %v4460_v37 = vrot.slane %v13313_v32, 2  ;;  %v4461_v41 = vrot.slane %v13317_v44, 2 }
 0x37d   : > { %18402 = vst [vmem:[#allocation9_spill] sm:$0xff] %v13309_v62  ;;  %v13337_v45 = vmul.f32 %v18404_v29, %v18411_v11  ;;  %v13341_v1 = vmul.f32 %v18404_v29, %v18412_v26  ;;  %v18413_v62 = vld [vmem:[#allocation112_spill] sm:$0xff]  ;;  %v18414_v6 = vld [vmem:[#allocation35_spill] sm:$0xff]  ;;  %v18423_v19 = vld [vmem:[#allocation29_spill] sm:$0xff]  ;;  %v4466_v20 = vrot.slane %v13329_v51, 2 }
 0x37e   : > { %18410 = vst [vmem:[#allocation19_spill] sm:$0xff] %v13333_v30  ;;  %v13345_v39 = vmul.f32 %v18404_v29, %v18413_v62  ;;  %v13349_v53 = vmul.f32 %v18404_v29, %v18414_v6  ;;  %v13354_v28 = vld [vmem:[%s15683_s3] sm:$0xff]  ;;  %v18419_v26 = vld [vmem:[#allocation111_spill] sm:$0xff]  ;;  %v18420_v62 = vld [vmem:[#allocation73_spill] sm:$0xff]  ;;  %v13375_v10 = vmul.f32 %v18404_v29, %v18423_v19  ;;  %v4465_v3 = vrot.slane %v13325_v40, 2 }
 0x37f   : > { %18415 = vst [vmem:[#allocation42_spill] sm:$0xff] %v13354_v28  ;;  %v18416_v8 = vld [vmem:[#allocation8_spill] sm:$0xff]  ;;  %v13363_v14 = vmul.f32 %v18404_v29, %v18419_v26  ;;  %v13367_v63 = vmul.f32 %v18404_v29, %v18420_v62  ;;  %v18427_v34 = vld [vmem:[#allocation71_spill] sm:$0xff]  ;;  %v18428_v59 = vld [vmem:[#allocation122_spill] sm:$0xff]  ;;  %v4470_v17 = vrot.slane %v13337_v45, 2  ;;  %v4471_v33 = vrot.slane %v13341_v1, 2 }
 0x380   : > { %v18417_v11 = vsub.s32 2, %v18416_v8  ;;  %v18422_v6 = vld [vmem:[#allocation120_spill] sm:$0xff]  ;;  %v18424_v8 = vld [vmem:[#allocation87_spill] sm:$0xff]  ;;  %v18430_v36 = vld [vmem:[#allocation26_spill] sm:$0xff]  ;;  %v4475_v32 = vrot.slane %v13349_v53, 2  ;;  %v4481_v1 = vrot.slane %v13375_v10, 2  ;;  %v13529_v53 = vsel %vm1195_vm3, %v4460_v37, %v4461_v41 }
 0x381   : > { %18421 = vst [vmem:[#allocation63_spill] sm:$0xff] %v13367_v63  ;;  %v13371_v49 = vmul.f32 %v18404_v29, %v18422_v6  ;;  %v18429_v55 = vld [vmem:[#allocation115_spill] sm:$0xff]  ;;  %v18431_v18 = vld [vmem:[#allocation74_spill] sm:$0xff]  ;;  %v18432_v0 = vld [vmem:[#allocation61_spill] sm:$0xff]  ;;  %v4476_v44 = vrot.slane %v13363_v14, 2  ;;  %v18464_v14 = vrot.slane %v13321_v24, 2  ;;  %v13545_v12 = vsel %vm1195_vm3, %v4470_v17, %v4471_v33 }
 0x382   : > { %v13359_v56 = vrot.slane %v13354_v28, %v18417_v11  ;;  %v13379_v11 = vmul.f32 %v18404_v29, %v18424_v8  ;;  %v18426_v28 = vld [vmem:[#allocation14_spill] sm:$0xff]  ;;  %v18433_v21 = vld [vmem:[#allocation28_spill] sm:$0xff]  ;;  %v18434_v25 = vld [vmem:[#allocation123_spill] sm:$0xff] }
 0x383   : > { %v13383_v26 = vmul.f32 %v18404_v29, %v18426_v28  ;;  %v18435_v9 = vld [vmem:[#allocation32_spill] sm:$0xff]  ;;  %v18436_v58 = vld [vmem:[#allocation50_spill] sm:$0xff]  ;;  %v18437_v42 = vld [vmem:[#allocation101_spill] sm:$0xff]  ;;  %v4480_v45 = vrot.slane %v13371_v49, 2  ;;  %v13534_v40 = vsel %vm1195_vm3, %v4461_v41, %v18464_v14  ;;  %v18465_v49 = vrot.slane %v13333_v30, 2 }
 0x384   : > { %18418 = vst [vmem:[#allocation83_spill] sm:$0xff] %v13359_v56  ;;  %18425 = vst [vmem:[#allocation10_spill] sm:$0xff] %v13379_v11  ;;  %v13387_v62 = vmul.f32 %v13359_v56, %v18427_v34  ;;  %v13391_v6 = vmul.f32 %v13359_v56, %v18428_v59  ;;  %v13395_v19 = vmul.f32 %v13359_v56, %v18429_v55  ;;  %v18438_v60 = vld [vmem:[#allocation15_spill] sm:$0xff]  ;;  %v18439_v4 = vld [vmem:[#allocation58_spill] sm:$0xff] }
 0x385   : > { %v13399_v8 = vmul.f32 %v13359_v56, %v18430_v36  ;;  %v13403_v28 = vmul.f32 %v13359_v56, %v18431_v18  ;;  %v13407_v34 = vmul.f32 %v13359_v56, %v18432_v0  ;;  %v13411_v59 = vmul.f32 %v13359_v56, %v18433_v21  ;;  %v18440_v5 = vld [vmem:[#allocation124_spill] sm:$0xff]  ;;  %v18442_v38 = vld [vmem:[#allocation46_spill] sm:$0xff]  ;;  %v18443_v48 = vld [vmem:[#allocation33_spill] sm:$0xff] }
 0x386   : > { %v13415_v55 = vmul.f32 %v13359_v56, %v18434_v25  ;;  %v13419_v36 = vmul.f32 %v13359_v56, %v18435_v9  ;;  %v13423_v18 = vmul.f32 %v13359_v56, %v18436_v58  ;;  %v13427_v0 = vmul.f32 %v13359_v56, %v18437_v42  ;;  %v18441_v35 = vld [vmem:[#allocation52_spill] sm:$0xff]  ;;  %v18444_v23 = vld [vmem:[#allocation75_spill] sm:$0xff]  ;;  %v18445_v27 = vld [vmem:[#allocation98_spill] sm:$0xff] }
 0x387   : > { %v13431_v21 = vmul.f32 %v13359_v56, %v18438_v60  ;;  %v13435_v25 = vmul.f32 %v13359_v56, %v18439_v4  ;;  %v13439_v9 = vmul.f32 %v13359_v56, %v18440_v5  ;;  %v13443_v58 = vmul.f32 %v18404_v29, %v18441_v35  ;;  %v18446_v46 = vld [vmem:[#allocation127_spill] sm:$0xff]  ;;  %v18448_v47 = vld [vmem:[#allocation37_spill] sm:$0xff]  ;;  %v18450_v52 = vld [vmem:[#allocation88_spill] sm:$0xff] }
 0x388   : > { %v13447_v42 = vmul.f32 %v13359_v56, %v18442_v38  ;;  %v13451_v60 = vmul.f32 %v13359_v56, %v18443_v48  ;;  %v13455_v4 = vmul.f32 %v13359_v56, %v18444_v23  ;;  %v13459_v5 = vmul.f32 %v18404_v29, %v18445_v27  ;;  %v18447_v50 = vld [vmem:[#allocation43_spill] sm:$0xff]  ;;  %v18451_v54 = vld [vmem:[#allocation77_spill] sm:$0xff]  ;;  %v18455_v15 = vld [vmem:[#allocation86_spill] sm:$0xff] }
 0x389   : > { %v13463_v35 = vmul.f32 %v18404_v29, %v18446_v46  ;;  %v13467_v38 = vmul.f32 %v18404_v29, %v18447_v50  ;;  %v13471_v48 = vmul.f32 %v18404_v29, %v18448_v47  ;;  %v13475_v23 = vmul.f32 %v18404_v29, %v18450_v52  ;;  %v18452_v22 = vld [vmem:[#allocation89_spill] sm:$0xff]  ;;  %v18456_v43 = vld [vmem:[#allocation79_spill] sm:$0xff]  ;;  %v18458_v16 = vld [vmem:[#allocation106_spill] sm:$0xff] }
 0x38a   : > { %v13479_v27 = vmul.f32 %v18404_v29, %v18451_v54  ;;  %v13483_v46 = vmul.f32 %v18404_v29, %v18452_v22  ;;  %v18454_v7 = vld [vmem:[#allocation65_spill] sm:$0xff]  ;;  %v13491_v47 = vmul.f32 %v18404_v29, %v18455_v15  ;;  %v13495_v57 = vmul.f32 %v18404_v29, %v18456_v43  ;;  %v18460_v31 = vld [vmem:[#allocation78_spill] sm:$0xff] }
 0x38b   : > { %18449 = vst [vmem:[#allocation84_spill] sm:$0xff] %v13471_v48  ;;  %v13487_v50 = vmul.f32 %v18404_v29, %v18454_v7  ;;  %v13499_v61 = vmul.f32 %v18404_v29, %v18458_v16  ;;  %v18461_v13 = vld [vmem:[#allocation90_spill] sm:$0xff]  ;;  %v13542_v10 = vsel %vm1195_vm3, %v4466_v20, %v18465_v49  ;;  %v13555_v14 = vsel %vm1195_vm3, %v4475_v32, %v4476_v44 }
 0x38c   : > { %18453 = vst [vmem:[#allocation22_spill] sm:$0xff] %v13483_v46  ;;  %18457 = vst [vmem:[#allocation30_spill] sm:$0xff] %v13495_v57  ;;  %v13519_v51 = vmul.f32 %v18404_v29, %v18461_v13  ;;  %v18463_v2 = vld [vmem:[#allocation94_spill] sm:$0xff]  ;;  %v4486_v17 = vrot.slane %v13443_v58, 2  ;;  %v13565_v49 = vsel %vm1195_vm3, %v4480_v45, %v4481_v1  ;;  %v4685_v58 = vmul.f32 %v13359_v56, %v18451_v54 }
 0x38d   : > { %18459 = vst [vmem:[#allocation25_spill] sm:$0xff] %v13499_v61  ;;  %v13512_v61 = vmul.f32 %v18404_v29, %v18460_v31  ;;  %v13526_v57 = vmul.f32 %v18404_v29, %v18463_v2  ;;  %v18466_v29 = vrot.slane %v13345_v39, 2  ;;  %v4693_v41 = vmul.f32 %v13359_v56, %v18463_v2  ;;  %18468 = vst [vmem:[#allocation81_spill] sm:$0xff] %v13565_v49 }
 0x38e   : > { %18462 = vst [vmem:[#allocation57_spill] sm:$0xff] %v13519_v51  ;;  %v13537_v51 = vsel %vm1195_vm3, %v4465_v3, %v4466_v20  ;;  %v18467_v3 = vrot.slane %v13367_v63, 2  ;;  %v4485_v20 = vrot.slane %v13383_v26, 2  ;;  %v4490_v2 = vrot.slane %v13463_v35, 2 }
 0x38f   : > { %v13550_v37 = vsel %vm1195_vm3, %v4471_v33, %v18466_v29  ;;  %v18469_v33 = vrot.slane %v13379_v11, 2  ;;  %v4491_v63 = vrot.slane %v13467_v38, 2  ;;  %v4684_v26 = vmul.f32 %v13359_v56, %v18450_v52 }
 0x390   : > { %v13560_v30 = vsel %vm1195_vm3, %v4476_v44, %v18467_v3  ;;  %v13582_v45 = vmul.f32 %v13359_v56, %v18452_v22  ;;  %v4688_v35 = vmul.f32 %v13359_v56, %v18455_v15  ;;  %v4817_v3 = vrot.slane %v4693_v41, 4 }
 0x391   : > { %v13570_v29 = vsel %vm1195_vm3, %v4481_v1, %v18469_v33  ;;  %v4687_v1 = vmul.f32 %v13359_v56, %v18454_v7  ;;  %v13590_v38 = vmul.f32 %v13359_v56, %v18456_v43  ;;  %v4818_v33 = vrot.slane %v13387_v62, 4 }
 0x392   : > { %18470 = vst [vmem:[#allocation108_spill] sm:$0xff] %v13570_v29  ;;  %v16132_v44 = vrot.slane %v13391_v6, 4  ;;  %v4822_v32 = vrot.slane %v13395_v19, 4  ;;  %v4690_v22 = vmul.f32 %v13359_v56, %v18458_v16  ;;  %v4691_v7 = vmul.f32 %v13359_v56, %v18460_v31 }
 0x393   : > { %v4823_v54 = vrot.slane %v13399_v8, 4  ;;  %v16131_v41 = vrot.slane %v13403_v28, 4  ;;  %v13602_v15 = vsel %vm2014_vm4, %v4817_v3, %v4818_v33  ;;  %v4827_v19 = vrot.slane %v13407_v34, 4 }
 0x394   : > { %v13607_v62 = vsel %vm2014_vm4, %v4818_v33, %v16132_v44  ;;  %v4828_v43 = vrot.slane %v13411_v59, 4  ;;  %v16134_v3 = vrot.slane %v13415_v55, 4  ;;  %v4832_v31 = vrot.slane %v13419_v36, 4 }
 0x395   : > { %v13612_v52 = vsel %vm2014_vm4, %v4822_v32, %v4823_v54  ;;  %v13617_v8 = vsel %vm2014_vm4, %v4823_v54, %v16131_v41  ;;  %v4833_v33 = vrot.slane %v13423_v18, 4  ;;  %v16135_v34 = vrot.slane %v13427_v0, 4 }
 0x396   : > { %v13622_v16 = vsel %vm2014_vm4, %v4827_v19, %v4828_v43  ;;  %v4837_v59 = vrot.slane %v13431_v21, 4  ;;  %v4831_v32 = vsel %vm2014_vm4, %v4828_v43, %v16134_v3  ;;  %v4838_v54 = vrot.slane %v13435_v25, 4 }
 0x397   : > { %v16139_v41 = vrot.slane %v13439_v9, 4  ;;  %v4842_v44 = vrot.slane %v13447_v42, 4  ;;  %v4834_v36 = vsel %vm2014_vm4, %v4832_v31, %v4833_v33  ;;  %v4836_v18 = vsel %vm2014_vm4, %v4833_v33, %v16135_v34 }
 0x398   : > { %v4843_v19 = vrot.slane %v13451_v60, 4  ;;  %v16140_v21 = vrot.slane %v13455_v4, 4  ;;  %v4495_v11 = vrot.slane %v13475_v23, 2  ;;  %v4692_v43 = vmul.f32 %v13359_v56, %v18461_v13 }
 0x399   : > { %v4839_v25 = vsel %vm2014_vm4, %v4837_v59, %v4838_v54  ;;  %v4841_v42 = vsel %vm2014_vm4, %v4838_v54, %v16139_v41  ;;  %v4496_v31 = vrot.slane %v13479_v27, 2  ;;  %v4802_v23 = vrot.slane %v4684_v26, 4 }
 0x39a   : > { %v4844_v33 = vsel %vm2014_vm4, %v4842_v44, %v4843_v19  ;;  %v4846_v60 = vsel %vm2014_vm4, %v4843_v19, %v16140_v21  ;;  %v4803_v34 = vrot.slane %v4685_v58, 4  ;;  %v4805_v13 = vrot.slane %v13582_v45, 4  ;;  %v18478_v21 = vld [vmem:[#allocation55_spill] sm:$0xff] }
 0x39b   : > { %v4807_v56 = vrot.slane %v4687_v1, 4  ;;  %v4808_v59 = vrot.slane %v4688_v35, 4  ;;  %v4810_v29 = vrot.slane %v13590_v38, 4  ;;  %v4812_v49 = vrot.slane %v4690_v22, 4 }
 0x39c   : > { %v4813_v54 = vrot.slane %v4691_v7, 4  ;;  %v13655_v27 = vsel %vm1195_vm3, %v4485_v20, %v4486_v17  ;;  %v4500_v41 = vrot.slane %v13487_v50, 2  ;;  %v4501_v44 = vrot.slane %v13491_v47, 2  ;;  %v18473_v7 = vld [vmem:[#allocation30_spill] sm:$0xff]  ;;  %v18475_v47 = vld [vmem:[#allocation25_spill] sm:$0xff] }
 0x39d   : > { %v4815_v3 = vrot.slane %v4692_v43, 4  ;;  %v18471_v19 = vrot.slane %v13459_v5, 2  ;;  %v13665_v58 = vsel %vm1195_vm3, %v4490_v2, %v4491_v63  ;;  %v18472_v45 = vrot.slane %v13471_v48, 2  ;;  %v18477_v20 = vld [vmem:[#allocation57_spill] sm:$0xff] }
 0x39e   : > { %v13674_v50 = vsel %vm1195_vm3, %v4495_v11, %v4496_v31  ;;  %v4505_v1 = vrot.slane %v18475_v47, 2  ;;  %v4804_v35 = vsel %vm2014_vm4, %v4802_v23, %v4803_v34  ;;  %v18476_v38 = vrot.slane %v13483_v46, 2  ;;  %v18488_v47 = vld [vmem:[#allocation131_spill] sm:$0xff] }
 0x39f   : > { %v13662_v26 = vsel %vm1195_vm3, %v4486_v17, %v18471_v19  ;;  %v13670_v22 = vsel %vm1195_vm3, %v4491_v63, %v18472_v45  ;;  %18474 = vst [vmem:[#allocation125_spill] sm:$0xff] %v13674_v50  ;;  %v4806_v17 = vsel %vm2014_vm4, %v4803_v34, %v4805_v13  ;;  %v4809_v43 = vsel %vm2014_vm4, %v4807_v56, %v4808_v59  ;;  %v18482_v56 = vld [vmem:[#allocation118_spill] sm:$0xff] }
 0x3a0   : > { %v4499_v2 = vsel %vm1195_vm3, %v4496_v31, %v18476_v38  ;;  %v4811_v63 = vsel %vm2014_vm4, %v4808_v59, %v4810_v29  ;;  %v4814_v19 = vsel %vm2014_vm4, %v4812_v49, %v4813_v54  ;;  %v4502_v45 = vsel %vm1195_vm3, %v4500_v41, %v4501_v44  ;;  %v18480_v31 = vld [vmem:[#allocation129_spill] sm:$0xff]  ;;  %v18484_v49 = vld [vmem:[#allocation130_spill] sm:$0xff]  ;;  %v18486_v41 = vld [vmem:[#allocation107_spill] sm:$0xff] }
 0x3a1   : > { %v4506_v11 = vrot.slane %v13512_v61, 2  ;;  %v4816_v23 = vsel %vm2014_vm4, %v4813_v54, %v4815_v3  ;;  %v4510_v34 = vrot.slane %v13526_v57, 2  ;;  %v13691_v46 = vadd.f32 %v4804_v35, %v18478_v21  ;;  %v18490_v54 = vld [vmem:[#allocation18_spill] sm:$0xff]  ;;  %v18492_v21 = vld [vmem:[#allocation132_spill] sm:$0xff] }
 0x3a2   : > { %v13694_v38 = vadd.f32 %v4806_v17, %v18480_v31  ;;  %v13697_v59 = vadd.f32 %v4805_v13, %v18482_v56  ;;  %v13700_v50 = vadd.f32 %v4809_v43, %v18484_v49  ;;  %v13703_v61 = vadd.f32 %v4811_v63, %v18486_v41  ;;  %v18494_v17 = vld [vmem:[#allocation91_spill] sm:$0xff]  ;;  %v18496_v13 = vld [vmem:[#allocation105_spill] sm:$0xff]  ;;  %v18498_v43 = vld [vmem:[#allocation62_spill] sm:$0xff] }
 0x3a3   : > { %18479 = vst [vmem:[#allocation139_spill] sm:$0xff] %v13691_v46  ;;  %v13706_v48 = vadd.f32 %v4810_v29, %v18488_v47  ;;  %v13709_v57 = vadd.f32 %v4814_v19, %v18490_v54  ;;  %v13712_v35 = vadd.f32 %v4816_v23, %v18492_v21  ;;  %v13715_v31 = vadd.f32 %v4815_v3, %v18494_v17  ;;  %v18500_v49 = vld [vmem:[#allocation16_spill] sm:$0xff]  ;;  %v18503_v19 = vld [vmem:[#allocation82_spill] sm:$0xff]  ;;  %v18505_v41 = vld [vmem:[#allocation47_spill] sm:$0xff] }
 0x3a4   : > { %18481 = vst [vmem:[#allocation30_spill] sm:$0xff] %v13694_v38  ;;  %18483 = vst [vmem:[#allocation25_spill] sm:$0xff] %v13697_v59  ;;  %v13719_v56 = vadd.f32 %v13602_v15, %v18496_v13  ;;  %v13723_v63 = vadd.f32 %v13607_v62, %v18498_v43  ;;  %v18501_v29 = vrot.slane %v13391_v6, 4  ;;  %v13732_v23 = vadd.f32 %v13612_v52, %v18503_v19  ;;  %v18507_v54 = vld [vmem:[#allocation38_spill] sm:$0xff]  ;;  %v18510_v62 = vld [vmem:[#allocation44_spill] sm:$0xff] }
 0x3a5   : > { %18485 = vst [vmem:[#allocation57_spill] sm:$0xff] %v13700_v50  ;;  %18487 = vst [vmem:[#allocation55_spill] sm:$0xff] %v13703_v61  ;;  %v13736_v3 = vadd.f32 %v13617_v8, %v18505_v41  ;;  %v18508_v15 = vrot.slane %v13403_v28, 4  ;;  %v13745_v17 = vadd.f32 %v13622_v16, %v18510_v62  ;;  %v18512_v6 = vld [vmem:[#allocation48_spill] sm:$0xff]  ;;  %v18514_v43 = vld [vmem:[#allocation138_spill] sm:$0xff]  ;;  %v18515_v52 = vrot.slane %v13415_v55, 4 }
 0x3a6   : > { %18489 = vst [vmem:[#allocation129_spill] sm:$0xff] %v13706_v48  ;;  %18491 = vst [vmem:[#allocation118_spill] sm:$0xff] %v13709_v57  ;;  %v13728_v47 = vadd.f32 %v18501_v29, %v18500_v49  ;;  %v13748_v13 = vadd.f32 %v4831_v32, %v18512_v6  ;;  %v18517_v29 = vld [vmem:[#allocation39_spill] sm:$0xff]  ;;  %v18519_v19 = vld [vmem:[#allocation133_spill] sm:$0xff] }
 0x3a7   : > { %18493 = vst [vmem:[#allocation130_spill] sm:$0xff] %v13712_v35  ;;  %18495 = vst [vmem:[#allocation107_spill] sm:$0xff] %v13715_v31  ;;  %v13741_v21 = vadd.f32 %v18508_v15, %v18507_v54  ;;  %v13753_v49 = vadd.f32 %v18515_v52, %v18514_v43  ;;  %v13756_v8 = vadd.f32 %v4834_v36, %v18517_v29  ;;  %v18521_v28 = vld [vmem:[#allocation134_spill] sm:$0xff]  ;;  %v18522_v54 = vrot.slane %v13427_v0, 4  ;;  %v18524_v16 = vld [vmem:[#allocation135_spill] sm:$0xff] }
 0x3a8   : > { %18497 = vst [vmem:[#allocation131_spill] sm:$0xff] %v13719_v56  ;;  %18499 = vst [vmem:[#allocation18_spill] sm:$0xff] %v13723_v63  ;;  %v13759_v41 = vadd.f32 %v4836_v18, %v18519_v19  ;;  %v13767_v62 = vadd.f32 %v4839_v25, %v18524_v16  ;;  %v18526_v32 = vld [vmem:[#allocation136_spill] sm:$0xff]  ;;  %v18528_v55 = vld [vmem:[#allocation113_spill] sm:$0xff]  ;;  %v18529_v43 = vrot.slane %v13439_v9, 4  ;;  %v18538_v25 = vrot.slane %v18473_v7, 2 }
 0x3a9   : > { %18502 = vst [vmem:[#allocation132_spill] sm:$0xff] %v13728_v47  ;;  %18504 = vst [vmem:[#allocation91_spill] sm:$0xff] %v13732_v23  ;;  %v13764_v15 = vadd.f32 %v18522_v54, %v18521_v28  ;;  %v13770_v6 = vadd.f32 %v4841_v42, %v18526_v32  ;;  %v18531_v36 = vld [vmem:[#allocation34_spill] sm:$0xff]  ;;  %v18533_v18 = vld [vmem:[#allocation60_spill] sm:$0xff]  ;;  %v18536_v28 = vrot.slane %v13455_v4, 4  ;;  %v4507_v16 = vsel %vm1195_vm3, %v4505_v1, %v4506_v11 }
 0x3aa   : > { %18506 = vst [vmem:[#allocation105_spill] sm:$0xff] %v13736_v3  ;;  %18509 = vst [vmem:[#allocation62_spill] sm:$0xff] %v13741_v21  ;;  %v13775_v52 = vadd.f32 %v18529_v43, %v18528_v55  ;;  %v13778_v29 = vadd.f32 %v4844_v33, %v18531_v36  ;;  %v13781_v19 = vadd.f32 %v4846_v60, %v18533_v18  ;;  %v18535_v0 = vld [vmem:[#allocation31_spill] sm:$0xff]  ;;  %v18539_v9 = vrot.slane %v18477_v20, 2  ;;  %v18540_v33 = vld [vmem:[#allocation80_spill] sm:$0xff] }
 0x3ab   : > { %18511 = vst [vmem:[#allocation16_spill] sm:$0xff] %v13745_v17  ;;  %18513 = vst [vmem:[#allocation82_spill] sm:$0xff] %v13748_v13  ;;  %v13786_v54 = vadd.f32 %v18536_v28, %v18535_v0  ;;  %v4504_v42 = vsel %vm1195_vm3, %v4501_v44, %v18538_v25  ;;  %v18541_v55 = vrot.slane %v18540_v33, 2  ;;  %v18542_v43 = vld [vmem:[#allocation102_spill] sm:$0xff]  ;;  %v18544_v0 = vld [vmem:[#allocation56_spill] sm:$0xff]  ;;  %v18545_v44 = vrot.slane %v13321_v24, 2 }
 0x3ac   : > { %18516 = vst [vmem:[#allocation47_spill] sm:$0xff] %v13753_v49  ;;  %18518 = vst [vmem:[#allocation38_spill] sm:$0xff] %v13756_v8  ;;  %v4509_v32 = vsel %vm1195_vm3, %v4506_v11, %v18539_v9  ;;  %v13800_v36 = vadd.f32 %v13529_v53, %v18542_v43  ;;  %v18543_v4 = vld [vmem:[#allocation70_spill] sm:$0xff]  ;;  %v18546_v28 = vld [vmem:[#allocation72_spill] sm:$0xff] }
 0x3ad   : > { %18520 = vst [vmem:[#allocation44_spill] sm:$0xff] %v13759_v41  ;;  %18523 = vst [vmem:[#allocation48_spill] sm:$0xff] %v13764_v15  ;;  %v4512_v60 = vsel %vm1195_vm3, %v4510_v34, %v18541_v55  ;;  %v13804_v18 = vadd.f32 %v13534_v40, %v18543_v4  ;;  %v13809_v1 = vadd.f32 %v18545_v44, %v18544_v0  ;;  %v18547_v25 = vld [vmem:[#allocation45_spill] sm:$0xff]  ;;  %v18548_v9 = vld [vmem:[#allocation114_spill] sm:$0xff] }
 0x3ae   : > { %18525 = vst [vmem:[#allocation138_spill] sm:$0xff] %v13767_v62  ;;  %18527 = vst [vmem:[#allocation39_spill] sm:$0xff] %v13770_v6  ;;  %v13813_v11 = vadd.f32 %v13537_v51, %v18546_v28  ;;  %v13817_v34 = vadd.f32 %v13542_v10, %v18547_v25  ;;  %v18549_v53 = vld [vmem:[#allocation19_spill] sm:$0xff]  ;;  %v18555_v0 = vld [vmem:[#allocation104_spill] sm:$0xff]  ;;  %v18556_v51 = vrot.slane %v13345_v39, 2 }
 0x3af   : > { %18530 = vst [vmem:[#allocation133_spill] sm:$0xff] %v13775_v52  ;;  %18532 = vst [vmem:[#allocation134_spill] sm:$0xff] %v13778_v29  ;;  %v18550_v33 = vrot.slane %v18549_v53, 2  ;;  %v18551_v40 = vld [vmem:[#allocation103_spill] sm:$0xff]  ;;  %v18558_v10 = vld [vmem:[#allocation100_spill] sm:$0xff] }
 0x3b0   : > { %18534 = vst [vmem:[#allocation135_spill] sm:$0xff] %v13781_v19  ;;  %18537 = vst [vmem:[#allocation136_spill] sm:$0xff] %v13786_v54  ;;  %v13826_v43 = vadd.f32 %v13545_v12, %v18551_v40  ;;  %v18553_v24 = vld [vmem:[#allocation95_spill] sm:$0xff]  ;;  %v13835_v44 = vadd.f32 %v18556_v51, %v18555_v0  ;;  %v13839_v28 = vadd.f32 %v13555_v14, %v18558_v10  ;;  %v18560_v25 = vld [vmem:[#allocation137_spill] sm:$0xff] }
 0x3b1   : > { %v13822_v55 = vadd.f32 %v18550_v33, %v18548_v9  ;;  %v13830_v4 = vadd.f32 %v13550_v37, %v18553_v24  ;;  %v13843_v9 = vadd.f32 %v13560_v30, %v18560_v25  ;;  %v18562_v53 = vld [vmem:[#allocation11_spill] sm:$0xff]  ;;  %v18566_v37 = vld [vmem:[#allocation24_spill] sm:$0xff]  ;;  %v18567_v24 = vld [vmem:[#allocation81_spill] sm:$0xff] }
 0x3b2   : > { %18552 = vst [vmem:[#allocation113_spill] sm:$0xff] %v13826_v43  ;;  %18557 = vst [vmem:[#allocation60_spill] sm:$0xff] %v13835_v44  ;;  %v18563_v12 = vld [vmem:[#allocation63_spill] sm:$0xff]  ;;  %v13852_v54 = vadd.f32 %v18567_v24, %v18566_v37  ;;  %v18569_v39 = vld [vmem:[#allocation92_spill] sm:$0xff]  ;;  %v18581_v37 = vrot.slane %v13459_v5, 2 }
 0x3b3   : > { %18554 = vst [vmem:[#allocation34_spill] sm:$0xff] %v13830_v4  ;;  %18559 = vst [vmem:[#allocation31_spill] sm:$0xff] %v13839_v28  ;;  %v18564_v33 = vrot.slane %v18563_v12, 2  ;;  %v18570_v0 = vld [vmem:[#allocation108_spill] sm:$0xff]  ;;  %v18573_v14 = vld [vmem:[#allocation10_spill] sm:$0xff] }
 0x3b4   : > { %18561 = vst [vmem:[#allocation80_spill] sm:$0xff] %v13843_v9  ;;  %18568 = vst [vmem:[#allocation70_spill] sm:$0xff] %v13852_v54  ;;  %v13856_v51 = vadd.f32 %v18570_v0, %v18569_v39  ;;  %v18572_v19 = vld [vmem:[#allocation64_spill] sm:$0xff]  ;;  %v18574_v10 = vrot.slane %v18573_v14, 2  ;;  %v18576_v30 = vld [vmem:[#allocation54_spill] sm:$0xff] }
 0x3b5   : > { %v13848_v40 = vadd.f32 %v18564_v33, %v18562_v53  ;;  %v13865_v25 = vadd.f32 %v13655_v27, %v18576_v30  ;;  %v18578_v12 = vld [vmem:[#allocation23_spill] sm:$0xff]  ;;  %v18580_v33 = vld [vmem:[#allocation17_spill] sm:$0xff]  ;;  %v18588_v27 = vld [vmem:[#allocation84_spill] sm:$0xff] }
 0x3b6   : > { %18571 = vst [vmem:[#allocation56_spill] sm:$0xff] %v13856_v51  ;;  %v13861_v28 = vadd.f32 %v18574_v10, %v18572_v19  ;;  %v13869_v53 = vadd.f32 %v13662_v26, %v18578_v12  ;;  %v13874_v24 = vadd.f32 %v18581_v37, %v18580_v33  ;;  %v18583_v39 = vld [vmem:[#allocation49_spill] sm:$0xff]  ;;  %v18589_v30 = vrot.slane %v18588_v27, 2  ;;  %v18591_v26 = vld [vmem:[#allocation110_spill] sm:$0xff]  ;;  %v18594_v5 = vld [vmem:[#allocation68_spill] sm:$0xff] }
 0x3b7   : > { %18565 = vst [vmem:[#allocation102_spill] sm:$0xff] %v13848_v40  ;;  %18577 = vst [vmem:[#allocation45_spill] sm:$0xff] %v13865_v25  ;;  %v13878_v0 = vadd.f32 %v13665_v58, %v18583_v39  ;;  %v18585_v14 = vld [vmem:[#allocation121_spill] sm:$0xff]  ;;  %v13894_v33 = vadd.f32 %v4499_v2, %v18594_v5  ;;  %v18596_v37 = vld [vmem:[#allocation8_spill] sm:$0xff]  ;;  %v18609_v2 = vrot.slane %v18473_v7, 2 }
 0x3b8   : > { %18575 = vst [vmem:[#allocation72_spill] sm:$0xff] %v13861_v28  ;;  %18579 = vst [vmem:[#allocation114_spill] sm:$0xff] %v13869_v53  ;;  %v13882_v19 = vadd.f32 %v13670_v22, %v18585_v14  ;;  %v18587_v10 = vld [vmem:[#allocation69_spill] sm:$0xff]  ;;  %v18598_v58 = vld [vmem:[#allocation42_spill] sm:$0xff] }
 0x3b9   : > { %18582 = vst [vmem:[#allocation19_spill] sm:$0xff] %v13874_v24  ;;  %18584 = vst [vmem:[#allocation103_spill] sm:$0xff] %v13878_v0  ;;  %v13887_v25 = vadd.f32 %v18589_v30, %v18587_v10  ;;  %v18592_v12 = vld [vmem:[#allocation125_spill] sm:$0xff]  ;;  %v18597_v24 = vsub.s32 5, %v18596_v37  ;;  %v18600_v0 = vld [vmem:[#allocation12_spill] sm:$0xff] }
 0x3ba   : > { %18586 = vst [vmem:[#allocation95_spill] sm:$0xff] %v13882_v19  ;;  %v13891_v53 = vadd.f32 %v18592_v12, %v18591_v26  ;;  %18595 = vst [vmem:[#allocation137_spill] sm:$0xff] %v13894_v33  ;;  %v18601_v22 = vld [vmem:[#allocation22_spill] sm:$0xff]  ;;  %v18604_v27 = vld [vmem:[#allocation41_spill] sm:$0xff] }
 0x3bb   : > { %18590 = vst [vmem:[#allocation104_spill] sm:$0xff] %v13887_v25  ;;  %v13899_v39 = vrot.slane %v18598_v58, %v18597_v24  ;;  %v18602_v14 = vrot.slane %v18601_v22, 2  ;;  %v13907_v10 = vadd.f32 %v4502_v45, %v18604_v27  ;;  %v18606_v30 = vld [vmem:[#allocation116_spill] sm:$0xff]  ;;  %v18608_v26 = vld [vmem:[#allocation51_spill] sm:$0xff]  ;;  %v18616_v45 = vld [vmem:[#allocation122_spill] sm:$0xff] }
 0x3bc   : > { %18593 = vst [vmem:[#allocation100_spill] sm:$0xff] %v13891_v53  ;;  %v13910_v25 = vadd.f32 %v4504_v42, %v18606_v30  ;;  %v13915_v12 = vadd.f32 %v18609_v2, %v18608_v26  ;;  %v18611_v5 = vld [vmem:[#allocation96_spill] sm:$0xff]  ;;  %v18615_v22 = vld [vmem:[#allocation71_spill] sm:$0xff]  ;;  %v18618_v7 = vld [vmem:[#allocation26_spill] sm:$0xff] }
 0x3bd   : > { %18599 = vst [vmem:[#allocation11_spill] sm:$0xff] %v13899_v39  ;;  %v13904_v19 = vadd.f32 %v18602_v14, %v18600_v0  ;;  %18605 = vst [vmem:[#allocation24_spill] sm:$0xff] %v13907_v10  ;;  %v13918_v37 = vadd.f32 %v4507_v16, %v18611_v5  ;;  %v18613_v24 = vld [vmem:[#allocation36_spill] sm:$0xff]  ;;  %v13925_v0 = vmul.f32 %v13899_v39, %v18615_v22  ;;  %v18617_v42 = vld [vmem:[#allocation115_spill] sm:$0xff] }
 0x3be   : > { %18607 = vst [vmem:[#allocation81_spill] sm:$0xff] %v13910_v25  ;;  %18610 = vst [vmem:[#allocation92_spill] sm:$0xff] %v13915_v12  ;;  %v13921_v58 = vadd.f32 %v4509_v32, %v18613_v24  ;;  %v13929_v14 = vmul.f32 %v13899_v39, %v18616_v45  ;;  %v13933_v27 = vmul.f32 %v13899_v39, %v18617_v42  ;;  %v18619_v16 = vld [vmem:[#allocation74_spill] sm:$0xff]  ;;  %v18621_v26 = vld [vmem:[#allocation61_spill] sm:$0xff] }
 0x3bf   : > { %18603 = vst [vmem:[#allocation63_spill] sm:$0xff] %v13904_v19  ;;  %18612 = vst [vmem:[#allocation108_spill] sm:$0xff] %v13918_v37  ;;  %v13937_v30 = vmul.f32 %v13899_v39, %v18618_v7  ;;  %v13941_v32 = vmul.f32 %v13899_v39, %v18619_v16  ;;  %v13945_v2 = vmul.f32 %v13899_v39, %v18621_v26  ;;  %v18622_v5 = vld [vmem:[#allocation28_spill] sm:$0xff]  ;;  %v18623_v45 = vld [vmem:[#allocation123_spill] sm:$0xff] }
 0x3c0   : > { %18614 = vst [vmem:[#allocation64_spill] sm:$0xff] %v13921_v58  ;;  %v13949_v24 = vmul.f32 %v13899_v39, %v18622_v5  ;;  %v13953_v42 = vmul.f32 %v13899_v39, %v18623_v45  ;;  %v18624_v22 = vld [vmem:[#allocation32_spill] sm:$0xff]  ;;  %v18625_v58 = vld [vmem:[#allocation50_spill] sm:$0xff]  ;;  %v13966_v26 = vld [vmem:[%s15683_s3 + $0x8] ss:$0 sm:$0xff] }
 0x3c1   : > { %18620 = vst [vmem:[#allocation10_spill] sm:$0xff] %v13941_v32  ;;  %v13957_v7 = vmul.f32 %v13899_v39, %v18624_v22  ;;  %v13961_v16 = vmul.f32 %v13899_v39, %v18625_v58  ;;  %18626 = vst [vmem:[#allocation54_spill] sm:$0xff] %v13966_v26  ;;  %v18627_v37 = vld [vmem:[#allocation101_spill] sm:$0xff]  ;;  %v18628_v12 = vld [vmem:[#allocation15_spill] sm:$0xff] }
 0x3c2   : > { %v13970_v5 = vmul.f32 %v13899_v39, %v18627_v37  ;;  %v13974_v45 = vmul.f32 %v13899_v39, %v18628_v12  ;;  %v18629_v25 = vld [vmem:[#allocation58_spill] sm:$0xff]  ;;  %v18630_v10 = vld [vmem:[#allocation124_spill] sm:$0xff]  ;;  %v18632_v53 = vld [vmem:[#allocation33_spill] sm:$0xff] }
 0x3c3   : > { %v13978_v22 = vmul.f32 %v13899_v39, %v18629_v25  ;;  %v13982_v58 = vmul.f32 %v13899_v39, %v18630_v10  ;;  %v18631_v19 = vld [vmem:[#allocation46_spill] sm:$0xff]  ;;  %v13990_v37 = vmul.f32 %v13899_v39, %v18632_v53  ;;  %v18633_v28 = vld [vmem:[#allocation75_spill] sm:$0xff]  ;;  %v18634_v51 = vld [vmem:[#allocation85_spill] sm:$0xff]  ;;  %v18636_v10 = vrot.slane %v18477_v20, 2 }
 0x3c4   : > { %v13986_v33 = vmul.f32 %v13899_v39, %v18631_v19  ;;  %v13994_v12 = vmul.f32 %v13899_v39, %v18633_v28  ;;  %v13998_v25 = vmul.f32 %v13899_v39, %v18634_v51  ;;  %v18635_v54 = vld [vmem:[#allocation20_spill] sm:$0xff]  ;;  %v18638_v9 = vld [vmem:[#allocation117_spill] sm:$0xff]  ;;  %v18640_v29 = vld [vmem:[#allocation59_spill] sm:$0xff] }
 0x3c5   : > { %v14003_v40 = vadd.f32 %v18636_v10, %v18635_v54  ;;  %v14006_v19 = vadd.f32 %v4512_v60, %v18638_v9  ;;  %v14010_v53 = vmul.f32 %v13899_v39, %v18640_v29  ;;  %v18641_v52 = vld [vmem:[#allocation109_spill] sm:$0xff]  ;;  %v18643_v62 = vld [vmem:[#allocation126_spill] sm:$0xff]  ;;  %v18648_v54 = vld [vmem:[#allocation27_spill] sm:$0xff] }
 0x3c6   : > { %v14014_v28 = vmul.f32 %v13899_v39, %v18641_v52  ;;  %v18642_v6 = vld [vmem:[#allocation9_spill] sm:$0xff]  ;;  %v18644_v51 = vrot.slane %v18643_v62, 2  ;;  %v14027_v60 = vmul.f32 %v13966_v26, %v18648_v54  ;;  %v18650_v9 = vld [vmem:[#allocation76_spill] sm:$0xff]  ;;  %v18652_v29 = vld [vmem:[#allocation119_spill] sm:$0xff] }
 0x3c7   : > { %18637 = vst [vmem:[#allocation23_spill] sm:$0xff] %v14003_v40  ;;  %18639 = vst [vmem:[#allocation17_spill] sm:$0xff] %v14006_v19  ;;  %v18646_v41 = vld [vmem:[#allocation21_spill] sm:$0xff]  ;;  %v14031_v10 = vmul.f32 %v13966_v26, %v18650_v9  ;;  %v18653_v52 = vld [vmem:[#allocation83_spill] sm:$0xff] }
 0x3c8   : > { %v14019_v15 = vadd.f32 %v18644_v51, %v18642_v6  ;;  %v14023_v20 = vmul.f32 %v13966_v26, %v18646_v41  ;;  %18649 = vst [vmem:[#allocation69_spill] sm:$0xff] %v14027_v60  ;;  %v4660_v19 = vmul.f32 %v18653_v52, %v18652_v29  ;;  %v18654_v40 = vld [vmem:[#allocation66_spill] sm:$0xff]  ;;  %v18655_v6 = vld [vmem:[#allocation112_spill] sm:$0xff]  ;;  %v18657_v8 = vld [vmem:[#allocation93_spill] sm:$0xff]  ;;  %v14051_v26 = vmul.f32 %v18653_v52, %v18646_v41 }
 0x3c9   : > { %18651 = vst [vmem:[#allocation84_spill] sm:$0xff] %v14031_v10  ;;  %v4661_v62 = vmul.f32 %v18653_v52, %v18654_v40  ;;  %v4662_v51 = vmul.f32 %v18653_v52, %v18655_v6  ;;  %v14045_v60 = vmul.f32 %v18653_v52, %v18657_v8  ;;  %v18658_v49 = vld [vmem:[#allocation97_spill] sm:$0xff]  ;;  %v14055_v40 = vmul.f32 %v18653_v52, %v18648_v54  ;;  %v18660_v8 = vld [vmem:[#allocation67_spill] sm:$0xff]  ;;  %v18665_v23 = vld [vmem:[#allocation120_spill] sm:$0xff] }
 0x3ca   : > { %18645 = vst [vmem:[#allocation49_spill] sm:$0xff] %v14019_v15  ;;  %18647 = vst [vmem:[#allocation121_spill] sm:$0xff] %v14023_v20  ;;  %v18656_v15 = vld [vmem:[#allocation40_spill] sm:$0xff]  ;;  %v4665_v10 = vmul.f32 %v18653_v52, %v18658_v49  ;;  %v4668_v6 = vmul.f32 %v18653_v52, %v18650_v9  ;;  %v18659_v29 = vld [vmem:[#allocation53_spill] sm:$0xff]  ;;  %v14065_v13 = vmul.f32 %v18653_v52, %v18660_v8  ;;  %v4762_v63 = vrot.slane %v4660_v19, 4 }
 0x3cb   : > { %v14041_v20 = vmul.f32 %v18653_v52, %v18656_v15  ;;  %v14061_v15 = vmul.f32 %v18653_v52, %v18659_v29  ;;  %v18661_v49 = vld [vmem:[#allocation99_spill] sm:$0xff]  ;;  %v18664_v9 = vld [vmem:[#allocation73_spill] sm:$0xff]  ;;  %v14085_v8 = vmul.f32 %v18653_v52, %v18665_v23  ;;  %v4763_v56 = vrot.slane %v4661_v62, 4  ;;  %v18668_v35 = vld [vmem:[#allocation14_spill] sm:$0xff] }
 0x3cc   : > { %v14069_v17 = vmul.f32 %v18653_v52, %v18661_v49  ;;  %v18662_v41 = vld [vmem:[#allocation35_spill] sm:$0xff]  ;;  %v14081_v29 = vmul.f32 %v18653_v52, %v18664_v9  ;;  %v18666_v47 = vld [vmem:[#allocation29_spill] sm:$0xff]  ;;  %v14099_v9 = vmul.f32 %v18653_v52, %v18668_v35  ;;  %v18669_v57 = vld [vmem:[#allocation52_spill] sm:$0xff]  ;;  %v14123_v59 = vrot.slane %v4665_v10, 4 }
 0x3cd   : > { %v14073_v21 = vmul.f32 %v18653_v52, %v18662_v41  ;;  %v18663_v54 = vld [vmem:[#allocation111_spill] sm:$0xff]  ;;  %v14089_v49 = vmul.f32 %v18653_v52, %v18666_v47  ;;  %v14091_v41 = vrot.slane %v4662_v51, 4  ;;  %v14103_v23 = vmul.f32 %v18653_v52, %v18669_v57  ;;  %v18670_v48 = vld [vmem:[#allocation98_spill] sm:$0xff]  ;;  %v18673_v61 = vld [vmem:[#allocation37_spill] sm:$0xff] }
 0x3ce   : > { %v14077_v3 = vmul.f32 %v18653_v52, %v18663_v54  ;;  %v18667_v31 = vld [vmem:[#allocation87_spill] sm:$0xff]  ;;  %v14107_v47 = vmul.f32 %v18653_v52, %v18670_v48  ;;  %v14119_v35 = vmul.f32 %v18653_v52, %v18673_v61  ;;  %v18675_v38 = vld [vmem:[#allocation94_spill] sm:$0xff]  ;;  %v14129_v46 = vsel %vm2014_vm4, %v4762_v63, %v4763_v56 }
 0x3cf   : > { %v14095_v54 = vmul.f32 %v18653_v52, %v18667_v31  ;;  %v18671_v19 = vld [vmem:[#allocation127_spill] sm:$0xff]  ;;  %v14136_v61 = vrot.slane %v4668_v6, 4  ;;  %v4777_v50 = vrot.slane %v14061_v15, 4  ;;  %v4778_v10 = vrot.slane %v14065_v13, 4  ;;  %v18676_v4 = vld [vmem:[#allocation106_spill] sm:$0xff] }
 0x3d0   : > { %v14111_v62 = vmul.f32 %v18653_v52, %v18671_v19  ;;  %v18672_v51 = vld [vmem:[#allocation43_spill] sm:$0xff]  ;;  %18674 = vst [vmem:[#allocation110_spill] sm:$0xff] %v14119_v35  ;;  %v4995_v19 = vmul.f32 %v13899_v39, %v18675_v38  ;;  %v4782_v57 = vrot.slane %v14073_v21, 4  ;;  %v4783_v38 = vrot.slane %v14077_v3, 4  ;;  %v18677_v43 = vld [vmem:[#allocation78_spill] sm:$0xff] }
 0x3d1   : > { %v14115_v31 = vmul.f32 %v18653_v52, %v18672_v51  ;;  %v14133_v51 = vsel %vm2014_vm4, %v4763_v56, %v14091_v41  ;;  %v4773_v52 = vrot.slane %v14055_v40, 4  ;;  %v4787_v44 = vrot.slane %v14085_v8, 4  ;;  %v18678_v8 = vld [vmem:[#allocation90_spill] sm:$0xff] }
 0x3d2   : > { %v4788_v56 = vrot.slane %v14089_v49, 4  ;;  %v4792_v6 = vrot.slane %v14099_v9, 4  ;;  %v4992_v15 = vmul.f32 %v13899_v39, %v18676_v4  ;;  %v5125_v13 = vrot.slane %v4995_v19, 4 }
 0x3d3   : > { %v4993_v48 = vmul.f32 %v13899_v39, %v18677_v43  ;;  %v5126_v21 = vrot.slane %v13925_v0, 4  ;;  %v16150_v3 = vrot.slane %v13929_v14, 4  ;;  %v5130_v63 = vrot.slane %v13933_v27, 4 }
 0x3d4   : > { %v14157_v49 = vmul.f32 %v13899_v39, %v18678_v8  ;;  %v5131_v40 = vrot.slane %v13937_v30, 4  ;;  %v16153_v9 = vrot.slane %v13941_v32, 4  ;;  %v5135_v4 = vrot.slane %v13945_v2, 4 }
 0x3d5   : > { %v14163_v19 = vsel %vm2014_vm4, %v5125_v13, %v5126_v21  ;;  %v14168_v0 = vsel %vm2014_vm4, %v5126_v21, %v16150_v3  ;;  %v5136_v27 = vrot.slane %v13949_v24, 4  ;;  %v16152_v43 = vrot.slane %v13953_v42, 4 }
 0x3d6   : > { %v14173_v8 = vsel %vm2014_vm4, %v5130_v63, %v5131_v40  ;;  %v14178_v30 = vsel %vm2014_vm4, %v5131_v40, %v16153_v9  ;;  %v5140_v2 = vrot.slane %v13957_v7, 4  ;;  %v5141_v13 = vrot.slane %v13961_v16, 4 }
 0x3d7   : > { %v5137_v39 = vsel %vm2014_vm4, %v5135_v4, %v5136_v27  ;;  %v5139_v24 = vsel %vm2014_vm4, %v5136_v27, %v16152_v43  ;;  %v16154_v21 = vrot.slane %v13970_v5, 4  ;;  %v5145_v63 = vrot.slane %v13974_v45, 4 }
 0x3d8   : > { %v5142_v3 = vsel %vm2014_vm4, %v5140_v2, %v5141_v13  ;;  %v5146_v32 = vrot.slane %v13978_v22, 4  ;;  %v16155_v40 = vrot.slane %v13982_v58, 4  ;;  %v5150_v7 = vrot.slane %v13986_v33, 4 }
 0x3d9   : > { %v5144_v4 = vsel %vm2014_vm4, %v5141_v13, %v16154_v21  ;;  %v5151_v16 = vrot.slane %v13990_v37, 4  ;;  %v14197_v27 = vrot.slane %v13994_v12, 4  ;;  %v5155_v43 = vrot.slane %v13998_v25, 4 }
 0x3da   : > { %v5147_v45 = vsel %vm2014_vm4, %v5145_v63, %v5146_v32  ;;  %v5149_v22 = vsel %vm2014_vm4, %v5146_v32, %v16155_v40  ;;  %v5156_v2 = vrot.slane %v14010_v53, 4  ;;  %v5158_v33 = vrot.slane %v14014_v28, 4 }
 0x3db   : > { %v4793_v9 = vrot.slane %v14103_v23, 4  ;;  %v5152_v37 = vsel %vm2014_vm4, %v5150_v7, %v5151_v16  ;;  %v5154_v12 = vsel %vm2014_vm4, %v5151_v16, %v14197_v27  ;;  %v4797_v25 = vrot.slane %v14111_v62, 4 }
 0x3dc   : > { %v4798_v63 = vrot.slane %v14115_v31, 4  ;;  %v5157_v21 = vsel %vm2014_vm4, %v5155_v43, %v5156_v2  ;;  %v5159_v32 = vsel %vm2014_vm4, %v5156_v2, %v5158_v33  ;;  %v5120_v28 = vrot.slane %v4992_v15, 4 }
 0x3dd   : > { %v5121_v40 = vrot.slane %v4993_v48, 4  ;;  %v5123_v23 = vrot.slane %v14157_v49, 4  ;;  %v18679_v13 = vrot.slane %v14045_v60, 4  ;;  %v18680_v7 = vrot.slane %v14041_v20, 4 }
 0x3de   : > { %v18682_v43 = vrot.slane %v14051_v26, 4  ;;  %v4776_v48 = vsel %vm2014_vm4, %v4773_v52, %v14136_v61  ;;  %v4779_v15 = vsel %vm2014_vm4, %v4777_v50, %v4778_v10  ;;  %v18683_v49 = vrot.slane %v14069_v17, 4 }
 0x3df   : > { %v4769_v16 = vsel %vm2014_vm4, %v18680_v7, %v18679_v13  ;;  %v18681_v62 = vmov %v18679_v13  ;;  %v4784_v13 = vsel %vm2014_vm4, %v4782_v57, %v4783_v38  ;;  %v18684_v7 = vrot.slane %v14081_v29, 4 }
 0x3e0   : > { %v4771_v31 = vsel %vm2014_vm4, %v18681_v62, %v14123_v59  ;;  %v4774_v2 = vsel %vm2014_vm4, %v18682_v43, %v4773_v52  ;;  %v4781_v20 = vsel %vm2014_vm4, %v4778_v10, %v18683_v49  ;;  %v4789_v62 = vsel %vm2014_vm4, %v4787_v44, %v4788_v56 }
 0x3e1   : > { %v4786_v60 = vsel %vm2014_vm4, %v4783_v38, %v18684_v7  ;;  %v18685_v26 = vrot.slane %v14095_v54, 4  ;;  %v4794_v52 = vsel %vm2014_vm4, %v4792_v6, %v4793_v9  ;;  %v18686_v50 = vrot.slane %v14107_v47, 4 }
 0x3e2   : > { %v4799_v10 = vsel %vm2014_vm4, %v4797_v25, %v4798_v63  ;;  %v18687_v57 = vrot.slane %v14119_v35, 4  ;;  %v5122_v38 = vsel %vm2014_vm4, %v5120_v28, %v5121_v40  ;;  %v5124_v44 = vsel %vm2014_vm4, %v5121_v40, %v5123_v23  ;;  %v18693_v28 = vld [vmem:[#allocation34_spill] sm:$0xff]  ;;  %v18701_v35 = vld [vmem:[#allocation25_spill] sm:$0xff] }
 0x3e3   : > { %v4791_v43 = vsel %vm2014_vm4, %v4788_v56, %v18685_v26  ;;  %v4796_v53 = vsel %vm2014_vm4, %v4793_v9, %v18686_v50  ;;  %v14255_v7 = vadd.f32 %v14129_v46, %v13800_v36  ;;  %v14259_v56 = vadd.f32 %v14133_v51, %v13804_v18  ;;  %v18691_v36 = vld [vmem:[#allocation113_spill] sm:$0xff]  ;;  %v18695_v26 = vld [vmem:[#allocation60_spill] sm:$0xff]  ;;  %v18697_v50 = vld [vmem:[#allocation139_spill] sm:$0xff] }
 0x3e4   : > { %v4801_v49 = vsel %vm2014_vm4, %v4798_v63, %v18687_v57  ;;  %v14263_v6 = vadd.f32 %v14091_v41, %v13809_v1  ;;  %v14266_v9 = vadd.f32 %v4769_v16, %v13813_v11  ;;  %v14269_v25 = vadd.f32 %v4771_v31, %v13817_v34  ;;  %v18699_v57 = vld [vmem:[#allocation30_spill] sm:$0xff] }
 0x3e5   : > { %v14273_v40 = vadd.f32 %v14123_v59, %v13822_v55  ;;  %v14276_v63 = vadd.f32 %v4774_v2, %v18691_v36  ;;  %v14279_v18 = vadd.f32 %v4776_v48, %v18693_v28  ;;  %v14283_v1 = vadd.f32 %v14136_v61, %v18695_v26  ;;  %v18703_v55 = vld [vmem:[#allocation57_spill] sm:$0xff] }
 0x3e6   : > { %18688 = vst [vmem:[#allocation125_spill] sm:$0xff] %v14266_v9  ;;  %18689 = vst [vmem:[#allocation68_spill] sm:$0xff] %v14269_v25  ;;  %v14286_v11 = vadd.f32 %v5122_v38, %v18697_v50  ;;  %v14289_v34 = vadd.f32 %v5124_v44, %v18699_v57  ;;  %v14292_v25 = vadd.f32 %v5123_v23, %v18701_v35  ;;  %v18708_v26 = vrot.slane %v13929_v14, 4  ;;  %v18710_v38 = vld [vmem:[#allocation118_spill] sm:$0xff]  ;;  %v18714_v23 = vld [vmem:[#allocation107_spill] sm:$0xff] }
 0x3e7   : > { %18690 = vst [vmem:[#allocation8_spill] sm:$0xff] %v14273_v40  ;;  %18692 = vst [vmem:[#allocation42_spill] sm:$0xff] %v14276_v63  ;;  %v14296_v36 = vadd.f32 %v14163_v19, %v18703_v55  ;;  %v18705_v63 = vld [vmem:[#allocation55_spill] sm:$0xff]  ;;  %v14309_v44 = vadd.f32 %v14173_v8, %v18710_v38  ;;  %v18712_v50 = vld [vmem:[#allocation130_spill] sm:$0xff] }
 0x3e8   : > { %18694 = vst [vmem:[#allocation12_spill] sm:$0xff] %v14279_v18  ;;  %18696 = vst [vmem:[#allocation22_spill] sm:$0xff] %v14283_v1  ;;  %v14300_v28 = vadd.f32 %v14168_v0, %v18705_v63  ;;  %v18707_v18 = vld [vmem:[#allocation129_spill] sm:$0xff]  ;;  %v14313_v35 = vadd.f32 %v14178_v30, %v18712_v50  ;;  %v18715_v19 = vld [vmem:[#allocation10_spill] sm:$0xff] }
 0x3e9   : > { %18698 = vst [vmem:[#allocation41_spill] sm:$0xff] %v14286_v11  ;;  %18700 = vst [vmem:[#allocation116_spill] sm:$0xff] %v14289_v34  ;;  %v14305_v1 = vadd.f32 %v18708_v26, %v18707_v18  ;;  %v18716_v57 = vrot.slane %v18715_v19, 4  ;;  %v18718_v0 = vld [vmem:[#allocation131_spill] sm:$0xff]  ;;  %v18722_v18 = vld [vmem:[#allocation132_spill] sm:$0xff]  ;;  %v18723_v26 = vrot.slane %v13953_v42, 4 }
 0x3ea   : > { %18702 = vst [vmem:[#allocation51_spill] sm:$0xff] %v14292_v25  ;;  %18704 = vst [vmem:[#allocation96_spill] sm:$0xff] %v14296_v36  ;;  %v14321_v63 = vadd.f32 %v5137_v39, %v18718_v0  ;;  %v18725_v38 = vld [vmem:[#allocation91_spill] sm:$0xff]  ;;  %v18727_v30 = vld [vmem:[#allocation105_spill] sm:$0xff] }
 0x3eb   : > { %18706 = vst [vmem:[#allocation36_spill] sm:$0xff] %v14300_v28  ;;  %18709 = vst [vmem:[#allocation20_spill] sm:$0xff] %v14305_v1  ;;  %v14318_v55 = vadd.f32 %v18716_v57, %v18714_v23  ;;  %v18720_v28 = vld [vmem:[#allocation18_spill] sm:$0xff]  ;;  %v14329_v8 = vadd.f32 %v18723_v26, %v18722_v18  ;;  %v14335_v50 = vadd.f32 %v5144_v4, %v18727_v30  ;;  %v18730_v23 = vrot.slane %v13970_v5, 4  ;;  %v18732_v39 = vld [vmem:[#allocation16_spill] sm:$0xff] }
 0x3ec   : > { %18711 = vst [vmem:[#allocation117_spill] sm:$0xff] %v14309_v44  ;;  %18713 = vst [vmem:[#allocation9_spill] sm:$0xff] %v14313_v35  ;;  %v14324_v14 = vadd.f32 %v5139_v24, %v18720_v28  ;;  %v14332_v44 = vadd.f32 %v5142_v3, %v18725_v38  ;;  %v18729_v19 = vld [vmem:[#allocation62_spill] sm:$0xff]  ;;  %v14343_v0 = vadd.f32 %v5147_v45, %v18732_v39  ;;  %v18736_v42 = vld [vmem:[#allocation47_spill] sm:$0xff]  ;;  %v18737_v18 = vrot.slane %v13982_v58, 4 }
 0x3ed   : > { %18717 = vst [vmem:[#allocation126_spill] sm:$0xff] %v14318_v55  ;;  %18719 = vst [vmem:[#allocation83_spill] sm:$0xff] %v14321_v63  ;;  %v14340_v57 = vadd.f32 %v18730_v23, %v18729_v19  ;;  %v18734_v24 = vld [vmem:[#allocation82_spill] sm:$0xff]  ;;  %v18741_v4 = vld [vmem:[#allocation44_spill] sm:$0xff] }
 0x3ee   : > { %18721 = vst [vmem:[#allocation113_spill] sm:$0xff] %v14324_v14  ;;  %18724 = vst [vmem:[#allocation34_spill] sm:$0xff] %v14329_v8  ;;  %v14346_v28 = vadd.f32 %v5149_v22, %v18734_v24  ;;  %v14351_v26 = vadd.f32 %v18737_v18, %v18736_v42  ;;  %v18739_v3 = vld [vmem:[#allocation38_spill] sm:$0xff]  ;;  %v14357_v30 = vadd.f32 %v5154_v12, %v18741_v4  ;;  %v18743_v5 = vld [vmem:[#allocation48_spill] sm:$0xff] }
 0x3ef   : > { %18726 = vst [vmem:[#allocation60_spill] sm:$0xff] %v14332_v44  ;;  %18728 = vst [vmem:[#allocation139_spill] sm:$0xff] %v14335_v50  ;;  %v14354_v38 = vadd.f32 %v5152_v37, %v18739_v3  ;;  %v14361_v19 = vadd.f32 %v14197_v27, %v18743_v5  ;;  %v18745_v45 = vld [vmem:[#allocation138_spill] sm:$0xff]  ;;  %v18747_v22 = vld [vmem:[#allocation39_spill] sm:$0xff] }
 0x3f0   : > { %18731 = vst [vmem:[#allocation30_spill] sm:$0xff] %v14340_v57  ;;  %18733 = vst [vmem:[#allocation25_spill] sm:$0xff] %v14343_v0  ;;  %v14364_v23 = vadd.f32 %v5157_v21, %v18745_v45  ;;  %v14367_v39 = vadd.f32 %v5159_v32, %v18747_v22  ;;  %v18749_v24 = vld [vmem:[#allocation133_spill] sm:$0xff]  ;;  %v18751_v42 = vld [vmem:[#allocation134_spill] sm:$0xff] }
 0x3f1   : > { %18735 = vst [vmem:[#allocation57_spill] sm:$0xff] %v14346_v28  ;;  %18738 = vst [vmem:[#allocation55_spill] sm:$0xff] %v14351_v26  ;;  %v14370_v58 = vadd.f32 %v5158_v33, %v18749_v24  ;;  %v14373_v18 = vadd.f32 %v5152_v37, %v18751_v42  ;;  %v18753_v3 = vld [vmem:[#allocation135_spill] sm:$0xff]  ;;  %v18755_v4 = vld [vmem:[#allocation136_spill] sm:$0xff]  ;;  %v18762_v33 = vrot.slane %v14069_v17, 4 }
 0x3f2   : > { %18740 = vst [vmem:[#allocation129_spill] sm:$0xff] %v14354_v38  ;;  %18742 = vst [vmem:[#allocation118_spill] sm:$0xff] %v14357_v30  ;;  %v14376_v38 = vadd.f32 %v5154_v12, %v18753_v3  ;;  %v14380_v30 = vadd.f32 %v14197_v27, %v18755_v4  ;;  %v18757_v5 = vld [vmem:[#allocation31_spill] sm:$0xff]  ;;  %v18759_v21 = vld [vmem:[#allocation80_spill] sm:$0xff] }
 0x3f3   : > { %18744 = vst [vmem:[#allocation130_spill] sm:$0xff] %v14361_v19  ;;  %18746 = vst [vmem:[#allocation107_spill] sm:$0xff] %v14364_v23  ;;  %v14383_v19 = vadd.f32 %v4779_v15, %v18757_v5  ;;  %v14386_v45 = vadd.f32 %v4781_v20, %v18759_v21  ;;  %v18761_v32 = vld [vmem:[#allocation102_spill] sm:$0xff]  ;;  %v18766_v12 = vld [vmem:[#allocation56_spill] sm:$0xff] }
 0x3f4   : > { %18748 = vst [vmem:[#allocation10_spill] sm:$0xff] %v14367_v39  ;;  %18750 = vst [vmem:[#allocation131_spill] sm:$0xff] %v14370_v58  ;;  %v14391_v22 = vadd.f32 %v18762_v33, %v18761_v32  ;;  %v18764_v37 = vld [vmem:[#allocation70_spill] sm:$0xff]  ;;  %v14397_v42 = vadd.f32 %v4776_v48, %v18766_v12  ;;  %v18768_v3 = vld [vmem:[#allocation72_spill] sm:$0xff] }
 0x3f5   : > { %18752 = vst [vmem:[#allocation18_spill] sm:$0xff] %v14373_v18  ;;  %18754 = vst [vmem:[#allocation132_spill] sm:$0xff] %v14376_v38  ;;  %v14394_v24 = vadd.f32 %v4774_v2, %v18764_v37  ;;  %v14401_v27 = vadd.f32 %v14136_v61, %v18768_v3  ;;  %v18770_v15 = vld [vmem:[#allocation45_spill] sm:$0xff]  ;;  %v18772_v20 = vld [vmem:[#allocation114_spill] sm:$0xff] }
 0x3f6   : > { %18756 = vst [vmem:[#allocation91_spill] sm:$0xff] %v14380_v30  ;;  %18758 = vst [vmem:[#allocation105_spill] sm:$0xff] %v14383_v19  ;;  %v14404_v4 = vadd.f32 %v4769_v16, %v18770_v15  ;;  %v14407_v5 = vadd.f32 %v4771_v31, %v18772_v20  ;;  %v18774_v21 = vld [vmem:[#allocation19_spill] sm:$0xff]  ;;  %v18780_v61 = vld [vmem:[#allocation104_spill] sm:$0xff]  ;;  %v18787_v15 = vrot.slane %v14081_v29, 4 }
 0x3f7   : > { %18760 = vst [vmem:[#allocation62_spill] sm:$0xff] %v14386_v45  ;;  %18763 = vst [vmem:[#allocation16_spill] sm:$0xff] %v14391_v22  ;;  %v14411_v17 = vadd.f32 %v14123_v59, %v18774_v21  ;;  %v18776_v32 = vld [vmem:[#allocation103_spill] sm:$0xff]  ;;  %v14423_v37 = vadd.f32 %v14091_v41, %v18780_v61  ;;  %v18782_v16 = vld [vmem:[#allocation100_spill] sm:$0xff]  ;;  %v18794_v41 = vrot.slane %v14095_v54, 4 }
 0x3f8   : > { %18765 = vst [vmem:[#allocation82_spill] sm:$0xff] %v14394_v24  ;;  %18767 = vst [vmem:[#allocation47_spill] sm:$0xff] %v14397_v42  ;;  %v14415_v2 = vadd.f32 %v14129_v46, %v18776_v32  ;;  %v18778_v48 = vld [vmem:[#allocation95_spill] sm:$0xff]  ;;  %v14426_v12 = vadd.f32 %v4784_v13, %v18782_v16  ;;  %v18784_v31 = vld [vmem:[#allocation137_spill] sm:$0xff] }
 0x3f9   : > { %18769 = vst [vmem:[#allocation38_spill] sm:$0xff] %v14401_v27  ;;  %18771 = vst [vmem:[#allocation44_spill] sm:$0xff] %v14404_v4  ;;  %v14419_v33 = vadd.f32 %v14133_v51, %v18778_v48  ;;  %v14429_v3 = vadd.f32 %v4786_v60, %v18784_v31  ;;  %v18786_v59 = vld [vmem:[#allocation63_spill] sm:$0xff]  ;;  %v18789_v46 = vld [vmem:[#allocation24_spill] sm:$0xff] }
 0x3fa   : > { %18773 = vst [vmem:[#allocation48_spill] sm:$0xff] %v14407_v5  ;;  %18775 = vst [vmem:[#allocation138_spill] sm:$0xff] %v14411_v17  ;;  %v14434_v20 = vadd.f32 %v18787_v15, %v18786_v59  ;;  %v14437_v21 = vadd.f32 %v4789_v62, %v18789_v46  ;;  %v18791_v51 = vld [vmem:[#allocation81_spill] sm:$0xff]  ;;  %v18793_v48 = vld [vmem:[#allocation92_spill] sm:$0xff]  ;;  %v18801_v59 = vrot.slane %v14107_v47, 4 }
 0x3fb   : > { %18777 = vst [vmem:[#allocation39_spill] sm:$0xff] %v14415_v2  ;;  %18779 = vst [vmem:[#allocation133_spill] sm:$0xff] %v14419_v33  ;;  %v14440_v32 = vadd.f32 %v4791_v43, %v18791_v51  ;;  %v14445_v61 = vadd.f32 %v18794_v41, %v18793_v48  ;;  %v18796_v13 = vld [vmem:[#allocation108_spill] sm:$0xff]  ;;  %v18800_v29 = vld [vmem:[#allocation23_spill] sm:$0xff] }
 0x3fc   : > { %18781 = vst [vmem:[#allocation134_spill] sm:$0xff] %v14423_v37  ;;  %18783 = vst [vmem:[#allocation135_spill] sm:$0xff] %v14426_v12  ;;  %v14448_v16 = vadd.f32 %v4794_v52, %v18796_v13  ;;  %v18798_v60 = vld [vmem:[#allocation64_spill] sm:$0xff]  ;;  %v14456_v15 = vadd.f32 %v18801_v59, %v18800_v29  ;;  %v18803_v62 = vld [vmem:[#allocation17_spill] sm:$0xff] }
 0x3fd   : > { %18785 = vst [vmem:[#allocation136_spill] sm:$0xff] %v14429_v3  ;;  %18788 = vst [vmem:[#allocation31_spill] sm:$0xff] %v14434_v20  ;;  %v14451_v31 = vadd.f32 %v4796_v53, %v18798_v60  ;;  %v14459_v46 = vadd.f32 %v4799_v10, %v18803_v62  ;;  %v18805_v43 = vld [vmem:[#allocation128_spill] sm:$0xff]  ;;  %v18806_v54 = vld [vmem:[#allocation21_spill] sm:$0xff] }
 0x3fe   : > { %18790 = vst [vmem:[#allocation80_spill] sm:$0xff] %v14437_v21  ;;  %18792 = vst [vmem:[#allocation102_spill] sm:$0xff] %v14440_v32  ;;  %v14462_v51 = vadd.f32 %v4801_v49, %v18805_v43  ;;  %v18807_v48 = vld [vmem:[#allocation11_spill] sm:$0xff]  ;;  %v18809_v13 = vld [vmem:[#allocation76_spill] sm:$0xff] }
 0x3ff   : > { %18795 = vst [vmem:[#allocation70_spill] sm:$0xff] %v14445_v61  ;;  %18797 = vst [vmem:[#allocation56_spill] sm:$0xff] %v14448_v16  ;;  %v4962_v41 = vmul.f32 %v18807_v48, %v18806_v54  ;;  %v18808_v61 = vld [vmem:[#allocation27_spill] sm:$0xff]  ;;  %v4964_v53 = vmul.f32 %v18807_v48, %v18809_v13  ;;  %v18810_v60 = vld [vmem:[#allocation53_spill] sm:$0xff] }
 0x400   : > { %18799 = vst [vmem:[#allocation72_spill] sm:$0xff] %v14451_v31  ;;  %18802 = vst [vmem:[#allocation45_spill] sm:$0xff] %v14456_v15  ;;  %v4963_v52 = vmul.f32 %v18807_v48, %v18808_v61  ;;  %v4965_v47 = vmul.f32 %v18807_v48, %v18810_v60  ;;  %v18811_v29 = vld [vmem:[#allocation67_spill] sm:$0xff]  ;;  %v18814_v49 = vld [vmem:[#allocation40_spill] sm:$0xff] }
 0x401   : > { %18804 = vst [vmem:[#allocation114_spill] sm:$0xff] %v14459_v46  ;;  %v4966_v59 = vmul.f32 %v18807_v48, %v18811_v29  ;;  %v18812_v10 = vld [vmem:[#allocation99_spill] sm:$0xff]  ;;  %v14480_v43 = vmul.f32 %v18807_v48, %v18814_v49  ;;  %v18815_v54 = vld [vmem:[#allocation93_spill] sm:$0xff]  ;;  %v18818_v29 = vld [vmem:[#allocation66_spill] sm:$0xff]  ;;  %v5070_v33 = vrot.slane %v4962_v41, 4 }
 0x402   : > { %v14476_v62 = vmul.f32 %v18807_v48, %v18812_v10  ;;  %v14484_v61 = vmul.f32 %v18807_v48, %v18815_v54  ;;  %v18816_v46 = vld [vmem:[#allocation97_spill] sm:$0xff]  ;;  %v18817_v60 = vld [vmem:[#allocation119_spill] sm:$0xff]  ;;  %v14496_v10 = vmul.f32 %v18807_v48, %v18818_v29  ;;  %v18819_v31 = vld [vmem:[#allocation112_spill] sm:$0xff]  ;;  %v5071_v2 = vrot.slane %v4963_v52, 4 }
 0x403   : > { %v14488_v13 = vmul.f32 %v18807_v48, %v18816_v46  ;;  %v14492_v15 = vmul.f32 %v18807_v48, %v18817_v60  ;;  %v14500_v16 = vmul.f32 %v18807_v48, %v18819_v31  ;;  %v18820_v32 = vld [vmem:[#allocation35_spill] sm:$0xff]  ;;  %v18822_v21 = vld [vmem:[#allocation73_spill] sm:$0xff]  ;;  %v18823_v20 = vld [vmem:[#allocation120_spill] sm:$0xff]  ;;  %v5075_v41 = vrot.slane %v4965_v47, 4 }
 0x404   : > { %18813 = vst [vmem:[#allocation19_spill] sm:$0xff] %v14476_v62  ;;  %v14504_v54 = vmul.f32 %v18807_v48, %v18820_v32  ;;  %v18821_v49 = vld [vmem:[#allocation111_spill] sm:$0xff]  ;;  %v14512_v60 = vmul.f32 %v18807_v48, %v18822_v21  ;;  %v14516_v29 = vmul.f32 %v18807_v48, %v18823_v20  ;;  %v18824_v3 = vld [vmem:[#allocation29_spill] sm:$0xff]  ;;  %v18826_v37 = vld [vmem:[#allocation14_spill] sm:$0xff]  ;;  %v5076_v52 = vrot.slane %v4966_v59, 4 }
 0x405   : > { %v14508_v46 = vmul.f32 %v18807_v48, %v18821_v49  ;;  %v14520_v31 = vmul.f32 %v18807_v48, %v18824_v3  ;;  %v18825_v12 = vld [vmem:[#allocation87_spill] sm:$0xff]  ;;  %v14528_v49 = vmul.f32 %v18807_v48, %v18826_v37  ;;  %v18827_v21 = vld [vmem:[#allocation52_spill] sm:$0xff]  ;;  %v18828_v20 = vld [vmem:[#allocation98_spill] sm:$0xff]  ;;  %v14578_v19 = vsel %vm2014_vm4, %v5070_v33, %v5071_v2 }
 0x406   : > { %v14524_v32 = vmul.f32 %v18807_v48, %v18825_v12  ;;  %v14532_v17 = vmul.f32 %v18807_v48, %v18827_v21  ;;  %v14536_v5 = vmul.f32 %v18807_v48, %v18828_v20  ;;  %v18829_v3 = vld [vmem:[#allocation127_spill] sm:$0xff]  ;;  %v14542_v12 = vrot.slane %v4964_v53, 4  ;;  %v18831_v21 = vld [vmem:[#allocation37_spill] sm:$0xff]  ;;  %v18833_v20 = vld [vmem:[#allocation88_spill] sm:$0xff] }
 0x407   : > { %v14540_v4 = vmul.f32 %v18807_v48, %v18829_v3  ;;  %v18830_v27 = vld [vmem:[#allocation43_spill] sm:$0xff]  ;;  %v14551_v24 = vmul.f32 %v18807_v48, %v18831_v21  ;;  %v14555_v22 = vmul.f32 %v18807_v48, %v18833_v20  ;;  %v18834_v3 = vld [vmem:[#allocation77_spill] sm:$0xff]  ;;  %v18838_v42 = vld [vmem:[#allocation86_spill] sm:$0xff]  ;;  %v18842_v18 = vrot.slane %v14476_v62, 4 }
 0x408   : > { %v14546_v37 = vmul.f32 %v18807_v48, %v18830_v27  ;;  %v14559_v53 = vmul.f32 %v18807_v48, %v18834_v3  ;;  %v18835_v30 = vld [vmem:[#allocation89_spill] sm:$0xff]  ;;  %v14571_v21 = vmul.f32 %v18807_v48, %v18838_v42  ;;  %v18839_v45 = vld [vmem:[#allocation79_spill] sm:$0xff]  ;;  %v14582_v3 = vsel %vm2014_vm4, %v5071_v2, %v14542_v12  ;;  %v18847_v38 = vld [vmem:[#allocation122_spill] sm:$0xff] }
 0x409   : > { %18832 = vst [vmem:[#allocation103_spill] sm:$0xff] %v14551_v24  ;;  %v14563_v27 = vmul.f32 %v18807_v48, %v18835_v30  ;;  %v18837_v47 = vld [vmem:[#allocation65_spill] sm:$0xff]  ;;  %v14575_v20 = vmul.f32 %v18807_v48, %v18839_v45  ;;  %v14588_v42 = vsel %vm2014_vm4, %v5075_v41, %v5076_v52  ;;  %v18844_v45 = vld [vmem:[#allocation71_spill] sm:$0xff]  ;;  %v18851_v26 = vld [vmem:[#allocation74_spill] sm:$0xff] }
 0x40a   : > { %v14567_v59 = vmul.f32 %v18807_v48, %v18837_v47  ;;  %18841 = vst [vmem:[#allocation100_spill] sm:$0xff] %v14588_v42  ;;  %v14593_v48 = vsel %vm2014_vm4, %v5076_v52, %v18842_v18  ;;  %v18845_v47 = vld [vmem:[#allocation54_spill] sm:$0xff]  ;;  %v18849_v58 = vld [vmem:[#allocation115_spill] sm:$0xff]  ;;  %v18852_v2 = vld [vmem:[#allocation61_spill] sm:$0xff] }
 0x40b   : > { %18836 = vst [vmem:[#allocation95_spill] sm:$0xff] %v14563_v27  ;;  %18840 = vst [vmem:[#allocation104_spill] sm:$0xff] %v14575_v20  ;;  %v14611_v23 = vmul.f32 %v18845_v47, %v18844_v45  ;;  %v14615_v41 = vmul.f32 %v18845_v47, %v18847_v38  ;;  %v5311_v39 = vmul.f32 %v18845_v47, %v18849_v58  ;;  %v18850_v18 = vld [vmem:[#allocation26_spill] sm:$0xff]  ;;  %v18853_v28 = vld [vmem:[#allocation28_spill] sm:$0xff] }
 0x40c   : > { %18843 = vst [vmem:[#allocation137_spill] sm:$0xff] %v14593_v48  ;;  %v5312_v52 = vmul.f32 %v18845_v47, %v18850_v18  ;;  %v14623_v33 = vmul.f32 %v18845_v47, %v18851_v26  ;;  %v5314_v30 = vmul.f32 %v18845_v47, %v18852_v2  ;;  %v5315_v45 = vmul.f32 %v18845_v47, %v18853_v28  ;;  %v18854_v0 = vld [vmem:[#allocation123_spill] sm:$0xff]  ;;  %v18855_v57 = vld [vmem:[#allocation32_spill] sm:$0xff]  ;;  %v18856_v50 = vld [vmem:[#allocation50_spill] sm:$0xff] }
 0x40d   : > { %18846 = vst [vmem:[#allocation63_spill] sm:$0xff] %v14611_v23  ;;  %18848 = vst [vmem:[#allocation24_spill] sm:$0xff] %v14615_v41  ;;  %v14631_v38 = vmul.f32 %v18845_v47, %v18854_v0  ;;  %v5317_v58 = vmul.f32 %v18845_v47, %v18855_v57  ;;  %v5318_v18 = vmul.f32 %v18845_v47, %v18856_v50  ;;  %v18857_v44 = vld [vmem:[#allocation101_spill] sm:$0xff]  ;;  %v18858_v8 = vld [vmem:[#allocation15_spill] sm:$0xff]  ;;  %v16161_v25 = vrot.slane %v14615_v41, 4 }
 0x40e   : > { %v5319_v26 = vmul.f32 %v18845_v47, %v18857_v44  ;;  %v5320_v14 = vmul.f32 %v18845_v47, %v18858_v8  ;;  %v18859_v2 = vld [vmem:[#allocation58_spill] sm:$0xff]  ;;  %v18860_v28 = vld [vmem:[#allocation124_spill] sm:$0xff]  ;;  %v18862_v1 = vld [vmem:[#allocation33_spill] sm:$0xff]  ;;  %v16162_v44 = vrot.slane %v14611_v23, 4  ;;  %v5435_v8 = vrot.slane %v5311_v39, 4 }
 0x40f   : > { %v5321_v63 = vmul.f32 %v18845_v47, %v18859_v2  ;;  %v5322_v55 = vmul.f32 %v18845_v47, %v18860_v28  ;;  %v18861_v0 = vld [vmem:[#allocation46_spill] sm:$0xff]  ;;  %v5324_v57 = vmul.f32 %v18845_v47, %v18862_v1  ;;  %v18863_v36 = vld [vmem:[#allocation75_spill] sm:$0xff]  ;;  %v18864_v34 = vld [vmem:[#allocation85_spill] sm:$0xff]  ;;  %v5436_v62 = vrot.slane %v5312_v52, 4 }
 0x410   : > { %v5323_v35 = vmul.f32 %v18845_v47, %v18861_v0  ;;  %v5325_v50 = vmul.f32 %v18845_v47, %v18863_v36  ;;  %v5326_v2 = vmul.f32 %v18845_v47, %v18864_v34  ;;  %v18865_v11 = vld [vmem:[#allocation59_spill] sm:$0xff]  ;;  %v16163_v0 = vrot.slane %v14623_v33, 4  ;;  %v18866_v40 = vld [vmem:[#allocation109_spill] sm:$0xff] }
 0x411   : > { %v5327_v28 = vmul.f32 %v18845_v47, %v18865_v11  ;;  %v14660_v1 = vmul.f32 %v18845_v47, %v18866_v40  ;;  %v5434_v36 = vsel %vm2014_vm4, %v16162_v44, %v16161_v25  ;;  %v5440_v39 = vrot.slane %v5314_v30, 4 }
 0x412   : > { %v5441_v48 = vrot.slane %v5315_v45, 4  ;;  %v5437_v34 = vsel %vm2014_vm4, %v5435_v8, %v5436_v62  ;;  %v5439_v11 = vsel %vm2014_vm4, %v5436_v62, %v16163_v0  ;;  %v5443_v52 = vrot.slane %v14631_v38, 4 }
 0x413   : > { %v5445_v42 = vrot.slane %v5317_v58, 4  ;;  %v5446_v47 = vrot.slane %v5318_v18, 4  ;;  %v14673_v9 = vrot.slane %v5319_v26, 4  ;;  %v5450_v41 = vrot.slane %v5320_v14, 4 }
 0x414   : > { %v5442_v40 = vsel %vm2014_vm4, %v5440_v39, %v5441_v48  ;;  %v5444_v23 = vsel %vm2014_vm4, %v5441_v48, %v5443_v52  ;;  %v5451_v25 = vrot.slane %v5321_v63, 4  ;;  %v14676_v30 = vrot.slane %v5322_v55, 4 }
 0x415   : > { %v5455_v45 = vrot.slane %v5323_v35, 4  ;;  %v14679_v8 = vsel %vm2014_vm4, %v5445_v42, %v5446_v47  ;;  %v14683_v62 = vsel %vm2014_vm4, %v5446_v47, %v14673_v9  ;;  %v5456_v38 = vrot.slane %v5324_v57, 4 }
 0x416   : > { %v14685_v58 = vrot.slane %v5325_v50, 4  ;;  %v14688_v18 = vsel %vm2014_vm4, %v5450_v41, %v5451_v25  ;;  %v14692_v14 = vsel %vm2014_vm4, %v5451_v25, %v14676_v30  ;;  %v5460_v55 = vrot.slane %v5326_v2, 4 }
 0x417   : > { %v5461_v63 = vrot.slane %v5327_v28, 4  ;;  %v5116_v35 = vrot.slane %v14571_v21, 4  ;;  %v5457_v42 = vsel %vm2014_vm4, %v5455_v45, %v5456_v38  ;;  %v5463_v48 = vrot.slane %v14660_v1, 4 }
 0x418   : > { %v5459_v47 = vsel %vm2014_vm4, %v5456_v38, %v14685_v58  ;;  %v5106_v26 = vrot.slane %v14546_v37, 4  ;;  %v16165_v41 = vrot.slane %v14551_v24, 4  ;;  %v5110_v57 = vrot.slane %v14555_v22, 4  ;;  %v18926_v24 = vld [vmem:[#allocation55_spill] sm:$0xff] }
 0x419   : > { %v5462_v25 = vsel %vm2014_vm4, %v5460_v55, %v5461_v63  ;;  %v5111_v50 = vrot.slane %v14559_v53, 4  ;;  %v16164_v2 = vrot.slane %v14563_v27, 4  ;;  %v18867_v21 = vrot.slane %v14575_v20, 4  ;;  %v18909_v20 = vld [vmem:[#allocation116_spill] sm:$0xff] }
 0x41a   : > { %v5464_v39 = vsel %vm2014_vm4, %v5461_v63, %v5463_v48  ;;  %v18868_v1 = vrot.slane %v14484_v61, 4  ;;  %v18869_v37 = vrot.slane %v14480_v43, 4  ;;  %v18870_v22 = vrot.slane %v14488_v13, 4  ;;  %v18913_v27 = vld [vmem:[#allocation36_spill] sm:$0xff] }
 0x41b   : > { %v5119_v28 = vsel %vm2014_vm4, %v5116_v35, %v18867_v21  ;;  %v18872_v55 = vrot.slane %v14496_v10, 4  ;;  %v18873_v44 = vrot.slane %v14492_v15, 4  ;;  %v5115_v63 = vrot.slane %v14567_v59, 4 }
 0x41c   : > { %v5082_v45 = vsel %vm2014_vm4, %v18869_v37, %v18868_v1  ;;  %v18871_v38 = vmov %v18868_v1  ;;  %v18874_v0 = vrot.slane %v14500_v16, 4  ;;  %v18876_v37 = vrot.slane %v14508_v46, 4 }
 0x41d   : > { %v5084_v53 = vsel %vm2014_vm4, %v18871_v38, %v18870_v22  ;;  %v5087_v21 = vsel %vm2014_vm4, %v18873_v44, %v18872_v55  ;;  %v18875_v43 = vmov %v18872_v55  ;;  %v18877_v61 = vrot.slane %v14504_v54, 4 }
 0x41e   : > { %v5089_v1 = vsel %vm2014_vm4, %v18875_v43, %v18874_v0  ;;  %v18878_v38 = vrot.slane %v14512_v60, 4  ;;  %v18879_v15 = vmov %v18876_v37  ;;  %v18880_v59 = vrot.slane %v14520_v31, 4 }
 0x41f   : > { %v5092_v22 = vsel %vm2014_vm4, %v18877_v61, %v18876_v37  ;;  %v18881_v55 = vrot.slane %v14516_v29, 4  ;;  %v18882_v0 = vrot.slane %v14524_v32, 4  ;;  %v18884_v37 = vrot.slane %v14532_v17, 4 }
 0x420   : > { %v5094_v44 = vsel %vm2014_vm4, %v18879_v15, %v18878_v38  ;;  %v18883_v43 = vmov %v18880_v59  ;;  %v18885_v61 = vrot.slane %v14528_v49, 4  ;;  %v18886_v38 = vrot.slane %v14536_v5, 4 }
 0x421   : > { %v5097_v10 = vsel %vm2014_vm4, %v18881_v55, %v18880_v59  ;;  %v5099_v54 = vsel %vm2014_vm4, %v18883_v43, %v18882_v0  ;;  %v18887_v15 = vmov %v18884_v37  ;;  %v5245_v59 = vadd.f32 %v5119_v28, %v14462_v51  ;;  %v18894_v28 = vld [vmem:[#allocation100_spill] sm:$0xff] }
 0x422   : > { %v5102_v46 = vsel %vm2014_vm4, %v18885_v61, %v18884_v37  ;;  %v5104_v29 = vsel %vm2014_vm4, %v18887_v15, %v18886_v38  ;;  %v18888_v55 = vrot.slane %v14540_v4, 4  ;;  %v5109_v0 = vsel %vm2014_vm4, %v5106_v26, %v16165_v41  ;;  %v18897_v61 = vld [vmem:[#allocation137_spill] sm:$0xff]  ;;  %v18900_v38 = vld [vmem:[#allocation19_spill] sm:$0xff] }
 0x423   : > { %v14768_v49 = vsel %vm2014_vm4, %v5110_v57, %v5111_v50  ;;  %v14773_v43 = vsel %vm2014_vm4, %v5111_v50, %v16164_v2  ;;  %v14776_v17 = vsel %vm2014_vm4, %v5115_v63, %v5116_v35  ;;  %v14780_v4 = vadd.f32 %v14578_v19, %v14255_v7  ;;  %v18893_v57 = vld [vmem:[#allocation125_spill] sm:$0xff]  ;;  %v18896_v50 = vld [vmem:[#allocation68_spill] sm:$0xff] }
 0x424   : > { %v5107_v31 = vsel %vm2014_vm4, %v18888_v55, %v5106_v26  ;;  %18889 = vst [vmem:[#allocation81_spill] sm:$0xff] %v14768_v49  ;;  %18890 = vst [vmem:[#allocation92_spill] sm:$0xff] %v14773_v43  ;;  %v14784_v51 = vadd.f32 %v14582_v3, %v14259_v56  ;;  %v14788_v26 = vadd.f32 %v14542_v12, %v14263_v6  ;;  %v18899_v63 = vld [vmem:[#allocation8_spill] sm:$0xff]  ;;  %v18901_v7 = vrot.slane %v18900_v38, 4  ;;  %v18903_v55 = vld [vmem:[#allocation42_spill] sm:$0xff] }
 0x425   : > { %18891 = vst [vmem:[#allocation108_spill] sm:$0xff] %v14776_v17  ;;  %v14792_v37 = vadd.f32 %v18894_v28, %v18893_v57  ;;  %v14796_v35 = vadd.f32 %v18897_v61, %v18896_v50  ;;  %v14805_v56 = vadd.f32 %v14578_v19, %v18903_v55  ;;  %v18905_v2 = vld [vmem:[#allocation12_spill] sm:$0xff]  ;;  %v14811_v41 = vadd.f32 %v5434_v36, %v5245_v59  ;;  %v18908_v57 = vld [vmem:[#allocation41_spill] sm:$0xff]  ;;  %v18910_v61 = vld [vmem:[#allocation51_spill] sm:$0xff] }
 0x426   : > { %18892 = vst [vmem:[#allocation64_spill] sm:$0xff] %v14788_v26  ;;  %v14801_v15 = vadd.f32 %v18901_v7, %v18899_v63  ;;  %v14809_v6 = vadd.f32 %v14582_v3, %v18905_v2  ;;  %v5549_v28 = vadd.f32 %v5437_v34, %v18908_v57  ;;  %v5550_v50 = vadd.f32 %v5439_v11, %v18909_v20  ;;  %v18912_v63 = vld [vmem:[#allocation96_spill] sm:$0xff]  ;;  %v18915_v49 = vld [vmem:[#allocation117_spill] sm:$0xff]  ;;  %v18917_v59 = vld [vmem:[#allocation126_spill] sm:$0xff] }
 0x427   : > { %18895 = vst [vmem:[#allocation23_spill] sm:$0xff] %v14792_v37  ;;  %18898 = vst [vmem:[#allocation17_spill] sm:$0xff] %v14796_v35  ;;  %v18911_v17 = vrot.slane %v14623_v33, 4  ;;  %v5552_v7 = vadd.f32 %v5442_v40, %v18912_v63  ;;  %v5553_v43 = vadd.f32 %v5444_v23, %v18913_v27  ;;  %v18914_v19 = vld [vmem:[#allocation20_spill] sm:$0xff]  ;;  %v5555_v3 = vadd.f32 %v14679_v8, %v18915_v49  ;;  %v18916_v2 = vld [vmem:[#allocation9_spill] sm:$0xff] }
 0x428   : > { %18902 = vst [vmem:[#allocation128_spill] sm:$0xff] %v14801_v15  ;;  %18904 = vst [vmem:[#allocation21_spill] sm:$0xff] %v14805_v56  ;;  %v5554_v55 = vadd.f32 %v5443_v52, %v18914_v19  ;;  %v5556_v36 = vadd.f32 %v14683_v62, %v18916_v2  ;;  %v5557_v34 = vadd.f32 %v14673_v9, %v18917_v59  ;;  %v18918_v20 = vld [vmem:[#allocation83_spill] sm:$0xff]  ;;  %v18919_v33 = vld [vmem:[#allocation113_spill] sm:$0xff] }
 0x429   : > { %18906 = vst [vmem:[#allocation11_spill] sm:$0xff] %v14809_v6  ;;  %18907 = vst [vmem:[#allocation27_spill] sm:$0xff] %v14811_v41  ;;  %v5551_v38 = vadd.f32 %v18911_v17, %v18910_v61  ;;  %v5558_v11 = vadd.f32 %v14688_v18, %v18918_v20  ;;  %v5559_v17 = vadd.f32 %v14692_v14, %v18919_v33  ;;  %v18920_v40 = vld [vmem:[#allocation34_spill] sm:$0xff]  ;;  %v18921_v27 = vld [vmem:[#allocation60_spill] sm:$0xff] }
 0x42a   : > { %v5560_v23 = vadd.f32 %v14676_v30, %v18920_v40  ;;  %v5561_v52 = vadd.f32 %v5457_v42, %v18921_v27  ;;  %v18922_v57 = vld [vmem:[#allocation139_spill] sm:$0xff]  ;;  %v18923_v49 = vld [vmem:[#allocation30_spill] sm:$0xff]  ;;  %v18924_v19 = vld [vmem:[#allocation25_spill] sm:$0xff]  ;;  %v5566_v6 = vadd.f32 %v5463_v48, %v18926_v24 }
 0x42b   : > { %v5562_v61 = vadd.f32 %v5459_v47, %v18922_v57  ;;  %v5563_v63 = vadd.f32 %v14685_v58, %v18923_v49  ;;  %v5564_v2 = vadd.f32 %v5462_v25, %v18924_v19  ;;  %v18925_v41 = vld [vmem:[#allocation57_spill] sm:$0xff]  ;;  %v18928_v15 = vld [vmem:[#allocation118_spill] sm:$0xff]  ;;  %v18930_v37 = vld [vmem:[#allocation107_spill] sm:$0xff] }
 0x42c   : > { %v5565_v59 = vadd.f32 %v5464_v39, %v18925_v41  ;;  %v18927_v20 = vld [vmem:[#allocation129_spill] sm:$0xff]  ;;  %v5568_v33 = vadd.f32 %v5459_v47, %v18928_v15  ;;  %v18929_v35 = vld [vmem:[#allocation130_spill] sm:$0xff]  ;;  %v5570_v27 = vadd.f32 %v14688_v18, %v18930_v37  ;;  %v18932_v49 = vld [vmem:[#allocation131_spill] sm:$0xff]  ;;  %v18940_v15 = vrot.slane %v14488_v13, 4 }
 0x42d   : > { %v5567_v56 = vadd.f32 %v5457_v42, %v18927_v20  ;;  %v5569_v40 = vadd.f32 %v14685_v58, %v18929_v35  ;;  %v18931_v57 = vld [vmem:[#allocation10_spill] sm:$0xff]  ;;  %v5572_v25 = vadd.f32 %v14676_v30, %v18932_v49  ;;  %v18934_v24 = vld [vmem:[#allocation132_spill] sm:$0xff]  ;;  %v18936_v58 = vld [vmem:[#allocation105_spill] sm:$0xff] }
 0x42e   : > { %v5571_v26 = vadd.f32 %v14692_v14, %v18931_v57  ;;  %v18933_v19 = vld [vmem:[#allocation18_spill] sm:$0xff]  ;;  %v5574_v42 = vadd.f32 %v14683_v62, %v18934_v24  ;;  %v14859_v39 = vadd.f32 %v5082_v45, %v18936_v58  ;;  %v18938_v14 = vld [vmem:[#allocation91_spill] sm:$0xff]  ;;  %v18939_v30 = vld [vmem:[#allocation16_spill] sm:$0xff]  ;;  %v18944_v45 = vrot.slane %v14500_v16, 4 }
 0x42f   : > { %v5573_v41 = vadd.f32 %v14679_v8, %v18933_v19  ;;  %v18935_v48 = vld [vmem:[#allocation22_spill] sm:$0xff]  ;;  %v5575_v35 = vadd.f32 %v14673_v9, %v18938_v14  ;;  %v14869_v8 = vadd.f32 %v18940_v15, %v18939_v30  ;;  %v18942_v57 = vld [vmem:[#allocation47_spill] sm:$0xff]  ;;  %v18946_v9 = vld [vmem:[#allocation48_spill] sm:$0xff]  ;;  %v18948_v58 = vrot.slane %v14512_v60, 4 }
 0x430   : > { %v14856_v47 = vadd.f32 %v14542_v12, %v18935_v48  ;;  %v18937_v18 = vld [vmem:[#allocation62_spill] sm:$0xff]  ;;  %v14875_v12 = vadd.f32 %v5089_v1, %v18942_v57  ;;  %v14886_v48 = vadd.f32 %v5094_v44, %v18946_v9  ;;  %v18950_v1 = vld [vmem:[#allocation133_spill] sm:$0xff]  ;;  %v18952_v15 = vrot.slane %v14524_v32, 4  ;;  %v18956_v44 = vld [vmem:[#allocation136_spill] sm:$0xff] }
 0x431   : > { %v14862_v37 = vadd.f32 %v5084_v53, %v18937_v18  ;;  %v18941_v20 = vld [vmem:[#allocation82_spill] sm:$0xff]  ;;  %v18945_v53 = vld [vmem:[#allocation44_spill] sm:$0xff]  ;;  %v14897_v30 = vadd.f32 %v5099_v54, %v18950_v1  ;;  %v18958_v60 = vld [vmem:[#allocation31_spill] sm:$0xff] }
 0x432   : > { %v14872_v62 = vadd.f32 %v5087_v21, %v18941_v20  ;;  %v18943_v49 = vld [vmem:[#allocation38_spill] sm:$0xff]  ;;  %v14883_v24 = vadd.f32 %v5092_v22, %v18945_v53  ;;  %v18949_v21 = vld [vmem:[#allocation39_spill] sm:$0xff]  ;;  %v18963_v54 = vld [vmem:[#allocation40_spill] sm:$0xff] }
 0x433   : > { %v14880_v19 = vadd.f32 %v18944_v45, %v18943_v49  ;;  %v18947_v13 = vld [vmem:[#allocation138_spill] sm:$0xff]  ;;  %v14894_v14 = vadd.f32 %v5097_v10, %v18949_v21  ;;  %v18954_v22 = vld [vmem:[#allocation135_spill] sm:$0xff]  ;;  %v14908_v49 = vadd.f32 %v5104_v29, %v18956_v44  ;;  %v18959_v45 = vrot.slane %v14536_v5, 4  ;;  %v18961_v10 = vld [vmem:[#allocation80_spill] sm:$0xff] }
 0x434   : > { %v14891_v18 = vadd.f32 %v18948_v58, %v18947_v13  ;;  %v18951_v16 = vld [vmem:[#allocation134_spill] sm:$0xff]  ;;  %v14905_v57 = vadd.f32 %v5102_v46, %v18954_v22  ;;  %v14916_v9 = vadd.f32 %v5107_v31, %v18961_v10  ;;  %v18965_v32 = vld [vmem:[#allocation93_spill] sm:$0xff]  ;;  %v18969_v5 = vld [vmem:[#allocation119_spill] sm:$0xff] }
 0x435   : > { %v14902_v20 = vadd.f32 %v18952_v15, %v18951_v16  ;;  %18957 = vst [vmem:[#allocation67_spill] sm:$0xff] %v14908_v49  ;;  %v14913_v53 = vadd.f32 %v18959_v45, %v18958_v60  ;;  %v18964_v13 = vld [vmem:[#allocation54_spill] sm:$0xff]  ;;  %v18968_v29 = vld [vmem:[#allocation97_spill] sm:$0xff]  ;;  %v18971_v44 = vld [vmem:[#allocation112_spill] sm:$0xff] }
 0x436   : > { %18955 = vst [vmem:[#allocation53_spill] sm:$0xff] %v14905_v57  ;;  %18962 = vst [vmem:[#allocation71_spill] sm:$0xff] %v14916_v9  ;;  %v5281_v58 = vmul.f32 %v18964_v13, %v18963_v54  ;;  %v14922_v21 = vmul.f32 %v18964_v13, %v18965_v32  ;;  %v18966_v46 = vld [vmem:[#allocation102_spill] sm:$0xff]  ;;  %v14929_v16 = vmul.f32 %v18964_v13, %v18968_v29  ;;  %v18972_v45 = vld [vmem:[#allocation35_spill] sm:$0xff] }
 0x437   : > { %18953 = vst [vmem:[#allocation76_spill] sm:$0xff] %v14902_v20  ;;  %18960 = vst [vmem:[#allocation99_spill] sm:$0xff] %v14913_v53  ;;  %v14925_v1 = vadd.f32 %v5109_v0, %v18966_v46  ;;  %v14933_v15 = vmul.f32 %v18964_v13, %v18969_v5  ;;  %v18970_v31 = vld [vmem:[#allocation66_spill] sm:$0xff]  ;;  %v14941_v60 = vmul.f32 %v18964_v13, %v18971_v44  ;;  %v18973_v10 = vld [vmem:[#allocation111_spill] sm:$0xff] }
 0x438   : > { %v14937_v22 = vmul.f32 %v18964_v13, %v18970_v31  ;;  %v14945_v0 = vmul.f32 %v18964_v13, %v18972_v45  ;;  %v14949_v54 = vmul.f32 %v18964_v13, %v18973_v10  ;;  %v18974_v32 = vld [vmem:[#allocation73_spill] sm:$0xff]  ;;  %v18975_v29 = vld [vmem:[#allocation120_spill] sm:$0xff]  ;;  %v5385_v10 = vrot.slane %v5281_v58, 4 }
 0x439   : > { %18967 = vst [vmem:[#allocation122_spill] sm:$0xff] %v14925_v1  ;;  %v14953_v46 = vmul.f32 %v18964_v13, %v18974_v32  ;;  %v14957_v5 = vmul.f32 %v18964_v13, %v18975_v29  ;;  %v18976_v31 = vld [vmem:[#allocation121_spill] sm:$0xff]  ;;  %v18978_v53 = vld [vmem:[#allocation84_spill] sm:$0xff]  ;;  %v5386_v57 = vrot.slane %v14922_v21, 4 }
 0x43a   : > { %v5380_v1 = vrot.slane %v18976_v31, 4  ;;  %v18977_v44 = vld [vmem:[#allocation69_spill] sm:$0xff]  ;;  %v5383_v49 = vrot.slane %v18978_v53, 4  ;;  %v14965_v45 = vld [vmem:[%s15684_s4] ss:$0 sm:$0xff] }
 0x43b   : > { %v5381_v9 = vrot.slane %v18977_v44, 4  ;;  %v14969_v32 = vadd.f32 %v14965_v45, %v5549_v28  ;;  %v14972_v29 = vadd.f32 %v14965_v45, %v5550_v50  ;;  %v14975_v31 = vadd.f32 %v14965_v45, %v5551_v38 }
 0x43c   : > { %v14978_v44 = vadd.f32 %v14965_v45, %v5552_v7  ;;  %v14981_v53 = vadd.f32 %v14965_v45, %v5553_v43  ;;  %v14984_v20 = vadd.f32 %v14965_v45, %v5554_v55  ;;  %v14987_v58 = vadd.f32 %v14965_v45, %v5555_v3 }
 0x43d   : > { %v14990_v28 = vadd.f32 %v14965_v45, %v5556_v36  ;;  %v14993_v50 = vadd.f32 %v14965_v45, %v5557_v34  ;;  %v14996_v38 = vadd.f32 %v14965_v45, %v5558_v11  ;;  %v14999_v7 = vadd.f32 %v14965_v45, %v5559_v17 }
 0x43e   : > { %18979 = vst [vmem:[#allocation115_spill] sm:$0xff] %v14978_v44  ;;  %18980 = vst [vmem:[#allocation26_spill] sm:$0xff] %v14981_v53  ;;  %v15002_v43 = vadd.f32 %v14965_v45, %v5560_v23  ;;  %v15005_v55 = vadd.f32 %v14965_v45, %v5561_v52  ;;  %v15008_v3 = vadd.f32 %v14965_v45, %v5562_v61 }
 0x43f   : > { %18981 = vst [vmem:[#allocation74_spill] sm:$0xff] %v14987_v58  ;;  %18982 = vst [vmem:[#allocation61_spill] sm:$0xff] %v14990_v28  ;;  %v15011_v36 = vadd.f32 %v14965_v45, %v5563_v63  ;;  %v15014_v34 = vadd.f32 %v14965_v45, %v5564_v2  ;;  %v15017_v11 = vadd.f32 %v14965_v45, %v5565_v59  ;;  %v19007_v28 = vld [vmem:[#allocation65_spill] sm:$0xff] }
 0x440   : > { %18983 = vst [vmem:[#allocation28_spill] sm:$0xff] %v14996_v38  ;;  %18984 = vst [vmem:[#allocation123_spill] sm:$0xff] %v14999_v7  ;;  %v15020_v17 = vadd.f32 %v14965_v45, %v5566_v6  ;;  %v15023_v23 = vadd.f32 %v14965_v45, %v5567_v56  ;;  %v15026_v52 = vadd.f32 %v14965_v45, %v5568_v33  ;;  %v18995_v33 = vld [vmem:[#allocation29_spill] sm:$0xff] }
 0x441   : > { %18985 = vst [vmem:[#allocation32_spill] sm:$0xff] %v15005_v55  ;;  %18986 = vst [vmem:[#allocation50_spill] sm:$0xff] %v15008_v3  ;;  %v15029_v61 = vadd.f32 %v14965_v45, %v5569_v40  ;;  %v15032_v63 = vadd.f32 %v14965_v45, %v5570_v27  ;;  %v15035_v2 = vadd.f32 %v14965_v45, %v5571_v26  ;;  %v18996_v40 = vld [vmem:[#allocation87_spill] sm:$0xff]  ;;  %v18997_v27 = vld [vmem:[#allocation14_spill] sm:$0xff] }
 0x442   : > { %18987 = vst [vmem:[#allocation101_spill] sm:$0xff] %v15014_v34  ;;  %18988 = vst [vmem:[#allocation15_spill] sm:$0xff] %v15017_v11  ;;  %v15038_v59 = vadd.f32 %v14965_v45, %v5572_v25  ;;  %v15041_v6 = vadd.f32 %v14965_v45, %v5573_v41  ;;  %v15044_v56 = vadd.f32 %v14965_v45, %v5574_v42  ;;  %v18998_v25 = vld [vmem:[#allocation52_spill] sm:$0xff]  ;;  %v5391_v34 = vrot.slane %v14937_v22, 4  ;;  %v19006_v38 = vld [vmem:[#allocation89_spill] sm:$0xff] }
 0x443   : > { %18989 = vst [vmem:[#allocation58_spill] sm:$0xff] %v15023_v23  ;;  %18990 = vst [vmem:[#allocation124_spill] sm:$0xff] %v15026_v52  ;;  %v5291_v21 = vmul.f32 %v18964_v13, %v18995_v33  ;;  %v15050_v52 = vmul.f32 %v18964_v13, %v18996_v40  ;;  %v5293_v26 = vmul.f32 %v18964_v13, %v18997_v27  ;;  %v5388_v33 = vrot.slane %v14929_v16, 4 }
 0x444   : > { %18991 = vst [vmem:[#allocation46_spill] sm:$0xff] %v15032_v63  ;;  %18992 = vst [vmem:[#allocation33_spill] sm:$0xff] %v15035_v2  ;;  %v15055_v2 = vadd.f32 %v14965_v45, %v5575_v35  ;;  %v15059_v41 = vmul.f32 %v18964_v13, %v18998_v25  ;;  %v5382_v42 = vsel %vm2014_vm4, %v5380_v1, %v5381_v9  ;;  %v19000_v63 = vld [vmem:[#allocation127_spill] sm:$0xff]  ;;  %v19002_v25 = vld [vmem:[#allocation37_spill] sm:$0xff]  ;;  %v5393_v22 = vrot.slane %v14941_v60, 4 }
 0x445   : > { %18993 = vst [vmem:[#allocation75_spill] sm:$0xff] %v15041_v6  ;;  %18994 = vst [vmem:[#allocation85_spill] sm:$0xff] %v15044_v56  ;;  %v5384_v56 = vsel %vm2014_vm4, %v5381_v9, %v5383_v49  ;;  %v18999_v6 = vld [vmem:[#allocation98_spill] sm:$0xff]  ;;  %v15070_v27 = vmul.f32 %v18964_v13, %v19000_v63  ;;  %v19001_v35 = vld [vmem:[#allocation43_spill] sm:$0xff]  ;;  %v15078_v11 = vmul.f32 %v18964_v13, %v19002_v25  ;;  %v5401_v58 = vrot.slane %v5291_v21, 4 }
 0x446   : > { %v15066_v40 = vmul.f32 %v18964_v13, %v18999_v6  ;;  %v15074_v23 = vmul.f32 %v18964_v13, %v19001_v35  ;;  %v19003_v1 = vld [vmem:[#allocation88_spill] sm:$0xff]  ;;  %v5387_v16 = vsel %vm2014_vm4, %v5385_v10, %v5386_v57  ;;  %v5390_v6 = vrot.slane %v14933_v15, 4  ;;  %v19004_v63 = vld [vmem:[#allocation77_spill] sm:$0xff] }
 0x447   : > { %v15082_v9 = vmul.f32 %v18964_v13, %v19003_v1  ;;  %v15089_v3 = vmul.f32 %v18964_v13, %v19004_v63  ;;  %v5516_v35 = vadd.f32 %v5382_v42, %v14780_v4  ;;  %v5517_v55 = vadd.f32 %v5384_v56, %v14784_v51  ;;  %v19005_v25 = vld [vmem:[#allocation64_spill] sm:$0xff]  ;;  %v19008_v56 = vld [vmem:[#allocation23_spill] sm:$0xff]  ;;  %v19009_v42 = vld [vmem:[#allocation86_spill] sm:$0xff] }
 0x448   : > { %v5518_v7 = vadd.f32 %v5383_v49, %v19005_v25  ;;  %v15096_v1 = vmul.f32 %v18964_v13, %v19006_v38  ;;  %v15100_v10 = vmul.f32 %v18964_v13, %v19007_v28  ;;  %v5389_v15 = vsel %vm2014_vm4, %v5386_v57, %v5388_v33  ;;  %v19010_v57 = vld [vmem:[#allocation17_spill] sm:$0xff]  ;;  %v19011_v21 = vld [vmem:[#allocation128_spill] sm:$0xff] }
 0x449   : > { %v5395_v63 = vrot.slane %v14945_v0, 4  ;;  %v5396_v4 = vrot.slane %v14949_v54, 4  ;;  %v5398_v51 = vrot.slane %v14953_v46, 4  ;;  %v5519_v49 = vadd.f32 %v5387_v16, %v19008_v56 }
 0x44a   : > { %v15110_v38 = vmul.f32 %v18964_v13, %v19009_v42  ;;  %v5392_v25 = vsel %vm2014_vm4, %v5390_v6, %v5391_v34  ;;  %v5400_v28 = vrot.slane %v14957_v5, 4  ;;  %v5520_v53 = vadd.f32 %v5389_v15, %v19010_v57 }
 0x44b   : > { %v5583_v60 = vadd.f32 %v14965_v45, %v5516_v35  ;;  %v5584_v0 = vadd.f32 %v14965_v45, %v5517_v55  ;;  %v5585_v54 = vadd.f32 %v14965_v45, %v5518_v7  ;;  %v5394_v46 = vsel %vm2014_vm4, %v5391_v34, %v5393_v22  ;;  %v19012_v34 = vld [vmem:[#allocation21_spill] sm:$0xff] }
 0x44c   : > { %v5403_v16 = vrot.slane %v15050_v52, 4  ;;  %v5405_v56 = vrot.slane %v5293_v26, 4  ;;  %v5406_v13 = vrot.slane %v15059_v41, 4  ;;  %v5397_v6 = vsel %vm2014_vm4, %v5395_v63, %v5396_v4 }
 0x44d   : > { %v5399_v5 = vsel %vm2014_vm4, %v5396_v4, %v5398_v51  ;;  %v5521_v42 = vadd.f32 %v5388_v33, %v19011_v21  ;;  %v5586_v15 = vadd.f32 %v14965_v45, %v5519_v49  ;;  %v5402_v35 = vsel %vm2014_vm4, %v5400_v28, %v5401_v58  ;;  %v19013_v28 = vld [vmem:[#allocation11_spill] sm:$0xff] }
 0x44e   : > { %v5408_v55 = vrot.slane %v15066_v40, 4  ;;  %v5410_v7 = vrot.slane %v15070_v27, 4  ;;  %v5522_v57 = vadd.f32 %v5392_v25, %v19012_v34  ;;  %v5587_v52 = vadd.f32 %v14965_v45, %v5520_v53 }
 0x44f   : > { %v5643_v26 = vmax.f32 %v5583_v60, 0.0  ;;  %v5644_v41 = vmax.f32 %v5584_v0, 0.0  ;;  %v5645_v44 = vmax.f32 %v5585_v54, 0.0  ;;  %v5404_v63 = vsel %vm2014_vm4, %v5401_v58, %v5403_v16 }
 0x450   : > { %v15132_v4 = vsel %vm2014_vm4, %v5405_v56, %v5406_v13  ;;  %v5411_v33 = vrot.slane %v15074_v23, 4  ;;  %v5413_v49 = vrot.slane %v15078_v11, 4  ;;  %v5523_v21 = vadd.f32 %v5394_v46, %v19013_v28 }
 0x451   : > { %v5524_v27 = vadd.f32 %v5393_v22, %v14856_v47  ;;  %v5588_v25 = vadd.f32 %v14965_v45, %v5521_v42  ;;  %v5646_v34 = vmax.f32 %v5586_v15, 0.0  ;;  %v5589_v53 = vadd.f32 %v14965_v45, %v5522_v57 }
 0x452   : > { %v5647_v60 = vmax.f32 %v5587_v52, 0.0  ;;  %v5704_v58 = vsel %vm5703_vm6, %v5643_v26, 0.0  ;;  %v5705_v0 = vsel %vm5703_vm6, %v5644_v41, 0.0  ;;  %v5708_v23 = vsel %vm5707_vm7, %v5645_v44, 0.0 }
 0x453   : > { %v6509_v54 = vmov 0.0|0.0   ;;  %v5409_v47 = vsel %vm2014_vm4, %v5406_v13, %v5408_v55  ;;  %v5415_v22 = vrot.slane %v15082_v9, 4  ;;  %v5525_v46 = vadd.f32 %v5397_v6, %v14859_v39 }
 0x454   : > { %6287 = vmatprep.subr.bf16.mxu0 %v6509_v54  ;;  %6293 = vmatprep.subr.bf16.mxu1 %v6509_v54  ;;  %v5706_v56 = vadd.f32 %v5705_v0, %v5704_v58  ;;  %v5416_v42 = vrot.slane %v15089_v3, 4  ;;  %v5590_v15 = vadd.f32 %v14965_v45, %v5523_v21  ;;  %v5648_v57 = vmax.f32 %v5588_v25, 0.0 }
 0x455   : > { %v5710_v44 = vsel %vm5703_vm6, %v5646_v34, 0.0  ;;  %v15154_v52 = vsel %vm2014_vm4, %v5410_v7, %v5411_v33  ;;  %v15159_v26 = vsel %vm2014_vm4, %v5411_v33, %v5413_v49  ;;  %v5526_v13 = vadd.f32 %v5399_v5, %v14862_v37 }
 0x456   : > { %v5709_v41 = vadd.f32 %v5708_v23, %v5706_v56  ;;  %v5527_v39 = vadd.f32 %v5398_v51, %v14869_v8  ;;  %v5591_v6 = vadd.f32 %v14965_v45, %v5524_v27  ;;  %v5649_v28 = vmax.f32 %v5589_v53, 0.0 }
 0x457   : > { %v5712_v21 = vsel %vm5703_vm6, %v5647_v60, 0.0  ;;  %v5528_v25 = vadd.f32 %v5402_v35, %v14872_v62  ;;  %v5529_v7 = vadd.f32 %v5404_v63, %v14875_v12  ;;  %v5592_v34 = vadd.f32 %v14965_v45, %v5525_v46 }
 0x458   : > { %v5711_v58 = vadd.f32 %v5710_v44, %v5709_v41  ;;  %v5650_v0 = vmax.f32 %v5590_v15, 0.0  ;;  %v5678_v33 = vmax.f32 %v14975_v31, 0.0  ;;  %v5681_v37 = vmax.f32 %v14984_v20, 0.0 }
 0x459   : > { %v5714_v5 = vsel %vm5707_vm7, %v5648_v57, 0.0  ;;  %v5530_v8 = vadd.f32 %v5403_v16, %v14880_v19  ;;  %v5593_v51 = vadd.f32 %v14965_v45, %v5526_v13  ;;  %v5684_v27 = vmax.f32 %v14993_v50, 0.0 }
 0x45a   : > { %v5713_v53 = vadd.f32 %v5712_v21, %v5711_v58  ;;  %v5594_v62 = vadd.f32 %v14965_v45, %v5527_v39  ;;  %v5651_v12 = vmax.f32 %v5591_v6, 0.0  ;;  %v5687_v35 = vmax.f32 %v15002_v43, 0.0  ;;  %v5911_v58 = vld [vmem:[%s15686_s6 + $0x8] sm:$0xff] }
 0x45b   : > { %v5716_v63 = vsel %vm5703_vm6, %v5649_v28, 0.0  ;;  %v5595_v31 = vadd.f32 %v14965_v45, %v5528_v25  ;;  %v5652_v60 = vmax.f32 %v5592_v34, 0.0  ;;  %v5690_v20 = vmax.f32 %v15011_v36, 0.0  ;;  %v5832_v25 = vld [vmem:[%s15685_s5] sm:$0xff] }
 0x45c   : > { %v5715_v23 = vadd.f32 %v5714_v5, %v5713_v53  ;;  %v5693_v19 = vmax.f32 %v15020_v17, 0.0  ;;  %v5718_v16 = vsel %vm5703_vm6, %v5650_v0, 0.0  ;;  %v15182_v50 = vsel %vm5707_vm7, %v5678_v33, 0.0  ;;  %v5910_v34 = vld [vmem:[%s15686_s6] sm:$0xff]  ;;  %v5913_v53 = vld [vmem:[%s15686_s6 + $0x18] sm:$0xff] }
 0x45d   : > { %v15185_v46 = vsel %vm5707_vm7, %v5681_v37, 0.0  ;;  %v5653_v56 = vmax.f32 %v5593_v51, 0.0  ;;  %v5696_v43 = vmax.f32 %v15029_v61, 0.0  ;;  %v15189_v57 = vsel %vm5707_vm7, %v5684_v27, 0.0  ;;  %v5835_v37 = vld [vmem:[%s15685_s5 + $0x18] sm:$0xff]  ;;  %v5912_v27 = vld [vmem:[%s15686_s6 + $0x10] sm:$0xff] }
 0x45e   : > { %v5717_v15 = vadd.f32 %v5716_v63, %v5715_v23  ;;  %v5699_v36 = vmax.f32 %v15038_v59, 0.0  ;;  %v5702_v44 = vmax.f32 %v15055_v2, 0.0  ;;  %v5720_v17 = vsel %vm5707_vm7, %v5651_v12, 0.0 }
 0x45f   : > { %v15195_v13 = vsel %vm5707_vm7, %v5687_v35, 0.0  ;;  %v5531_v41 = vadd.f32 %v15132_v4, %v14883_v24  ;;  %v5532_v39 = vadd.f32 %v5409_v47, %v14886_v48  ;;  %v15201_v61 = vsel %vm5707_vm7, %v5690_v20, 0.0  ;;  %v5833_v24 = vld [vmem:[%s15685_s5 + $0x8] sm:$0xff] }
 0x460   : > { %v5719_v6 = vadd.f32 %v5718_v16, %v5717_v15  ;;  %v5596_v28 = vadd.f32 %v14965_v45, %v5529_v7  ;;  %v5654_v21 = vmax.f32 %v5594_v62, 0.0  ;;  %v5722_v59 = vsel %vm5703_vm6, %v5652_v60, 0.0 }
 0x461   : > { %v15206_v2 = vsel %vm5707_vm7, %v5693_v19, 0.0  ;;  %v5533_v48 = vadd.f32 %v5408_v55, %v14891_v18  ;;  %v5597_v4 = vadd.f32 %v14965_v45, %v5530_v8  ;;  %v15219_v7 = vsel %vm5707_vm7, %v5696_v43, 0.0  ;;  %v5834_v55 = vld [vmem:[%s15685_s5 + $0x10] sm:$0xff] }
 0x462   : > { %v5721_v47 = vadd.f32 %v5720_v17, %v5719_v6  ;;  %v5655_v0 = vmax.f32 %v5595_v31, 0.0  ;;  %v5724_v33 = vsel %vm5703_vm6, %v5653_v56, 0.0  ;;  %v15229_v40 = vsel %vm5707_vm7, %v5699_v36, 0.0 }
 0x463   : > { %v15232_v18 = vsel %vm5707_vm7, %v5702_v44, 0.0  ;;  %v5598_v5 = vadd.f32 %v14965_v45, %v5531_v41  ;;  %v6288_v51 = vpack.c.bf16 %v5833_v24, %v5832_v25  ;;  %v5656_v62 = vmax.f32 %v5596_v28, 0.0  ;;  %v5914_v41 = vld [vmem:[%s15686_s6 + $0x20] sm:$0xff] }
 0x464   : > { %v5723_v8 = vadd.f32 %v5722_v59, %v5721_v47  ;;  %v5726_v12 = vsel %vm5707_vm7, %v5654_v21, 0.0  ;;  %v6294_v35 = vpack.c.bf16 %v5911_v58, %v5910_v34  ;;  %v5418_v63 = vrot.slane %v15096_v1, 4  ;;  %v19015_v25 = vld [vmem:[#allocation76_spill] sm:$0xff]  ;;  %v19017_v34 = vld [vmem:[#allocation78_spill] sm:$0xff] }
 0x465   : > { %v5534_v31 = vadd.f32 %v15154_v52, %v14894_v14  ;;  %6289 = vmatpush3.bf16.msra.mxu0 %v6288_v51  ;;  %v6291_v20 = vpack.c.bf16 %v5835_v37, %v5834_v55  ;;  %v6511_v23 = vmov 0.0   ;;  %v5599_v19 = vadd.f32 %v14965_v45, %v5532_v39  ;;  %v15258_v14 = vld [vmem:[%s15683_s3 + $0x8] ss:$0 sm:$0xff]  ;;  %v19014_v52 = vld [vmem:[#allocation79_spill] sm:$0xff] }
 0x466   : > { %v5725_v60 = vadd.f32 %v5724_v33, %v5723_v8  ;;  %6249 = vmatprep.mubr.msk.f32.mxu0 %vm6510_vm8, %v6511_v23  ;;  %v5657_v16 = vmax.f32 %v5597_v4, 0.0  ;;  %v5728_v56 = vsel %vm5703_vm6, %v5655_v0, 0.0  ;;  %6290 = vmatprep.subr.bf16.mxu0 %v6509_v54  ;;  %v6297_v43 = vpack.c.bf16 %v5913_v53, %v5912_v27  ;;  %v5915_v39 = vld [vmem:[%s15686_s6 + $0x28] sm:$0xff]  ;;  %v5917_v0 = vld [vmem:[%s15686_s6 + $0x38] sm:$0xff] }
 0x467   : > { %6295 = vmatpush3.bf16.msra.mxu1 %v6294_v35  ;;  %v15262_v15 = vmul.f32 %v15258_v14, %v19014_v52  ;;  %v5420_v36 = vrot.slane %v15100_v10, 4  ;;  %v5421_v44 = vrot.slane %v15110_v38, 4  ;;  %6284 = vmatprep.mubr.msk.f32.mxu1 %vm6510_vm8, %v6511_v23  ;;  %v5535_v6 = vadd.f32 %v15159_v26, %v14897_v30  ;;  %v19019_v33 = vld [vmem:[#allocation53_spill] sm:$0xff]  ;;  %v19020_v53 = vld [vmem:[#allocation67_spill] sm:$0xff]  ;;  %v19021_v23 = vld [vmem:[#allocation70_spill] sm:$0xff] }
 0x468   : > { %v5727_v17 = vadd.f32 %v5726_v12, %v5725_v60  ;;  %6296 = vmatprep.subr.bf16.mxu1 %v6509_v54  ;;  %v5600_v10 = vadd.f32 %v14965_v45, %v5533_v48  ;;  %v5658_v28 = vmax.f32 %v5598_v5, 0.0  ;;  %v5730_v38 = vsel %vm5703_vm6, %v5656_v62, 0.0 }
 0x469   : > { %v5417_v21 = vsel %vm2014_vm4, %v5415_v22, %v5416_v42  ;;  %v5419_v59 = vsel %vm2014_vm4, %v5416_v42, %v5418_v63  ;;  %v5536_v30 = vadd.f32 %v5413_v49, %v19015_v25  ;;  %6292 = vmatpush3.bf16.msra.mxu0 %v6291_v20  ;;  %v5601_v24 = vadd.f32 %v14965_v45, %v5534_v31  ;;  %v19016_v22 = vld [vmem:[#allocation106_spill] sm:$0xff] }
 0x46a   : > { %v5729_v26 = vadd.f32 %v5728_v56, %v5727_v17  ;;  %v5659_v48 = vmax.f32 %v5599_v19, 0.0  ;;  %v5732_v4 = vsel %vm5707_vm7, %v5657_v16, 0.0  ;;  %v6300_v9 = vpack.c.bf16 %v5915_v39, %v5914_v41  ;;  %v19018_v42 = vld [vmem:[#allocation90_spill] sm:$0xff]  ;;  %v19022_v19 = vld [vmem:[#allocation103_spill] sm:$0xff] }
 0x46b   : > { %6298 = vmatpush3.bf16.msra.mxu1 %v6297_v43  ;;  %v5305_v47 = vmul.f32 %v15258_v14, %v19016_v22  ;;  %v5306_v3 = vmul.f32 %v15258_v14, %v19017_v34  ;;  %v15299_v58 = vmul.f32 %v15258_v14, %v19018_v42  ;;  %v5916_v49 = vld [vmem:[%s15686_s6 + $0x30] sm:$0xff]  ;;  %v5537_v55 = vadd.f32 %v5417_v21, %v19019_v33  ;;  %v19024_v41 = vld [vmem:[#allocation99_spill] sm:$0xff]  ;;  %v19028_v22 = vld [vmem:[#allocation72_spill] sm:$0xff] }
 0x46c   : > { %v5731_v11 = vadd.f32 %v5730_v38, %v5729_v26  ;;  %6299 = vmatprep.subr.bf16.mxu1 %v6509_v54  ;;  %v5602_v37 = vadd.f32 %v14965_v45, %v5535_v6  ;;  %v5660_v5 = vmax.f32 %v5600_v10, 0.0  ;;  %v5734_v8 = vsel %vm5703_vm6, %v5658_v28, 0.0 }
 0x46d   : > { %v5422_v51 = vsel %vm2014_vm4, %v5420_v36, %v5421_v44  ;;  %v5423_v27 = vrot.slane %v15262_v15, 4  ;;  %v5538_v62 = vadd.f32 %v5419_v59, %v19020_v53  ;;  %v5603_v35 = vadd.f32 %v14965_v45, %v5536_v30  ;;  %v5918_v15 = vld [vmem:[%s15686_s6 + $0x40] sm:$0xff]  ;;  %v5919_v36 = vld [vmem:[%s15686_s6 + $0x48] sm:$0xff]  ;;  %v19025_v59 = vld [vmem:[#allocation71_spill] sm:$0xff] }
 0x46e   : > { %v5733_v12 = vadd.f32 %v5732_v4, %v5731_v11  ;;  %v5661_v31 = vmax.f32 %v5601_v24, 0.0  ;;  %v5736_v60 = vsel %vm5703_vm6, %v5659_v48, 0.0  ;;  %v6303_v20 = vpack.c.bf16 %v5917_v0, %v5916_v49  ;;  %v19027_v4 = vld [vmem:[#allocation81_spill] sm:$0xff]  ;;  %v5921_v11 = vld [vmem:[%s15686_s6 + $0x58] sm:$0xff]  ;;  %v19031_v49 = vld [vmem:[#allocation122_spill] sm:$0xff] }
 0x46f   : > { %6301 = vmatpush3.bf16.msra.mxu1 %v6300_v9  ;;  %v19023_v16 = vrot.slane %v19022_v19, 4  ;;  %v5425_v43 = vrot.slane %v5305_v47, 4  ;;  %v5426_v52 = vrot.slane %v5306_v3, 4  ;;  %v5539_v39 = vadd.f32 %v5418_v63, %v19024_v41  ;;  %v19026_v63 = vld [vmem:[#allocation56_spill] sm:$0xff]  ;;  %v19030_v3 = vld [vmem:[#allocation94_spill] sm:$0xff] }
 0x470   : > { %v5735_v17 = vadd.f32 %v5734_v8, %v5733_v12  ;;  %6302 = vmatprep.subr.bf16.mxu1 %v6509_v54  ;;  %v5604_v6 = vadd.f32 %v14965_v45, %v5537_v55  ;;  %v5662_v10 = vmax.f32 %v5602_v37, 0.0  ;;  %v5738_v28 = vsel %vm5707_vm7, %v5660_v5, 0.0  ;;  %v19029_v47 = vld [vmem:[#allocation92_spill] sm:$0xff]  ;;  %v19036_v41 = vld [vmem:[#allocation110_spill] sm:$0xff] }
 0x471   : > { %v5240_v56 = vadd.f32 %v19023_v16, %v19021_v23  ;;  %v5424_v38 = vsel %vm2014_vm4, %v5421_v44, %v5423_v27  ;;  %v5428_v21 = vrot.slane %v15299_v58, 4  ;;  %v5540_v25 = vadd.f32 %v5422_v51, %v19025_v59  ;;  %v5920_v58 = vld [vmem:[%s15686_s6 + $0x50] sm:$0xff] }
 0x472   : > { %v5737_v30 = vadd.f32 %v5736_v60, %v5735_v17  ;;  %v5605_v26 = vadd.f32 %v14965_v45, %v5538_v62  ;;  %v5663_v24 = vmax.f32 %v5603_v35, 0.0  ;;  %v5740_v48 = vsel %vm5703_vm6, %v5661_v31, 0.0  ;;  %v19032_v31 = vld [vmem:[#allocation45_spill] sm:$0xff]  ;;  %v19033_v60 = vld [vmem:[#allocation95_spill] sm:$0xff] }
 0x473   : > { %6304 = vmatpush3.bf16.msra.mxu1 %v6303_v20  ;;  %v6306_v1 = vpack.c.bf16 %v5919_v36, %v5918_v15  ;;  %v5241_v9 = vadd.f32 %v19027_v4, %v19026_v63  ;;  %v5242_v34 = vadd.f32 %v19029_v47, %v19028_v22  ;;  %v5308_v44 = vmul.f32 %v15258_v14, %v19030_v3  ;;  %v19035_v36 = vld [vmem:[#allocation49_spill] sm:$0xff] }
 0x474   : > { %v5739_v42 = vadd.f32 %v5738_v28, %v5737_v30  ;;  %6305 = vmatprep.subr.bf16.mxu1 %v6509_v54  ;;  %v5541_v0 = vadd.f32 %v5424_v38, %v19031_v49  ;;  %v5606_v33 = vadd.f32 %v14965_v45, %v5539_v39  ;;  %v5664_v55 = vmax.f32 %v5604_v6, 0.0  ;;  %v19039_v28 = vld [vmem:[#allocation108_spill] sm:$0xff] }
 0x475   : > { %v5742_v37 = vsel %vm5703_vm6, %v5662_v10, 0.0  ;;  %v5427_v14 = vsel %vm2014_vm4, %v5425_v43, %v5426_v52  ;;  %v5429_v5 = vsel %vm2014_vm4, %v5426_v52, %v5428_v21  ;;  %v5542_v8 = vadd.f32 %v5423_v27, %v5240_v56  ;;  %v5922_v43 = vld [vmem:[%s15686_s6 + $0x60] sm:$0xff]  ;;  %v5923_v27 = vld [vmem:[%s15686_s6 + $0x68] sm:$0xff]  ;;  %v19038_v10 = vld [vmem:[#allocation114_spill] sm:$0xff] }
 0x476   : > { %v5741_v51 = vadd.f32 %v5740_v48, %v5739_v42  ;;  %v5607_v53 = vadd.f32 %v14965_v45, %v5540_v25  ;;  %v5665_v62 = vmax.f32 %v5605_v26, 0.0  ;;  %v5744_v12 = vsel %vm5707_vm7, %v5663_v24, 0.0 }
 0x477   : > { %6307 = vmatpush3.bf16.msra.mxu1 %v6306_v1  ;;  %v6309_v35 = vpack.c.bf16 %v5921_v11, %v5920_v58  ;;  %v19034_v20 = vrot.slane %v19033_v60, 4  ;;  %v5430_v19 = vrot.slane %v5308_v44, 4  ;;  %v5543_v56 = vadd.f32 %v5427_v14, %v5241_v9  ;;  %v19040_v1 = vld [vmem:[#allocation63_spill] sm:$0xff]  ;;  %v19042_v44 = vld [vmem:[#allocation104_spill] sm:$0xff] }
 0x478   : > { %v5743_v16 = vadd.f32 %v5742_v37, %v5741_v51  ;;  %6308 = vmatprep.subr.bf16.mxu1 %v6509_v54  ;;  %v5608_v52 = vadd.f32 %v14965_v45, %v5541_v0  ;;  %v5666_v17 = vmax.f32 %v5606_v33, 0.0  ;;  %v5746_v15 = vsel %vm5703_vm6, %v5664_v55, 0.0  ;;  %v19044_v51 = vld [vmem:[#allocation24_spill] sm:$0xff] }
 0x479   : > { %v5243_v23 = vadd.f32 %v19034_v20, %v19032_v31  ;;  %v19037_v39 = vrot.slane %v19036_v41, 4  ;;  %v5244_v38 = vadd.f32 %v19039_v28, %v19038_v10  ;;  %v5544_v59 = vadd.f32 %v5429_v5, %v5242_v34  ;;  %v19046_v20 = vld [vmem:[#allocation27_spill] sm:$0xff] }
 0x47a   : > { %v5745_v25 = vadd.f32 %v5744_v12, %v5743_v16  ;;  %v5609_v30 = vadd.f32 %v14965_v45, %v5542_v8  ;;  %v5667_v26 = vmax.f32 %v5607_v53, 0.0  ;;  %v5748_v24 = vsel %vm5703_vm6, %v5665_v62, 0.0 }
 0x47b   : > { %v4930_v6 = vadd.f32 %v19037_v39, %v19035_v36  ;;  %6310 = vmatpush3.bf16.msra.mxu1 %v6309_v35  ;;  %v6312_v48 = vpack.c.bf16 %v5923_v27, %v5922_v43  ;;  %v19041_v63 = vrot.slane %v19040_v1, 4  ;;  %v5545_v22 = vadd.f32 %v5428_v21, %v5243_v23 }
 0x47c   : > { %v5747_v9 = vadd.f32 %v5746_v15, %v5745_v25  ;;  %6311 = vmatprep.subr.bf16.mxu1 %v6509_v54  ;;  %v5610_v47 = vadd.f32 %v14965_v45, %v5543_v56  ;;  %v5668_v3 = vmax.f32 %v5608_v52, 0.0  ;;  %v5750_v34 = vsel %vm5707_vm7, %v5666_v17, 0.0 }
 0x47d   : > { %v5432_v4 = vsel %vm2014_vm4, %v5430_v19, %v19041_v63  ;;  %v19043_v42 = vrot.slane %v19042_v44, 4  ;;  %v5611_v0 = vadd.f32 %v14965_v45, %v5544_v59  ;;  %v5669_v33 = vmax.f32 %v5609_v30, 0.0 }
 0x47e   : > { %v5749_v11 = vadd.f32 %v5748_v24, %v5747_v9  ;;  %v5546_v49 = vadd.f32 %v5432_v4, %v5244_v38  ;;  %v5752_v55 = vsel %vm5703_vm6, %v5667_v26, 0.0  ;;  %v5612_v21 = vadd.f32 %v14965_v45, %v5545_v22  ;;  %v19047_v24 = vld [vmem:[#allocation115_spill] sm:$0xff]  ;;  %v19048_v4 = vld [vmem:[#allocation26_spill] sm:$0xff] }
 0x47f   : > { %v5246_v58 = vadd.f32 %v19043_v42, %v4930_v6  ;;  %6313 = vmatpush3.bf16.msra.mxu1 %v6312_v48  ;;  %v5670_v14 = vmax.f32 %v5610_v47, 0.0  ;;  %v5754_v5 = vsel %vm5703_vm6, %v5668_v3, 0.0  ;;  %v19045_v53 = vrot.slane %v19044_v51, 4  ;;  %v19049_v3 = vld [vmem:[#allocation74_spill] sm:$0xff]  ;;  %v19050_v42 = vld [vmem:[#allocation61_spill] sm:$0xff] }
 0x480   : > { %v5751_v37 = vadd.f32 %v5750_v34, %v5749_v11  ;;  %6314 = vmatprep.subr.bf16.mxu1 %v6509_v54  ;;  %v5613_v12 = vadd.f32 %v14965_v45, %v5546_v49  ;;  %v5671_v35 = vmax.f32 %v5611_v0, 0.0  ;;  %v5756_v31 = vsel %vm5707_vm7, %v5669_v33, 0.0  ;;  %v19051_v33 = vld [vmem:[#allocation28_spill] sm:$0xff] }
 0x481   : > { %v5548_v62 = vadd.f32 %v19045_v53, %v5246_v58  ;;  %v5614_v23 = vadd.f32 %v14965_v45, %v19046_v20  ;;  %v5672_v19 = vmax.f32 %v5612_v21, 0.0  ;;  %v5758_v54 = vsel %vm5703_vm6, %v5670_v14, 0.0  ;;  %v19052_v14 = vld [vmem:[#allocation123_spill] sm:$0xff]  ;;  %v19053_v53 = vld [vmem:[#allocation32_spill] sm:$0xff] }
 0x482   : > { %v5753_v8 = vadd.f32 %v5752_v55, %v5751_v37  ;;  %v5673_v27 = vmax.f32 %v5613_v12, 0.0  ;;  %v5760_v56 = vsel %vm5703_vm6, %v5671_v35, 0.0  ;;  %v5676_v10 = vmax.f32 %v14969_v32, 0.0 }
 0x483   : > { %v5615_v43 = vadd.f32 %v14965_v45, %v5548_v62  ;;  %v5674_v17 = vmax.f32 %v5614_v23, 0.0  ;;  %v5762_v15 = vsel %vm5707_vm7, %v5672_v19, 0.0  ;;  %v5677_v59 = vmax.f32 %v14972_v29, 0.0  ;;  %v19055_v19 = vld [vmem:[#allocation101_spill] sm:$0xff] }
 0x484   : > { %v5755_v60 = vadd.f32 %v5754_v5, %v5753_v8  ;;  %v5764_v39 = vsel %vm5703_vm6, %v5673_v27, 0.0  ;;  %v5770_v30 = vsel %vm5703_vm6, %v5676_v10, 0.0  ;;  %v5679_v48 = vmax.f32 %v19047_v24, 0.0  ;;  %v19056_v27 = vld [vmem:[#allocation15_spill] sm:$0xff] }
 0x485   : > { %v5675_v41 = vmax.f32 %v5615_v43, 0.0  ;;  %v5766_v28 = vsel %vm5703_vm6, %v5674_v17, 0.0  ;;  %v5772_v1 = vsel %vm5703_vm6, %v5677_v59, 0.0  ;;  %v5680_v9 = vmax.f32 %v19048_v4, 0.0  ;;  %v19059_v59 = vld [vmem:[#allocation46_spill] sm:$0xff] }
 0x486   : > { %v5757_v16 = vadd.f32 %v5756_v31, %v5755_v60  ;;  %v5776_v32 = vsel %vm5703_vm6, %v5679_v48, 0.0  ;;  %v5682_v29 = vmax.f32 %v19049_v3, 0.0  ;;  %v5683_v58 = vmax.f32 %v19050_v42, 0.0  ;;  %v19054_v31 = vld [vmem:[#allocation50_spill] sm:$0xff] }
 0x487   : > { %v5768_v45 = vsel %vm5707_vm7, %v5675_v41, 0.0  ;;  %v5778_v34 = vsel %vm5703_vm6, %v5680_v9, 0.0  ;;  %v5685_v55 = vmax.f32 %v19051_v33, 0.0  ;;  %v5686_v5 = vmax.f32 %v19052_v14, 0.0 }
 0x488   : > { %v5759_v52 = vadd.f32 %v5758_v54, %v5757_v16  ;;  %v5782_v49 = vsel %vm5703_vm6, %v5682_v29, 0.0  ;;  %v5784_v37 = vsel %vm5703_vm6, %v5683_v58, 0.0  ;;  %v5688_v62 = vmax.f32 %v19053_v53, 0.0 }
 0x489   : > { %v5788_v8 = vsel %vm5703_vm6, %v5685_v55, 0.0  ;;  %v5790_v12 = vsel %vm5703_vm6, %v5686_v5, 0.0  ;;  %v5689_v60 = vmax.f32 %v19054_v31, 0.0  ;;  %v5691_v54 = vmax.f32 %v19055_v19, 0.0  ;;  %v19063_v31 = vld [vmem:[#allocation13_spill] sm:$0xff] }
 0x48a   : > { %v5761_v36 = vadd.f32 %v5760_v56, %v5759_v52  ;;  %v5794_v20 = vsel %vm5703_vm6, %v5688_v62, 0.0  ;;  %v5692_v56 = vmax.f32 %v19056_v27, 0.0  ;;  %v6377_v19 = vld [vmem:[%s6667_s15 + $0x8] sm:$0xff]  ;;  %v6379_v27 = vld [vmem:[%s6667_s15 + $0x18] sm:$0xff] }
 0x48b   : > { %v5796_v16 = vsel %vm5703_vm6, %v5689_v60, 0.0  ;;  %v5800_v52 = vsel %vm5703_vm6, %v5691_v54, 0.0 }
 0x48c   : > { %v5763_v6 = vadd.f32 %v5762_v15, %v5761_v36  ;;  %v19057_v15 = vld [vmem:[#allocation58_spill] sm:$0xff]  ;;  %v5802_v41 = vsel %vm5703_vm6, %v5692_v56, 0.0 }
 0x48d   : > { %v5694_v36 = vmax.f32 %v19057_v15, 0.0 }
 0x48e   : > { %v5765_v38 = vadd.f32 %v5764_v39, %v5763_v6  ;;  %v19058_v6 = vld [vmem:[#allocation124_spill] sm:$0xff] }
 0x48f   : > { %v5695_v10 = vmax.f32 %v19058_v6, 0.0 }
 0x490   : > { %v5767_v25 = vadd.f32 %v5766_v28, %v5765_v38  ;;  %v5806_v28 = vsel %vm5703_vm6, %v5694_v36, 0.0  ;;  %v6382_v36 = vld [vmem:[%s6667_s15 + $0x30] sm:$0xff] }
 0x492   : > { %v5769_v26 = vadd.f32 %v5768_v45, %v5767_v25  ;;  %v5697_v45 = vmax.f32 %v19059_v59, 0.0  ;;  %v5808_v25 = vsel %vm5703_vm6, %v5695_v10, 0.0  ;;  %v6384_v10 = vld [vmem:[%s6667_s15 + $0x40] sm:$0xff]  ;;  %v6386_v59 = vld [vmem:[%s6667_s15 + $0x50] sm:$0xff] }
 0x494   : > { %v5771_v63 = vadd.f32 %v5770_v30, %v5769_v26  ;;  %v19060_v26 = vld [vmem:[#allocation33_spill] sm:$0xff]  ;;  %v5812_v48 = vsel %vm5703_vm6, %v5697_v45, 0.0 }
 0x495   : > { %v5698_v24 = vmax.f32 %v19060_v26, 0.0  ;;  %v6388_v26 = vld [vmem:[%s6667_s15 + $0x60] sm:$0xff] }
 0x496   : > { %v5773_v22 = vadd.f32 %v5772_v1, %v5771_v63  ;;  %v19061_v63 = vld [vmem:[#allocation75_spill] sm:$0xff] }
 0x497   : > { %v5700_v4 = vmax.f32 %v19061_v63, 0.0  ;;  %v5814_v9 = vsel %vm5703_vm6, %v5698_v24, 0.0 }
 0x498   : > { %v5775_v47 = vadd.f32 %v15182_v50, %v5773_v22 }
 0x499   : > { %v5818_v3 = vsel %vm5703_vm6, %v5700_v4, 0.0  ;;  %v6391_v4 = vld [vmem:[%s6667_s15 + $0x78] sm:$0xff] }
 0x49a   : > { %v5777_v44 = vadd.f32 %v5776_v32, %v5775_v47  ;;  %v19062_v32 = vld [vmem:[#allocation85_spill] sm:$0xff] }
 0x49b   : > { %v5701_v47 = vmax.f32 %v19062_v32, 0.0 }
 0x49c   : > { %v5779_v11 = vadd.f32 %v5778_v34, %v5777_v44 }
 0x49d   : > { %v5820_v34 = vsel %vm5703_vm6, %v5701_v47, 0.0  ;;  %v6393_v47 = vld [vmem:[%s6667_s15 + $0x88] sm:$0xff] }
 0x49e   : > { %v5781_v0 = vadd.f32 %v15185_v46, %v5779_v11 }
 0x4a0   : > { %v5783_v21 = vadd.f32 %v5782_v49, %v5781_v0 }
 0x4a2   : > { %v5785_v50 = vadd.f32 %v5784_v37, %v5783_v21  ;;  %v5924_v21 = vld [vmem:[%s15686_s6 + $0x70] sm:$0xff] }
 0x4a4   : > { %v5787_v51 = vadd.f32 %v15189_v57, %v5785_v50 }
 0x4a6   : > { %v5789_v35 = vadd.f32 %v5788_v8, %v5787_v51 }
 0x4a8   : > { %v5791_v46 = vadd.f32 %v5790_v12, %v5789_v35 }
 0x4aa   : > { %v5793_v23 = vadd.f32 %v15195_v13, %v5791_v46 }
 0x4ac   : > { %v5795_v43 = vadd.f32 %v5794_v20, %v5793_v23  ;;  %v6376_v20 = vld [vmem:[%s6667_s15] sm:$0xff] }
 0x4ae   : > { %v5797_v57 = vadd.f32 %v5796_v16, %v5795_v43  ;;  %v6378_v16 = vld [vmem:[%s6667_s15 + $0x10] sm:$0xff] }
 0x4b0   : > { %v5799_v17 = vadd.f32 %v15201_v61, %v5797_v57  ;;  %v6380_v57 = vld [vmem:[%s6667_s15 + $0x20] sm:$0xff] }
 0x4b2   : > { %v5801_v39 = vadd.f32 %v5800_v52, %v5799_v17  ;;  %v6381_v17 = vld [vmem:[%s6667_s15 + $0x28] sm:$0xff] }
 0x4b4   : > { %v5803_v13 = vadd.f32 %v5802_v41, %v5801_v39  ;;  %v6383_v39 = vld [vmem:[%s6667_s15 + $0x38] sm:$0xff] }
 0x4b6   : > { %v5805_v38 = vadd.f32 %v15206_v2, %v5803_v13 }
 0x4b8   : > { %v5807_v30 = vadd.f32 %v5806_v28, %v5805_v38  ;;  %v6385_v28 = vld [vmem:[%s6667_s15 + $0x48] sm:$0xff] }
 0x4ba   : > { %v5809_v61 = vadd.f32 %v5808_v25, %v5807_v30  ;;  %v6387_v25 = vld [vmem:[%s6667_s15 + $0x58] sm:$0xff] }
 0x4bc   : > { %v5811_v1 = vadd.f32 %v15219_v7, %v5809_v61  ;;  %v6389_v61 = vld [vmem:[%s6667_s15 + $0x68] sm:$0xff] }
 0x4be   : > { %v5813_v22 = vadd.f32 %v5812_v48, %v5811_v1  ;;  %v6390_v1 = vld [vmem:[%s6667_s15 + $0x70] sm:$0xff] }
 0x4c0   : > { %v5815_v2 = vadd.f32 %v5814_v9, %v5813_v22  ;;  %v6392_v22 = vld [vmem:[%s6667_s15 + $0x80] sm:$0xff] }
 0x4c2   : > { %v5817_v29 = vadd.f32 %v15229_v40, %v5815_v2  ;;  %v5925_v40 = vld [vmem:[%s15686_s6 + $0x78] sm:$0xff] }
 0x4c3   : > { %v6315_v14 = vpack.c.bf16 %v5925_v40, %v5924_v21  ;;  %v6401_v40 = vld [vmem:[%s6667_s15 + $0xc8] sm:$0xff] }
 0x4c4   : > { %v5819_v44 = vadd.f32 %v5818_v3, %v5817_v29  ;;  %v6394_v3 = vld [vmem:[%s6667_s15 + $0x90] sm:$0xff] }
 0x4c5   : > { %6316 = vmatpush3.bf16.msra.mxu1 %v6315_v14 }
 0x4c6   : > { %v5821_v42 = vadd.f32 %v5820_v34, %v5819_v44  ;;  %v6395_v34 = vld [vmem:[%s6667_s15 + $0x98] sm:$0xff] }
 0x4c8   : > { %v5823_v58 = vadd.f32 %v15232_v18, %v5821_v42  ;;  %v6396_v42 = vld [vmem:[%s6667_s15 + $0xa0] sm:$0xff] }
 0x4ca   : > { %v5824_v11 = vrot.slane %v5823_v58, 4 }
 0x4cc   : > { %v5825_v7 = vadd.f32 %v5824_v11, %v5823_v58  ;;  %v6397_v11 = vld [vmem:[%s6667_s15 + $0xa8] sm:$0xff] }
 0x4ce   : > { %v5826_v49 = vrot.slane %v5825_v7, 2 }
 0x4d0   : > { %v5827_v0 = vadd.f32 %v5826_v49, %v5825_v7  ;;  %v6398_v49 = vld [vmem:[%s6667_s15 + $0xb0] sm:$0xff] }
 0x4d2   : > { %v5828_v33 = vrot.slane %v5827_v0, 1 }
 0x4d4   : > { %v5829_v55 = vadd.f32 %v5828_v33, %v5827_v0  ;;  %v6399_v33 = vld [vmem:[%s6667_s15 + $0xb8] sm:$0xff] }
 0x4d6   : > { %v5831_v37 = vmul.f32 0.0025, %v5829_v55 }
 0x4d8   : > { %6250 = vmatmul.mubr.msk.f32.vlgmr.msra.gmra.mrb[0].mxu0 %vm5703_vm6, %v5831_v37  ;;  %v6400_v37 = vld [vmem:[%s6667_s15 + $0xc0] sm:$0xff] }
 0x5ab   : > { %v5905_v18 = vpop.f32.mrb[0].mxu0 }
 0x5ac   : > { %v5909_v5 = vmax.f32 %v5905_v18, 0.0  ;;  %v6251_v50 = vpop.f32.mrb[1].mxu0  ;;  %v6402_v18 = vld [vmem:[%s6667_s15 + $0xd0] sm:$0xff] }
 0x5ad   : > { %v6403_v50 = vld [vmem:[%s6667_s15 + $0xd8] sm:$0xff] }
 0x5ae   : > { %6285 = vmatmul.mubr.f32.vlgmr.msra.gmra.mrb[0].mxu1 %v5909_v5 }
 0x681   : > { %v5992_v8 = vpop.f32.mrb[0].mxu1 }
 0x682   : > { %v6286_v51 = vpop.f32.mrb[1].mxu1  ;;  %v5996_v53 = vmax.f32 %v5992_v8, 0.0 }
 0x684   : > { %v6033_v62 = vsub.f32 1.0, %v5996_v53  ;;  %v15455_v46 = vrot.slane %v5996_v53, %v19063_v31 }
 0x686   : > { %6035 = vrot.lane.b32.xlu0 %v6033_v62, %s6512_s19  ;;  %v15459_v23 = vmul.f32 %v6376_v20, %v15455_v46  ;;  %v15463_v54 = vmul.f32 %v6377_v19, %v15455_v46  ;;  %v6003_v43 = vmul.f32 %v6378_v16, %v15455_v46  ;;  %v6004_v56 = vmul.f32 %v6379_v27, %v15455_v46  ;;  %v6407_v20 = vld [vmem:[%s6667_s15 + $0xf8] sm:$0xff] }
 0x687   : > { %v6005_v52 = vmul.f32 %v6380_v57, %v15455_v46  ;;  %v6006_v15 = vmul.f32 %v6381_v17, %v15455_v46  ;;  %v6007_v41 = vmul.f32 %v6382_v36, %v15455_v46  ;;  %v6008_v6 = vmul.f32 %v6383_v39, %v15455_v46 }
 0x688   : > { %v6009_v13 = vmul.f32 %v6384_v10, %v15455_v46  ;;  %v6010_v38 = vmul.f32 %v6385_v28, %v15455_v46  ;;  %v6011_v45 = vmul.f32 %v6386_v59, %v15455_v46  ;;  %v6012_v30 = vmul.f32 %v6387_v25, %v15455_v46 }
 0x689   : > { %v6013_v24 = vmul.f32 %v6388_v26, %v15455_v46  ;;  %v6014_v48 = vmul.f32 %v6389_v61, %v15455_v46  ;;  %v6015_v63 = vmul.f32 %v6390_v1, %v15455_v46  ;;  %v6016_v9 = vmul.f32 %v6391_v4, %v15455_v46 }
 0x68a   : > { %v6017_v32 = vmul.f32 %v6392_v22, %v15455_v46  ;;  %v6018_v2 = vmul.f32 %v6393_v47, %v15455_v46  ;;  %v6019_v29 = vmul.f32 %v6394_v3, %v15455_v46  ;;  %v6020_v44 = vmul.f32 %v6395_v34, %v15455_v46 }
 0x68b   : > { %v6021_v58 = vmul.f32 %v6396_v42, %v15455_v46  ;;  %v6022_v7 = vmul.f32 %v6397_v11, %v15455_v46  ;;  %v6023_v0 = vmul.f32 %v6398_v49, %v15455_v46  ;;  %v6024_v55 = vmul.f32 %v6399_v33, %v15455_v46 }
 0x68c   : > { %v6025_v21 = vmul.f32 %v6400_v37, %v15455_v46  ;;  %v6026_v14 = vmul.f32 %v6401_v40, %v15455_v46  ;;  %v6027_v5 = vmul.f32 %v6402_v18, %v15455_v46  ;;  %v6028_v8 = vmul.f32 %v6403_v50, %v15455_v46 }
 0x68d   : > { %v6032_v19 = vmul.f32 %v6407_v20, %v15455_v46 }
 0x6f8   : > { %v6036_v12 = vpop.permute.xlu0 %6035 }
 0x6f9   : > { %v6038_v35 = vmul.f32 %v6036_v12, %v5996_v53  ;;  %v6404_v53 = vld [vmem:[%s6667_s15 + $0xe0] sm:$0xff]  ;;  %v6405_v12 = vld [vmem:[%s6667_s15 + $0xe8] sm:$0xff] }
 0x6fa   : > { %v6029_v62 = vmul.f32 %v6404_v53, %v15455_v46 }
 0x6fb   : > { %v6042_v60 = vrot.slane %v6038_v35, %v19063_v31  ;;  %v6030_v35 = vmul.f32 %v6405_v12, %v15455_v46  ;;  %v6406_v31 = vld [vmem:[%s6667_s15 + $0xf0] sm:$0xff]  ;;  %s15543_s15 = scalar_lea.vmem [#allocation5], %s6205_s17  ;;  %s6218_s17 = sshll.u32 %s6578_s28, 12 }
 0x6fc   : > { %s6125_s9 = sshll.u32 %s15543_s15, 4  ;;  %s15606_s11 = scalar_lea.hbm %s15687_s7, %s6218_s17  ;;  %s15608_s9 = int_to_ptr.vmem [resolvable:$true] %s6125_s9 }
 0x6fd   : > { %6044 = vrot.lane.b32.xlu0 %v6042_v60, %s6513_s21  ;;  %v6031_v60 = vmul.f32 %v6406_v31, %v15455_v46  ;;  %s6438_s12 = scalar_lea.vmem %s15608_s9, 4096  ;;  %p6445_p8 = scmp.lt.s32.totalorder %s15608_s9, %s6443_s22 }
 0x6fe   : > { %p6439_p6 = scmp.ne.s32.totalorder %s15608_s9, %s6438_s12  ;;  %p6446_p10 = scmp.lt.s32.totalorder %s6444_s23, %s6438_s12 }
 0x700   : > { %p6440_p12 = pnand %p6439_p6, %p19064_p11  ;;  %p6447_p0 = por %p6446_p10, %p6445_p8 }
 0x702   : > { %p6441_p13 = pneg %p6440_p12 }
 0x704   : > { %p6448_p2 = pnand %p6447_p0, %p6441_p13 }
 0x76f   : > { %v15517_v51 = vpop.permute.xlu0 %6044 }
 0x770   : > { %v6047_v16 = vadd.f32 %v15517_v51, %v15459_v23  ;;  %v6048_v27 = vadd.f32 %v15517_v51, %v15463_v54  ;;  %v6049_v57 = vadd.f32 %v15517_v51, %v6003_v43  ;;  %v6050_v17 = vadd.f32 %v15517_v51, %v6004_v56 }
 0x771   : > { %v6051_v36 = vadd.f32 %v15517_v51, %v6005_v52  ;;  %v6052_v39 = vadd.f32 %v15517_v51, %v6006_v15  ;;  %v6053_v10 = vadd.f32 %v15517_v51, %v6007_v41  ;;  %v6054_v28 = vadd.f32 %v15517_v51, %v6008_v6 }
 0x772   : > { %v6055_v46 = vadd.f32 %v15517_v51, %v6009_v13  ;;  %v6056_v59 = vadd.f32 %v15517_v51, %v6010_v38  ;;  %v6057_v23 = vadd.f32 %v15517_v51, %v6011_v45  ;;  %v6058_v54 = vadd.f32 %v15517_v51, %v6012_v30  ;;  %6079 = vst.msk [vmem:[%s15543_s15] sm:$0xff] %vm5703_vm6, %v6047_v16 }
 0x773   : > { %6080 = vst.msk [vmem:[%s15543_s15 + $0x8] sm:$0xff] %vm5703_vm6, %v6048_v27  ;;  %6081 = vst.msk [vmem:[%s15543_s15 + $0x10] sm:$0xff] %vm5703_vm6, %v6049_v57  ;;  %v6059_v43 = vadd.f32 %v15517_v51, %v6013_v24  ;;  %v6060_v56 = vadd.f32 %v15517_v51, %v6014_v48  ;;  %v6061_v52 = vadd.f32 %v15517_v51, %v6015_v63 }
 0x774   : > { %6082 = vst.msk [vmem:[%s15543_s15 + $0x18] sm:$0xff] %vm5703_vm6, %v6050_v17  ;;  %v6062_v15 = vadd.f32 %v15517_v51, %v6016_v9  ;;  %6083 = vst.msk [vmem:[%s15543_s15 + $0x20] sm:$0xff] %vm5703_vm6, %v6051_v36  ;;  %v6063_v41 = vadd.f32 %v15517_v51, %v6017_v32  ;;  %v6064_v6 = vadd.f32 %v15517_v51, %v6018_v2 }
 0x775   : > { %6084 = vst.msk [vmem:[%s15543_s15 + $0x28] sm:$0xff] %vm5703_vm6, %v6052_v39  ;;  %6085 = vst.msk [vmem:[%s15543_s15 + $0x30] sm:$0xff] %vm5703_vm6, %v6053_v10  ;;  %v6065_v13 = vadd.f32 %v15517_v51, %v6019_v29  ;;  %v6066_v38 = vadd.f32 %v15517_v51, %v6020_v44  ;;  %v6067_v45 = vadd.f32 %v15517_v51, %v6021_v58 }
 0x776   : > { %6086 = vst.msk [vmem:[%s15543_s15 + $0x38] sm:$0xff] %vm5703_vm6, %v6054_v28  ;;  %6087 = vst.msk [vmem:[%s15543_s15 + $0x40] sm:$0xff] %vm5703_vm6, %v6055_v46  ;;  %v6068_v25 = vadd.f32 %v15517_v51, %v6022_v7  ;;  %v6069_v30 = vadd.f32 %v15517_v51, %v6023_v0  ;;  %v6070_v26 = vadd.f32 %v15517_v51, %v6024_v55 }
 0x777   : > { %6088 = vst.msk [vmem:[%s15543_s15 + $0x48] sm:$0xff] %vm5703_vm6, %v6056_v59  ;;  %6089 = vst.msk [vmem:[%s15543_s15 + $0x50] sm:$0xff] %vm5703_vm6, %v6057_v23  ;;  %v6071_v24 = vadd.f32 %v15517_v51, %v6025_v21  ;;  %v6072_v61 = vadd.f32 %v15517_v51, %v6026_v14  ;;  %v6073_v48 = vadd.f32 %v15517_v51, %v6027_v5 }
 0x778   : > { %6090 = vst.msk [vmem:[%s15543_s15 + $0x58] sm:$0xff] %vm5703_vm6, %v6058_v54  ;;  %6091 = vst.msk [vmem:[%s15543_s15 + $0x60] sm:$0xff] %vm5703_vm6, %v6059_v43  ;;  %v6074_v1 = vadd.f32 %v15517_v51, %v6028_v8  ;;  %v6075_v63 = vadd.f32 %v15517_v51, %v6029_v62  ;;  %v6076_v4 = vadd.f32 %v15517_v51, %v6030_v35 }
 0x779   : > { %6092 = vst.msk [vmem:[%s15543_s15 + $0x68] sm:$0xff] %vm5703_vm6, %v6060_v56  ;;  %6093 = vst.msk [vmem:[%s15543_s15 + $0x70] sm:$0xff] %vm5703_vm6, %v6061_v52  ;;  %v6077_v9 = vadd.f32 %v15517_v51, %v6031_v60  ;;  %v6078_v22 = vadd.f32 %v15517_v51, %v6032_v19 }
 0x77a   : > { %6094 = vst.msk [vmem:[%s15543_s15 + $0x78] sm:$0xff] %vm5703_vm6, %v6062_v15  ;;  %6095 = vst.msk [vmem:[%s15543_s15 + $0x80] sm:$0xff] %vm5703_vm6, %v6063_v41 }
 0x77b   : > { %6096 = vst.msk [vmem:[%s15543_s15 + $0x88] sm:$0xff] %vm5703_vm6, %v6064_v6  ;;  %6097 = vst.msk [vmem:[%s15543_s15 + $0x90] sm:$0xff] %vm5703_vm6, %v6065_v13 }
 0x77c   : > { %6098 = vst.msk [vmem:[%s15543_s15 + $0x98] sm:$0xff] %vm5703_vm6, %v6066_v38  ;;  %6099 = vst.msk [vmem:[%s15543_s15 + $0xa0] sm:$0xff] %vm5703_vm6, %v6067_v45 }
 0x77d   : > { %6100 = vst.msk [vmem:[%s15543_s15 + $0xa8] sm:$0xff] %vm5703_vm6, %v6068_v25  ;;  %6101 = vst.msk [vmem:[%s15543_s15 + $0xb0] sm:$0xff] %vm5703_vm6, %v6069_v30 }
 0x77e   : > { %6102 = vst.msk [vmem:[%s15543_s15 + $0xb8] sm:$0xff] %vm5703_vm6, %v6070_v26  ;;  %6103 = vst.msk [vmem:[%s15543_s15 + $0xc0] sm:$0xff] %vm5703_vm6, %v6071_v24 }
 0x77f   : > { %6104 = vst.msk [vmem:[%s15543_s15 + $0xc8] sm:$0xff] %vm5703_vm6, %v6072_v61  ;;  %6105 = vst.msk [vmem:[%s15543_s15 + $0xd0] sm:$0xff] %vm5703_vm6, %v6073_v48 }
 0x780   : > { %6106 = vst.msk [vmem:[%s15543_s15 + $0xd8] sm:$0xff] %vm5703_vm6, %v6074_v1  ;;  %6107 = vst.msk [vmem:[%s15543_s15 + $0xe0] sm:$0xff] %vm5703_vm6, %v6075_v63 }
 0x781   : > { %6108 = vst.msk [vmem:[%s15543_s15 + $0xe8] sm:$0xff] %vm5703_vm6, %v6076_v4  ;;  %6109 = vst.msk [vmem:[%s15543_s15 + $0xf0] sm:$0xff] %vm5703_vm6, %v6077_v9 }
 0x782   : > { %6110 = vst.msk [vmem:[%s15543_s15 + $0xf8] sm:$0xff] %vm5703_vm6, %v6078_v22 }
 0x783   : > { %6451 = shalt.err (!%p6448_p2)
}
 0x784   : > { %s6452_s29 = scalar_lea.hbm %s15606_s11, 4096  ;;  %s6456_s15 = scalar_lea.hbm %s15687_s7, 8192 }
 0x785   : > { %p6453_p4 = scmp.ne.s32.totalorder %s15606_s11, %s6452_s29  ;;  %p6457_p9 = scmp.lt.u32.totalorder %s15606_s11, %s15687_s7 }
 0x786   : > { %p6458_p1 = scmp.lt.u32.totalorder %s6456_s15, %s6452_s29  ;;  %p6460_p6 = scmp.lt.u32.totalorder %s6452_s29, %s15606_s11 }
 0x787   : > { %p6454_p5 = pnand %p6453_p4, %p19064_p11 }
 0x788   : > { %p6459_p3 = por %p6458_p1, %p6457_p9 }
 0x789   : > { %p6455_p7 = pneg %p6454_p5 }
 0x78a   : > { %p6461_p12 = por %p6460_p6, %p6459_p3 }
 0x78c   : > { %p6462_p13 = pnand %p6461_p12, %p6455_p7 }
 0x78e   : > { %6465 = shalt.err (!%p6462_p13)
}
 0x78f   : > { %s6515_s8 = smov 128   ;;  %s6516_s12 = smov 8  }
 0x790   : > { %6319 = dma.vmem_to_hbm [thread:$0]  (%p19064_p11), %s15608_s9, 4096, %s15606_s11, %s6112_s18, %s6515_s8, %s6515_s8, %s6516_s12  }
 0x791 PF: > { %s6140_s20 = sand.u32 1, %s6492_s24   ;;  %p19065_p8 = scmp.ne.s32.totalorder %s16172_s14, 0 }
 0x792   : > { %p19066_p10 = scmp.ge.s32.totalorder %s6504_s27, 2  ;;  %s6141_s22 = scalar_lea.sflag [#allocation4], %s6140_s20 }
 0x794   : > { %p6326_p0 = pnand %p19066_p10, %p19065_p8 }
 0x796   : > { %6487 = dma.done.wait (!%p6326_p0), %s6141_s22, 4096  }
 0x797   : > { %6489 = vsyncadd (!%p6326_p0), %s6141_s22, 4294963200  ;;  %p20_p2 = scmp.ge.s32.totalorder %s6582_s30, 4   ;;  %s19067_s24 = smov %s6496_s25 }
 0x798   : > { %s19068_s25 = smov %s6500_s26  ;;  %s19069_s26 = smov %s6594_s10 }
 0x799   : > { %s19070_s27 = smov %s6582_s30  ;;  %22 = sbr.rel (!%p20_p2) target bundleno = 5 (0x5), region = 93 }
 0x7a0   :  { %6146 = vsyncpa [#allocation3], 1 }
 0x7a1   :  { %6148 = vsyncpa [#allocation3 + $0x1], 1 }
 0x7a2   :  { %6149 = vsyncpa [#allocation4], 1 }
 0x7a3   :  { %6151 = vsyncpa [#allocation4 + $0x1], 1 }

</bundles_post_ra>
